<compile_context>
chip_gen: v6e
topology: v6e:2x2x1
jax: 0.10.0
libtpu: 0.0.40
codegen_flags: <defaults>
</compile_context>

<pallas_src>
import functools

import jax
import jax.numpy as jnp
import numpy as np
from jax.experimental import pallas as pl
from jax.experimental.pallas import tpu as pltpu

BN_EPS = 1e-5

# Set to jnp.bfloat16 on v6e/v7x for ~2x lower HBM/VMEM traffic and higher MXU
# throughput (accumulation stays f32).  Kept at f32 here so the strict
# correctness check against the f32 reference passes.
COMPUTE_DTYPE = jnp.float32


# ----------------------------- Pallas kernels -----------------------------

def _matmul_bias_act_kernel(x_ref, w_ref, b_ref, o_ref, *, apply_relu):
    y = jnp.dot(x_ref[...], w_ref[...], preferred_element_type=jnp.float32)
    y = y + b_ref[...]
    if apply_relu:
        y = jnp.maximum(y, 0.0)
    o_ref[...] = y.astype(o_ref.dtype)


def matmul_bias_act(x, w, b, *, apply_relu=True, tm=256):
    """y = [relu](x @ w + b).  BN scale must already be folded into w columns."""
    M, K = x.shape
    _, N = w.shape
    tm = min(tm, M)
    Mp = pl.cdiv(M, tm) * tm
    if Mp != M:  # pad rows so the grid is a clean cdiv (rows independent; sliced off below)
        x = jnp.pad(x, ((0, Mp - M), (0, 0)))
    out = pl.pallas_call(
        functools.partial(_matmul_bias_act_kernel, apply_relu=apply_relu),
        out_shape=jax.ShapeDtypeStruct((Mp, N), x.dtype),
        grid=(Mp // tm,),
        in_specs=[
            pl.BlockSpec((tm, K), lambda i: (i, 0)),
            pl.BlockSpec((K, N), lambda i: (0, 0)),
            pl.BlockSpec((1, N), lambda i: (0, 0)),
        ],
        out_specs=pl.BlockSpec((tm, N), lambda i: (i, 0)),
        compiler_params=pltpu.CompilerParams(dimension_semantics=("parallel",)),
    )(x, w, b)
    return out[:M] if Mp != M else out


def _sk_branch_kernel(x_ref, w_ref, b_ref, o_ref, *, k, groups, H, W):
    # x_ref: (1, H+2p, W+2p, D) padded activation (one batch element)
    # w_ref: (k*k*G, D/G, D/G)  per-(tap, group) weights with BN scale folded
    # b_ref: (1, D)             fused conv-bias + BN bias
    # o_ref: (1, H*W, D)
    D = x_ref.shape[-1]
    cin_g = D // groups
    x = x_ref[0]                                            # (Hp, Wp, D)
    accs = [None] * groups
    for kh in range(k):
        for kw in range(k):
            win = x[kh:kh + H, kw:kw + W, :].reshape(H * W, D)
            for g in range(groups):
                t = (kh * k + kw) * groups + g
                part = jnp.dot(win[:, g * cin_g:(g + 1) * cin_g], w_ref[t],
                               preferred_element_type=jnp.float32)
                accs[g] = part if accs[g] is None else accs[g] + part
    y = jnp.concatenate(accs, axis=-1) + b_ref[...]
    o_ref[0] = jnp.maximum(y, 0.0).astype(o_ref.dtype)


def sk_branch_conv(x_nhwc, w_taps, bias, *, k, pad, groups):
    """Grouped KxK conv (stride 1) + folded BN + relu; in-kernel tap accumulation."""
    N, H, W, D = x_nhwc.shape
    Hp, Wp = H + 2 * pad, W + 2 * pad
    xp = jnp.pad(x_nhwc, ((0, 0), (pad, pad), (pad, pad), (0, 0))) if pad else x_nhwc
    kern = functools.partial(_sk_branch_kernel, k=k, groups=groups, H=H, W=W)
    return pl.pallas_call(
        kern,
        out_shape=jax.ShapeDtypeStruct((N, H * W, D), x_nhwc.dtype),
        grid=(N,),
        in_specs=[
            pl.BlockSpec((1, Hp, Wp, D), lambda n: (n, 0, 0, 0)),
            pl.BlockSpec(w_taps.shape, lambda n: (0, 0, 0)),
            pl.BlockSpec((1, D), lambda n: (0, 0)),
        ],
        out_specs=pl.BlockSpec((1, H * W, D), lambda n: (n, 0, 0)),
        compiler_params=pltpu.CompilerParams(dimension_semantics=("parallel",)),
    )(xp, w_taps, bias)


def _gap_kernel(feas_ref, o_ref, *, inv_hw):
    @pl.when(pl.program_id(1) == 0)
    def _():
        o_ref[...] = jnp.zeros_like(o_ref)
    part = jnp.sum(feas_ref[...], axis=(0, 2)) * inv_hw          # (1, D)
    o_ref[0] = o_ref[0] + part.astype(o_ref.dtype)


def branch_sum_gap(feas, *, thw):
    """(Mb, N, HW, D) -> (N, D): sum over branches, mean over HW (tiled + accumulated)."""
    Mb, N, HW, D = feas.shape
    out = pl.pallas_call(
        functools.partial(_gap_kernel, inv_hw=1.0 / HW),
        out_shape=jax.ShapeDtypeStruct((N, 1, D), feas.dtype),
        grid=(N, HW // thw),
        in_specs=[pl.BlockSpec((Mb, 1, thw, D), lambda n, h: (0, n, h, 0))],
        out_specs=pl.BlockSpec((1, 1, D), lambda n, h: (n, 0, 0)),
        compiler_params=pltpu.CompilerParams(
            dimension_semantics=("parallel", "arbitrary")),
    )(feas)
    return out[:, 0, :]


def _attention_kernel(s_ref, fcw_ref, fcb_ref, w_ref, b_ref, o_ref, *, n_branches):
    # s: (N, D); fcw: (D, d); fcb: (1, d); w: (M, d, D); b: (M, 1, D); out: (M, N, D)
    z = jnp.dot(s_ref[...], fcw_ref[...], preferred_element_type=jnp.float32) + fcb_ref[...]
    logits = [jnp.dot(z, w_ref[m], preferred_element_type=jnp.float32) + b_ref[m]
              for m in range(n_branches)]
    mx = logits[0]
    for l in logits[1:]:
        mx = jnp.maximum(mx, l)
    exps = [jnp.exp(l - mx) for l in logits]
    denom = exps[0]
    for e in exps[1:]:
        denom = denom + e
    inv = pl.reciprocal(denom, approx=True)      # EUP slot, ~free
    for m in range(n_branches):
        o_ref[m] = (exps[m] * inv).astype(o_ref.dtype)


def attention(fea_s, fc_w, fc_b, fcs_w, fcs_b):
    Mb, d, D = fcs_w.shape
    N = fea_s.shape[0]
    return pl.pallas_call(
        functools.partial(_attention_kernel, n_branches=Mb),
        out_shape=jax.ShapeDtypeStruct((Mb, N, D), fea_s.dtype),
    )(fea_s, fc_w, fc_b, fcs_w, fcs_b)


def _select_expand_shortcut_kernel(feas_ref, attn_ref, x_ref, sbn_ref, bbn_ref,
                                   wexp_ref, wsc_ref, bias_ref, o_ref, *, n_branches):
    # feas: (M, 1, thw, D); attn: (1, M, D); x: (1, thw, Cin)
    a = attn_ref[0]                                      # (M, D)
    fv = feas_ref[0, 0] * a[0:1, :]
    for m in range(1, n_branches):
        fv = fv + feas_ref[m, 0] * a[m:m + 1, :]
    u = jnp.maximum(fv * sbn_ref[...] + bbn_ref[...], 0.0)           # self.bn + relu
    y = (jnp.dot(u, wexp_ref[...], preferred_element_type=jnp.float32)
         + jnp.dot(x_ref[0], wsc_ref[...], preferred_element_type=jnp.float32)
         + bias_ref[...])                                             # expand + shortcut + biases
    o_ref[0] = jnp.maximum(y, 0.0).astype(o_ref.dtype)


def select_expand_shortcut(feas, attn_nmd, x_res, s_bn, b_bn, w_exp, w_sc, b_final, *, thw):
    Mb, N, HW, D = feas.shape
    Cin = x_res.shape[-1]
    Cout = w_exp.shape[-1]
    kern = functools.partial(_select_expand_shortcut_kernel, n_branches=Mb)
    return pl.pallas_call(
        kern,
        out_shape=jax.ShapeDtypeStruct((N, HW, Cout), x_res.dtype),
        grid=(N, HW // thw),
        in_specs=[
            pl.BlockSpec((Mb, 1, thw, D), lambda n, h: (0, n, h, 0)),
            pl.BlockSpec((1, Mb, D), lambda n, h: (n, 0, 0)),
            pl.BlockSpec((1, thw, Cin), lambda n, h: (n, h, 0)),
            pl.BlockSpec((1, D), lambda n, h: (0, 0)),
            pl.BlockSpec((1, D), lambda n, h: (0, 0)),
            pl.BlockSpec((D, Cout), lambda n, h: (0, 0)),
            pl.BlockSpec((Cin, Cout), lambda n, h: (0, 0)),
            pl.BlockSpec((1, Cout), lambda n, h: (0, 0)),
        ],
        out_specs=pl.BlockSpec((1, thw, Cout), lambda n, h: (n, h, 0)),
        compiler_params=pltpu.CompilerParams(
            dimension_semantics=("parallel", "parallel")),
    )(feas, attn_nmd, x_res, s_bn, b_bn, w_exp, w_sc, b_final)


# ------------------------------ parameter prep ------------------------------

def bn_fold(p, eps=BN_EPS):
    gamma, beta, mean, var = p
    scale = gamma / jnp.sqrt(var + eps)
    bias = beta - mean * scale
    return scale, bias


def prepare_params(params, *, groups, n_branches):
    """One-time host-side prep: fold BN scale into conv weights, restructure grouped
    weights into per-(tap, group) matmul blocks, pre-transpose everything."""
    prep = {}

    # conv_reduce + bn_reduce
    s, b = bn_fold(params['bn_reduce'])
    w = params['conv_reduce_w'][:, :, 0, 0]                          # (D, Cin)
    D = w.shape[0]
    prep['w_reduce'] = (w.T * s[None, :]).astype(COMPUTE_DTYPE)      # (Cin, D)
    prep['b_reduce'] = b.reshape(1, D)

    # SK branches: grouped KxK conv weights, BN scale folded into out-channels.
    cout_g = D // groups
    prep['branch_w'], prep['branch_b'] = [], []
    for i in range(n_branches):
        k = 1 + 2 * i
        s_i, b_i = bn_fold(params['sk_bn'][i])
        wi = params['sk_conv_w'][i]                                  # (D, D//G, k, k)
        taps = []
        for kh in range(k):
            for kw in range(k):
                for g in range(groups):
                    wg = wi[g * cout_g:(g + 1) * cout_g, :, kh, kw]  # (cout_g, cin_g)
                    sg = s_i[g * cout_g:(g + 1) * cout_g]
                    taps.append((wg * sg[:, None]).T)                # (cin_g, cout_g)
        prep['branch_w'].append(jnp.stack(taps, 0).astype(COMPUTE_DTYPE))
        prep['branch_b'].append(
            (b_i + params['sk_conv_b'][i] * s_i).reshape(1, D))

    # attention MLP
    prep['fc_w'] = params['fc_w'].T.astype(COMPUTE_DTYPE)            # (D, d)
    prep['fc_b'] = params['fc_b'].reshape(1, -1)
    prep['fcs_w'] = jnp.stack([wm.T for wm in params['fcs_w']], 0).astype(COMPUTE_DTYPE)  # (M, d, D)
    prep['fcs_b'] = jnp.stack(params['fcs_b'], 0)[:, None, :]        # (M, 1, D)

    # self.bn (applied to fea_v before relu -> cannot fold into expand weights)
    s_bn, b_bn = bn_fold(params['bn'])
    prep['s_bn'] = s_bn.reshape(1, D)
    prep['b_bn'] = b_bn.reshape(1, D)

    # conv_expand + bn_expand and shortcut conv + shortcut_bn, scales folded
    s_e, b_e = bn_fold(params['bn_expand'])
    prep['w_expand'] = (params['conv_expand_w'][:, :, 0, 0].T * s_e[None, :]).astype(COMPUTE_DTYPE)
    s_s, b_s = bn_fold(params['shortcut_bn'])
    prep['w_short'] = (params['shortcut_w'][:, :, 0, 0].T * s_s[None, :]).astype(COMPUTE_DTYPE)
    prep['b_final'] = (b_e + b_s).reshape(1, -1)
    return prep


# ------------------------- Bottleneck forward (Pallas) -------------------------

def _pick_hw_tile(hw, target=512):
    if hw <= target:
        return hw
    t = (target // 8) * 8
    while t >= 8:
        if hw % t == 0:
            return t
        t -= 8
    return hw


def bottleneck_forward(prep, x_nchw, *, groups, n_branches, stride=1):
    assert stride == 1  # TODO(synk): strided branch convs / shortcut not implemented
    x = jnp.transpose(x_nchw, (0, 2, 3, 1)).astype(COMPUTE_DTYPE)    # NHWC
    N, H, W, Cin = x.shape
    HW = H * W
    thw = _pick_hw_tile(HW)

    # conv_reduce + bn_reduce + relu
    out2d = matmul_bias_act(x.reshape(N * HW, Cin), prep['w_reduce'],
                            prep['b_reduce'], apply_relu=True)
    D = out2d.shape[1]
    out_nhwc = out2d.reshape(N, H, W, D)

    # SK branches: grouped conv + folded BN + relu (in-kernel tap accumulation)
    branch_feas = []
    for i in range(n_branches):
        y = sk_branch_conv(out_nhwc, prep['branch_w'][i], prep['branch_b'][i],
                           k=1 + 2 * i, pad=i, groups=groups)        # (N, HW, D)
        branch_feas.append(y)
    feas = jnp.stack(branch_feas, axis=0)                            # (Mb, N, HW, D)

    # branch-sum + GAP -> attention weights
    fea_s = branch_sum_gap(feas, thw=thw)                            # (N, D)
    attn = attention(fea_s, prep['fc_w'], prep['fc_b'],
                     prep['fcs_w'], prep['fcs_b'])                   # (Mb, N, D)
    attn_nmd = jnp.transpose(attn, (1, 0, 2))                        # (N, Mb, D)

    # select + bn + relu + conv_expand + bn_expand + shortcut + add + relu (one kernel)
    y = select_expand_shortcut(feas, attn_nmd, x.reshape(N, HW, Cin),
                               prep['s_bn'], prep['b_bn'], prep['w_expand'],
                               prep['w_short'], prep['b_final'], thw=thw)
    Cout = y.shape[-1]
    return jnp.transpose(y.reshape(N, H, W, Cout), (0, 3, 1, 2)).astype(jnp.float32)


# --------------------------- pure-JAX reference ---------------------------

def _ref_conv(x, w, stride=1, padding=0, groups=1, bias=None):
    y = jax.lax.conv_general_dilated(
        x, w, window_strides=(stride, stride),
        padding=[(padding, padding), (padding, padding)],
        dimension_numbers=('NCHW', 'OIHW', 'NCHW'),
        feature_group_count=groups,
        precision=jax.lax.Precision.HIGHEST)
    if bias is not None:
        y = y + bias[None, :, None, None]
    return y


def _ref_bn(x, p):
    g, b, m, v = p
    shp = (1, -1, 1, 1)
    return (x - m.reshape(shp)) / jnp.sqrt(v.reshape(shp) + BN_EPS) * g.reshape(shp) + b.reshape(shp)


def ref_forward(params, x, *, groups, n_branches):
    relu = jax.nn.relu
    out = _ref_conv(x, params['conv_reduce_w'])
    out = relu(_ref_bn(out, params['bn_reduce']))
    feas = []
    for i in range(n_branches):
        f = _ref_conv(out, params['sk_conv_w'][i], padding=i, groups=groups,
                      bias=params['sk_conv_b'][i])
        feas.append(relu(_ref_bn(f, params['sk_bn'][i])))
    feas = jnp.stack(feas, axis=1)                       # (N, M, C, H, W)
    fea_U = feas.sum(axis=1)
    fea_s = fea_U.mean(axis=(2, 3))                      # (N, C)
    fea_z = jnp.dot(fea_s, params['fc_w'].T, precision=jax.lax.Precision.HIGHEST) + params['fc_b']
    vecs = jnp.stack(
        [jnp.dot(fea_z, w.T, precision=jax.lax.Precision.HIGHEST) + b
         for w, b in zip(params['fcs_w'], params['fcs_b'])], axis=1)   # (N, M, C)
    attn = jax.nn.softmax(vecs, axis=1)[:, :, :, None, None]
    fea_v = (feas * attn).sum(axis=1)
    out = relu(_ref_bn(fea_v, params['bn']))
    out = _ref_conv(out, params['conv_expand_w'])
    out = _ref_bn(out, params['bn_expand'])
    residual = _ref_bn(_ref_conv(x, params['shortcut_w']), params['shortcut_bn'])
    return relu(residual + out)


# ------------------------------ initialization ------------------------------

def init_params(key, in_ch, out_ch, cardinality, base_width, expansion, Mb, r, L):
    width_ratio = out_ch / (expansion * 64.0)
    D = cardinality * int(base_width * width_ratio)
    d = max(int(D / r), L)
    keys = iter(jax.random.split(key, 128))

    def nrm(shape, s=0.1):
        return s * jax.random.normal(next(keys), shape, jnp.float32)

    def bn_p(c):
        return (1.0 + nrm((c,)), nrm((c,)), nrm((c,)), 1.0 + jnp.abs(nrm((c,))))

    params = {
        'conv_reduce_w': nrm((D, in_ch, 1, 1)),
        'bn_reduce': bn_p(D),
        'sk_conv_w': [nrm((D, D // cardinality, 1 + 2 * i, 1 + 2 * i)) for i in range(Mb)],
        'sk_conv_b': [nrm((D,)) for _ in range(Mb)],
        'sk_bn': [bn_p(D) for _ in range(Mb)],
        'fc_w': nrm((d, D)),
        'fc_b': nrm((d,)),
        'fcs_w': [nrm((D, d)) for _ in range(Mb)],
        'fcs_b': [nrm((D,)) for _ in range(Mb)],
        'bn': bn_p(D),
        'conv_expand_w': nrm((out_ch, D, 1, 1)),
        'bn_expand': bn_p(out_ch),
        'shortcut_w': nrm((out_ch, in_ch, 1, 1)),
        'shortcut_bn': bn_p(out_ch),
    }
    return params, D, d


# ----------------------------------- main -----------------------------------

if __name__ == "__main__":
    key = jax.random.PRNGKey(0)
    kp, kx = jax.random.split(key)

    # Bottleneck(in_channels=32, out_channels=64, stride=1, cardinality=2,
    #            base_width=8, expansion=1, M=2, r=2, L=8)  ->  D=16, d=8
    in_ch, out_ch = 32, 64
    cardinality, base_width, expansion = 2, 8, 1
    Mb, r, L = 2, 2, 8
    stride = 1
    Nb, H, W = 2, 16, 16

    params, D, d = init_params(kp, in_ch, out_ch, cardinality, base_width,
                               expansion, Mb, r, L)
    x = jax.random.normal(kx, (Nb, in_ch, H, W), jnp.float32)

    prep = prepare_params(params, groups=cardinality, n_branches=Mb)
    fwd = jax.jit(functools.partial(bottleneck_forward, groups=cardinality,
                                    n_branches=Mb, stride=stride))
    y = jax.block_until_ready(fwd(prep, x))

    y_ref = jax.block_until_ready(ref_forward(params, x, groups=cardinality, n_branches=Mb))

    assert y.shape == (Nb, out_ch, H, W), y.shape
    np.testing.assert_allclose(np.asarray(y), np.asarray(y_ref), atol=5e-3, rtol=5e-3)
    print("KERNEL_OK")
</pallas_src>

<mosaic_0001>
module attributes {stable_mosaic.version = 11 : i64} {
  func.func @_matmul_bias_act_kernel(%arg0: i32, %arg1: memref<256x32xf32, #tpu.memory_space<vmem>>, %arg2: memref<32x16xf32, #tpu.memory_space<vmem>>, %arg3: memref<1x16xf32, #tpu.memory_space<vmem>>, %arg4: memref<256x16xf32, #tpu.memory_space<vmem>>) attributes {dimension_semantics = [#tpu.dimension_semantics<parallel>], iteration_bounds = array<i64: 2>, scalar_prefetch = 0 : i64, scratch_operands = 0 : i64, tpu.core_type = #tpu.core_type<tc>, window_params = [{transform_indices = @transform_0, window_bounds = array<i64: 256, 32>}, {pipeline_mode = #tpu.pipeline_mode<synchronous>, transform_indices = @transform_1, window_bounds = array<i64: 32, 16>}, {pipeline_mode = #tpu.pipeline_mode<synchronous>, transform_indices = @transform_2, window_bounds = array<i64: 1, 16>}, {transform_indices = @transform_3, window_bounds = array<i64: 256, 16>}]} {
    %c0 = arith.constant 0 : index
    %c0_0 = arith.constant 0 : index
    %0 = vector.load %arg1[%c0, %c0_0] : memref<256x32xf32, #tpu.memory_space<vmem>>, vector<256x32xf32>
    %c0_1 = arith.constant 0 : index
    %c0_2 = arith.constant 0 : index
    %1 = vector.load %arg2[%c0_1, %c0_2] : memref<32x16xf32, #tpu.memory_space<vmem>>, vector<32x16xf32>
    %cst = arith.constant dense<0.000000e+00> : vector<256x16xf32>
    %2 = tpu.matmul %0, %1, %cst {dimension_numbers = #tpu.dot_dimension_numbers<[1], [0], [0], [1], [0, 0, 1, 1], [], []>} : vector<256x32xf32>, vector<32x16xf32>, vector<256x16xf32> -> vector<256x16xf32>
    %c0_3 = arith.constant 0 : index
    %c0_4 = arith.constant 0 : index
    %3 = vector.load %arg3[%c0_3, %c0_4] : memref<1x16xf32, #tpu.memory_space<vmem>>, vector<1x16xf32>
    %4 = vector.broadcast %3 : vector<1x16xf32> to vector<256x16xf32>
    %5 = arith.addf %2, %4 : vector<256x16xf32>
    %cst_5 = arith.constant 0.000000e+00 : f32
    %6 = vector.broadcast %cst_5 : f32 to vector<256x16xf32>
    %7 = arith.maximumf %5, %6 : vector<256x16xf32>
    %c0_6 = arith.constant 0 : index
    %c0_7 = arith.constant 0 : index
    %8 = vector.load %arg4[%c0_6, %c0_7] : memref<256x16xf32, #tpu.memory_space<vmem>>, vector<256x16xf32>
    tpu.vector_store %arg4[%c0_6, %c0_7], %7 {strides = array<i32>} : memref<256x16xf32, #tpu.memory_space<vmem>>, vector<256x16xf32>,
    return
  }
  func.func @transform_0(%arg0: i32) -> (i32, i32) {
    %c0_i32 = arith.constant 0 : i32
    %c0_i32_0 = arith.constant 0 : i32
    return %arg0, %c0_i32 : i32, i32
  }
  func.func @transform_1(%arg0: i32) -> (i32, i32) {
    %c0_i32 = arith.constant 0 : i32
    %c0_i32_0 = arith.constant 0 : i32
    %c0_i32_1 = arith.constant 0 : i32
    return %c0_i32, %c0_i32_0 : i32, i32
  }
  func.func @transform_2(%arg0: i32) -> (i32, i32) {
    %c0_i32 = arith.constant 0 : i32
    %c0_i32_0 = arith.constant 0 : i32
    %c0_i32_1 = arith.constant 0 : i32
    return %c0_i32, %c0_i32_0 : i32, i32
  }
  func.func @transform_3(%arg0: i32) -> (i32, i32) {
    %c0_i32 = arith.constant 0 : i32
    %c0_i32_0 = arith.constant 0 : i32
    return %arg0, %c0_i32 : i32, i32
  }
}

module attributes {stable_mosaic.version = 11 : i64} {
  func.func @_sk_branch_kernel(%arg0: i32, %arg1: memref<1x16x16x16xf32, #tpu.memory_space<vmem>>, %arg2: memref<2x8x8xf32, #tpu.memory_space<vmem>>, %arg3: memref<1x16xf32, #tpu.memory_space<vmem>>, %arg4: memref<1x256x16xf32, #tpu.memory_space<vmem>>) attributes {dimension_semantics = [#tpu.dimension_semantics<parallel>], iteration_bounds = array<i64: 2>, scalar_prefetch = 0 : i64, scratch_operands = 0 : i64, tpu.core_type = #tpu.core_type<tc>, window_params = [{transform_indices = @transform_0, window_bounds = array<i64: 1, 16, 16, 16>}, {pipeline_mode = #tpu.pipeline_mode<synchronous>, transform_indices = @transform_1, window_bounds = array<i64: 2, 8, 8>}, {pipeline_mode = #tpu.pipeline_mode<synchronous>, transform_indices = @transform_2, window_bounds = array<i64: 1, 16>}, {transform_indices = @transform_3, window_bounds = array<i64: 1, 256, 16>}]} {
    %c0 = arith.constant 0 : index
    %c0_0 = arith.constant 0 : index
    %c0_1 = arith.constant 0 : index
    %c0_2 = arith.constant 0 : index
    %0 = vector.load %arg1[%c0, %c0_0, %c0_1, %c0_2] : memref<1x16x16x16xf32, #tpu.memory_space<vmem>>, vector<1x16x16x16xf32>
    %1 = vector.shape_cast %0 : vector<1x16x16x16xf32> to vector<16x16x16xf32>
    %2 = vector.shape_cast %1 : vector<16x16x16xf32> to vector<256x16xf32>
    %3 = vector.extract_strided_slice %2 {offsets = [0, 0], sizes = [256, 8], strides = [1, 1]} : vector<256x16xf32> to vector<256x8xf32>
    %c0_3 = arith.constant 0 : index
    %c0_4 = arith.constant 0 : index
    %c0_5 = arith.constant 0 : index
    %4 = vector.load %arg2[%c0_3, %c0_4, %c0_5] : memref<2x8x8xf32, #tpu.memory_space<vmem>>, vector<1x8x8xf32>
    %5 = vector.shape_cast %4 : vector<1x8x8xf32> to vector<8x8xf32>
    %cst = arith.constant dense<0.000000e+00> : vector<256x8xf32>
    %6 = tpu.matmul %3, %5, %cst {dimension_numbers = #tpu.dot_dimension_numbers<[1], [0], [0], [1], [0, 0, 1, 1], [], []>} : vector<256x8xf32>, vector<8x8xf32>, vector<256x8xf32> -> vector<256x8xf32>
    %7 = vector.extract_strided_slice %2 {offsets = [0, 8], sizes = [256, 8], strides = [1, 1]} : vector<256x16xf32> to vector<256x8xf32>
    %c1 = arith.constant 1 : index
    %c0_6 = arith.constant 0 : index
    %c0_7 = arith.constant 0 : index
    %8 = vector.load %arg2[%c1, %c0_6, %c0_7] : memref<2x8x8xf32, #tpu.memory_space<vmem>>, vector<1x8x8xf32>
    %9 = vector.shape_cast %8 : vector<1x8x8xf32> to vector<8x8xf32>
    %cst_8 = arith.constant dense<0.000000e+00> : vector<256x8xf32>
    %10 = tpu.matmul %7, %9, %cst_8 {dimension_numbers = #tpu.dot_dimension_numbers<[1], [0], [0], [1], [0, 0, 1, 1], [], []>} : vector<256x8xf32>, vector<8x8xf32>, vector<256x8xf32> -> vector<256x8xf32>
    %11 = tpu.concatenate %6, %10 in 1 : vector<256x8xf32>, vector<256x8xf32> -> vector<256x16xf32>
    %c0_9 = arith.constant 0 : index
    %c0_10 = arith.constant 0 : index
    %12 = vector.load %arg3[%c0_9, %c0_10] : memref<1x16xf32, #tpu.memory_space<vmem>>, vector<1x16xf32>
    %13 = vector.broadcast %12 : vector<1x16xf32> to vector<256x16xf32>
    %14 = arith.addf %11, %13 : vector<256x16xf32>
    %cst_11 = arith.constant 0.000000e+00 : f32
    %15 = vector.broadcast %cst_11 : f32 to vector<256x16xf32>
    %16 = arith.maximumf %14, %15 : vector<256x16xf32>
    %c0_12 = arith.constant 0 : index
    %c0_13 = arith.constant 0 : index
    %c0_14 = arith.constant 0 : index
    %17 = vector.load %arg4[%c0_12, %c0_13, %c0_14] : memref<1x256x16xf32, #tpu.memory_space<vmem>>, vector<1x256x16xf32>
    %18 = vector.shape_cast %17 : vector<1x256x16xf32> to vector<256x16xf32>
    %19 = vector.shape_cast %16 : vector<256x16xf32> to vector<1x256x16xf32>
    tpu.vector_store %arg4[%c0_12, %c0_13, %c0_14], %19 {strides = array<i32>} : memref<1x256x16xf32, #tpu.memory_space<vmem>>, vector<1x256x16xf32>,
    return
  }
  func.func @transform_0(%arg0: i32) -> (i32, i32, i32, i32) {
    %c0_i32 = arith.constant 0 : i32
    %c0_i32_0 = arith.constant 0 : i32
    %c0_i32_1 = arith.constant 0 : i32
    %c0_i32_2 = arith.constant 0 : i32
    return %arg0, %c0_i32, %c0_i32_0, %c0_i32_1 : i32, i32, i32, i32
  }
  func.func @transform_1(%arg0: i32) -> (i32, i32, i32) {
    %c0_i32 = arith.constant 0 : i32
    %c0_i32_0 = arith.constant 0 : i32
    %c0_i32_1 = arith.constant 0 : i32
    %c0_i32_2 = arith.constant 0 : i32
    return %c0_i32, %c0_i32_0, %c0_i32_1 : i32, i32, i32
  }
  func.func @transform_2(%arg0: i32) -> (i32, i32) {
    %c0_i32 = arith.constant 0 : i32
    %c0_i32_0 = arith.constant 0 : i32
    %c0_i32_1 = arith.constant 0 : i32
    return %c0_i32, %c0_i32_0 : i32, i32
  }
  func.func @transform_3(%arg0: i32) -> (i32, i32, i32) {
    %c0_i32 = arith.constant 0 : i32
    %c0_i32_0 = arith.constant 0 : i32
    %c0_i32_1 = arith.constant 0 : i32
    return %arg0, %c0_i32, %c0_i32_0 : i32, i32, i32
  }
}

module attributes {stable_mosaic.version = 11 : i64} {
  func.func @_sk_branch_kernel(%arg0: i32, %arg1: memref<1x18x18x16xf32, #tpu.memory_space<vmem>>, %arg2: memref<18x8x8xf32, #tpu.memory_space<vmem>>, %arg3: memref<1x16xf32, #tpu.memory_space<vmem>>, %arg4: memref<1x256x16xf32, #tpu.memory_space<vmem>>) attributes {dimension_semantics = [#tpu.dimension_semantics<parallel>], iteration_bounds = array<i64: 2>, scalar_prefetch = 0 : i64, scratch_operands = 0 : i64, tpu.core_type = #tpu.core_type<tc>, window_params = [{transform_indices = @transform_0, window_bounds = array<i64: 1, 18, 18, 16>}, {pipeline_mode = #tpu.pipeline_mode<synchronous>, transform_indices = @transform_1, window_bounds = array<i64: 18, 8, 8>}, {pipeline_mode = #tpu.pipeline_mode<synchronous>, transform_indices = @transform_2, window_bounds = array<i64: 1, 16>}, {transform_indices = @transform_3, window_bounds = array<i64: 1, 256, 16>}]} {
    %c0 = arith.constant 0 : index
    %c0_0 = arith.constant 0 : index
    %c0_1 = arith.constant 0 : index
    %c0_2 = arith.constant 0 : index
    %0 = vector.load %arg1[%c0, %c0_0, %c0_1, %c0_2] : memref<1x18x18x16xf32, #tpu.memory_space<vmem>>, vector<1x18x18x16xf32>
    %1 = vector.shape_cast %0 : vector<1x18x18x16xf32> to vector<18x18x16xf32>
    %2 = vector.extract_strided_slice %1 {offsets = [0, 0, 0], sizes = [16, 16, 16], strides = [1, 1, 1]} : vector<18x18x16xf32> to vector<16x16x16xf32>
    %3 = vector.shape_cast %2 : vector<16x16x16xf32> to vector<256x16xf32>
    %4 = vector.extract_strided_slice %3 {offsets = [0, 0], sizes = [256, 8], strides = [1, 1]} : vector<256x16xf32> to vector<256x8xf32>
    %c0_3 = arith.constant 0 : index
    %c0_4 = arith.constant 0 : index
    %c0_5 = arith.constant 0 : index
    %5 = vector.load %arg2[%c0_3, %c0_4, %c0_5] : memref<18x8x8xf32, #tpu.memory_space<vmem>>, vector<1x8x8xf32>
    %6 = vector.shape_cast %5 : vector<1x8x8xf32> to vector<8x8xf32>
    %cst = arith.constant dense<0.000000e+00> : vector<256x8xf32>
    %7 = tpu.matmul %4, %6, %cst {dimension_numbers = #tpu.dot_dimension_numbers<[1], [0], [0], [1], [0, 0, 1, 1], [], []>} : vector<256x8xf32>, vector<8x8xf32>, vector<256x8xf32> -> vector<256x8xf32>
    %8 = vector.extract_strided_slice %3 {offsets = [0, 8], sizes = [256, 8], strides = [1, 1]} : vector<256x16xf32> to vector<256x8xf32>
    %c1 = arith.constant 1 : index
    %c0_6 = arith.constant 0 : index
    %c0_7 = arith.constant 0 : index
    %9 = vector.load %arg2[%c1, %c0_6, %c0_7] : memref<18x8x8xf32, #tpu.memory_space<vmem>>, vector<1x8x8xf32>
    %10 = vector.shape_cast %9 : vector<1x8x8xf32> to vector<8x8xf32>
    %cst_8 = arith.constant dense<0.000000e+00> : vector<256x8xf32>
    %11 = tpu.matmul %8, %10, %cst_8 {dimension_numbers = #tpu.dot_dimension_numbers<[1], [0], [0], [1], [0, 0, 1, 1], [], []>} : vector<256x8xf32>, vector<8x8xf32>, vector<256x8xf32> -> vector<256x8xf32>
    %12 = vector.extract_strided_slice %1 {offsets = [0, 1, 0], sizes = [16, 16, 16], strides = [1, 1, 1]} : vector<18x18x16xf32> to vector<16x16x16xf32>
    %13 = vector.shape_cast %12 : vector<16x16x16xf32> to vector<256x16xf32>
    %14 = vector.extract_strided_slice %13 {offsets = [0, 0], sizes = [256, 8], strides = [1, 1]} : vector<256x16xf32> to vector<256x8xf32>
    %c2 = arith.constant 2 : index
    %c0_9 = arith.constant 0 : index
    %c0_10 = arith.constant 0 : index
    %15 = vector.load %arg2[%c2, %c0_9, %c0_10] : memref<18x8x8xf32, #tpu.memory_space<vmem>>, vector<1x8x8xf32>
    %16 = vector.shape_cast %15 : vector<1x8x8xf32> to vector<8x8xf32>
    %cst_11 = arith.constant dense<0.000000e+00> : vector<256x8xf32>
    %17 = tpu.matmul %14, %16, %cst_11 {dimension_numbers = #tpu.dot_dimension_numbers<[1], [0], [0], [1], [0, 0, 1, 1], [], []>} : vector<256x8xf32>, vector<8x8xf32>, vector<256x8xf32> -> vector<256x8xf32>
    %18 = arith.addf %7, %17 : vector<256x8xf32>
    %19 = vector.extract_strided_slice %13 {offsets = [0, 8], sizes = [256, 8], strides = [1, 1]} : vector<256x16xf32> to vector<256x8xf32>
    %c3 = arith.constant 3 : index
    %c0_12 = arith.constant 0 : index
    %c0_13 = arith.constant 0 : index
    %20 = vector.load %arg2[%c3, %c0_12, %c0_13] : memref<18x8x8xf32, #tpu.memory_space<vmem>>, vector<1x8x8xf32>
    %21 = vector.shape_cast %20 : vector<1x8x8xf32> to vector<8x8xf32>
    %cst_14 = arith.constant dense<0.000000e+00> : vector<256x8xf32>
    %22 = tpu.matmul %19, %21, %cst_14 {dimension_numbers = #tpu.dot_dimension_numbers<[1], [0], [0], [1], [0, 0, 1, 1], [], []>} : vector<256x8xf32>, vector<8x8xf32>, vector<256x8xf32> -> vector<256x8xf32>
    %23 = arith.addf %11, %22 : vector<256x8xf32>
    %24 = vector.extract_strided_slice %1 {offsets = [0, 2, 0], sizes = [16, 16, 16], strides = [1, 1, 1]} : vector<18x18x16xf32> to vector<16x16x16xf32>
    %25 = vector.shape_cast %24 : vector<16x16x16xf32> to vector<256x16xf32>
    %26 = vector.extract_strided_slice %25 {offsets = [0, 0], sizes = [256, 8], strides = [1, 1]} : vector<256x16xf32> to vector<256x8xf32>
    %c4 = arith.constant 4 : index
    %c0_15 = arith.constant 0 : index
    %c0_16 = arith.constant 0 : index
    %27 = vector.load %arg2[%c4, %c0_15, %c0_16] : memref<18x8x8xf32, #tpu.memory_space<vmem>>, vector<1x8x8xf32>
    %28 = vector.shape_cast %27 : vector<1x8x8xf32> to vector<8x8xf32>
    %cst_17 = arith.constant dense<0.000000e+00> : vector<256x8xf32>
    %29 = tpu.matmul %26, %28, %cst_17 {dimension_numbers = #tpu.dot_dimension_numbers<[1], [0], [0], [1], [0, 0, 1, 1], [], []>} : vector<256x8xf32>, vector<8x8xf32>, vector<256x8xf32> -> vector<256x8xf32>
    %30 = arith.addf %18, %29 : vector<256x8xf32>
    %31 = vector.extract_strided_slice %25 {offsets = [0, 8], sizes = [256, 8], strides = [1, 1]} : vector<256x16xf32> to vector<256x8xf32>
    %c5 = arith.constant 5 : index
    %c0_18 = arith.constant 0 : index
    %c0_19 = arith.constant 0 : index
    %32 = vector.load %arg2[%c5, %c0_18, %c0_19] : memref<18x8x8xf32, #tpu.memory_space<vmem>>, vector<1x8x8xf32>
    %33 = vector.shape_cast %32 : vector<1x8x8xf32> to vector<8x8xf32>
    %cst_20 = arith.constant dense<0.000000e+00> : vector<256x8xf32>
    %34 = tpu.matmul %31, %33, %cst_20 {dimension_numbers = #tpu.dot_dimension_numbers<[1], [0], [0], [1], [0, 0, 1, 1], [], []>} : vector<256x8xf32>, vector<8x8xf32>, vector<256x8xf32> -> vector<256x8xf32>
    %35 = arith.addf %23, %34 : vector<256x8xf32>
    %36 = vector.extract_strided_slice %1 {offsets = [1, 0, 0], sizes = [16, 16, 16], strides = [1, 1, 1]} : vector<18x18x16xf32> to vector<16x16x16xf32>
    %37 = vector.shape_cast %36 : vector<16x16x16xf32> to vector<256x16xf32>
    %38 = vector.extract_strided_slice %37 {offsets = [0, 0], sizes = [256, 8], strides = [1, 1]} : vector<256x16xf32> to vector<256x8xf32>
    %c6 = arith.constant 6 : index
    %c0_21 = arith.constant 0 : index
    %c0_22 = arith.constant 0 : index
    %39 = vector.load %arg2[%c6, %c0_21, %c0_22] : memref<18x8x8xf32, #tpu.memory_space<vmem>>, vector<1x8x8xf32>
    %40 = vector.shape_cast %39 : vector<1x8x8xf32> to vector<8x8xf32>
    %cst_23 = arith.constant dense<0.000000e+00> : vector<256x8xf32>
    %41 = tpu.matmul %38, %40, %cst_23 {dimension_numbers = #tpu.dot_dimension_numbers<[1], [0], [0], [1], [0, 0, 1, 1], [], []>} : vector<256x8xf32>, vector<8x8xf32>, vector<256x8xf32> -> vector<256x8xf32>
    %42 = arith.addf %30, %41 : vector<256x8xf32>
    %43 = vector.extract_strided_slice %37 {offsets = [0, 8], sizes = [256, 8], strides = [1, 1]} : vector<256x16xf32> to vector<256x8xf32>
    %c7 = arith.constant 7 : index
    %c0_24 = arith.constant 0 : index
    %c0_25 = arith.constant 0 : index
    %44 = vector.load %arg2[%c7, %c0_24, %c0_25] : memref<18x8x8xf32, #tpu.memory_space<vmem>>, vector<1x8x8xf32>
    %45 = vector.shape_cast %44 : vector<1x8x8xf32> to vector<8x8xf32>
    %cst_26 = arith.constant dense<0.000000e+00> : vector<256x8xf32>
    %46 = tpu.matmul %43, %45, %cst_26 {dimension_numbers = #tpu.dot_dimension_numbers<[1], [0], [0], [1], [0, 0, 1, 1], [], []>} : vector<256x8xf32>, vector<8x8xf32>, vector<256x8xf32> -> vector<256x8xf32>
    %47 = arith.addf %35, %46 : vector<256x8xf32>
    %48 = vector.extract_strided_slice %1 {offsets = [1, 1, 0], sizes = [16, 16, 16], strides = [1, 1, 1]} : vector<18x18x16xf32> to vector<16x16x16xf32>
    %49 = vector.shape_cast %48 : vector<16x16x16xf32> to vector<256x16xf32>
    %50 = vector.extract_strided_slice %49 {offsets = [0, 0], sizes = [256, 8], strides = [1, 1]} : vector<256x16xf32> to vector<256x8xf32>
    %c8 = arith.constant 8 : index
    %c0_27 = arith.constant 0 : index
    %c0_28 = arith.constant 0 : index
    %51 = vector.load %arg2[%c8, %c0_27, %c0_28] : memref<18x8x8xf32, #tpu.memory_space<vmem>>, vector<1x8x8xf32>
    %52 = vector.shape_cast %51 : vector<1x8x8xf32> to vector<8x8xf32>
    %cst_29 = arith.constant dense<0.000000e+00> : vector<256x8xf32>
    %53 = tpu.matmul %50, %52, %cst_29 {dimension_numbers = #tpu.dot_dimension_numbers<[1], [0], [0], [1], [0, 0, 1, 1], [], []>} : vector<256x8xf32>, vector<8x8xf32>, vector<256x8xf32> -> vector<256x8xf32>
    %54 = arith.addf %42, %53 : vector<256x8xf32>
    %55 = vector.extract_strided_slice %49 {offsets = [0, 8], sizes = [256, 8], strides = [1, 1]} : vector<256x16xf32> to vector<256x8xf32>
    %c9 = arith.constant 9 : index
    %c0_30 = arith.constant 0 : index
    %c0_31 = arith.constant 0 : index
    %56 = vector.load %arg2[%c9, %c0_30, %c0_31] : memref<18x8x8xf32, #tpu.memory_space<vmem>>, vector<1x8x8xf32>
    %57 = vector.shape_cast %56 : vector<1x8x8xf32> to vector<8x8xf32>
    %cst_32 = arith.constant dense<0.000000e+00> : vector<256x8xf32>
    %58 = tpu.matmul %55, %57, %cst_32 {dimension_numbers = #tpu.dot_dimension_numbers<[1], [0], [0], [1], [0, 0, 1, 1], [], []>} : vector<256x8xf32>, vector<8x8xf32>, vector<256x8xf32> -> vector<256x8xf32>
    %59 = arith.addf %47, %58 : vector<256x8xf32>
    %60 = vector.extract_strided_slice %1 {offsets = [1, 2, 0], sizes = [16, 16, 16], strides = [1, 1, 1]} : vector<18x18x16xf32> to vector<16x16x16xf32>
    %61 = vector.shape_cast %60 : vector<16x16x16xf32> to vector<256x16xf32>
    %62 = vector.extract_strided_slice %61 {offsets = [0, 0], sizes = [256, 8], strides = [1, 1]} : vector<256x16xf32> to vector<256x8xf32>
    %c10 = arith.constant 10 : index
    %c0_33 = arith.constant 0 : index
    %c0_34 = arith.constant 0 : index
    %63 = vector.load %arg2[%c10, %c0_33, %c0_34] : memref<18x8x8xf32, #tpu.memory_space<vmem>>, vector<1x8x8xf32>
    %64 = vector.shape_cast %63 : vector<1x8x8xf32> to vector<8x8xf32>
    %cst_35 = arith.constant dense<0.000000e+00> : vector<256x8xf32>
    %65 = tpu.matmul %62, %64, %cst_35 {dimension_numbers = #tpu.dot_dimension_numbers<[1], [0], [0], [1], [0, 0, 1, 1], [], []>} : vector<256x8xf32>, vector<8x8xf32>, vector<256x8xf32> -> vector<256x8xf32>
    %66 = arith.addf %54, %65 : vector<256x8xf32>
    %67 = vector.extract_strided_slice %61 {offsets = [0, 8], sizes = [256, 8], strides = [1, 1]} : vector<256x16xf32> to vector<256x8xf32>
    %c11 = arith.constant 11 : index
    %c0_36 = arith.constant 0 : index
    %c0_37 = arith.constant 0 : index
    %68 = vector.load %arg2[%c11, %c0_36, %c0_37] : memref<18x8x8xf32, #tpu.memory_space<vmem>>, vector<1x8x8xf32>
    %69 = vector.shape_cast %68 : vector<1x8x8xf32> to vector<8x8xf32>
    %cst_38 = arith.constant dense<0.000000e+00> : vector<256x8xf32>
    %70 = tpu.matmul %67, %69, %cst_38 {dimension_numbers = #tpu.dot_dimension_numbers<[1], [0], [0], [1], [0, 0, 1, 1], [], []>} : vector<256x8xf32>, vector<8x8xf32>, vector<256x8xf32> -> vector<256x8xf32>
    %71 = arith.addf %59, %70 : vector<256x8xf32>
    %72 = vector.extract_strided_slice %1 {offsets = [2, 0, 0], sizes = [16, 16, 16], strides = [1, 1, 1]} : vector<18x18x16xf32> to vector<16x16x16xf32>
    %73 = vector.shape_cast %72 : vector<16x16x16xf32> to vector<256x16xf32>
    %74 = vector.extract_strided_slice %73 {offsets = [0, 0], sizes = [256, 8], strides = [1, 1]} : vector<256x16xf32> to vector<256x8xf32>
    %c12 = arith.constant 12 : index
    %c0_39 = arith.constant 0 : index
    %c0_40 = arith.constant 0 : index
    %75 = vector.load %arg2[%c12, %c0_39, %c0_40] : memref<18x8x8xf32, #tpu.memory_space<vmem>>, vector<1x8x8xf32>
    %76 = vector.shape_cast %75 : vector<1x8x8xf32> to vector<8x8xf32>
    %cst_41 = arith.constant dense<0.000000e+00> : vector<256x8xf32>
    %77 = tpu.matmul %74, %76, %cst_41 {dimension_numbers = #tpu.dot_dimension_numbers<[1], [0], [0], [1], [0, 0, 1, 1], [], []>} : vector<256x8xf32>, vector<8x8xf32>, vector<256x8xf32> -> vector<256x8xf32>
    %78 = arith.addf %66, %77 : vector<256x8xf32>
    %79 = vector.extract_strided_slice %73 {offsets = [0, 8], sizes = [256, 8], strides = [1, 1]} : vector<256x16xf32> to vector<256x8xf32>
    %c13 = arith.constant 13 : index
    %c0_42 = arith.constant 0 : index
    %c0_43 = arith.constant 0 : index
    %80 = vector.load %arg2[%c13, %c0_42, %c0_43] : memref<18x8x8xf32, #tpu.memory_space<vmem>>, vector<1x8x8xf32>
    %81 = vector.shape_cast %80 : vector<1x8x8xf32> to vector<8x8xf32>
    %cst_44 = arith.constant dense<0.000000e+00> : vector<256x8xf32>
    %82 = tpu.matmul %79, %81, %cst_44 {dimension_numbers = #tpu.dot_dimension_numbers<[1], [0], [0], [1], [0, 0, 1, 1], [], []>} : vector<256x8xf32>, vector<8x8xf32>, vector<256x8xf32> -> vector<256x8xf32>
    %83 = arith.addf %71, %82 : vector<256x8xf32>
    %84 = vector.extract_strided_slice %1 {offsets = [2, 1, 0], sizes = [16, 16, 16], strides = [1, 1, 1]} : vector<18x18x16xf32> to vector<16x16x16xf32>
    %85 = vector.shape_cast %84 : vector<16x16x16xf32> to vector<256x16xf32>
    %86 = vector.extract_strided_slice %85 {offsets = [0, 0], sizes = [256, 8], strides = [1, 1]} : vector<256x16xf32> to vector<256x8xf32>
    %c14 = arith.constant 14 : index
    %c0_45 = arith.constant 0 : index
    %c0_46 = arith.constant 0 : index
    %87 = vector.load %arg2[%c14, %c0_45, %c0_46] : memref<18x8x8xf32, #tpu.memory_space<vmem>>, vector<1x8x8xf32>
    %88 = vector.shape_cast %87 : vector<1x8x8xf32> to vector<8x8xf32>
    %cst_47 = arith.constant dense<0.000000e+00> : vector<256x8xf32>
    %89 = tpu.matmul %86, %88, %cst_47 {dimension_numbers = #tpu.dot_dimension_numbers<[1], [0], [0], [1], [0, 0, 1, 1], [], []>} : vector<256x8xf32>, vector<8x8xf32>, vector<256x8xf32> -> vector<256x8xf32>
    %90 = arith.addf %78, %89 : vector<256x8xf32>
    %91 = vector.extract_strided_slice %85 {offsets = [0, 8], sizes = [256, 8], strides = [1, 1]} : vector<256x16xf32> to vector<256x8xf32>
    %c15 = arith.constant 15 : index
    %c0_48 = arith.constant 0 : index
    %c0_49 = arith.constant 0 : index
    %92 = vector.load %arg2[%c15, %c0_48, %c0_49] : memref<18x8x8xf32, #tpu.memory_space<vmem>>, vector<1x8x8xf32>
    %93 = vector.shape_cast %92 : vector<1x8x8xf32> to vector<8x8xf32>
    %cst_50 = arith.constant dense<0.000000e+00> : vector<256x8xf32>
    %94 = tpu.matmul %91, %93, %cst_50 {dimension_numbers = #tpu.dot_dimension_numbers<[1], [0], [0], [1], [0, 0, 1, 1], [], []>} : vector<256x8xf32>, vector<8x8xf32>, vector<256x8xf32> -> vector<256x8xf32>
    %95 = arith.addf %83, %94 : vector<256x8xf32>
    %96 = vector.extract_strided_slice %1 {offsets = [2, 2, 0], sizes = [16, 16, 16], strides = [1, 1, 1]} : vector<18x18x16xf32> to vector<16x16x16xf32>
    %97 = vector.shape_cast %96 : vector<16x16x16xf32> to vector<256x16xf32>
    %98 = vector.extract_strided_slice %97 {offsets = [0, 0], sizes = [256, 8], strides = [1, 1]} : vector<256x16xf32> to vector<256x8xf32>
    %c16 = arith.constant 16 : index
    %c0_51 = arith.constant 0 : index
    %c0_52 = arith.constant 0 : index
    %99 = vector.load %arg2[%c16, %c0_51, %c0_52] : memref<18x8x8xf32, #tpu.memory_space<vmem>>, vector<1x8x8xf32>
    %100 = vector.shape_cast %99 : vector<1x8x8xf32> to vector<8x8xf32>
    %cst_53 = arith.constant dense<0.000000e+00> : vector<256x8xf32>
    %101 = tpu.matmul %98, %100, %cst_53 {dimension_numbers = #tpu.dot_dimension_numbers<[1], [0], [0], [1], [0, 0, 1, 1], [], []>} : vector<256x8xf32>, vector<8x8xf32>, vector<256x8xf32> -> vector<256x8xf32>
    %102 = arith.addf %90, %101 : vector<256x8xf32>
    %103 = vector.extract_strided_slice %97 {offsets = [0, 8], sizes = [256, 8], strides = [1, 1]} : vector<256x16xf32> to vector<256x8xf32>
    %c17 = arith.constant 17 : index
    %c0_54 = arith.constant 0 : index
    %c0_55 = arith.constant 0 : index
    %104 = vector.load %arg2[%c17, %c0_54, %c0_55] : memref<18x8x8xf32, #tpu.memory_space<vmem>>, vector<1x8x8xf32>
    %105 = vector.shape_cast %104 : vector<1x8x8xf32> to vector<8x8xf32>
    %cst_56 = arith.constant dense<0.000000e+00> : vector<256x8xf32>
    %106 = tpu.matmul %103, %105, %cst_56 {dimension_numbers = #tpu.dot_dimension_numbers<[1], [0], [0], [1], [0, 0, 1, 1], [], []>} : vector<256x8xf32>, vector<8x8xf32>, vector<256x8xf32> -> vector<256x8xf32>
    %107 = arith.addf %95, %106 : vector<256x8xf32>
    %108 = tpu.concatenate %102, %107 in 1 : vector<256x8xf32>, vector<256x8xf32> -> vector<256x16xf32>
    %c0_57 = arith.constant 0 : index
    %c0_58 = arith.constant 0 : index
    %109 = vector.load %arg3[%c0_57, %c0_58] : memref<1x16xf32, #tpu.memory_space<vmem>>, vector<1x16xf32>
    %110 = vector.broadcast %109 : vector<1x16xf32> to vector<256x16xf32>
    %111 = arith.addf %108, %110 : vector<256x16xf32>
    %cst_59 = arith.constant 0.000000e+00 : f32
    %112 = vector.broadcast %cst_59 : f32 to vector<256x16xf32>
    %113 = arith.maximumf %111, %112 : vector<256x16xf32>
    %c0_60 = arith.constant 0 : index
    %c0_61 = arith.constant 0 : index
    %c0_62 = arith.constant 0 : index
    %114 = vector.load %arg4[%c0_60, %c0_61, %c0_62] : memref<1x256x16xf32, #tpu.memory_space<vmem>>, vector<1x256x16xf32>
    %115 = vector.shape_cast %114 : vector<1x256x16xf32> to vector<256x16xf32>
    %116 = vector.shape_cast %113 : vector<256x16xf32> to vector<1x256x16xf32>
    tpu.vector_store %arg4[%c0_60, %c0_61, %c0_62], %116 {strides = array<i32>} : memref<1x256x16xf32, #tpu.memory_space<vmem>>, vector<1x256x16xf32>,
    return
  }
  func.func @transform_0(%arg0: i32) -> (i32, i32, i32, i32) {
    %c0_i32 = arith.constant 0 : i32
    %c0_i32_0 = arith.constant 0 : i32
    %c0_i32_1 = arith.constant 0 : i32
    %c0_i32_2 = arith.constant 0 : i32
    return %arg0, %c0_i32, %c0_i32_0, %c0_i32_1 : i32, i32, i32, i32
  }
  func.func @transform_1(%arg0: i32) -> (i32, i32, i32) {
    %c0_i32 = arith.constant 0 : i32
    %c0_i32_0 = arith.constant 0 : i32
    %c0_i32_1 = arith.constant 0 : i32
    %c0_i32_2 = arith.constant 0 : i32
    return %c0_i32, %c0_i32_0, %c0_i32_1 : i32, i32, i32
  }
  func.func @transform_2(%arg0: i32) -> (i32, i32) {
    %c0_i32 = arith.constant 0 : i32
    %c0_i32_0 = arith.constant 0 : i32
    %c0_i32_1 = arith.constant 0 : i32
    return %c0_i32, %c0_i32_0 : i32, i32
  }
  func.func @transform_3(%arg0: i32) -> (i32, i32, i32) {
    %c0_i32 = arith.constant 0 : i32
    %c0_i32_0 = arith.constant 0 : i32
    %c0_i32_1 = arith.constant 0 : i32
    return %arg0, %c0_i32, %c0_i32_0 : i32, i32, i32
  }
}

module attributes {stable_mosaic.version = 11 : i64} {
  func.func @_gap_kernel(%arg0: i32, %arg1: i32, %arg2: memref<2x1x256x16xf32, #tpu.memory_space<vmem>>, %arg3: memref<1x1x16xf32, #tpu.memory_space<vmem>>) attributes {dimension_semantics = [#tpu.dimension_semantics<parallel>, #tpu.dimension_semantics<arbitrary>], iteration_bounds = array<i64: 2, 1>, scalar_prefetch = 0 : i64, scratch_operands = 0 : i64, tpu.core_type = #tpu.core_type<tc>, window_params = [{transform_indices = @transform_0, window_bounds = array<i64: 2, 1, 256, 16>}, {transform_indices = @transform_1, window_bounds = array<i64: 1, 1, 16>}]} {
    %c0_i32 = arith.constant 0 : i32
    %0 = arith.cmpi eq, %arg1, %c0_i32 : i32
    %1 = arith.extui %0 : i1 to i32
    %c0_i32_0 = arith.constant 0 : i32
    %2 = arith.cmpi ne, %1, %c0_i32_0 : i32
    scf.if %2 {
      %cst_11 = arith.constant 0.000000e+00 : f32
      %13 = vector.broadcast %cst_11 : f32 to vector<1x1x16xf32>
      %c0_12 = arith.constant 0 : index
      %c0_13 = arith.constant 0 : index
      %c0_14 = arith.constant 0 : index
      %14 = vector.load %arg3[%c0_12, %c0_13, %c0_14] : memref<1x1x16xf32, #tpu.memory_space<vmem>>, vector<1x1x16xf32>
      tpu.vector_store %arg3[%c0_12, %c0_13, %c0_14], %13 {strides = array<i32>} : memref<1x1x16xf32, #tpu.memory_space<vmem>>, vector<1x1x16xf32>,
    } else {
    }
    %c0 = arith.constant 0 : index
    %c0_1 = arith.constant 0 : index
    %c0_2 = arith.constant 0 : index
    %c0_3 = arith.constant 0 : index
    %3 = vector.load %arg2[%c0, %c0_1, %c0_2, %c0_3] : memref<2x1x256x16xf32, #tpu.memory_space<vmem>>, vector<2x1x256x16xf32>
    %cst = arith.constant dense<0.000000e+00> : vector<1x16xf32>
    %4 = vector.multi_reduction <add>, %3, %cst [0, 2] : vector<2x1x256x16xf32> to vector<1x16xf32>
    %cst_4 = arith.constant 3.906250e-03 : f32
    %5 = vector.broadcast %cst_4 : f32 to vector<1x16xf32>
    %6 = arith.mulf %4, %5 : vector<1x16xf32>
    %c0_5 = arith.constant 0 : index
    %c0_6 = arith.constant 0 : index
    %c0_7 = arith.constant 0 : index
    %7 = vector.load %arg3[%c0_5, %c0_6, %c0_7] : memref<1x1x16xf32, #tpu.memory_space<vmem>>, vector<1x1x16xf32>
    %8 = vector.shape_cast %7 : vector<1x1x16xf32> to vector<1x16xf32>
    %9 = arith.addf %8, %6 : vector<1x16xf32>
    %c0_8 = arith.constant 0 : index
    %c0_9 = arith.constant 0 : index
    %c0_10 = arith.constant 0 : index
    %10 = vector.load %arg3[%c0_8, %c0_9, %c0_10] : memref<1x1x16xf32, #tpu.memory_space<vmem>>, vector<1x1x16xf32>
    %11 = vector.shape_cast %10 : vector<1x1x16xf32> to vector<1x16xf32>
    %12 = vector.shape_cast %9 : vector<1x16xf32> to vector<1x1x16xf32>
    tpu.vector_store %arg3[%c0_8, %c0_9, %c0_10], %12 {strides = array<i32>} : memref<1x1x16xf32, #tpu.memory_space<vmem>>, vector<1x1x16xf32>,
    return
  }
  func.func @transform_0(%arg0: i32, %arg1: i32) -> (i32, i32, i32, i32) {
    %c0_i32 = arith.constant 0 : i32
    %c0_i32_0 = arith.constant 0 : i32
    %c0_i32_1 = arith.constant 0 : i32
    return %c0_i32, %arg0, %arg1, %c0_i32_0 : i32, i32, i32, i32
  }
  func.func @transform_1(%arg0: i32, %arg1: i32) -> (i32, i32, i32) {
    %c0_i32 = arith.constant 0 : i32
    %c0_i32_0 = arith.constant 0 : i32
    %c0_i32_1 = arith.constant 0 : i32
    return %arg0, %c0_i32, %c0_i32_0 : i32, i32, i32
  }
}

module attributes {stable_mosaic.version = 11 : i64} {
  func.func @_attention_kernel(%arg0: memref<2x16xf32, #tpu.memory_space<vmem>>, %arg1: memref<16x8xf32, #tpu.memory_space<vmem>>, %arg2: memref<1x8xf32, #tpu.memory_space<vmem>>, %arg3: memref<2x8x16xf32, #tpu.memory_space<vmem>>, %arg4: memref<2x1x16xf32, #tpu.memory_space<vmem>>, %arg5: memref<2x2x16xf32, #tpu.memory_space<vmem>>) attributes {dimension_semantics = [], scalar_prefetch = 0 : i64, scratch_operands = 0 : i64, tpu.core_type = #tpu.core_type<tc>} {
    %c0 = arith.constant 0 : index
    %c0_0 = arith.constant 0 : index
    %0 = vector.load %arg0[%c0, %c0_0] : memref<2x16xf32, #tpu.memory_space<vmem>>, vector<2x16xf32>
    %c0_1 = arith.constant 0 : index
    %c0_2 = arith.constant 0 : index
    %1 = vector.load %arg1[%c0_1, %c0_2] : memref<16x8xf32, #tpu.memory_space<vmem>>, vector<16x8xf32>
    %cst = arith.constant dense<0.000000e+00> : vector<2x8xf32>
    %2 = tpu.matmul %0, %1, %cst {dimension_numbers = #tpu.dot_dimension_numbers<[1], [0], [0], [1], [0, 0, 1, 1], [], []>} : vector<2x16xf32>, vector<16x8xf32>, vector<2x8xf32> -> vector<2x8xf32>
    %c0_3 = arith.constant 0 : index
    %c0_4 = arith.constant 0 : index
    %3 = vector.load %arg2[%c0_3, %c0_4] : memref<1x8xf32, #tpu.memory_space<vmem>>, vector<1x8xf32>
    %4 = vector.broadcast %3 : vector<1x8xf32> to vector<2x8xf32>
    %5 = arith.addf %2, %4 : vector<2x8xf32>
    %c0_5 = arith.constant 0 : index
    %c0_6 = arith.constant 0 : index
    %c0_7 = arith.constant 0 : index
    %6 = vector.load %arg3[%c0_5, %c0_6, %c0_7] : memref<2x8x16xf32, #tpu.memory_space<vmem>>, vector<1x8x16xf32>
    %7 = vector.shape_cast %6 : vector<1x8x16xf32> to vector<8x16xf32>
    %cst_8 = arith.constant dense<0.000000e+00> : vector<2x16xf32>
    %8 = tpu.matmul %5, %7, %cst_8 {dimension_numbers = #tpu.dot_dimension_numbers<[1], [0], [0], [1], [0, 0, 1, 1], [], []>} : vector<2x8xf32>, vector<8x16xf32>, vector<2x16xf32> -> vector<2x16xf32>
    %c0_9 = arith.constant 0 : index
    %c0_10 = arith.constant 0 : index
    %c0_11 = arith.constant 0 : index
    %9 = vector.load %arg4[%c0_9, %c0_10, %c0_11] : memref<2x1x16xf32, #tpu.memory_space<vmem>>, vector<1x1x16xf32>
    %10 = vector.shape_cast %9 : vector<1x1x16xf32> to vector<1x16xf32>
    %11 = vector.broadcast %10 : vector<1x16xf32> to vector<2x16xf32>
    %12 = arith.addf %8, %11 : vector<2x16xf32>
    %c1 = arith.constant 1 : index
    %c0_12 = arith.constant 0 : index
    %c0_13 = arith.constant 0 : index
    %13 = vector.load %arg3[%c1, %c0_12, %c0_13] : memref<2x8x16xf32, #tpu.memory_space<vmem>>, vector<1x8x16xf32>
    %14 = vector.shape_cast %13 : vector<1x8x16xf32> to vector<8x16xf32>
    %cst_14 = arith.constant dense<0.000000e+00> : vector<2x16xf32>
    %15 = tpu.matmul %5, %14, %cst_14 {dimension_numbers = #tpu.dot_dimension_numbers<[1], [0], [0], [1], [0, 0, 1, 1], [], []>} : vector<2x8xf32>, vector<8x16xf32>, vector<2x16xf32> -> vector<2x16xf32>
    %c1_15 = arith.constant 1 : index
    %c0_16 = arith.constant 0 : index
    %c0_17 = arith.constant 0 : index
    %16 = vector.load %arg4[%c1_15, %c0_16, %c0_17] : memref<2x1x16xf32, #tpu.memory_space<vmem>>, vector<1x1x16xf32>
    %17 = vector.shape_cast %16 : vector<1x1x16xf32> to vector<1x16xf32>
    %18 = vector.broadcast %17 : vector<1x16xf32> to vector<2x16xf32>
    %19 = arith.addf %15, %18 : vector<2x16xf32>
    %20 = arith.maximumf %12, %19 : vector<2x16xf32>
    %21 = arith.subf %12, %20 : vector<2x16xf32>
    %22 = math.exp %21 : vector<2x16xf32>
    %23 = arith.subf %19, %20 : vector<2x16xf32>
    %24 = math.exp %23 : vector<2x16xf32>
    %25 = arith.addf %22, %24 : vector<2x16xf32>
    %26 = tpu.reciprocal %25 {approx = true} : vector<2x16xf32> -> vector<2x16xf32>
    %27 = arith.mulf %22, %26 : vector<2x16xf32>
    %c0_18 = arith.constant 0 : index
    %c0_19 = arith.constant 0 : index
    %c0_20 = arith.constant 0 : index
    %28 = vector.load %arg5[%c0_18, %c0_19, %c0_20] : memref<2x2x16xf32, #tpu.memory_space<vmem>>, vector<1x2x16xf32>
    %29 = vector.shape_cast %28 : vector<1x2x16xf32> to vector<2x16xf32>
    %30 = vector.shape_cast %27 : vector<2x16xf32> to vector<1x2x16xf32>
    tpu.vector_store %arg5[%c0_18, %c0_19, %c0_20], %30 {strides = array<i32>} : memref<2x2x16xf32, #tpu.memory_space<vmem>>, vector<1x2x16xf32>,
    %31 = arith.mulf %24, %26 : vector<2x16xf32>
    %c1_21 = arith.constant 1 : index
    %c0_22 = arith.constant 0 : index
    %c0_23 = arith.constant 0 : index
    %32 = vector.load %arg5[%c1_21, %c0_22, %c0_23] : memref<2x2x16xf32, #tpu.memory_space<vmem>>, vector<1x2x16xf32>
    %33 = vector.shape_cast %32 : vector<1x2x16xf32> to vector<2x16xf32>
    %34 = vector.shape_cast %31 : vector<2x16xf32> to vector<1x2x16xf32>
    tpu.vector_store %arg5[%c1_21, %c0_22, %c0_23], %34 {strides = array<i32>} : memref<2x2x16xf32, #tpu.memory_space<vmem>>, vector<1x2x16xf32>,
    return
  }
}

module attributes {stable_mosaic.version = 11 : i64} {
  func.func @_select_expand_shortcut_kernel(%arg0: i32, %arg1: i32, %arg2: memref<2x1x256x16xf32, #tpu.memory_space<vmem>>, %arg3: memref<1x2x16xf32, #tpu.memory_space<vmem>>, %arg4: memref<1x256x32xf32, #tpu.memory_space<vmem>>, %arg5: memref<1x16xf32, #tpu.memory_space<vmem>>, %arg6: memref<1x16xf32, #tpu.memory_space<vmem>>, %arg7: memref<16x64xf32, #tpu.memory_space<vmem>>, %arg8: memref<32x64xf32, #tpu.memory_space<vmem>>, %arg9: memref<1x64xf32, #tpu.memory_space<vmem>>, %arg10: memref<1x256x64xf32, #tpu.memory_space<vmem>>) attributes {dimension_semantics = [#tpu.dimension_semantics<parallel>, #tpu.dimension_semantics<parallel>], iteration_bounds = array<i64: 2, 1>, scalar_prefetch = 0 : i64, scratch_operands = 0 : i64, tpu.core_type = #tpu.core_type<tc>, window_params = [{transform_indices = @transform_0, window_bounds = array<i64: 2, 1, 256, 16>}, {transform_indices = @transform_1, window_bounds = array<i64: 1, 2, 16>}, {transform_indices = @transform_2, window_bounds = array<i64: 1, 256, 32>}, {pipeline_mode = #tpu.pipeline_mode<synchronous>, transform_indices = @transform_3, window_bounds = array<i64: 1, 16>}, {pipeline_mode = #tpu.pipeline_mode<synchronous>, transform_indices = @transform_4, window_bounds = array<i64: 1, 16>}, {pipeline_mode = #tpu.pipeline_mode<synchronous>, transform_indices = @transform_5, window_bounds = array<i64: 16, 64>}, {pipeline_mode = #tpu.pipeline_mode<synchronous>, transform_indices = @transform_6, window_bounds = array<i64: 32, 64>}, {pipeline_mode = #tpu.pipeline_mode<synchronous>, transform_indices = @transform_7, window_bounds = array<i64: 1, 64>}, {transform_indices = @transform_8, window_bounds = array<i64: 1, 256, 64>}]} {
    %c0 = arith.constant 0 : index
    %c0_0 = arith.constant 0 : index
    %c0_1 = arith.constant 0 : index
    %0 = vector.load %arg3[%c0, %c0_0, %c0_1] : memref<1x2x16xf32, #tpu.memory_space<vmem>>, vector<1x2x16xf32>
    %1 = vector.shape_cast %0 : vector<1x2x16xf32> to vector<2x16xf32>
    %c0_2 = arith.constant 0 : index
    %c0_3 = arith.constant 0 : index
    %c0_4 = arith.constant 0 : index
    %c0_5 = arith.constant 0 : index
    %2 = vector.load %arg2[%c0_2, %c0_3, %c0_4, %c0_5] : memref<2x1x256x16xf32, #tpu.memory_space<vmem>>, vector<1x1x256x16xf32>
    %3 = vector.shape_cast %2 : vector<1x1x256x16xf32> to vector<256x16xf32>
    %4 = vector.extract_strided_slice %1 {offsets = [0, 0], sizes = [1, 16], strides = [1, 1]} : vector<2x16xf32> to vector<1x16xf32>
    %5 = vector.broadcast %4 : vector<1x16xf32> to vector<256x16xf32>
    %6 = arith.mulf %3, %5 : vector<256x16xf32>
    %c1 = arith.constant 1 : index
    %c0_6 = arith.constant 0 : index
    %c0_7 = arith.constant 0 : index
    %c0_8 = arith.constant 0 : index
    %7 = vector.load %arg2[%c1, %c0_6, %c0_7, %c0_8] : memref<2x1x256x16xf32, #tpu.memory_space<vmem>>, vector<1x1x256x16xf32>
    %8 = vector.shape_cast %7 : vector<1x1x256x16xf32> to vector<256x16xf32>
    %9 = vector.extract_strided_slice %1 {offsets = [1, 0], sizes = [1, 16], strides = [1, 1]} : vector<2x16xf32> to vector<1x16xf32>
    %10 = vector.broadcast %9 : vector<1x16xf32> to vector<256x16xf32>
    %11 = arith.mulf %8, %10 : vector<256x16xf32>
    %12 = arith.addf %6, %11 : vector<256x16xf32>
    %c0_9 = arith.constant 0 : index
    %c0_10 = arith.constant 0 : index
    %13 = vector.load %arg5[%c0_9, %c0_10] : memref<1x16xf32, #tpu.memory_space<vmem>>, vector<1x16xf32>
    %14 = vector.broadcast %13 : vector<1x16xf32> to vector<256x16xf32>
    %15 = arith.mulf %12, %14 : vector<256x16xf32>
    %c0_11 = arith.constant 0 : index
    %c0_12 = arith.constant 0 : index
    %16 = vector.load %arg6[%c0_11, %c0_12] : memref<1x16xf32, #tpu.memory_space<vmem>>, vector<1x16xf32>
    %17 = vector.broadcast %16 : vector<1x16xf32> to vector<256x16xf32>
    %18 = arith.addf %15, %17 : vector<256x16xf32>
    %cst = arith.constant 0.000000e+00 : f32
    %19 = vector.broadcast %cst : f32 to vector<256x16xf32>
    %20 = arith.maximumf %18, %19 : vector<256x16xf32>
    %c0_13 = arith.constant 0 : index
    %c0_14 = arith.constant 0 : index
    %21 = vector.load %arg7[%c0_13, %c0_14] : memref<16x64xf32, #tpu.memory_space<vmem>>, vector<16x64xf32>
    %cst_15 = arith.constant dense<0.000000e+00> : vector<256x64xf32>
    %22 = tpu.matmul %20, %21, %cst_15 {dimension_numbers = #tpu.dot_dimension_numbers<[1], [0], [0], [1], [0, 0, 1, 1], [], []>} : vector<256x16xf32>, vector<16x64xf32>, vector<256x64xf32> -> vector<256x64xf32>
    %c0_16 = arith.constant 0 : index
    %c0_17 = arith.constant 0 : index
    %c0_18 = arith.constant 0 : index
    %23 = vector.load %arg4[%c0_16, %c0_17, %c0_18] : memref<1x256x32xf32, #tpu.memory_space<vmem>>, vector<1x256x32xf32>
    %24 = vector.shape_cast %23 : vector<1x256x32xf32> to vector<256x32xf32>
    %c0_19 = arith.constant 0 : index
    %c0_20 = arith.constant 0 : index
    %25 = vector.load %arg8[%c0_19, %c0_20] : memref<32x64xf32, #tpu.memory_space<vmem>>, vector<32x64xf32>
    %cst_21 = arith.constant dense<0.000000e+00> : vector<256x64xf32>
    %26 = tpu.matmul %24, %25, %cst_21 {dimension_numbers = #tpu.dot_dimension_numbers<[1], [0], [0], [1], [0, 0, 1, 1], [], []>} : vector<256x32xf32>, vector<32x64xf32>, vector<256x64xf32> -> vector<256x64xf32>
    %27 = arith.addf %22, %26 : vector<256x64xf32>
    %c0_22 = arith.constant 0 : index
    %c0_23 = arith.constant 0 : index
    %28 = vector.load %arg9[%c0_22, %c0_23] : memref<1x64xf32, #tpu.memory_space<vmem>>, vector<1x64xf32>
    %29 = vector.broadcast %28 : vector<1x64xf32> to vector<256x64xf32>
    %30 = arith.addf %27, %29 : vector<256x64xf32>
    %cst_24 = arith.constant 0.000000e+00 : f32
    %31 = vector.broadcast %cst_24 : f32 to vector<256x64xf32>
    %32 = arith.maximumf %30, %31 : vector<256x64xf32>
    %c0_25 = arith.constant 0 : index
    %c0_26 = arith.constant 0 : index
    %c0_27 = arith.constant 0 : index
    %33 = vector.load %arg10[%c0_25, %c0_26, %c0_27] : memref<1x256x64xf32, #tpu.memory_space<vmem>>, vector<1x256x64xf32>
    %34 = vector.shape_cast %33 : vector<1x256x64xf32> to vector<256x64xf32>
    %35 = vector.shape_cast %32 : vector<256x64xf32> to vector<1x256x64xf32>
    tpu.vector_store %arg10[%c0_25, %c0_26, %c0_27], %35 {strides = array<i32>} : memref<1x256x64xf32, #tpu.memory_space<vmem>>, vector<1x256x64xf32>,
    return
  }
  func.func @transform_0(%arg0: i32, %arg1: i32) -> (i32, i32, i32, i32) {
    %c0_i32 = arith.constant 0 : i32
    %c0_i32_0 = arith.constant 0 : i32
    %c0_i32_1 = arith.constant 0 : i32
    return %c0_i32, %arg0, %arg1, %c0_i32_0 : i32, i32, i32, i32
  }
  func.func @transform_1(%arg0: i32, %arg1: i32) -> (i32, i32, i32) {
    %c0_i32 = arith.constant 0 : i32
    %c0_i32_0 = arith.constant 0 : i32
    %c0_i32_1 = arith.constant 0 : i32
    return %arg0, %c0_i32, %c0_i32_0 : i32, i32, i32
  }
  func.func @transform_2(%arg0: i32, %arg1: i32) -> (i32, i32, i32) {
    %c0_i32 = arith.constant 0 : i32
    %c0_i32_0 = arith.constant 0 : i32
    return %arg0, %arg1, %c0_i32 : i32, i32, i32
  }
  func.func @transform_3(%arg0: i32, %arg1: i32) -> (i32, i32) {
    %c0_i32 = arith.constant 0 : i32
    %c0_i32_0 = arith.constant 0 : i32
    %c0_i32_1 = arith.constant 0 : i32
    return %c0_i32, %c0_i32_0 : i32, i32
  }
  func.func @transform_4(%arg0: i32, %arg1: i32) -> (i32, i32) {
    %c0_i32 = arith.constant 0 : i32
    %c0_i32_0 = arith.constant 0 : i32
    %c0_i32_1 = arith.constant 0 : i32
    return %c0_i32, %c0_i32_0 : i32, i32
  }
  func.func @transform_5(%arg0: i32, %arg1: i32) -> (i32, i32) {
    %c0_i32 = arith.constant 0 : i32
    %c0_i32_0 = arith.constant 0 : i32
    %c0_i32_1 = arith.constant 0 : i32
    return %c0_i32, %c0_i32_0 : i32, i32
  }
  func.func @transform_6(%arg0: i32, %arg1: i32) -> (i32, i32) {
    %c0_i32 = arith.constant 0 : i32
    %c0_i32_0 = arith.constant 0 : i32
    %c0_i32_1 = arith.constant 0 : i32
    return %c0_i32, %c0_i32_0 : i32, i32
  }
  func.func @transform_7(%arg0: i32, %arg1: i32) -> (i32, i32) {
    %c0_i32 = arith.constant 0 : i32
    %c0_i32_0 = arith.constant 0 : i32
    %c0_i32_1 = arith.constant 0 : i32
    return %c0_i32, %c0_i32_0 : i32, i32
  }
  func.func @transform_8(%arg0: i32, %arg1: i32) -> (i32, i32, i32) {
    %c0_i32 = arith.constant 0 : i32
    %c0_i32_0 = arith.constant 0 : i32
    return %arg0, %arg1, %c0_i32 : i32, i32, i32
  }
}

</mosaic_0001>

<bundles_post_ra>
// kernel: bottleneck_forward.6
= control target key start
LH: loop header
LB: loop body
LE: loop exit
PB: predicated region body
PF: predicated region fallthrough
CT: control target
= control target key end

     0   :  { %8 = vsyncpa [#allocation3], 0  ;;  %s1246_s0 = inlined_call_operand.hbm [shape: f32[512,32], index: 0, kind: input, shape index: {}]   ;;  %s1247_s1 = inlined_call_operand.vmem [shape: f32[32,16], index: 1, kind: input, shape index: {}]   ;;  %s1248_s2 = inlined_call_operand.vmem [shape: f32[1,16], index: 2, kind: input, shape index: {}]   ;;  %s1249_s3 = inlined_call_operand.vmem [shape: f32[512,16], index: 3, kind: output, shape index: {}]  }
   0x1   :  { %10 = vsyncpa [#allocation3 + $0x1], 0  ;;  %s965_s12 = smov 0   ;;  %s967_s13 = smov 0  }
   0x2   :  { %s969_s14 = smov 0   ;;  %s971_s15 = smov 0  }
   0x3 LB: > { %s690_s16 = sadd.s32 4294967295, %s940_s15   ;;  %s985_s17 = sadd.s32 1, %s940_s15   ;;  %s940_s15 = sphi %s971_s15, %s1258_s15   ;;  %s936_s14 = sphi %s969_s14, %s1257_s14   ;;  %s932_s13 = sphi %s967_s13, %s1256_s13   ;;  %s928_s12 = sphi %s965_s12, %s1255_s12  }
   0x4   : > { %s20_s18 = ssub.s32 %s940_s15, %s985_s17  ;;  %s23_s19 = sadd.s32 1, %s936_s14 }
   0x5   : > { %p21_p0 = scmp.eq.s32.totalorder %s20_s18, 0  ;;  %p30_p1 = scmp.ne.s32.totalorder %s936_s14, %s932_s13 }
   0x6   : > { %p31_p2 = scmp.eq.s32.totalorder %s940_s15, 0  ;;  %p36_p3 = scmp.ne.s32.totalorder %s932_s13, %s928_s12 }
   0x7   : > { %s995_s20 = scalar_select %p21_p0, %s936_s14, %s23_s19  }
   0x8   : > { %p32_p4 = por %p31_p2, %p30_p1  ;;  %p37_p5 = scmp.eq.s32.totalorder %s690_s16, 0 }
   0x9   : > { %p843_p6 = scmp.lt.s32.totalorder %s940_s15, 2  ;;  %s134_s22 = sand.u32 1, %s936_s14  }
   0xa   : > { %p1000_p7 = por %p37_p5, %p36_p3  ;;  %s694_s23 = sshll.u32 %s134_s22, 8 }
   0xb   : > { %s736_s24 = sshll.u32 %s940_s15, 12  ;;  %s138_s28 = scalar_lea.vmem [#allocation2], %s694_s23 }
   0xc   : > { %s1251_s21 = scalar_select %p1000_p7, 1, 0 }
   0xd   : > { %s1009_s27 = scalar_lea.hbm %s1246_s0, %s736_s24  ;;  %s145_s29 = sshll.u32 %s138_s28, 4  ;;  %s1011_s29 = int_to_ptr.vmem [resolvable:$true] %s145_s29 }
   0xe   : > { %p1013_p8 = pnand %p843_p6, %p32_p4  ;;  %s1018_s4 = scalar_lea.sflag [#allocation3], %s134_s22 }
   0xf   : > { %s878_s5 = scalar_lea.hbm %s1009_s27, 4096  ;;  %s883_s8 = scalar_lea.hbm %s1246_s0, 8192 }
  0x10   : > { %p879_p10 = scmp.ne.s32.totalorder %s1009_s27, %s878_s5  ;;  %p880_p11 = pneg %p1013_p8 }
  0x11   : > { %p884_p0 = scmp.lt.s32.totalorder %s1009_s27, %s1246_s0  ;;  %p885_p1 = scmp.lt.s32.totalorder %s883_s8, %s878_s5 }
  0x12   : > { %p881_p12 = pnand %p880_p11, %p879_p10 }
  0x13   : > { %p886_p2 = por %p885_p1, %p884_p0 }
  0x14   : > { %p882_p13 = pneg %p881_p12 }
  0x16   : > { %p887_p3 = pnand %p886_p2, %p882_p13 }
  0x18   : > { %890 = shalt.err (!%p887_p3)
}
  0x19   : > { %s891_s11 = scalar_lea.vmem %s1011_s29, 4096  ;;  %s942_s12 = smov [#allocation2]  }
  0x1a   : > { %p892_p4 = scmp.ne.s32.totalorder %s1011_s29, %s891_s11  ;;  %s896_s18 = sshll.u32 %s942_s12, 4  ;;  %s897_s18 = int_to_ptr.vmem [resolvable:$false] %s896_s18 }
  0x1b   : > { %s898_s19 = scalar_lea.vmem %s897_s18, 8192  ;;  %p899_p10 = scmp.lt.s32.totalorder %s1011_s29, %s897_s18 }
  0x1c   : > { %p894_p5 = pnand %p892_p4, %p880_p11  ;;  %p900_p12 = scmp.lt.s32.totalorder %s898_s19, %s891_s11 }
  0x1e   : > { %p895_p6 = pneg %p894_p5  ;;  %p901_p9 = por %p900_p12, %p899_p10 }
  0x20   : > { %p902_p7 = pnand %p901_p9, %p895_p6 }
  0x22   : > { %905 = shalt.err (!%p902_p7)
}
  0x23   : > { %s943_s22 = smov 128   ;;  %s944_s23 = smov 8  }
  0x24   : > { %842 = dma.hbm_to_vmem [thread:$0]  (!%p1013_p8), %s1009_s27, 4096, %s1011_s29, %s1018_s4, %s943_s22, %s943_s22, %s944_s23  }
  0x25   : > { %p153_p11 = scmp.lt.s32.totalorder %s940_s15, 3  ;;  %p1253_p13 = scmp.ge.s32.totalorder %s940_s15, 1 }
  0x27   : > { %p154_p0 = pnand %p1253_p13, %p153_p11 }
  0x28   : > { %s159_s24 = sand.u32 (!%p154_p0), 1, %s932_s13   ;;  %p1254_p7 = scmp.ne.s32.totalorder (!%p154_p0), %s1251_s21, 0 }
  0x29   : > { %157 = sbr.rel (%p154_p0) target bundleno = 285 (0x11d), region = 32  ;;  %s698_s25 = sshll.u32 (!%p154_p0), %s159_s24, 8 }
  0x2a   : > { %s160_s26 = scalar_lea.sflag (!%p154_p0), [#allocation3], %s159_s24  ;;  %s1043_s28 = scalar_lea.vmem (!%p154_p0), [#allocation2], %s698_s25 }
  0x2e   : > { %923 = dma.done.wait (%p1254_p7), %s160_s26, 4096  }
  0x2f   : > { %925 = vsyncadd (%p1254_p7), %s160_s26, 4294963200  ;;  %v228_v0 = vld [vmem:[%s1247_s1 + $0x18] sm:$0xff]  ;;  %v227_v1 = vld [vmem:[%s1247_s1 + $0x10] sm:$0xff]  ;;  %vm236_vm0 = vcmask 261120   ;;  %s699_s8 = sshll.u32 %s690_s16, 5  ;;  %vm590_vm1 = vcmask 130048  }
  0x30   : > { %773 = vmatprep.subr.mxu0 %v228_v0  ;;  %829 = vmatprep.subr.mxu1 %v228_v0  ;;  %v226_v2 = vld [vmem:[%s1247_s1 + $0x8] sm:$0xff]  ;;  %v225_v3 = vld [vmem:[%s1247_s1] sm:$0xff]  ;;  %v195_v8 = vld [vmem:[%s1043_s28 + $0x10] sm:$0xff]  ;;  %p188_p8 = scmp.lt.s32.totalorder %s699_s8, 63 }
  0x31   : > { %774 = vmatpush3.msra.mxu0 %v228_v0  ;;  %833 = vmatpush3.msra.mxu1 %v228_v0  ;;  %v193_v4 = vld [vmem:[%s1043_s28] sm:$0xff]  ;;  %v194_v6 = vld [vmem:[%s1043_s28 + $0x8] sm:$0xff]  ;;  %v211_v9 = vld [vmem:[%s1043_s28 + $0x90] sm:$0xff] }
  0x32   : > { %775 = vmatprep.subr.mxu0 %v227_v1  ;;  %830 = vmatprep.subr.mxu1 %v227_v1  ;;  %v209_v5 = vld [vmem:[%s1043_s28 + $0x80] sm:$0xff]  ;;  %v210_v7 = vld [vmem:[%s1043_s28 + $0x88] sm:$0xff]  ;;  %v196_v10 = vld [vmem:[%s1043_s28 + $0x18] sm:$0xff]  ;;  %s1260_s8 = smov (!%p188_p8, %s699_s8), 63 }
  0x33   : > { %776 = vmatpush3.msra.mxu0 %v227_v1  ;;  %834 = vmatpush3.msra.mxu1 %v227_v1  ;;  %v212_v11 = vld [vmem:[%s1043_s28 + $0x98] sm:$0xff]  ;;  %v197_v12 = vld [vmem:[%s1043_s28 + $0x20] sm:$0xff]  ;;  %v198_v14 = vld [vmem:[%s1043_s28 + $0x28] sm:$0xff]  ;;  %s700_s11 = sshll.u32 %s1260_s8, 3 }
  0x34   : > { %777 = vmatprep.subr.mxu0 %v226_v2  ;;  %831 = vmatprep.subr.mxu1 %v226_v2  ;;  %v213_v13 = vld [vmem:[%s1043_s28 + $0xa0] sm:$0xff]  ;;  %v214_v15 = vld [vmem:[%s1043_s28 + $0xa8] sm:$0xff]  ;;  %v199_v16 = vld [vmem:[%s1043_s28 + $0x30] sm:$0xff]  ;;  %s1137_s19 = scalar_lea.vmem %s1249_s3, %s700_s11 }
  0x35   : > { %778 = vmatpush3.msra.mxu0 %v226_v2  ;;  %835 = vmatpush3.msra.mxu1 %v226_v2  ;;  %v215_v17 = vld [vmem:[%s1043_s28 + $0xb0] sm:$0xff]  ;;  %v200_v18 = vld [vmem:[%s1043_s28 + $0x38] sm:$0xff]  ;;  %v201_v20 = vld [vmem:[%s1043_s28 + $0x40] sm:$0xff] }
  0x36   : > { %779 = vmatprep.subr.mxu0 %v225_v3  ;;  %832 = vmatprep.subr.mxu1 %v225_v3  ;;  %v216_v19 = vld [vmem:[%s1043_s28 + $0xb8] sm:$0xff]  ;;  %v217_v21 = vld [vmem:[%s1043_s28 + $0xc0] sm:$0xff]  ;;  %v202_v22 = vld [vmem:[%s1043_s28 + $0x48] sm:$0xff] }
  0x37   : > { %780 = vmatpush3.msra.mxu0 %v225_v3  ;;  %836 = vmatpush3.msra.mxu1 %v225_v3  ;;  %v218_v23 = vld [vmem:[%s1043_s28 + $0xc8] sm:$0xff]  ;;  %v203_v24 = vld [vmem:[%s1043_s28 + $0x50] sm:$0xff]  ;;  %v204_v26 = vld [vmem:[%s1043_s28 + $0x58] sm:$0xff] }
  0x38   : > { %781 = vmatprep.mubr.msk.f32.mxu0 %vm236_vm0, %v193_v4  ;;  %805 = vmatprep.mubr.msk.f32.mxu1 %vm236_vm0, %v209_v5  ;;  %v219_v25 = vld [vmem:[%s1043_s28 + $0xd0] sm:$0xff]  ;;  %v220_v27 = vld [vmem:[%s1043_s28 + $0xd8] sm:$0xff]  ;;  %v205_v28 = vld [vmem:[%s1043_s28 + $0x60] sm:$0xff] }
  0x39   : > { %782 = vmatmul.mubr.msk.f32.vlgmr.msra.gmra.mxu0 %vm236_vm0, %v194_v6  ;;  %806 = vmatmul.mubr.msk.f32.vlgmr.msra.gmra.mxu1 %vm236_vm0, %v210_v7  ;;  %v221_v29 = vld [vmem:[%s1043_s28 + $0xe0] sm:$0xff]  ;;  %v206_v30 = vld [vmem:[%s1043_s28 + $0x68] sm:$0xff]  ;;  %v207_v32 = vld [vmem:[%s1043_s28 + $0x70] sm:$0xff] }
  0x3a   : > { %784 = vmatprep.mubr.msk.f32.mxu0 %vm236_vm0, %v195_v8  ;;  %808 = vmatprep.mubr.msk.f32.mxu1 %vm236_vm0, %v211_v9  ;;  %v222_v31 = vld [vmem:[%s1043_s28 + $0xe8] sm:$0xff]  ;;  %v223_v33 = vld [vmem:[%s1043_s28 + $0xf0] sm:$0xff]  ;;  %v208_v34 = vld [vmem:[%s1043_s28 + $0x78] sm:$0xff] }
  0x3b   : > { %v224_v35 = vld [vmem:[%s1043_s28 + $0xf8] sm:$0xff]  ;;  %v1130_v36 = vld [vmem:[%s1248_s2] ss:$0 sm:$0xff] }
  0x3d   : > { %785 = vmatmul.mubr.msk.f32.gmra.mxu0 %vm236_vm0, %v196_v10  ;;  %809 = vmatmul.mubr.msk.f32.gmra.mxu1 %vm236_vm0, %v212_v11 }
  0x3e   : > { %787 = vmatprep.mubr.msk.f32.mxu0 %vm236_vm0, %v197_v12  ;;  %811 = vmatprep.mubr.msk.f32.mxu1 %vm236_vm0, %v213_v13 }
  0x41   : > { %788 = vmatmul.mubr.msk.f32.gmra.mxu0 %vm236_vm0, %v198_v14  ;;  %812 = vmatmul.mubr.msk.f32.gmra.mxu1 %vm236_vm0, %v214_v15 }
  0x42   : > { %790 = vmatprep.mubr.msk.f32.mxu0 %vm236_vm0, %v199_v16  ;;  %814 = vmatprep.mubr.msk.f32.mxu1 %vm236_vm0, %v215_v17 }
  0x45   : > { %791 = vmatmul.mubr.msk.f32.gmra.mxu0 %vm236_vm0, %v200_v18  ;;  %815 = vmatmul.mubr.msk.f32.gmra.mxu1 %vm236_vm0, %v216_v19 }
  0x46   : > { %793 = vmatprep.mubr.msk.f32.mxu0 %vm236_vm0, %v201_v20  ;;  %817 = vmatprep.mubr.msk.f32.mxu1 %vm236_vm0, %v217_v21 }
  0x49   : > { %794 = vmatmul.mubr.msk.f32.gmra.mxu0 %vm236_vm0, %v202_v22  ;;  %818 = vmatmul.mubr.msk.f32.gmra.mxu1 %vm236_vm0, %v218_v23 }
  0x4a   : > { %796 = vmatprep.mubr.msk.f32.mxu0 %vm236_vm0, %v203_v24  ;;  %820 = vmatprep.mubr.msk.f32.mxu1 %vm236_vm0, %v219_v25 }
  0x4d   : > { %797 = vmatmul.mubr.msk.f32.gmra.mxu0 %vm236_vm0, %v204_v26  ;;  %821 = vmatmul.mubr.msk.f32.gmra.mxu1 %vm236_vm0, %v220_v27 }
  0x4e   : > { %799 = vmatprep.mubr.msk.f32.mxu0 %vm236_vm0, %v205_v28  ;;  %823 = vmatprep.mubr.msk.f32.mxu1 %vm236_vm0, %v221_v29 }
  0x51   : > { %800 = vmatmul.mubr.msk.f32.gmra.mxu0 %vm236_vm0, %v206_v30  ;;  %824 = vmatmul.mubr.msk.f32.gmra.mxu1 %vm236_vm0, %v222_v31 }
  0x52   : > { %802 = vmatprep.mubr.msk.f32.mxu0 %vm236_vm0, %v207_v32  ;;  %826 = vmatprep.mubr.msk.f32.mxu1 %vm236_vm0, %v223_v33 }
  0x55   : > { %803 = vmatmul.mubr.msk.f32.gmra.mxu0 %vm236_vm0, %v208_v34  ;;  %827 = vmatmul.mubr.msk.f32.gmra.mxu1 %vm236_vm0, %v224_v35 }
  0xf9   : > { %v783_v37 = vpop.f32.mrf.mxu0  ;;  %v807_v38 = vpop.f32.mrf.mxu1 }
  0xfa   : > { %v405_v39 = vadd.f32 %v783_v37, %v1130_v36  ;;  %v485_v40 = vadd.f32 %v807_v38, %v1130_v36 }
  0xfb   : > { %v399_v41 = vpop.f32.mrf.mxu0  ;;  %v479_v42 = vpop.f32.mrf.mxu1 }
  0xfc   : > { %v559_v43 = vmax.f32 %v405_v39, 0.0  ;;  %v575_v44 = vmax.f32 %v485_v40, 0.0  ;;  %v400_v45 = vadd.f32 %v1130_v36, %v399_v41  ;;  %v480_v46 = vadd.f32 %v1130_v36, %v479_v42 }
  0xfd   : > { %v786_v47 = vpop.f32.mrf.mxu0  ;;  %v810_v48 = vpop.f32.mrf.mxu1 }
  0xfe   : > { %592 = vst.msk [vmem:[%s1137_s19 + $0x8] sm:$0xff] %vm590_vm1, %v559_v43  ;;  %608 = vst.msk [vmem:[%s1137_s19 + $0x88] sm:$0xff] %vm590_vm1, %v575_v44  ;;  %v558_v49 = vmax.f32 %v400_v45, 0.0  ;;  %v574_v50 = vmax.f32 %v480_v46, 0.0  ;;  %v415_v51 = vadd.f32 %v786_v47, %v1130_v36  ;;  %v495_v52 = vadd.f32 %v810_v48, %v1130_v36 }
  0xff   : > { %v409_v53 = vpop.f32.mrf.mxu0  ;;  %v489_v54 = vpop.f32.mrf.mxu1 }
 0x100   : > { %591 = vst.msk [vmem:[%s1137_s19] sm:$0xff] %vm590_vm1, %v558_v49  ;;  %607 = vst.msk [vmem:[%s1137_s19 + $0x80] sm:$0xff] %vm590_vm1, %v574_v50  ;;  %v561_v55 = vmax.f32 %v415_v51, 0.0  ;;  %v577_v56 = vmax.f32 %v495_v52, 0.0  ;;  %v410_v57 = vadd.f32 %v1130_v36, %v409_v53  ;;  %v490_v58 = vadd.f32 %v1130_v36, %v489_v54 }
 0x101   : > { %v789_v59 = vpop.f32.mrf.mxu0  ;;  %v813_v60 = vpop.f32.mrf.mxu1 }
 0x102   : > { %594 = vst.msk [vmem:[%s1137_s19 + $0x18] sm:$0xff] %vm590_vm1, %v561_v55  ;;  %610 = vst.msk [vmem:[%s1137_s19 + $0x98] sm:$0xff] %vm590_vm1, %v577_v56  ;;  %v560_v61 = vmax.f32 %v410_v57, 0.0  ;;  %v576_v62 = vmax.f32 %v490_v58, 0.0  ;;  %v425_v63 = vadd.f32 %v789_v59, %v1130_v36  ;;  %v505_v0 = vadd.f32 %v813_v60, %v1130_v36 }
 0x103   : > { %v419_v1 = vpop.f32.mrf.mxu0  ;;  %v499_v2 = vpop.f32.mrf.mxu1 }
 0x104   : > { %593 = vst.msk [vmem:[%s1137_s19 + $0x10] sm:$0xff] %vm590_vm1, %v560_v61  ;;  %609 = vst.msk [vmem:[%s1137_s19 + $0x90] sm:$0xff] %vm590_vm1, %v576_v62  ;;  %v563_v3 = vmax.f32 %v425_v63, 0.0  ;;  %v579_v4 = vmax.f32 %v505_v0, 0.0  ;;  %v420_v5 = vadd.f32 %v1130_v36, %v419_v1  ;;  %v500_v6 = vadd.f32 %v1130_v36, %v499_v2 }
 0x105   : > { %v792_v7 = vpop.f32.mrf.mxu0  ;;  %v816_v8 = vpop.f32.mrf.mxu1 }
 0x106   : > { %596 = vst.msk [vmem:[%s1137_s19 + $0x28] sm:$0xff] %vm590_vm1, %v563_v3  ;;  %612 = vst.msk [vmem:[%s1137_s19 + $0xa8] sm:$0xff] %vm590_vm1, %v579_v4  ;;  %v562_v9 = vmax.f32 %v420_v5, 0.0  ;;  %v578_v10 = vmax.f32 %v500_v6, 0.0  ;;  %v435_v11 = vadd.f32 %v792_v7, %v1130_v36  ;;  %v515_v12 = vadd.f32 %v816_v8, %v1130_v36 }
 0x107   : > { %v429_v13 = vpop.f32.mrf.mxu0  ;;  %v509_v14 = vpop.f32.mrf.mxu1 }
 0x108   : > { %595 = vst.msk [vmem:[%s1137_s19 + $0x20] sm:$0xff] %vm590_vm1, %v562_v9  ;;  %611 = vst.msk [vmem:[%s1137_s19 + $0xa0] sm:$0xff] %vm590_vm1, %v578_v10  ;;  %v565_v15 = vmax.f32 %v435_v11, 0.0  ;;  %v581_v16 = vmax.f32 %v515_v12, 0.0  ;;  %v430_v17 = vadd.f32 %v1130_v36, %v429_v13  ;;  %v510_v18 = vadd.f32 %v1130_v36, %v509_v14 }
 0x109   : > { %v795_v19 = vpop.f32.mrf.mxu0  ;;  %v819_v20 = vpop.f32.mrf.mxu1 }
 0x10a   : > { %598 = vst.msk [vmem:[%s1137_s19 + $0x38] sm:$0xff] %vm590_vm1, %v565_v15  ;;  %614 = vst.msk [vmem:[%s1137_s19 + $0xb8] sm:$0xff] %vm590_vm1, %v581_v16  ;;  %v564_v21 = vmax.f32 %v430_v17, 0.0  ;;  %v580_v22 = vmax.f32 %v510_v18, 0.0  ;;  %v445_v23 = vadd.f32 %v795_v19, %v1130_v36  ;;  %v525_v24 = vadd.f32 %v819_v20, %v1130_v36 }
 0x10b   : > { %v439_v25 = vpop.f32.mrf.mxu0  ;;  %v519_v26 = vpop.f32.mrf.mxu1 }
 0x10c   : > { %597 = vst.msk [vmem:[%s1137_s19 + $0x30] sm:$0xff] %vm590_vm1, %v564_v21  ;;  %613 = vst.msk [vmem:[%s1137_s19 + $0xb0] sm:$0xff] %vm590_vm1, %v580_v22  ;;  %v567_v27 = vmax.f32 %v445_v23, 0.0  ;;  %v583_v28 = vmax.f32 %v525_v24, 0.0  ;;  %v440_v29 = vadd.f32 %v1130_v36, %v439_v25  ;;  %v520_v30 = vadd.f32 %v1130_v36, %v519_v26 }
 0x10d   : > { %v798_v31 = vpop.f32.mrf.mxu0  ;;  %v822_v32 = vpop.f32.mrf.mxu1 }
 0x10e   : > { %600 = vst.msk [vmem:[%s1137_s19 + $0x48] sm:$0xff] %vm590_vm1, %v567_v27  ;;  %616 = vst.msk [vmem:[%s1137_s19 + $0xc8] sm:$0xff] %vm590_vm1, %v583_v28  ;;  %v566_v33 = vmax.f32 %v440_v29, 0.0  ;;  %v582_v34 = vmax.f32 %v520_v30, 0.0  ;;  %v455_v35 = vadd.f32 %v798_v31, %v1130_v36  ;;  %v535_v37 = vadd.f32 %v822_v32, %v1130_v36 }
 0x10f   : > { %v449_v38 = vpop.f32.mrf.mxu0  ;;  %v529_v39 = vpop.f32.mrf.mxu1 }
 0x110   : > { %599 = vst.msk [vmem:[%s1137_s19 + $0x40] sm:$0xff] %vm590_vm1, %v566_v33  ;;  %615 = vst.msk [vmem:[%s1137_s19 + $0xc0] sm:$0xff] %vm590_vm1, %v582_v34  ;;  %v569_v40 = vmax.f32 %v455_v35, 0.0  ;;  %v585_v41 = vmax.f32 %v535_v37, 0.0  ;;  %v450_v42 = vadd.f32 %v1130_v36, %v449_v38  ;;  %v530_v43 = vadd.f32 %v1130_v36, %v529_v39 }
 0x111   : > { %v801_v44 = vpop.f32.mrf.mxu0  ;;  %v825_v45 = vpop.f32.mrf.mxu1 }
 0x112   : > { %602 = vst.msk [vmem:[%s1137_s19 + $0x58] sm:$0xff] %vm590_vm1, %v569_v40  ;;  %618 = vst.msk [vmem:[%s1137_s19 + $0xd8] sm:$0xff] %vm590_vm1, %v585_v41  ;;  %v568_v46 = vmax.f32 %v450_v42, 0.0  ;;  %v584_v47 = vmax.f32 %v530_v43, 0.0  ;;  %v465_v48 = vadd.f32 %v801_v44, %v1130_v36  ;;  %v545_v49 = vadd.f32 %v825_v45, %v1130_v36 }
 0x113   : > { %v459_v50 = vpop.f32.mrf.mxu0  ;;  %v539_v51 = vpop.f32.mrf.mxu1 }
 0x114   : > { %601 = vst.msk [vmem:[%s1137_s19 + $0x50] sm:$0xff] %vm590_vm1, %v568_v46  ;;  %617 = vst.msk [vmem:[%s1137_s19 + $0xd0] sm:$0xff] %vm590_vm1, %v584_v47  ;;  %v571_v52 = vmax.f32 %v465_v48, 0.0  ;;  %v587_v53 = vmax.f32 %v545_v49, 0.0  ;;  %v460_v54 = vadd.f32 %v1130_v36, %v459_v50  ;;  %v540_v55 = vadd.f32 %v1130_v36, %v539_v51 }
 0x115   : > { %v804_v56 = vpop.f32.mrf.mxu0  ;;  %v828_v57 = vpop.f32.mrf.mxu1 }
 0x116   : > { %604 = vst.msk [vmem:[%s1137_s19 + $0x68] sm:$0xff] %vm590_vm1, %v571_v52  ;;  %620 = vst.msk [vmem:[%s1137_s19 + $0xe8] sm:$0xff] %vm590_vm1, %v587_v53  ;;  %v570_v58 = vmax.f32 %v460_v54, 0.0  ;;  %v586_v59 = vmax.f32 %v540_v55, 0.0  ;;  %v475_v60 = vadd.f32 %v804_v56, %v1130_v36  ;;  %v555_v61 = vadd.f32 %v828_v57, %v1130_v36 }
 0x117   : > { %v469_v62 = vpop.f32.mrf.mxu0  ;;  %v549_v63 = vpop.f32.mrf.mxu1 }
 0x118   : > { %603 = vst.msk [vmem:[%s1137_s19 + $0x60] sm:$0xff] %vm590_vm1, %v570_v58  ;;  %619 = vst.msk [vmem:[%s1137_s19 + $0xe0] sm:$0xff] %vm590_vm1, %v586_v59  ;;  %v573_v0 = vmax.f32 %v475_v60, 0.0  ;;  %v589_v1 = vmax.f32 %v555_v61, 0.0  ;;  %v470_v2 = vadd.f32 %v1130_v36, %v469_v62  ;;  %v550_v3 = vadd.f32 %v1130_v36, %v549_v63 }
 0x11a   : > { %606 = vst.msk [vmem:[%s1137_s19 + $0x78] sm:$0xff] %vm590_vm1, %v573_v0  ;;  %622 = vst.msk [vmem:[%s1137_s19 + $0xf8] sm:$0xff] %vm590_vm1, %v589_v1  ;;  %v572_v4 = vmax.f32 %v470_v2, 0.0  ;;  %v588_v5 = vmax.f32 %v550_v3, 0.0 }
 0x11c   : > { %605 = vst.msk [vmem:[%s1137_s19 + $0x70] sm:$0xff] %vm590_vm1, %v572_v4  ;;  %621 = vst.msk [vmem:[%s1137_s19 + $0xf0] sm:$0xff] %vm590_vm1, %v588_v5 }
 0x11d PF: > { %p13_p9 = scmp.ge.s32.totalorder %s985_s17, 4   ;;  %s1255_s12 = smov %s932_s13 }
 0x11e   : > { %s1256_s13 = smov %s936_s14  ;;  %s1257_s14 = smov %s995_s20 }
 0x11f   : > { %s1258_s15 = smov %s985_s17  ;;  %15 = sbr.rel (!%p13_p9) target bundleno = 3 (0x3), region = 72 }
 0x124   :  { %645 = vsyncpa [#allocation3], 1 }
 0x125   :  { %647 = vsyncpa [#allocation3 + $0x1], 1 }

// kernel: bottleneck_forward.7
= control target key start
LH: loop header
LB: loop body
LE: loop exit
PB: predicated region body
PF: predicated region fallthrough
CT: control target
= control target key end

     0   :  { %s1485_s12 = smov 0   ;;  %s1850_s0 = inlined_call_operand.vmem [shape: f32[2,16,16,16], index: 0, kind: input, shape index: {}]   ;;  %s1851_s1 = inlined_call_operand.vmem [shape: f32[2,8,8], index: 1, kind: input, shape index: {}]   ;;  %s1852_s2 = inlined_call_operand.vmem [shape: f32[1,16], index: 2, kind: input, shape index: {}]   ;;  %s1853_s3 = inlined_call_operand.vmem [shape: f32[2,256,16], index: 3, kind: output, shape index: {}]  }
   0x1 LB: > { %s1200_s13 = sadd.s32 4294967295, %s1461_s12   ;;  %p1204_p0 = scmp.ge.s32.totalorder %s1461_s12, 1  ;;  %s1461_s12 = sphi %s1485_s12, %s13_s12  }
   0x2   : > { %p137_p1 = scmp.lt.s32.totalorder %s1461_s12, 3 }
   0x4   : > { %p138_p2 = pnand %p1204_p0, %p137_p1 }
   0x5   : > { %p161_p3 = scmp.lt.s32.totalorder (!%p138_p2), %s1200_s13, 1  ;;  %s1463_s20 = smov (!%p138_p2), 120  }
   0x6   : > { %141 = sbr.rel (%p138_p2) target bundleno = 510 (0x1fe), region = 32  ;;  %s1464_s23 = smov (!%p138_p2), 8  }
   0xb   : > { %v1241_v0 = vld [vmem:[%s1851_s1 + $0x8] sm:$0xff]  ;;  %s1855_s13 = smov (!%p161_p3, %s1200_s13), 1  ;;  %vm204_vm0 = vcmask 64512   ;;  %v203_v29 = vld [vmem:[%s1851_s1] sm:$0xff]  ;;  %vm1112_vm1 = vcmask 130048  }
   0xc   : > { %1395 = vmatprep.subr.mxu1 %v1241_v0  ;;  %s1277_s16 = sshll.u32 %s1855_s13, 8  ;;  %1345 = vmatprep.subr.mxu0 %v203_v29 }
   0xd   : > { %1396 = vmatpush3.msra.mxu1 %v1241_v0  ;;  %s1504_s19 = scalar_lea.vmem %s1850_s0, %s1277_s16  ;;  %1346 = vmatpush3.msra.mxu0 %v203_v29  ;;  %s1703_s28 = scalar_lea.vmem %s1853_s3, %s1277_s16 }
   0xe   : > { %v171_v1 = vld [vmem:[%s1504_s19] sm:$0xff]  ;;  %v1508_v2 = vld [vmem:[%s1504_s19 + $0x10] sm:$0xff]  ;;  %v172_v3 = vld [vmem:[%s1504_s19 + $0x8] sm:$0xff] }
   0xf   : > { %528 = vrot.lane.b32.xlu0 %v171_v1, %s1463_s20  ;;  %532 = vrot.lane.b32.xlu1 %v1508_v2, %s1463_s20  ;;  %v1515_v4 = vld [vmem:[%s1504_s19 + $0x18] sm:$0xff]  ;;  %v175_v5 = vld [vmem:[%s1504_s19 + $0x20] sm:$0xff] }
  0x10   : > { %1347 = vmatprep.mubr.msk.f32.mxu0 %vm204_vm0, %v171_v1  ;;  %v176_v6 = vld [vmem:[%s1504_s19 + $0x28] sm:$0xff]  ;;  %v177_v7 = vld [vmem:[%s1504_s19 + $0x30] sm:$0xff]  ;;  %v178_v8 = vld [vmem:[%s1504_s19 + $0x38] sm:$0xff] }
  0x11   : > { %v179_v9 = vld [vmem:[%s1504_s19 + $0x40] sm:$0xff]  ;;  %v180_v10 = vld [vmem:[%s1504_s19 + $0x48] sm:$0xff]  ;;  %v181_v11 = vld [vmem:[%s1504_s19 + $0x50] sm:$0xff]  ;;  %1348 = vmatmul.mubr.msk.f32.vlgmr.msra.gmra.mxu0 %vm204_vm0, %v172_v3 }
  0x12   : > { %v182_v12 = vld [vmem:[%s1504_s19 + $0x58] sm:$0xff]  ;;  %v183_v13 = vld [vmem:[%s1504_s19 + $0x60] sm:$0xff]  ;;  %v184_v14 = vld [vmem:[%s1504_s19 + $0x68] sm:$0xff]  ;;  %1350 = vmatprep.mubr.msk.f32.mxu0 %vm204_vm0, %v1508_v2 }
  0x13   : > { %530 = vrot.lane.b32.xlu0 %v172_v3, %s1463_s20  ;;  %534 = vrot.lane.b32.xlu1 %v1515_v4, %s1463_s20  ;;  %v185_v15 = vld [vmem:[%s1504_s19 + $0x70] sm:$0xff]  ;;  %v186_v16 = vld [vmem:[%s1504_s19 + $0x78] sm:$0xff] }
  0x14   : > { %v187_v17 = vld [vmem:[%s1504_s19 + $0x80] sm:$0xff]  ;;  %v188_v18 = vld [vmem:[%s1504_s19 + $0x88] sm:$0xff]  ;;  %v189_v19 = vld [vmem:[%s1504_s19 + $0x90] sm:$0xff] }
  0x15   : > { %v190_v20 = vld [vmem:[%s1504_s19 + $0x98] sm:$0xff]  ;;  %v191_v21 = vld [vmem:[%s1504_s19 + $0xa0] sm:$0xff]  ;;  %v192_v22 = vld [vmem:[%s1504_s19 + $0xa8] sm:$0xff]  ;;  %1351 = vmatmul.mubr.msk.f32.gmra.mxu0 %vm204_vm0, %v1515_v4 }
  0x16   : > { %v193_v23 = vld [vmem:[%s1504_s19 + $0xb0] sm:$0xff]  ;;  %v194_v24 = vld [vmem:[%s1504_s19 + $0xb8] sm:$0xff]  ;;  %v195_v25 = vld [vmem:[%s1504_s19 + $0xc0] sm:$0xff]  ;;  %1353 = vmatprep.mubr.msk.f32.mxu0 %vm204_vm0, %v175_v5 }
  0x17   : > { %536 = vrot.lane.b32.xlu0 %v175_v5, %s1463_s20  ;;  %538 = vrot.lane.b32.xlu1 %v176_v6, %s1463_s20  ;;  %v196_v26 = vld [vmem:[%s1504_s19 + $0xc8] sm:$0xff]  ;;  %v197_v27 = vld [vmem:[%s1504_s19 + $0xd0] sm:$0xff] }
  0x18   : > { %v198_v28 = vld [vmem:[%s1504_s19 + $0xd8] sm:$0xff]  ;;  %v199_v30 = vld [vmem:[%s1504_s19 + $0xe0] sm:$0xff]  ;;  %v200_v31 = vld [vmem:[%s1504_s19 + $0xe8] sm:$0xff] }
  0x19   : > { %v201_v32 = vld [vmem:[%s1504_s19 + $0xf0] sm:$0xff]  ;;  %v202_v33 = vld [vmem:[%s1504_s19 + $0xf8] sm:$0xff]  ;;  %1354 = vmatmul.mubr.msk.f32.gmra.mxu0 %vm204_vm0, %v176_v6 }
  0x1a   : > { %1356 = vmatprep.mubr.msk.f32.mxu0 %vm204_vm0, %v177_v7 }
  0x1b   : > { %540 = vrot.lane.b32.xlu0 %v177_v7, %s1463_s20  ;;  %542 = vrot.lane.b32.xlu1 %v178_v8, %s1463_s20 }
  0x1d   : > { %1357 = vmatmul.mubr.msk.f32.gmra.mxu0 %vm204_vm0, %v178_v8 }
  0x1e   : > { %1359 = vmatprep.mubr.msk.f32.mxu0 %vm204_vm0, %v179_v9 }
  0x1f   : > { %544 = vrot.lane.b32.xlu0 %v179_v9, %s1463_s20  ;;  %546 = vrot.lane.b32.xlu1 %v180_v10, %s1463_s20 }
  0x21   : > { %1360 = vmatmul.mubr.msk.f32.gmra.mxu0 %vm204_vm0, %v180_v10 }
  0x22   : > { %1362 = vmatprep.mubr.msk.f32.mxu0 %vm204_vm0, %v181_v11 }
  0x23   : > { %548 = vrot.lane.b32.xlu0 %v181_v11, %s1463_s20  ;;  %550 = vrot.lane.b32.xlu1 %v182_v12, %s1463_s20 }
  0x25   : > { %1363 = vmatmul.mubr.msk.f32.gmra.mxu0 %vm204_vm0, %v182_v12 }
  0x26   : > { %1365 = vmatprep.mubr.msk.f32.mxu0 %vm204_vm0, %v183_v13 }
  0x27   : > { %552 = vrot.lane.b32.xlu0 %v183_v13, %s1463_s20  ;;  %554 = vrot.lane.b32.xlu1 %v184_v14, %s1463_s20 }
  0x29   : > { %1366 = vmatmul.mubr.msk.f32.gmra.mxu0 %vm204_vm0, %v184_v14 }
  0x2a   : > { %1368 = vmatprep.mubr.msk.f32.mxu0 %vm204_vm0, %v185_v15 }
  0x2b   : > { %556 = vrot.lane.b32.xlu0 %v185_v15, %s1463_s20  ;;  %558 = vrot.lane.b32.xlu1 %v186_v16, %s1463_s20 }
  0x2d   : > { %1369 = vmatmul.mubr.msk.f32.gmra.mxu0 %vm204_vm0, %v186_v16 }
  0x2e   : > { %1371 = vmatprep.mubr.msk.f32.mxu0 %vm204_vm0, %v187_v17 }
  0x2f   : > { %560 = vrot.lane.b32.xlu0 %v187_v17, %s1463_s20  ;;  %562 = vrot.lane.b32.xlu1 %v188_v18, %s1463_s20 }
  0x31   : > { %1372 = vmatmul.mubr.msk.f32.gmra.mxu0 %vm204_vm0, %v188_v18 }
  0x32   : > { %1374 = vmatprep.mubr.msk.f32.mxu0 %vm204_vm0, %v189_v19 }
  0x33   : > { %564 = vrot.lane.b32.xlu0 %v189_v19, %s1463_s20  ;;  %566 = vrot.lane.b32.xlu1 %v190_v20, %s1463_s20 }
  0x35   : > { %1375 = vmatmul.mubr.msk.f32.gmra.mxu0 %vm204_vm0, %v190_v20 }
  0x36   : > { %1377 = vmatprep.mubr.msk.f32.mxu0 %vm204_vm0, %v191_v21 }
  0x37   : > { %568 = vrot.lane.b32.xlu0 %v191_v21, %s1463_s20  ;;  %570 = vrot.lane.b32.xlu1 %v192_v22, %s1463_s20 }
  0x39   : > { %1378 = vmatmul.mubr.msk.f32.gmra.mxu0 %vm204_vm0, %v192_v22 }
  0x3a   : > { %1380 = vmatprep.mubr.msk.f32.mxu0 %vm204_vm0, %v193_v23 }
  0x3b   : > { %572 = vrot.lane.b32.xlu0 %v193_v23, %s1463_s20  ;;  %574 = vrot.lane.b32.xlu1 %v194_v24, %s1463_s20 }
  0x3d   : > { %1381 = vmatmul.mubr.msk.f32.gmra.mxu0 %vm204_vm0, %v194_v24 }
  0x3e   : > { %1383 = vmatprep.mubr.msk.f32.mxu0 %vm204_vm0, %v195_v25 }
  0x3f   : > { %576 = vrot.lane.b32.xlu0 %v195_v25, %s1463_s20  ;;  %578 = vrot.lane.b32.xlu1 %v196_v26, %s1463_s20 }
  0x41   : > { %1384 = vmatmul.mubr.msk.f32.gmra.mxu0 %vm204_vm0, %v196_v26 }
  0x42   : > { %1386 = vmatprep.mubr.msk.f32.mxu0 %vm204_vm0, %v197_v27 }
  0x43   : > { %580 = vrot.lane.b32.xlu0 %v197_v27, %s1463_s20  ;;  %582 = vrot.lane.b32.xlu1 %v198_v28, %s1463_s20 }
  0x45   : > { %1387 = vmatmul.mubr.msk.f32.gmra.mxu0 %vm204_vm0, %v198_v28 }
  0x46   : > { %1389 = vmatprep.mubr.msk.f32.mxu0 %vm204_vm0, %v199_v30 }
  0x47   : > { %584 = vrot.lane.b32.xlu0 %v199_v30, %s1463_s20  ;;  %586 = vrot.lane.b32.xlu1 %v200_v31, %s1463_s20 }
  0x49   : > { %1390 = vmatmul.mubr.msk.f32.gmra.mxu0 %vm204_vm0, %v200_v31 }
  0x4a   : > { %1392 = vmatprep.mubr.msk.f32.mxu0 %vm204_vm0, %v201_v32 }
  0x4b   : > { %588 = vrot.lane.b32.xlu0 %v201_v32, %s1463_s20  ;;  %590 = vrot.lane.b32.xlu1 %v202_v33, %s1463_s20 }
  0x4d   : > { %1393 = vmatmul.mubr.msk.f32.gmra.mxu0 %vm204_vm0, %v202_v33 }
  0x81   : > { %v529_v34 = vpop.permute.xlu0 %528  ;;  %v533_v35 = vpop.permute.xlu1 %532 }
  0x82   : > { %1397 = vmatprep.mubr.msk.f32.mxu1 %vm204_vm0, %v529_v34 }
  0x85   : > { %v531_v36 = vpop.permute.xlu0 %530  ;;  %v535_v37 = vpop.permute.xlu1 %534 }
  0x86   : > { %1398 = vmatmul.mubr.msk.f32.vlgmr.msra.gmra.mxu1 %vm204_vm0, %v531_v36 }
  0x87   : > { %1400 = vmatprep.mubr.msk.f32.mxu1 %vm204_vm0, %v533_v35 }
  0x89   : > { %v537_v38 = vpop.permute.xlu0 %536  ;;  %v539_v39 = vpop.permute.xlu1 %538 }
  0x8a   : > { %1401 = vmatmul.mubr.msk.f32.gmra.mxu1 %vm204_vm0, %v535_v37 }
  0x8b   : > { %1403 = vmatprep.mubr.msk.f32.mxu1 %vm204_vm0, %v537_v38 }
  0x8d   : > { %v541_v40 = vpop.permute.xlu0 %540  ;;  %v543_v41 = vpop.permute.xlu1 %542 }
  0x8e   : > { %1404 = vmatmul.mubr.msk.f32.gmra.mxu1 %vm204_vm0, %v539_v39 }
  0x8f   : > { %1406 = vmatprep.mubr.msk.f32.mxu1 %vm204_vm0, %v541_v40 }
  0x91   : > { %v545_v42 = vpop.permute.xlu0 %544  ;;  %v547_v43 = vpop.permute.xlu1 %546 }
  0x92   : > { %1407 = vmatmul.mubr.msk.f32.gmra.mxu1 %vm204_vm0, %v543_v41 }
  0x93   : > { %1409 = vmatprep.mubr.msk.f32.mxu1 %vm204_vm0, %v545_v42 }
  0x95   : > { %v549_v44 = vpop.permute.xlu0 %548  ;;  %v551_v45 = vpop.permute.xlu1 %550 }
  0x96   : > { %1410 = vmatmul.mubr.msk.f32.gmra.mxu1 %vm204_vm0, %v547_v43 }
  0x97   : > { %1412 = vmatprep.mubr.msk.f32.mxu1 %vm204_vm0, %v549_v44 }
  0x99   : > { %v553_v46 = vpop.permute.xlu0 %552  ;;  %v555_v47 = vpop.permute.xlu1 %554 }
  0x9a   : > { %1413 = vmatmul.mubr.msk.f32.gmra.mxu1 %vm204_vm0, %v551_v45 }
  0x9b   : > { %1415 = vmatprep.mubr.msk.f32.mxu1 %vm204_vm0, %v553_v46 }
  0x9d   : > { %v557_v48 = vpop.permute.xlu0 %556  ;;  %v559_v49 = vpop.permute.xlu1 %558 }
  0x9e   : > { %1416 = vmatmul.mubr.msk.f32.gmra.mxu1 %vm204_vm0, %v555_v47 }
  0x9f   : > { %1418 = vmatprep.mubr.msk.f32.mxu1 %vm204_vm0, %v557_v48 }
  0xa1   : > { %v561_v50 = vpop.permute.xlu0 %560  ;;  %v563_v51 = vpop.permute.xlu1 %562 }
  0xa2   : > { %1419 = vmatmul.mubr.msk.f32.gmra.mxu1 %vm204_vm0, %v559_v49 }
  0xa3   : > { %1421 = vmatprep.mubr.msk.f32.mxu1 %vm204_vm0, %v561_v50  ;;  %v1692_v50 = vld [vmem:[%s1852_s2] ss:$0 sm:$0xff] }
  0xa5   : > { %v565_v52 = vpop.permute.xlu0 %564  ;;  %v567_v53 = vpop.permute.xlu1 %566 }
  0xa6   : > { %1422 = vmatmul.mubr.msk.f32.gmra.mxu1 %vm204_vm0, %v563_v51 }
  0xa7   : > { %1424 = vmatprep.mubr.msk.f32.mxu1 %vm204_vm0, %v565_v52 }
  0xa9   : > { %v569_v54 = vpop.permute.xlu0 %568  ;;  %v571_v55 = vpop.permute.xlu1 %570 }
  0xaa   : > { %1425 = vmatmul.mubr.msk.f32.gmra.mxu1 %vm204_vm0, %v567_v53 }
  0xab   : > { %1427 = vmatprep.mubr.msk.f32.mxu1 %vm204_vm0, %v569_v54 }
  0xad   : > { %v573_v56 = vpop.permute.xlu0 %572  ;;  %v575_v57 = vpop.permute.xlu1 %574 }
  0xae   : > { %1428 = vmatmul.mubr.msk.f32.gmra.mxu1 %vm204_vm0, %v571_v55 }
  0xaf   : > { %1430 = vmatprep.mubr.msk.f32.mxu1 %vm204_vm0, %v573_v56 }
  0xb1   : > { %v577_v58 = vpop.permute.xlu0 %576  ;;  %v579_v59 = vpop.permute.xlu1 %578 }
  0xb2   : > { %1431 = vmatmul.mubr.msk.f32.gmra.mxu1 %vm204_vm0, %v575_v57 }
  0xb3   : > { %1433 = vmatprep.mubr.msk.f32.mxu1 %vm204_vm0, %v577_v58 }
  0xb5   : > { %v581_v60 = vpop.permute.xlu0 %580  ;;  %v583_v61 = vpop.permute.xlu1 %582 }
  0xb6   : > { %1434 = vmatmul.mubr.msk.f32.gmra.mxu1 %vm204_vm0, %v579_v59 }
  0xb7   : > { %1436 = vmatprep.mubr.msk.f32.mxu1 %vm204_vm0, %v581_v60 }
  0xb9   : > { %v585_v62 = vpop.permute.xlu0 %584  ;;  %v587_v63 = vpop.permute.xlu1 %586 }
  0xba   : > { %1437 = vmatmul.mubr.msk.f32.gmra.mxu1 %vm204_vm0, %v583_v61 }
  0xbb   : > { %1439 = vmatprep.mubr.msk.f32.mxu1 %vm204_vm0, %v585_v62 }
  0xbd   : > { %v589_v0 = vpop.permute.xlu0 %588  ;;  %v591_v1 = vpop.permute.xlu1 %590 }
  0xbe   : > { %1440 = vmatmul.mubr.msk.f32.gmra.mxu1 %vm204_vm0, %v587_v63 }
  0xbf   : > { %1442 = vmatprep.mubr.msk.f32.mxu1 %vm204_vm0, %v589_v0 }
  0xc2   : > { %1443 = vmatmul.mubr.msk.f32.gmra.mxu1 %vm204_vm0, %v591_v1 }
  0xd1   : > { %v1349_v29 = vpop.f32.mrf.mxu0 }
  0xd3   : > { %v367_v32 = vpop.f32.mrf.mxu0 }
  0xd5   : > { %v1352_v35 = vpop.f32.mrf.mxu0 }
  0xd7   : > { %v377_v37 = vpop.f32.mrf.mxu0 }
  0xd9   : > { %v1355_v38 = vpop.f32.mrf.mxu0 }
  0xdb   : > { %v387_v39 = vpop.f32.mrf.mxu0 }
  0xdd   : > { %v1358_v40 = vpop.f32.mrf.mxu0 }
  0xdf   : > { %v397_v41 = vpop.f32.mrf.mxu0 }
  0xe1   : > { %v1361_v42 = vpop.f32.mrf.mxu0 }
  0xe3   : > { %v407_v43 = vpop.f32.mrf.mxu0 }
  0xe5   : > { %v1677_v44 = vpop.f32.mrf.mxu0 }
  0xe7   : > { %v1679_v45 = vpop.f32.mrf.mxu0 }
  0xe9   : > { %v1681_v46 = vpop.f32.mrf.mxu0 }
  0xeb   : > { %v1683_v47 = vpop.f32.mrf.mxu0 }
  0xed   : > { %v1685_v48 = vpop.f32.mrf.mxu0 }
  0xef   : > { %v1687_v49 = vpop.f32.mrf.mxu0 }
  0xf1   : > { %v1696_v55 = vpop.f32.mrf.mxu0 }
  0xf3   : > { %v1711_v0 = vpop.f32.mrf.mxu0 }
 0x146   : > { %v1399_v2 = vpop.f32.mrf.mxu1 }
 0x147   : > { %915 = vrot.lane.b32.xlu1 %v1399_v2, %s1464_s23 }
 0x148   : > { %v722_v3 = vpop.f32.mrf.mxu1 }
 0x149   : > { %913 = vrot.lane.b32.xlu0 %v722_v3, %s1464_s23 }
 0x14a   : > { %v1402_v4 = vpop.f32.mrf.mxu1 }
 0x14b   : > { %919 = vrot.lane.b32.xlu1 %v1402_v4, %s1464_s23 }
 0x14c   : > { %v732_v5 = vpop.f32.mrf.mxu1 }
 0x14d   : > { %917 = vrot.lane.b32.xlu0 %v732_v5, %s1464_s23 }
 0x14e   : > { %v1405_v6 = vpop.f32.mrf.mxu1 }
 0x14f   : > { %923 = vrot.lane.b32.xlu1 %v1405_v6, %s1464_s23 }
 0x150   : > { %v742_v7 = vpop.f32.mrf.mxu1 }
 0x151   : > { %921 = vrot.lane.b32.xlu0 %v742_v7, %s1464_s23 }
 0x152   : > { %v1408_v8 = vpop.f32.mrf.mxu1 }
 0x153   : > { %927 = vrot.lane.b32.xlu1 %v1408_v8, %s1464_s23 }
 0x154   : > { %v752_v9 = vpop.f32.mrf.mxu1 }
 0x155   : > { %925 = vrot.lane.b32.xlu0 %v752_v9, %s1464_s23  ;;  %v1721_v9 = vpop.f32.mrf.mxu0 }
 0x156   : > { %v1411_v10 = vpop.f32.mrf.mxu1 }
 0x157   : > { %931 = vrot.lane.b32.xlu1 %v1411_v10, %s1464_s23 }
 0x158   : > { %v762_v11 = vpop.f32.mrf.mxu1 }
 0x159   : > { %929 = vrot.lane.b32.xlu0 %v762_v11, %s1464_s23 }
 0x15a   : > { %v1414_v12 = vpop.f32.mrf.mxu1 }
 0x15b   : > { %935 = vrot.lane.b32.xlu1 %v1414_v12, %s1464_s23 }
 0x15c   : > { %v772_v13 = vpop.f32.mrf.mxu1 }
 0x15d   : > { %933 = vrot.lane.b32.xlu0 %v772_v13, %s1464_s23 }
 0x15e   : > { %v1417_v14 = vpop.f32.mrf.mxu1 }
 0x15f   : > { %939 = vrot.lane.b32.xlu1 %v1417_v14, %s1464_s23 }
 0x160   : > { %v782_v15 = vpop.f32.mrf.mxu1 }
 0x161   : > { %937 = vrot.lane.b32.xlu0 %v782_v15, %s1464_s23 }
 0x162   : > { %v1420_v16 = vpop.f32.mrf.mxu1 }
 0x163   : > { %943 = vrot.lane.b32.xlu1 %v1420_v16, %s1464_s23 }
 0x164   : > { %v792_v17 = vpop.f32.mrf.mxu1 }
 0x165   : > { %941 = vrot.lane.b32.xlu0 %v792_v17, %s1464_s23 }
 0x166   : > { %v1423_v18 = vpop.f32.mrf.mxu1 }
 0x167   : > { %947 = vrot.lane.b32.xlu1 %v1423_v18, %s1464_s23  ;;  %v1731_v18 = vpop.f32.mrf.mxu0 }
 0x168   : > { %v802_v19 = vpop.f32.mrf.mxu1 }
 0x169   : > { %945 = vrot.lane.b32.xlu0 %v802_v19, %s1464_s23 }
 0x16a   : > { %v1426_v20 = vpop.f32.mrf.mxu1 }
 0x16b   : > { %951 = vrot.lane.b32.xlu1 %v1426_v20, %s1464_s23 }
 0x16c   : > { %v812_v21 = vpop.f32.mrf.mxu1 }
 0x16d   : > { %949 = vrot.lane.b32.xlu0 %v812_v21, %s1464_s23 }
 0x16e   : > { %v1429_v22 = vpop.f32.mrf.mxu1 }
 0x16f   : > { %955 = vrot.lane.b32.xlu1 %v1429_v22, %s1464_s23 }
 0x170   : > { %v822_v23 = vpop.f32.mrf.mxu1 }
 0x171   : > { %953 = vrot.lane.b32.xlu0 %v822_v23, %s1464_s23 }
 0x172   : > { %v1432_v24 = vpop.f32.mrf.mxu1 }
 0x173   : > { %959 = vrot.lane.b32.xlu1 %v1432_v24, %s1464_s23 }
 0x174   : > { %v832_v25 = vpop.f32.mrf.mxu1 }
 0x175   : > { %957 = vrot.lane.b32.xlu0 %v832_v25, %s1464_s23 }
 0x176   : > { %v1435_v26 = vpop.f32.mrf.mxu1 }
 0x177   : > { %963 = vrot.lane.b32.xlu1 %v1435_v26, %s1464_s23 }
 0x178   : > { %v842_v27 = vpop.f32.mrf.mxu1 }
 0x179   : > { %961 = vrot.lane.b32.xlu0 %v842_v27, %s1464_s23  ;;  %v1379_v27 = vpop.f32.mrf.mxu0 }
 0x17a   : > { %v1438_v28 = vpop.f32.mrf.mxu1 }
 0x17b   : > { %967 = vrot.lane.b32.xlu1 %v1438_v28, %s1464_s23 }
 0x17c   : > { %v852_v30 = vpop.f32.mrf.mxu1 }
 0x17d   : > { %965 = vrot.lane.b32.xlu0 %v852_v30, %s1464_s23 }
 0x17e   : > { %v1441_v31 = vpop.f32.mrf.mxu1 }
 0x17f   : > { %971 = vrot.lane.b32.xlu1 %v1441_v31, %s1464_s23 }
 0x180   : > { %v862_v33 = vpop.f32.mrf.mxu1 }
 0x181   : > { %969 = vrot.lane.b32.xlu0 %v862_v33, %s1464_s23 }
 0x182   : > { %v1444_v34 = vpop.f32.mrf.mxu1 }
 0x183   : > { %975 = vrot.lane.b32.xlu1 %v1444_v34, %s1464_s23 }
 0x184   : > { %v872_v36 = vpop.f32.mrf.mxu1 }
 0x185   : > { %973 = vrot.lane.b32.xlu0 %v872_v36, %s1464_s23  ;;  %v467_v36 = vpop.f32.mrf.mxu0 }
 0x1b9   : > { %v916_v51 = vpop.permute.xlu1 %915 }
 0x1ba   : > { %v1010_v52 = vsel %vm204_vm0, %v1349_v29, %v916_v51  ;;  %v1382_v51 = vpop.f32.mrf.mxu0 }
 0x1bb   : > { %v1049_v53 = vadd.f32 %v1692_v50, %v1010_v52  ;;  %v914_v54 = vpop.permute.xlu0 %913 }
 0x1bc   : > { %v1009_v56 = vsel %vm204_vm0, %v367_v32, %v914_v54 }
 0x1bd   : > { %v1081_v57 = vmax.f32 %v1049_v53, 0.0  ;;  %v1048_v58 = vadd.f32 %v1692_v50, %v1009_v56  ;;  %v920_v59 = vpop.permute.xlu1 %919 }
 0x1be   : > { %v1012_v60 = vsel %vm204_vm0, %v1352_v35, %v920_v59  ;;  %v477_v59 = vpop.f32.mrf.mxu0 }
 0x1bf   : > { %1114 = vst.msk [vmem:[%s1703_s28 + $0x8] sm:$0xff] %vm1112_vm1, %v1081_v57  ;;  %v1080_v61 = vmax.f32 %v1048_v58, 0.0  ;;  %v1051_v62 = vadd.f32 %v1692_v50, %v1012_v60  ;;  %v918_v63 = vpop.permute.xlu0 %917 }
 0x1c0   : > { %v1011_v1 = vsel %vm204_vm0, %v377_v37, %v918_v63 }
 0x1c1   : > { %1113 = vst.msk [vmem:[%s1703_s28] sm:$0xff] %vm1112_vm1, %v1080_v61  ;;  %v1083_v2 = vmax.f32 %v1051_v62, 0.0  ;;  %v1050_v3 = vadd.f32 %v1692_v50, %v1011_v1  ;;  %v924_v4 = vpop.permute.xlu1 %923 }
 0x1c2   : > { %v1014_v5 = vsel %vm204_vm0, %v1355_v38, %v924_v4 }
 0x1c3   : > { %1116 = vst.msk [vmem:[%s1703_s28 + $0x18] sm:$0xff] %vm1112_vm1, %v1083_v2  ;;  %v1082_v6 = vmax.f32 %v1050_v3, 0.0  ;;  %v1053_v7 = vadd.f32 %v1692_v50, %v1014_v5  ;;  %v922_v8 = vpop.permute.xlu0 %921  ;;  %v1385_v3 = vpop.f32.mrf.mxu0 }
 0x1c4   : > { %v1013_v10 = vsel %vm204_vm0, %v387_v39, %v922_v8 }
 0x1c5   : > { %1115 = vst.msk [vmem:[%s1703_s28 + $0x10] sm:$0xff] %vm1112_vm1, %v1082_v6  ;;  %v1085_v11 = vmax.f32 %v1053_v7, 0.0  ;;  %v1052_v12 = vadd.f32 %v1692_v50, %v1013_v10  ;;  %v928_v13 = vpop.permute.xlu1 %927 }
 0x1c6   : > { %v1016_v14 = vsel %vm204_vm0, %v1358_v40, %v928_v13 }
 0x1c7   : > { %1118 = vst.msk [vmem:[%s1703_s28 + $0x28] sm:$0xff] %vm1112_vm1, %v1085_v11  ;;  %v1084_v15 = vmax.f32 %v1052_v12, 0.0  ;;  %v1055_v16 = vadd.f32 %v1692_v50, %v1016_v14  ;;  %v926_v17 = vpop.permute.xlu0 %925  ;;  %v487_v11 = vpop.f32.mrf.mxu0 }
 0x1c8   : > { %v1015_v19 = vsel %vm204_vm0, %v397_v41, %v926_v17 }
 0x1c9   : > { %1117 = vst.msk [vmem:[%s1703_s28 + $0x20] sm:$0xff] %vm1112_vm1, %v1084_v15  ;;  %v1087_v20 = vmax.f32 %v1055_v16, 0.0  ;;  %v1054_v21 = vadd.f32 %v1692_v50, %v1015_v19  ;;  %v932_v22 = vpop.permute.xlu1 %931  ;;  %v1388_v19 = vpop.f32.mrf.mxu0 }
 0x1ca   : > { %v1018_v23 = vsel %vm204_vm0, %v1361_v42, %v932_v22 }
 0x1cb   : > { %1120 = vst.msk [vmem:[%s1703_s28 + $0x38] sm:$0xff] %vm1112_vm1, %v1087_v20  ;;  %v1086_v24 = vmax.f32 %v1054_v21, 0.0  ;;  %v1057_v25 = vadd.f32 %v1692_v50, %v1018_v23  ;;  %v930_v26 = vpop.permute.xlu0 %929 }
 0x1cc   : > { %v1017_v28 = vsel %vm204_vm0, %v407_v43, %v930_v26 }
 0x1cd   : > { %1119 = vst.msk [vmem:[%s1703_s28 + $0x30] sm:$0xff] %vm1112_vm1, %v1086_v24  ;;  %v1089_v29 = vmax.f32 %v1057_v25, 0.0  ;;  %v1056_v30 = vadd.f32 %v1692_v50, %v1017_v28  ;;  %v936_v31 = vpop.permute.xlu1 %935 }
 0x1ce   : > { %v1020_v32 = vsel %vm204_vm0, %v1677_v44, %v936_v31 }
 0x1cf   : > { %1122 = vst.msk [vmem:[%s1703_s28 + $0x48] sm:$0xff] %vm1112_vm1, %v1089_v29  ;;  %v1088_v33 = vmax.f32 %v1056_v30, 0.0  ;;  %v1059_v34 = vadd.f32 %v1692_v50, %v1020_v32  ;;  %v934_v35 = vpop.permute.xlu0 %933 }
 0x1d0   : > { %v1019_v37 = vsel %vm204_vm0, %v1679_v45, %v934_v35 }
 0x1d1   : > { %1121 = vst.msk [vmem:[%s1703_s28 + $0x40] sm:$0xff] %vm1112_vm1, %v1088_v33  ;;  %v1091_v38 = vmax.f32 %v1059_v34, 0.0  ;;  %v1058_v39 = vadd.f32 %v1692_v50, %v1019_v37  ;;  %v940_v40 = vpop.permute.xlu1 %939 }
 0x1d2   : > { %v1022_v41 = vsel %vm204_vm0, %v1681_v46, %v940_v40 }
 0x1d3   : > { %1124 = vst.msk [vmem:[%s1703_s28 + $0x58] sm:$0xff] %vm1112_vm1, %v1091_v38  ;;  %v1090_v42 = vmax.f32 %v1058_v39, 0.0  ;;  %v1061_v43 = vadd.f32 %v1692_v50, %v1022_v41  ;;  %v938_v44 = vpop.permute.xlu0 %937 }
 0x1d4   : > { %v1021_v45 = vsel %vm204_vm0, %v1683_v47, %v938_v44 }
 0x1d5   : > { %1123 = vst.msk [vmem:[%s1703_s28 + $0x50] sm:$0xff] %vm1112_vm1, %v1090_v42  ;;  %v1093_v52 = vmax.f32 %v1061_v43, 0.0  ;;  %v1060_v53 = vadd.f32 %v1692_v50, %v1021_v45  ;;  %v944_v54 = vpop.permute.xlu1 %943 }
 0x1d6   : > { %v1024_v46 = vsel %vm204_vm0, %v1685_v48, %v944_v54 }
 0x1d7   : > { %1126 = vst.msk [vmem:[%s1703_s28 + $0x68] sm:$0xff] %vm1112_vm1, %v1093_v52  ;;  %v1092_v56 = vmax.f32 %v1060_v53, 0.0  ;;  %v1063_v57 = vadd.f32 %v1692_v50, %v1024_v46  ;;  %v942_v58 = vpop.permute.xlu0 %941 }
 0x1d8   : > { %v1023_v47 = vsel %vm204_vm0, %v1687_v49, %v942_v58 }
 0x1d9   : > { %1125 = vst.msk [vmem:[%s1703_s28 + $0x60] sm:$0xff] %vm1112_vm1, %v1092_v56  ;;  %v1095_v60 = vmax.f32 %v1063_v57, 0.0  ;;  %v1062_v61 = vadd.f32 %v1692_v50, %v1023_v47  ;;  %v948_v62 = vpop.permute.xlu1 %947 }
 0x1da   : > { %v1026_v48 = vsel %vm204_vm0, %v1696_v55, %v948_v62 }
 0x1db   : > { %1128 = vst.msk [vmem:[%s1703_s28 + $0x78] sm:$0xff] %vm1112_vm1, %v1095_v60  ;;  %v1094_v63 = vmax.f32 %v1062_v61, 0.0  ;;  %v1065_v1 = vadd.f32 %v1692_v50, %v1026_v48  ;;  %v946_v2 = vpop.permute.xlu0 %945 }
 0x1dc   : > { %v1025_v49 = vsel %vm204_vm0, %v1711_v0, %v946_v2 }
 0x1dd   : > { %1127 = vst.msk [vmem:[%s1703_s28 + $0x70] sm:$0xff] %vm1112_vm1, %v1094_v63  ;;  %v1097_v4 = vmax.f32 %v1065_v1, 0.0  ;;  %v1064_v5 = vadd.f32 %v1692_v50, %v1025_v49  ;;  %v952_v6 = vpop.permute.xlu1 %951 }
 0x1de   : > { %v1028_v55 = vsel %vm204_vm0, %v1721_v9, %v952_v6 }
 0x1df   : > { %1130 = vst.msk [vmem:[%s1703_s28 + $0x88] sm:$0xff] %vm1112_vm1, %v1097_v4  ;;  %v1096_v7 = vmax.f32 %v1064_v5, 0.0  ;;  %v1067_v8 = vadd.f32 %v1692_v50, %v1028_v55  ;;  %v950_v10 = vpop.permute.xlu0 %949 }
 0x1e0   : > { %v1027_v0 = vsel %vm204_vm0, %v1731_v18, %v950_v10 }
 0x1e1   : > { %1129 = vst.msk [vmem:[%s1703_s28 + $0x80] sm:$0xff] %vm1112_vm1, %v1096_v7  ;;  %v1099_v12 = vmax.f32 %v1067_v8, 0.0  ;;  %v1066_v13 = vadd.f32 %v1692_v50, %v1027_v0  ;;  %v956_v14 = vpop.permute.xlu1 %955 }
 0x1e2   : > { %v1030_v9 = vsel %vm204_vm0, %v1379_v27, %v956_v14  ;;  %v497_v27 = vpop.f32.mrf.mxu0 }
 0x1e3   : > { %1132 = vst.msk [vmem:[%s1703_s28 + $0x98] sm:$0xff] %vm1112_vm1, %v1099_v12  ;;  %v1098_v15 = vmax.f32 %v1066_v13, 0.0  ;;  %v1069_v16 = vadd.f32 %v1692_v50, %v1030_v9  ;;  %v954_v17 = vpop.permute.xlu0 %953 }
 0x1e4   : > { %v1029_v20 = vsel %vm204_vm0, %v467_v36, %v954_v17  ;;  %v1391_v36 = vpop.f32.mrf.mxu0 }
 0x1e5   : > { %1131 = vst.msk [vmem:[%s1703_s28 + $0x90] sm:$0xff] %vm1112_vm1, %v1098_v15  ;;  %v1101_v18 = vmax.f32 %v1069_v16, 0.0  ;;  %v1068_v21 = vadd.f32 %v1692_v50, %v1029_v20  ;;  %v960_v22 = vpop.permute.xlu1 %959 }
 0x1e6   : > { %v1032_v23 = vsel %vm204_vm0, %v1382_v51, %v960_v22  ;;  %v507_v51 = vpop.f32.mrf.mxu0 }
 0x1e7   : > { %1134 = vst.msk [vmem:[%s1703_s28 + $0xa8] sm:$0xff] %vm1112_vm1, %v1101_v18  ;;  %v1100_v24 = vmax.f32 %v1068_v21, 0.0  ;;  %v1071_v25 = vadd.f32 %v1692_v50, %v1032_v23  ;;  %v958_v26 = vpop.permute.xlu0 %957 }
 0x1e8   : > { %v1031_v28 = vsel %vm204_vm0, %v477_v59, %v958_v26  ;;  %v1394_v59 = vpop.f32.mrf.mxu0 }
 0x1e9   : > { %1133 = vst.msk [vmem:[%s1703_s28 + $0xa0] sm:$0xff] %vm1112_vm1, %v1100_v24  ;;  %v1103_v29 = vmax.f32 %v1071_v25, 0.0  ;;  %v1070_v30 = vadd.f32 %v1692_v50, %v1031_v28  ;;  %v964_v31 = vpop.permute.xlu1 %963 }
 0x1ea   : > { %v1034_v32 = vsel %vm204_vm0, %v1385_v3, %v964_v31  ;;  %v517_v2 = vpop.f32.mrf.mxu0 }
 0x1eb   : > { %1136 = vst.msk [vmem:[%s1703_s28 + $0xb8] sm:$0xff] %vm1112_vm1, %v1103_v29  ;;  %v1102_v33 = vmax.f32 %v1070_v30, 0.0  ;;  %v1073_v34 = vadd.f32 %v1692_v50, %v1034_v32  ;;  %v962_v35 = vpop.permute.xlu0 %961 }
 0x1ec   : > { %v1033_v37 = vsel %vm204_vm0, %v487_v11, %v962_v35 }
 0x1ed   : > { %1135 = vst.msk [vmem:[%s1703_s28 + $0xb0] sm:$0xff] %vm1112_vm1, %v1102_v33  ;;  %v1105_v38 = vmax.f32 %v1073_v34, 0.0  ;;  %v1072_v39 = vadd.f32 %v1692_v50, %v1033_v37  ;;  %v968_v40 = vpop.permute.xlu1 %967 }
 0x1ee   : > { %v1036_v41 = vsel %vm204_vm0, %v1388_v19, %v968_v40 }
 0x1ef   : > { %1138 = vst.msk [vmem:[%s1703_s28 + $0xc8] sm:$0xff] %vm1112_vm1, %v1105_v38  ;;  %v1104_v42 = vmax.f32 %v1072_v39, 0.0  ;;  %v1075_v43 = vadd.f32 %v1692_v50, %v1036_v41  ;;  %v966_v44 = vpop.permute.xlu0 %965 }
 0x1f0   : > { %v1035_v45 = vsel %vm204_vm0, %v497_v27, %v966_v44 }
 0x1f1   : > { %1137 = vst.msk [vmem:[%s1703_s28 + $0xc0] sm:$0xff] %vm1112_vm1, %v1104_v42  ;;  %v1107_v52 = vmax.f32 %v1075_v43, 0.0  ;;  %v1074_v53 = vadd.f32 %v1692_v50, %v1035_v45  ;;  %v972_v54 = vpop.permute.xlu1 %971 }
 0x1f2   : > { %v1038_v46 = vsel %vm204_vm0, %v1391_v36, %v972_v54 }
 0x1f3   : > { %1140 = vst.msk [vmem:[%s1703_s28 + $0xd8] sm:$0xff] %vm1112_vm1, %v1107_v52  ;;  %v1106_v56 = vmax.f32 %v1074_v53, 0.0  ;;  %v1077_v57 = vadd.f32 %v1692_v50, %v1038_v46  ;;  %v970_v58 = vpop.permute.xlu0 %969 }
 0x1f4   : > { %v1037_v47 = vsel %vm204_vm0, %v507_v51, %v970_v58 }
 0x1f5   : > { %1139 = vst.msk [vmem:[%s1703_s28 + $0xd0] sm:$0xff] %vm1112_vm1, %v1106_v56  ;;  %v1109_v60 = vmax.f32 %v1077_v57, 0.0  ;;  %v1076_v61 = vadd.f32 %v1692_v50, %v1037_v47  ;;  %v976_v62 = vpop.permute.xlu1 %975 }
 0x1f6   : > { %v1040_v48 = vsel %vm204_vm0, %v1394_v59, %v976_v62 }
 0x1f7   : > { %1142 = vst.msk [vmem:[%s1703_s28 + $0xe8] sm:$0xff] %vm1112_vm1, %v1109_v60  ;;  %v1108_v63 = vmax.f32 %v1076_v61, 0.0  ;;  %v1079_v1 = vadd.f32 %v1692_v50, %v1040_v48  ;;  %v974_v3 = vpop.permute.xlu0 %973 }
 0x1f8   : > { %v1039_v49 = vsel %vm204_vm0, %v517_v2, %v974_v3 }
 0x1f9   : > { %1141 = vst.msk [vmem:[%s1703_s28 + $0xe0] sm:$0xff] %vm1112_vm1, %v1108_v63  ;;  %v1111_v4 = vmax.f32 %v1079_v1, 0.0  ;;  %v1078_v5 = vadd.f32 %v1692_v50, %v1039_v49 }
 0x1fb   : > { %1144 = vst.msk [vmem:[%s1703_s28 + $0xf8] sm:$0xff] %vm1112_vm1, %v1111_v4  ;;  %v1110_v6 = vmax.f32 %v1078_v5, 0.0 }
 0x1fd   : > { %1143 = vst.msk [vmem:[%s1703_s28 + $0xf0] sm:$0xff] %vm1112_vm1, %v1110_v6 }
 0x1fe PF: > { %s13_s12 = sadd.s32 1, %s1461_s12  }
 0x1ff   : > { %p10_p4 = scmp.ge.s32.totalorder %s13_s12, 4  }
 0x201   :  { %12 = sbr.rel (!%p10_p4) target bundleno = 1 (0x1), region = 63 }

// kernel: bottleneck_forward.9
= control target key start
LH: loop header
LB: loop body
LE: loop exit
PB: predicated region body
PF: predicated region fallthrough
CT: control target
= control target key end

     0   :  { %s795_s6 = smov 0   ;;  %s797_s7 = smov 0   ;;  %s1226_s0 = inlined_call_operand.vmem [shape: f32[2,2,256,16], index: 0, kind: input, shape index: {}]   ;;  %s1227_s1 = inlined_call_operand.vmem [shape: f32[2,1,16], index: 1, kind: output, shape index: {}]  }
   0x1   :  { %s799_s8 = smov 0   ;;  %s801_s9 = smov 0  }
   0x2   :  { %s803_s10 = smov 0  }
   0x3 LB: > { %s23_s11 = sadd.s32 1, %s778_s9  ;;  %p39_p1 = scmp.ne.s32.totalorder %s770_s7, %s766_s6  ;;  %s782_s10 = sphi %s803_s10, %s11_s10   ;;  %s778_s9 = sphi %s801_s9, %s1231_s9   ;;  %s774_s8 = sphi %s799_s8, %s1230_s8   ;;  %s770_s7 = sphi %s797_s7, %s1229_s7   ;;  %s766_s6 = sphi %s795_s6, %s1228_s6  }
   0x4   : > { %p25_p0 = scmp.ge.s32.totalorder %s23_s11, 2  ;;  %p40_p2 = scmp.eq.s32.totalorder %s782_s10, 0 }
   0x5   : > { %s32_s13 = sadd.s32 1, %s770_s7  ;;  %p694_p5 = scmp.ge.s32.totalorder %s782_s10, 2 }
   0x6   : > { %s1233_s11 = smov (%p25_p0, %s23_s11), 0  ;;  %p41_p3 = por %p40_p2, %p39_p1 }
   0x7   : > { %s27_s12 = ssub.s32 %s778_s9, %s1233_s11  ;;  %91 = sbr.rel (%p694_p5) target bundleno = 48 (0x30), region = 16 }
   0x8   : > { %p30_p4 = scmp.eq.s32.totalorder %s27_s12, 0 }
   0xa   : > { %s830_s14 = scalar_select %p30_p4, %s770_s7, %s32_s13  }
   0xc   : > { %94 = sbr.rel (!%p41_p3) target bundleno = 48 (0x30), region = 20  ;;  %s96_s15 = sand.u32 (%p41_p3), 1, %s770_s7  }
   0xd   : > { %s702_s16 = sshll.u32 (%p41_p3), %s778_s9, 8  ;;  %s695_s17 = sshll.u32 (%p41_p3), %s96_s15, 9 }
   0xe   : > { %s838_s20 = scalar_lea.vmem (%p41_p3), %s1226_s0, %s702_s16  ;;  %s843_s21 = scalar_lea.vmem (%p41_p3), [#allocation2], %s695_s17 }
   0xf   : > { %v258_v0 = vld [vmem:[%s838_s20] sm:$0xff] (%p41_p3)  ;;  %v260_v1 = vld [vmem:[%s838_s20 + $0x8] sm:$0xff] (%p41_p3)  ;;  %v262_v2 = vld [vmem:[%s838_s20 + $0x10] sm:$0xff] (%p41_p3) }
  0x10   : > { %259 = vst [vmem:[%s843_s21] sm:$0xff] (%p41_p3), %v258_v0  ;;  %261 = vst [vmem:[%s843_s21 + $0x8] sm:$0xff] (%p41_p3), %v260_v1  ;;  %v264_v3 = vld [vmem:[%s838_s20 + $0x18] sm:$0xff] (%p41_p3)  ;;  %v266_v4 = vld [vmem:[%s838_s20 + $0x20] sm:$0xff] (%p41_p3) }
  0x11   : > { %263 = vst [vmem:[%s843_s21 + $0x10] sm:$0xff] %v262_v2  ;;  %v268_v5 = vld [vmem:[%s838_s20 + $0x28] sm:$0xff]  ;;  %265 = vst [vmem:[%s843_s21 + $0x18] sm:$0xff] %v264_v3  ;;  %v270_v6 = vld [vmem:[%s838_s20 + $0x30] sm:$0xff] }
  0x12   : > { %267 = vst [vmem:[%s843_s21 + $0x20] sm:$0xff] %v266_v4  ;;  %269 = vst [vmem:[%s843_s21 + $0x28] sm:$0xff] %v268_v5  ;;  %v272_v7 = vld [vmem:[%s838_s20 + $0x38] sm:$0xff]  ;;  %v274_v8 = vld [vmem:[%s838_s20 + $0x40] sm:$0xff] }
  0x13   : > { %271 = vst [vmem:[%s843_s21 + $0x30] sm:$0xff] %v270_v6  ;;  %273 = vst [vmem:[%s843_s21 + $0x38] sm:$0xff] %v272_v7  ;;  %v276_v9 = vld [vmem:[%s838_s20 + $0x48] sm:$0xff]  ;;  %v278_v10 = vld [vmem:[%s838_s20 + $0x50] sm:$0xff] }
  0x14   : > { %275 = vst [vmem:[%s843_s21 + $0x40] sm:$0xff] %v274_v8  ;;  %v280_v11 = vld [vmem:[%s838_s20 + $0x58] sm:$0xff]  ;;  %277 = vst [vmem:[%s843_s21 + $0x48] sm:$0xff] %v276_v9  ;;  %v282_v12 = vld [vmem:[%s838_s20 + $0x60] sm:$0xff] }
  0x15   : > { %279 = vst [vmem:[%s843_s21 + $0x50] sm:$0xff] %v278_v10  ;;  %281 = vst [vmem:[%s843_s21 + $0x58] sm:$0xff] %v280_v11  ;;  %v284_v13 = vld [vmem:[%s838_s20 + $0x68] sm:$0xff]  ;;  %v286_v14 = vld [vmem:[%s838_s20 + $0x70] sm:$0xff] }
  0x16   : > { %283 = vst [vmem:[%s843_s21 + $0x60] sm:$0xff] %v282_v12  ;;  %285 = vst [vmem:[%s843_s21 + $0x68] sm:$0xff] %v284_v13  ;;  %v288_v15 = vld [vmem:[%s838_s20 + $0x78] sm:$0xff]  ;;  %v290_v16 = vld [vmem:[%s838_s20 + $0x80] sm:$0xff] }
  0x17   : > { %287 = vst [vmem:[%s843_s21 + $0x70] sm:$0xff] %v286_v14  ;;  %v292_v17 = vld [vmem:[%s838_s20 + $0x88] sm:$0xff]  ;;  %289 = vst [vmem:[%s843_s21 + $0x78] sm:$0xff] %v288_v15  ;;  %v294_v18 = vld [vmem:[%s838_s20 + $0x90] sm:$0xff] }
  0x18   : > { %291 = vst [vmem:[%s843_s21 + $0x80] sm:$0xff] %v290_v16  ;;  %293 = vst [vmem:[%s843_s21 + $0x88] sm:$0xff] %v292_v17  ;;  %v296_v19 = vld [vmem:[%s838_s20 + $0x98] sm:$0xff]  ;;  %v298_v20 = vld [vmem:[%s838_s20 + $0xa0] sm:$0xff] }
  0x19   : > { %295 = vst [vmem:[%s843_s21 + $0x90] sm:$0xff] %v294_v18  ;;  %297 = vst [vmem:[%s843_s21 + $0x98] sm:$0xff] %v296_v19  ;;  %v300_v21 = vld [vmem:[%s838_s20 + $0xa8] sm:$0xff]  ;;  %v302_v22 = vld [vmem:[%s838_s20 + $0xb0] sm:$0xff] }
  0x1a   : > { %299 = vst [vmem:[%s843_s21 + $0xa0] sm:$0xff] %v298_v20  ;;  %v304_v23 = vld [vmem:[%s838_s20 + $0xb8] sm:$0xff]  ;;  %301 = vst [vmem:[%s843_s21 + $0xa8] sm:$0xff] %v300_v21  ;;  %v306_v24 = vld [vmem:[%s838_s20 + $0xc0] sm:$0xff] }
  0x1b   : > { %303 = vst [vmem:[%s843_s21 + $0xb0] sm:$0xff] %v302_v22  ;;  %305 = vst [vmem:[%s843_s21 + $0xb8] sm:$0xff] %v304_v23  ;;  %v308_v25 = vld [vmem:[%s838_s20 + $0xc8] sm:$0xff]  ;;  %v310_v26 = vld [vmem:[%s838_s20 + $0xd0] sm:$0xff] }
  0x1c   : > { %307 = vst [vmem:[%s843_s21 + $0xc0] sm:$0xff] %v306_v24  ;;  %309 = vst [vmem:[%s843_s21 + $0xc8] sm:$0xff] %v308_v25  ;;  %v312_v27 = vld [vmem:[%s838_s20 + $0xd8] sm:$0xff]  ;;  %v314_v28 = vld [vmem:[%s838_s20 + $0xe0] sm:$0xff] }
  0x1d   : > { %311 = vst [vmem:[%s843_s21 + $0xd0] sm:$0xff] %v310_v26  ;;  %v316_v29 = vld [vmem:[%s838_s20 + $0xe8] sm:$0xff]  ;;  %313 = vst [vmem:[%s843_s21 + $0xd8] sm:$0xff] %v312_v27  ;;  %v318_v30 = vld [vmem:[%s838_s20 + $0xf0] sm:$0xff] }
  0x1e   : > { %315 = vst [vmem:[%s843_s21 + $0xe0] sm:$0xff] %v314_v28  ;;  %317 = vst [vmem:[%s843_s21 + $0xe8] sm:$0xff] %v316_v29  ;;  %v320_v31 = vld [vmem:[%s838_s20 + $0xf8] sm:$0xff]  ;;  %v322_v32 = vld [vmem:[%s838_s20 + $0x200] sm:$0xff] }
  0x1f   : > { %319 = vst [vmem:[%s843_s21 + $0xf0] sm:$0xff] %v318_v30  ;;  %321 = vst [vmem:[%s843_s21 + $0xf8] sm:$0xff] %v320_v31  ;;  %v324_v33 = vld [vmem:[%s838_s20 + $0x208] sm:$0xff]  ;;  %v326_v34 = vld [vmem:[%s838_s20 + $0x210] sm:$0xff] }
  0x20   : > { %323 = vst [vmem:[%s843_s21 + $0x100] sm:$0xff] %v322_v32  ;;  %v328_v35 = vld [vmem:[%s838_s20 + $0x218] sm:$0xff]  ;;  %325 = vst [vmem:[%s843_s21 + $0x108] sm:$0xff] %v324_v33  ;;  %v330_v36 = vld [vmem:[%s838_s20 + $0x220] sm:$0xff] }
  0x21   : > { %327 = vst [vmem:[%s843_s21 + $0x110] sm:$0xff] %v326_v34  ;;  %329 = vst [vmem:[%s843_s21 + $0x118] sm:$0xff] %v328_v35  ;;  %v332_v37 = vld [vmem:[%s838_s20 + $0x228] sm:$0xff]  ;;  %v334_v38 = vld [vmem:[%s838_s20 + $0x230] sm:$0xff] }
  0x22   : > { %331 = vst [vmem:[%s843_s21 + $0x120] sm:$0xff] %v330_v36  ;;  %333 = vst [vmem:[%s843_s21 + $0x128] sm:$0xff] %v332_v37  ;;  %v336_v39 = vld [vmem:[%s838_s20 + $0x238] sm:$0xff]  ;;  %v338_v40 = vld [vmem:[%s838_s20 + $0x240] sm:$0xff] }
  0x23   : > { %335 = vst [vmem:[%s843_s21 + $0x130] sm:$0xff] %v334_v38  ;;  %v340_v41 = vld [vmem:[%s838_s20 + $0x248] sm:$0xff]  ;;  %337 = vst [vmem:[%s843_s21 + $0x138] sm:$0xff] %v336_v39  ;;  %v342_v42 = vld [vmem:[%s838_s20 + $0x250] sm:$0xff] }
  0x24   : > { %339 = vst [vmem:[%s843_s21 + $0x140] sm:$0xff] %v338_v40  ;;  %341 = vst [vmem:[%s843_s21 + $0x148] sm:$0xff] %v340_v41  ;;  %v344_v43 = vld [vmem:[%s838_s20 + $0x258] sm:$0xff]  ;;  %v346_v44 = vld [vmem:[%s838_s20 + $0x260] sm:$0xff] }
  0x25   : > { %343 = vst [vmem:[%s843_s21 + $0x150] sm:$0xff] %v342_v42  ;;  %345 = vst [vmem:[%s843_s21 + $0x158] sm:$0xff] %v344_v43  ;;  %v348_v45 = vld [vmem:[%s838_s20 + $0x268] sm:$0xff]  ;;  %v350_v46 = vld [vmem:[%s838_s20 + $0x270] sm:$0xff] }
  0x26   : > { %347 = vst [vmem:[%s843_s21 + $0x160] sm:$0xff] %v346_v44  ;;  %v352_v47 = vld [vmem:[%s838_s20 + $0x278] sm:$0xff]  ;;  %349 = vst [vmem:[%s843_s21 + $0x168] sm:$0xff] %v348_v45  ;;  %v354_v48 = vld [vmem:[%s838_s20 + $0x280] sm:$0xff] }
  0x27   : > { %351 = vst [vmem:[%s843_s21 + $0x170] sm:$0xff] %v350_v46  ;;  %353 = vst [vmem:[%s843_s21 + $0x178] sm:$0xff] %v352_v47  ;;  %v356_v49 = vld [vmem:[%s838_s20 + $0x288] sm:$0xff]  ;;  %v358_v50 = vld [vmem:[%s838_s20 + $0x290] sm:$0xff] }
  0x28   : > { %355 = vst [vmem:[%s843_s21 + $0x180] sm:$0xff] %v354_v48  ;;  %357 = vst [vmem:[%s843_s21 + $0x188] sm:$0xff] %v356_v49  ;;  %v360_v51 = vld [vmem:[%s838_s20 + $0x298] sm:$0xff]  ;;  %v362_v52 = vld [vmem:[%s838_s20 + $0x2a0] sm:$0xff] }
  0x29   : > { %359 = vst [vmem:[%s843_s21 + $0x190] sm:$0xff] %v358_v50  ;;  %v364_v53 = vld [vmem:[%s838_s20 + $0x2a8] sm:$0xff]  ;;  %361 = vst [vmem:[%s843_s21 + $0x198] sm:$0xff] %v360_v51  ;;  %v366_v54 = vld [vmem:[%s838_s20 + $0x2b0] sm:$0xff] }
  0x2a   : > { %363 = vst [vmem:[%s843_s21 + $0x1a0] sm:$0xff] %v362_v52  ;;  %365 = vst [vmem:[%s843_s21 + $0x1a8] sm:$0xff] %v364_v53  ;;  %v368_v55 = vld [vmem:[%s838_s20 + $0x2b8] sm:$0xff]  ;;  %v370_v56 = vld [vmem:[%s838_s20 + $0x2c0] sm:$0xff] }
  0x2b   : > { %367 = vst [vmem:[%s843_s21 + $0x1b0] sm:$0xff] %v366_v54  ;;  %369 = vst [vmem:[%s843_s21 + $0x1b8] sm:$0xff] %v368_v55  ;;  %v372_v57 = vld [vmem:[%s838_s20 + $0x2c8] sm:$0xff]  ;;  %v374_v58 = vld [vmem:[%s838_s20 + $0x2d0] sm:$0xff] }
  0x2c   : > { %371 = vst [vmem:[%s843_s21 + $0x1c0] sm:$0xff] %v370_v56  ;;  %v376_v59 = vld [vmem:[%s838_s20 + $0x2d8] sm:$0xff]  ;;  %373 = vst [vmem:[%s843_s21 + $0x1c8] sm:$0xff] %v372_v57  ;;  %v378_v60 = vld [vmem:[%s838_s20 + $0x2e0] sm:$0xff] }
  0x2d   : > { %375 = vst [vmem:[%s843_s21 + $0x1d0] sm:$0xff] %v374_v58  ;;  %377 = vst [vmem:[%s843_s21 + $0x1d8] sm:$0xff] %v376_v59  ;;  %v380_v61 = vld [vmem:[%s838_s20 + $0x2e8] sm:$0xff]  ;;  %v382_v62 = vld [vmem:[%s838_s20 + $0x2f0] sm:$0xff] }
  0x2e   : > { %379 = vst [vmem:[%s843_s21 + $0x1e0] sm:$0xff] %v378_v60  ;;  %381 = vst [vmem:[%s843_s21 + $0x1e8] sm:$0xff] %v380_v61  ;;  %v384_v63 = vld [vmem:[%s838_s20 + $0x2f8] sm:$0xff] }
  0x2f   : > { %383 = vst [vmem:[%s843_s21 + $0x1f0] sm:$0xff] %v382_v62  ;;  %385 = vst [vmem:[%s843_s21 + $0x1f8] sm:$0xff] %v384_v63 }
  0x30 PF: > { %p698_p6 = scmp.ge.s32.totalorder %s782_s10, 1  ;;  %p390_p7 = scmp.lt.s32.totalorder %s782_s10, 3 }
  0x32   : > { %p391_p8 = pnand %p698_p6, %p390_p7 }
  0x33   : > { %s397_s22 = sand.u32 (!%p391_p8), 1, %s766_s6   ;;  %p415_p9 = scmp.lt.s32.totalorder (!%p391_p8), %s774_s8, 1 }
  0x34   : > { %394 = sbr.rel (%p391_p8) target bundleno = 202 (0xca), region = 58  ;;  %s699_s23 = sshll.u32 (!%p391_p8), %s397_s22, 9 }
  0x35   : > { %s975_s24 = scalar_lea.vmem (!%p391_p8), [#allocation2], %s699_s23 }
  0x39   : > { %vm488_vm0 = vcmask 130048   ;;  %s1235_s8 = smov (!%p415_p9, %s774_s8), 1  ;;  %vm422_vm1 = vcmask 122880   ;;  %v424_v0 = vld [vmem:[%s975_s24] sm:$0xff]  ;;  %v425_v1 = vld [vmem:[%s975_s24 + $0x8] sm:$0xff]  ;;  %v426_v2 = vld [vmem:[%s975_s24 + $0x10] sm:$0xff] }
  0x3a   : > { %v427_v3 = vld [vmem:[%s975_s24 + $0x18] sm:$0xff]  ;;  %v489_v4 = vsel %vm488_vm0, %v424_v0, 0.0  ;;  %v490_v5 = vsel %vm488_vm0, %v425_v1, 0.0  ;;  %v492_v6 = vsel %vm488_vm0, %v426_v2, 0.0  ;;  %s987_s27 = scalar_lea.vmem %s1227_s1, %s1235_s8  ;;  %v428_v7 = vld [vmem:[%s975_s24 + $0x20] sm:$0xff]  ;;  %v784_v9 = vmov 0.0  }
  0x3b   : > { %v491_v8 = vadd.f32 %v490_v5, %v489_v4  ;;  %423 = vst.msk [vmem:[%s987_s27] sm:$0x1] %vm422_vm1, %v784_v9  ;;  %v494_v10 = vsel %vm488_vm0, %v427_v3, 0.0  ;;  %v429_v11 = vld [vmem:[%s975_s24 + $0x28] sm:$0xff]  ;;  %v496_v13 = vsel %vm488_vm0, %v428_v7, 0.0  ;;  %v430_v14 = vld [vmem:[%s975_s24 + $0x30] sm:$0xff] }
  0x3c   : > { %v431_v16 = vld [vmem:[%s975_s24 + $0x38] sm:$0xff]  ;;  %v432_v17 = vld [vmem:[%s975_s24 + $0x40] sm:$0xff]  ;;  %v498_v18 = vsel %vm488_vm0, %v429_v11, 0.0  ;;  %v433_v19 = vld [vmem:[%s975_s24 + $0x48] sm:$0xff]  ;;  %v500_v23 = vsel %vm488_vm0, %v430_v14, 0.0 }
  0x3d   : > { %v493_v12 = vadd.f32 %v492_v6, %v491_v8  ;;  %v434_v20 = vld [vmem:[%s975_s24 + $0x50] sm:$0xff]  ;;  %v435_v21 = vld [vmem:[%s975_s24 + $0x58] sm:$0xff]  ;;  %v502_v25 = vsel %vm488_vm0, %v431_v16, 0.0  ;;  %v504_v26 = vsel %vm488_vm0, %v432_v17, 0.0  ;;  %v457_v27 = vld [vmem:[%s975_s24 + $0x108] sm:$0xff]  ;;  %v506_v30 = vsel %vm488_vm0, %v433_v19, 0.0 }
  0x3e   : > { %v458_v28 = vld [vmem:[%s975_s24 + $0x110] sm:$0xff]  ;;  %v459_v29 = vld [vmem:[%s975_s24 + $0x118] sm:$0xff]  ;;  %v508_v31 = vsel %vm488_vm0, %v434_v20, 0.0  ;;  %v1011_v32 = vsel %vm488_vm0, %v435_v21, 0.0  ;;  %v460_v33 = vld [vmem:[%s975_s24 + $0x120] sm:$0xff]  ;;  %v1017_v37 = vsel %vm488_vm0, %v457_v27, 0.0 }
  0x3f   : > { %v495_v15 = vadd.f32 %v494_v10, %v493_v12  ;;  %v461_v34 = vld [vmem:[%s975_s24 + $0x128] sm:$0xff]  ;;  %v462_v35 = vld [vmem:[%s975_s24 + $0x130] sm:$0xff]  ;;  %v1020_v38 = vsel %vm488_vm0, %v458_v28, 0.0  ;;  %v1023_v39 = vsel %vm488_vm0, %v459_v29, 0.0  ;;  %v463_v40 = vld [vmem:[%s975_s24 + $0x138] sm:$0xff]  ;;  %v1029_v43 = vsel %vm488_vm0, %v460_v33, 0.0 }
  0x40   : > { %v464_v41 = vld [vmem:[%s975_s24 + $0x140] sm:$0xff]  ;;  %v465_v42 = vld [vmem:[%s975_s24 + $0x148] sm:$0xff]  ;;  %v1032_v44 = vsel %vm488_vm0, %v461_v34, 0.0  ;;  %v1035_v45 = vsel %vm488_vm0, %v462_v35, 0.0  ;;  %v466_v46 = vld [vmem:[%s975_s24 + $0x150] sm:$0xff]  ;;  %v1041_v50 = vsel %vm488_vm0, %v463_v40, 0.0 }
  0x41   : > { %v497_v22 = vadd.f32 %v496_v13, %v495_v15  ;;  %v467_v47 = vld [vmem:[%s975_s24 + $0x158] sm:$0xff]  ;;  %v468_v48 = vld [vmem:[%s975_s24 + $0x160] sm:$0xff]  ;;  %v1044_v51 = vsel %vm488_vm0, %v464_v41, 0.0  ;;  %v1047_v52 = vsel %vm488_vm0, %v465_v42, 0.0  ;;  %v469_v53 = vld [vmem:[%s975_s24 + $0x168] sm:$0xff]  ;;  %v1053_v56 = vsel %vm488_vm0, %v466_v46, 0.0 }
  0x42   : > { %v470_v54 = vld [vmem:[%s975_s24 + $0x170] sm:$0xff]  ;;  %v471_v55 = vld [vmem:[%s975_s24 + $0x178] sm:$0xff]  ;;  %v1056_v57 = vsel %vm488_vm0, %v467_v47, 0.0  ;;  %v1059_v58 = vsel %vm488_vm0, %v468_v48, 0.0  ;;  %v436_v59 = vld [vmem:[%s975_s24 + $0x60] sm:$0xff]  ;;  %v1066_v0 = vsel %vm488_vm0, %v469_v53, 0.0 }
  0x43   : > { %v499_v24 = vadd.f32 %v498_v18, %v497_v22  ;;  %v472_v60 = vld [vmem:[%s975_s24 + $0x180] sm:$0xff]  ;;  %v473_v61 = vld [vmem:[%s975_s24 + $0x188] sm:$0xff]  ;;  %v474_v62 = vld [vmem:[%s975_s24 + $0x190] sm:$0xff]  ;;  %v1069_v1 = vsel %vm488_vm0, %v470_v54, 0.0  ;;  %v1072_v2 = vsel %vm488_vm0, %v471_v55, 0.0  ;;  %v512_v33 = vsel %vm488_vm0, %v436_v59, 0.0 }
  0x44   : > { %v475_v3 = vld [vmem:[%s975_s24 + $0x198] sm:$0xff]  ;;  %v476_v4 = vld [vmem:[%s975_s24 + $0x1a0] sm:$0xff]  ;;  %v477_v5 = vld [vmem:[%s975_s24 + $0x1a8] sm:$0xff]  ;;  %v1078_v6 = vsel %vm488_vm0, %v472_v60, 0.0  ;;  %v1081_v7 = vsel %vm488_vm0, %v473_v61, 0.0  ;;  %v1084_v8 = vsel %vm488_vm0, %v474_v62, 0.0 }
  0x45   : > { %v501_v36 = vadd.f32 %v500_v23, %v499_v24  ;;  %v437_v9 = vld [vmem:[%s975_s24 + $0x68] sm:$0xff]  ;;  %v478_v10 = vld [vmem:[%s975_s24 + $0x1b0] sm:$0xff]  ;;  %v479_v11 = vld [vmem:[%s975_s24 + $0x1b8] sm:$0xff]  ;;  %v1091_v14 = vsel %vm488_vm0, %v475_v3, 0.0  ;;  %v1094_v15 = vsel %vm488_vm0, %v476_v4, 0.0  ;;  %v1097_v16 = vsel %vm488_vm0, %v477_v5, 0.0 }
  0x46   : > { %v480_v12 = vld [vmem:[%s975_s24 + $0x1c0] sm:$0xff]  ;;  %v481_v17 = vld [vmem:[%s975_s24 + $0x1c8] sm:$0xff]  ;;  %v482_v18 = vld [vmem:[%s975_s24 + $0x1d0] sm:$0xff]  ;;  %v1103_v20 = vsel %vm488_vm0, %v478_v10, 0.0  ;;  %v1106_v21 = vsel %vm488_vm0, %v479_v11, 0.0  ;;  %v514_v42 = vsel %vm488_vm0, %v437_v9, 0.0 }
  0x47   : > { %v503_v49 = vadd.f32 %v502_v25, %v501_v36  ;;  %v483_v19 = vld [vmem:[%s975_s24 + $0x1d8] sm:$0xff]  ;;  %v1109_v22 = vsel %vm488_vm0, %v480_v12, 0.0  ;;  %v484_v23 = vld [vmem:[%s975_s24 + $0x1e0] sm:$0xff]  ;;  %v485_v24 = vld [vmem:[%s975_s24 + $0x1e8] sm:$0xff]  ;;  %v1115_v27 = vsel %vm488_vm0, %v481_v17, 0.0  ;;  %v1118_v28 = vsel %vm488_vm0, %v482_v18, 0.0 }
  0x48   : > { %v486_v25 = vld [vmem:[%s975_s24 + $0x1f0] sm:$0xff]  ;;  %v1121_v29 = vsel %vm488_vm0, %v483_v19, 0.0  ;;  %v1126_v34 = vsel %vm488_vm0, %v484_v23, 0.0  ;;  %v439_v46 = vld [vmem:[%s975_s24 + $0x78] sm:$0xff]  ;;  %v441_v55 = vld [vmem:[%s975_s24 + $0x88] sm:$0xff] }
  0x49   : > { %v505_v63 = vadd.f32 %v504_v26, %v503_v49  ;;  %v1132_v35 = vsel %vm488_vm0, %v486_v25, 0.0  ;;  %v438_v36 = vld [vmem:[%s975_s24 + $0x70] sm:$0xff]  ;;  %v440_v49 = vld [vmem:[%s975_s24 + $0x80] sm:$0xff]  ;;  %v518_v54 = vsel %vm488_vm0, %v439_v46, 0.0  ;;  %v522_v62 = vsel %vm488_vm0, %v441_v55, 0.0  ;;  %v445_v11 = vld [vmem:[%s975_s24 + $0xa8] sm:$0xff] }
  0x4a   : > { %v516_v48 = vsel %vm488_vm0, %v438_v36, 0.0  ;;  %v442_v60 = vld [vmem:[%s975_s24 + $0x90] sm:$0xff]  ;;  %v444_v5 = vld [vmem:[%s975_s24 + $0xa0] sm:$0xff]  ;;  %v530_v19 = vsel %vm488_vm0, %v445_v11, 0.0  ;;  %v447_v23 = vld [vmem:[%s975_s24 + $0xb8] sm:$0xff] }
  0x4b   : > { %v507_v13 = vadd.f32 %v506_v30, %v505_v63  ;;  %v487_v30 = vld [vmem:[%s975_s24 + $0x1f8] sm:$0xff]  ;;  %v524_v4 = vsel %vm488_vm0, %v442_v60, 0.0  ;;  %v446_v17 = vld [vmem:[%s975_s24 + $0xb0] sm:$0xff]  ;;  %v449_v36 = vld [vmem:[%s975_s24 + $0xc8] sm:$0xff] }
  0x4c   : > { %v1137_v41 = vsel %vm488_vm0, %v487_v30, 0.0  ;;  %v443_v63 = vld [vmem:[%s975_s24 + $0x98] sm:$0xff]  ;;  %v532_v25 = vsel %vm488_vm0, %v446_v17, 0.0  ;;  %v450_v46 = vld [vmem:[%s975_s24 + $0xd0] sm:$0xff]  ;;  %v452_v55 = vld [vmem:[%s975_s24 + $0xe0] sm:$0xff] }
  0x4d   : > { %v509_v26 = vadd.f32 %v508_v31, %v507_v13  ;;  %v1129_v31 = vsel %vm488_vm0, %v485_v24, 0.0  ;;  %v526_v10 = vsel %vm488_vm0, %v443_v63, 0.0  ;;  %v528_v13 = vsel %vm488_vm0, %v444_v5, 0.0  ;;  %v453_v60 = vld [vmem:[%s975_s24 + $0xe8] sm:$0xff]  ;;  %v454_v63 = vld [vmem:[%s975_s24 + $0xf0] sm:$0xff]  ;;  %v455_v5 = vld [vmem:[%s975_s24 + $0xf8] sm:$0xff] }
  0x4e   : > { %v456_v11 = vld [vmem:[%s975_s24 + $0x100] sm:$0xff] }
  0x4f   : > { %v511_v40 = vadd.f32 %v1011_v32, %v509_v26  ;;  %v520_v32 = vsel %vm488_vm0, %v440_v49, 0.0  ;;  %v448_v26 = vld [vmem:[%s975_s24 + $0xc0] sm:$0xff]  ;;  %v451_v49 = vld [vmem:[%s975_s24 + $0xd8] sm:$0xff] }
  0x51   : > { %v513_v47 = vadd.f32 %v512_v33, %v511_v40  ;;  %v534_v33 = vsel %vm488_vm0, %v447_v23, 0.0 }
  0x53   : > { %v515_v53 = vadd.f32 %v514_v42, %v513_v47  ;;  %v536_v42 = vsel %vm488_vm0, %v448_v26, 0.0 }
  0x55   : > { %v517_v59 = vadd.f32 %v516_v48, %v515_v53  ;;  %v538_v48 = vsel %vm488_vm0, %v449_v36, 0.0 }
  0x57   : > { %v519_v61 = vadd.f32 %v518_v54, %v517_v59  ;;  %v540_v54 = vsel %vm488_vm0, %v450_v46, 0.0 }
  0x59   : > { %v521_v3 = vadd.f32 %v520_v32, %v519_v61  ;;  %v542_v32 = vsel %vm488_vm0, %v451_v49, 0.0 }
  0x5b   : > { %v523_v9 = vadd.f32 %v522_v62, %v521_v3  ;;  %v544_v62 = vsel %vm488_vm0, %v452_v55, 0.0 }
  0x5d   : > { %v525_v12 = vadd.f32 %v524_v4, %v523_v9  ;;  %v546_v4 = vsel %vm488_vm0, %v453_v60, 0.0 }
  0x5f   : > { %v527_v18 = vadd.f32 %v526_v10, %v525_v12  ;;  %v548_v10 = vsel %vm488_vm0, %v454_v63, 0.0 }
  0x61   : > { %v529_v24 = vadd.f32 %v528_v13, %v527_v18  ;;  %v550_v13 = vsel %vm488_vm0, %v455_v5, 0.0  ;;  %v552_v18 = vsel %vm488_vm0, %v456_v11, 0.0 }
  0x63   : > { %v531_v30 = vadd.f32 %v530_v19, %v529_v24 }
  0x65   : > { %v533_v40 = vadd.f32 %v532_v25, %v531_v30 }
  0x67   : > { %v535_v47 = vadd.f32 %v534_v33, %v533_v40 }
  0x69   : > { %v537_v53 = vadd.f32 %v536_v42, %v535_v47 }
  0x6b   : > { %v539_v59 = vadd.f32 %v538_v48, %v537_v53 }
  0x6d   : > { %v541_v61 = vadd.f32 %v540_v54, %v539_v59 }
  0x6f   : > { %v543_v3 = vadd.f32 %v542_v32, %v541_v61 }
  0x71   : > { %v545_v9 = vadd.f32 %v544_v62, %v543_v3 }
  0x73   : > { %v547_v12 = vadd.f32 %v546_v4, %v545_v9 }
  0x75   : > { %v549_v17 = vadd.f32 %v548_v10, %v547_v12 }
  0x77   : > { %v551_v19 = vadd.f32 %v550_v13, %v549_v17 }
  0x79   : > { %v553_v23 = vadd.f32 %v552_v18, %v551_v19 }
  0x7b   : > { %v555_v24 = vadd.f32 %v1017_v37, %v553_v23 }
  0x7d   : > { %v557_v25 = vadd.f32 %v1020_v38, %v555_v24 }
  0x7f   : > { %v559_v26 = vadd.f32 %v1023_v39, %v557_v25 }
  0x81   : > { %v561_v30 = vadd.f32 %v1029_v43, %v559_v26 }
  0x83   : > { %v563_v33 = vadd.f32 %v1032_v44, %v561_v30 }
  0x85   : > { %v565_v36 = vadd.f32 %v1035_v45, %v563_v33 }
  0x87   : > { %v567_v40 = vadd.f32 %v1041_v50, %v565_v36 }
  0x89   : > { %v569_v42 = vadd.f32 %v1044_v51, %v567_v40 }
  0x8b   : > { %v571_v46 = vadd.f32 %v1047_v52, %v569_v42 }
  0x8d   : > { %v573_v47 = vadd.f32 %v1053_v56, %v571_v46 }
  0x8f   : > { %v575_v37 = vadd.f32 %v1056_v57, %v573_v47 }
  0x91   : > { %v577_v38 = vadd.f32 %v1059_v58, %v575_v37 }
  0x93   : > { %v579_v39 = vadd.f32 %v1066_v0, %v577_v38 }
  0x95   : > { %v581_v43 = vadd.f32 %v1069_v1, %v579_v39 }
  0x97   : > { %v583_v44 = vadd.f32 %v1072_v2, %v581_v43 }
  0x99   : > { %v585_v45 = vadd.f32 %v1078_v6, %v583_v44 }
  0x9b   : > { %v587_v50 = vadd.f32 %v1081_v7, %v585_v45 }
  0x9d   : > { %v589_v51 = vadd.f32 %v1084_v8, %v587_v50 }
  0x9f   : > { %v591_v52 = vadd.f32 %v1091_v14, %v589_v51 }
  0xa1   : > { %v593_v56 = vadd.f32 %v1094_v15, %v591_v52 }
  0xa3   : > { %v595_v57 = vadd.f32 %v1097_v16, %v593_v56 }
  0xa5   : > { %v597_v58 = vadd.f32 %v1103_v20, %v595_v57 }
  0xa7   : > { %v599_v0 = vadd.f32 %v1106_v21, %v597_v58 }
  0xa9   : > { %v601_v1 = vadd.f32 %v1109_v22, %v599_v0 }
  0xab   : > { %v603_v2 = vadd.f32 %v1115_v27, %v601_v1  ;;  %v623_v27 = vld [vmem:[%s987_s27] sm:$0x1] }
  0xad   : > { %v605_v6 = vadd.f32 %v1118_v28, %v603_v2 }
  0xaf   : > { %v607_v7 = vadd.f32 %v1121_v29, %v605_v6 }
  0xb1   : > { %v609_v8 = vadd.f32 %v1126_v34, %v607_v7 }
  0xb3   : > { %v611_v14 = vadd.f32 %v1129_v31, %v609_v8 }
  0xb5   : > { %v613_v15 = vadd.f32 %v1132_v35, %v611_v14 }
  0xb7   : > { %v615_v16 = vadd.f32 %v1137_v41, %v613_v15 }
  0xb9   : > { %v616_v20 = vrot.slane %v615_v16, 4 }
  0xbb   : > { %v617_v48 = vadd.f32 %v616_v20, %v615_v16 }
  0xbd   : > { %v618_v21 = vrot.slane %v617_v48, 2 }
  0xbf   : > { %v619_v49 = vadd.f32 %v618_v21, %v617_v48 }
  0xc1   : > { %v620_v22 = vrot.slane %v619_v49, 1 }
  0xc3   : > { %v621_v53 = vadd.f32 %v620_v22, %v619_v49 }
  0xc5   : > { %v622_v54 = vmul.f32 0.00390625, %v621_v53 }
  0xc7   : > { %v624_v55 = vadd.f32 %v623_v27, %v622_v54 }
  0xc9   : > { %626 = vst.msk [vmem:[%s987_s27] sm:$0x1] %vm422_vm1, %v624_v55 }
  0xca PF: > { %s11_s10 = sadd.s32 1, %s782_s10   ;;  %s1228_s6 = smov %s770_s7 }
  0xcb   : > { %p8_p10 = scmp.ge.s32.totalorder %s11_s10, 4   ;;  %s1229_s7 = smov %s830_s14 }
  0xcc   : > { %s1230_s8 = smov %s778_s9  ;;  %s1231_s9 = smov %s1233_s11 }
  0xcd   :  { %10 = sbr.rel (!%p8_p10) target bundleno = 3 (0x3), region = 101 }

// kernel: bottleneck_forward.10
= control target key start
LH: loop header
LB: loop body
LE: loop exit
PB: predicated region body
PF: predicated region fallthrough
CT: control target
= control target key end

     0   :  { %v326_v0 = vmov 0.0   ;;  %vm327_vm0 = vmmov 0   ;;  %vm30_vm1 = vcmask 130048   ;;  %vm112_vm2 = vcmask 64512   ;;  %s391_s1 = inlined_call_operand.vmem [shape: f32[16,8], index: 1, kind: input, shape index: {}]   ;;  %s392_s0 = inlined_call_operand.vmem [shape: f32[2,16], index: 0, kind: input, shape index: {}]   ;;  %s393_s3 = inlined_call_operand.vmem [shape: f32[2,8,16], index: 3, kind: input, shape index: {}]   ;;  %s394_s2 = inlined_call_operand.vmem [shape: f32[1,8], index: 2, kind: input, shape index: {}]   ;;  %s395_s4 = inlined_call_operand.vmem [shape: f32[2,1,16], index: 4, kind: input, shape index: {}]   ;;  %s396_s5 = inlined_call_operand.vmem [shape: f32[2,2,16], index: 5, kind: output, shape index: {}]  }
   0x1   :  { %301 = vmatprep.subr.mxu0 %v326_v0  ;;  %v22_v1 = vld [vmem:[%s391_s1 + $0x8] sm:$0xff]  ;;  %v21_v2 = vld [vmem:[%s391_s1] sm:$0xff]  ;;  %305 = vmatprep.mubr.msk.f32.mxu0 %vm327_vm0, %v326_v0  ;;  %vm276_vm3 = vcmask 123904  }
   0x2   :  { %302 = vmatpush3.msra.mxu0 %v22_v1  ;;  %v20_v3 = vld [vmem:[%s392_s0] sm:$0x3]  ;;  %308 = vmatprep.subr.mxu1 %v326_v0  ;;  %v289_v8 = vld [vmem:[%s393_s3 + $0x8] sm:$0xff] }
   0x3   :  { %303 = vmatprep.subr.mxu0 %v326_v0  ;;  %310 = vmatprep.mubr.msk.f32.mxu1 %vm327_vm0, %v326_v0  ;;  %v104_v4 = vld [vmem:[%s393_s3] sm:$0xff] }
   0x4   :  { %304 = vmatpush3.msra.mxu0 %v21_v2  ;;  %309 = vmatpush3.msra.mxu1 %v104_v4  ;;  %v285_v5 = vld [vmem:[%s394_s2] ss:$0 sm:$0xff]  ;;  %v291_v13 = vld [vmem:[%s395_s4 + $0x1] ss:$0 sm:$0xff] }
   0x5   :  { %306 = vmatmul.mubr.msk.f32.vlgmr.msra.gmra.mxu0 %vm30_vm1, %v20_v3  ;;  %313 = vmatprep.subr.mxu1 %v326_v0  ;;  %v287_v11 = vld [vmem:[%s395_s4] ss:$0 sm:$0xff] }
  0xc5   :  { %v100_v6 = vpop.f32.mrf.mxu0 }
  0xc6   :  { %v101_v7 = vadd.f32 %v285_v5, %v100_v6 }
  0xc7   :  { %v307_v9 = vpop.f32.mrf.mxu0 }
  0xc8   :  { %311 = vmatmul.mubr.msk.f32.vlgmr.msra.gmra.mxu1 %vm112_vm2, %v101_v7 }
  0xc9   :  { %314 = vmatpush3.msra.mxu1 %v289_v8  ;;  %315 = vmatprep.mubr.msk.f32.mxu1 %vm327_vm0, %v326_v0 }
  0xcc   :  { %316 = vmatmul.mubr.msk.f32.vlgmr.msra.gmra.mxu1 %vm112_vm2, %v101_v7 }
 0x188   :  { %v182_v10 = vpop.f32.mrf.mxu1 }
 0x189   :  { %v183_v15 = vadd.f32 %v287_v11, %v182_v10 }
 0x18a   :  { %v312_v12 = vpop.f32.mrf.mxu1 }
 0x18c   :  { %v262_v14 = vpop.f32.mrf.mxu1 }
 0x18d   :  { %v263_v16 = vadd.f32 %v291_v13, %v262_v14 }
 0x18e   :  { %v317_v17 = vpop.f32.mrf.mxu1 }
 0x18f   :  { %v266_v18 = vmax.f32 %v183_v15, %v263_v16 }
 0x191   :  { %v267_v19 = vsub.f32 %v183_v15, %v266_v18  ;;  %v270_v20 = vsub.f32 %v263_v16, %v266_v18 }
 0x193   :  { %v268_v21 = vmul.f32 1.442695, %v267_v19  ;;  %v271_v22 = vmul.f32 1.442695, %v270_v20 }
 0x195   :  { %320 = vpow2.f32 %v268_v21 }
 0x196   :  { %322 = vpow2.f32 %v271_v22 }
 0x1a2   :  { %v321_v23 = vpop.eup %320 }
 0x1a3   :  { %v323_v24 = vpop.eup %322 }
 0x1a4   :  { %v273_v25 = vadd.f32 %v323_v24, %v321_v23 }
 0x1a6   :  { %324 = vrcp.f32 %v273_v25 }
 0x1b3   :  { %v325_v26 = vpop.eup %324 }
 0x1b4   :  { %v275_v27 = vmul.f32 %v325_v26, %v321_v23  ;;  %v278_v28 = vmul.f32 %v325_v26, %v323_v24 }
 0x1b6   :  { %277 = vst.msk [vmem:[%s396_s5] sm:$0x3] %vm276_vm3, %v275_v27  ;;  %293 = vst.msk [vmem:[%s396_s5 + $0x2] sm:$0x3] %vm276_vm3, %v278_v28 }

// kernel: bottleneck_forward.11
= control target key start
LH: loop header
LB: loop body
LE: loop exit
PB: predicated region body
PF: predicated region fallthrough
CT: control target
= control target key end

     0   :  { %13 = vsyncpa [#allocation4], 0  ;;  %s3034_s0 = inlined_call_operand.vmem [shape: f32[2,2,256,16], index: 0, kind: input, shape index: {}]   ;;  %s3035_s1 = inlined_call_operand.vmem [shape: f32[2,2,16], index: 1, kind: input, shape index: {}]   ;;  %s3036_s2 = inlined_call_operand.vmem [shape: f32[2,256,32], index: 2, kind: input, shape index: {}]   ;;  %s3037_s3 = inlined_call_operand.vmem [shape: f32[1,16], index: 3, kind: input, shape index: {}]   ;;  %s3038_s4 = inlined_call_operand.vmem [shape: f32[1,16], index: 4, kind: input, shape index: {}]   ;;  %s3039_s5 = inlined_call_operand.vmem [shape: f32[16,64], index: 5, kind: input, shape index: {}]   ;;  %s3040_s6 = inlined_call_operand.vmem [shape: f32[32,64], index: 6, kind: input, shape index: {}]   ;;  %s3041_s7 = inlined_call_operand.vmem [shape: f32[1,64], index: 7, kind: input, shape index: {}]   ;;  %s3042_s8 = inlined_call_operand.hbm [shape: f32[2,256,64], index: 8, kind: output, shape index: {}]  }
   0x1   :  { %15 = vsyncpa [#allocation4 + $0x1], 0  ;;  %s2340_s27 = smov 0   ;;  %s2342_s28 = smov 0  }
   0x2   :  { %s2344_s29 = smov 0   ;;  %s2346_s30 = smov 0  }
   0x3   :  { %s2348_s9 = smov 0   ;;  %s2350_s10 = smov 0  }
   0x4 LB: > { %s1859_s11 = sadd.s32 4294967295, %s2290_s10   ;;  %s1860_s12 = sadd.s32 4294967294, %s2290_s10   ;;  %s2290_s10 = sphi %s2350_s10, %s21_s10   ;;  %s2286_s9 = sphi %s2348_s9, %s3049_s9   ;;  %s2282_s30 = sphi %s2346_s30, %s3048_s30   ;;  %s2278_s29 = sphi %s2344_s29, %s3047_s29   ;;  %s2274_s28 = sphi %s2342_s28, %s3046_s28   ;;  %s2270_s27 = sphi %s2340_s27, %s3045_s27  }
   0x5   : > { %s33_s13 = sadd.s32 1, %s2286_s9  ;;  %s42_s14 = sadd.s32 1, %s2278_s29 }
   0x6   : > { %p35_p0 = scmp.ge.s32.totalorder %s33_s13, 2  ;;  %p49_p1 = scmp.ne.s32.totalorder %s2278_s29, %s2274_s28 }
   0x7   : > { %p50_p2 = scmp.eq.s32.totalorder %s2290_s10, 0  ;;  %p240_p3 = scmp.eq.s32.totalorder %s1859_s11, 1 }
   0x8   : > { %s3051_s13 = smov (%p35_p0, %s33_s13), 0  ;;  %p245_p6 = scmp.ne.s32.totalorder %s2274_s28, %s2270_s27 }
   0x9   : > { %p51_p4 = por %p50_p2, %p49_p1  ;;  %p2379_p5 = por %p240_p3, %p49_p1 }
   0xa   : > { %s37_s16 = ssub.s32 %s2286_s9, %s3051_s13  ;;  %p246_p8 = scmp.eq.s32.totalorder %s1860_s12, 1 }
   0xb   : > { %p40_p7 = scmp.eq.s32.totalorder %s37_s16, 0  ;;  %p1862_p10 = scmp.ge.s32.totalorder %s2290_s10, 2 }
   0xc   : > { %p2390_p9 = por %p246_p8, %p245_p6 }
   0xd   : > { %s2388_s17 = scalar_select %p40_p7, %s2278_s29, %s42_s14  }
   0xe   : > { %277 = sbr.rel (%p1862_p10) target bundleno = 55 (0x37), region = 36 }
  0x13   : > { %280 = sbr.rel (!%p51_p4) target bundleno = 55 (0x37), region = 40  ;;  %s282_s19 = sand.u32 (%p51_p4), 1, %s2278_s29  }
  0x14   : > { %s1976_s20 = sshll.u32 (%p51_p4), %s2286_s9, 8  ;;  %s1863_s21 = sshll.u32 (%p51_p4), %s282_s19, 9 }
  0x15   : > { %s2402_s24 = scalar_lea.vmem (%p51_p4), %s3034_s0, %s1976_s20  ;;  %s2407_s25 = scalar_lea.vmem (%p51_p4), [#allocation2], %s1863_s21 }
  0x16   : > { %v444_v0 = vld [vmem:[%s2402_s24] sm:$0xff] (%p51_p4)  ;;  %v446_v1 = vld [vmem:[%s2402_s24 + $0x8] sm:$0xff] (%p51_p4)  ;;  %v448_v2 = vld [vmem:[%s2402_s24 + $0x10] sm:$0xff] (%p51_p4) }
  0x17   : > { %445 = vst [vmem:[%s2407_s25] sm:$0xff] (%p51_p4), %v444_v0  ;;  %447 = vst [vmem:[%s2407_s25 + $0x8] sm:$0xff] (%p51_p4), %v446_v1  ;;  %v450_v3 = vld [vmem:[%s2402_s24 + $0x18] sm:$0xff] (%p51_p4)  ;;  %v452_v4 = vld [vmem:[%s2402_s24 + $0x20] sm:$0xff] (%p51_p4) }
  0x18   : > { %449 = vst [vmem:[%s2407_s25 + $0x10] sm:$0xff] %v448_v2  ;;  %v454_v5 = vld [vmem:[%s2402_s24 + $0x28] sm:$0xff]  ;;  %451 = vst [vmem:[%s2407_s25 + $0x18] sm:$0xff] %v450_v3  ;;  %v456_v6 = vld [vmem:[%s2402_s24 + $0x30] sm:$0xff] }
  0x19   : > { %453 = vst [vmem:[%s2407_s25 + $0x20] sm:$0xff] %v452_v4  ;;  %455 = vst [vmem:[%s2407_s25 + $0x28] sm:$0xff] %v454_v5  ;;  %v458_v7 = vld [vmem:[%s2402_s24 + $0x38] sm:$0xff]  ;;  %v460_v8 = vld [vmem:[%s2402_s24 + $0x40] sm:$0xff] }
  0x1a   : > { %457 = vst [vmem:[%s2407_s25 + $0x30] sm:$0xff] %v456_v6  ;;  %459 = vst [vmem:[%s2407_s25 + $0x38] sm:$0xff] %v458_v7  ;;  %v462_v9 = vld [vmem:[%s2402_s24 + $0x48] sm:$0xff]  ;;  %v464_v10 = vld [vmem:[%s2402_s24 + $0x50] sm:$0xff] }
  0x1b   : > { %461 = vst [vmem:[%s2407_s25 + $0x40] sm:$0xff] %v460_v8  ;;  %v466_v11 = vld [vmem:[%s2402_s24 + $0x58] sm:$0xff]  ;;  %463 = vst [vmem:[%s2407_s25 + $0x48] sm:$0xff] %v462_v9  ;;  %v468_v12 = vld [vmem:[%s2402_s24 + $0x60] sm:$0xff] }
  0x1c   : > { %465 = vst [vmem:[%s2407_s25 + $0x50] sm:$0xff] %v464_v10  ;;  %467 = vst [vmem:[%s2407_s25 + $0x58] sm:$0xff] %v466_v11  ;;  %v470_v13 = vld [vmem:[%s2402_s24 + $0x68] sm:$0xff]  ;;  %v472_v14 = vld [vmem:[%s2402_s24 + $0x70] sm:$0xff] }
  0x1d   : > { %469 = vst [vmem:[%s2407_s25 + $0x60] sm:$0xff] %v468_v12  ;;  %471 = vst [vmem:[%s2407_s25 + $0x68] sm:$0xff] %v470_v13  ;;  %v474_v15 = vld [vmem:[%s2402_s24 + $0x78] sm:$0xff]  ;;  %v476_v16 = vld [vmem:[%s2402_s24 + $0x80] sm:$0xff] }
  0x1e   : > { %473 = vst [vmem:[%s2407_s25 + $0x70] sm:$0xff] %v472_v14  ;;  %v478_v17 = vld [vmem:[%s2402_s24 + $0x88] sm:$0xff]  ;;  %475 = vst [vmem:[%s2407_s25 + $0x78] sm:$0xff] %v474_v15  ;;  %v480_v18 = vld [vmem:[%s2402_s24 + $0x90] sm:$0xff] }
  0x1f   : > { %477 = vst [vmem:[%s2407_s25 + $0x80] sm:$0xff] %v476_v16  ;;  %479 = vst [vmem:[%s2407_s25 + $0x88] sm:$0xff] %v478_v17  ;;  %v482_v19 = vld [vmem:[%s2402_s24 + $0x98] sm:$0xff]  ;;  %v484_v20 = vld [vmem:[%s2402_s24 + $0xa0] sm:$0xff] }
  0x20   : > { %481 = vst [vmem:[%s2407_s25 + $0x90] sm:$0xff] %v480_v18  ;;  %483 = vst [vmem:[%s2407_s25 + $0x98] sm:$0xff] %v482_v19  ;;  %v486_v21 = vld [vmem:[%s2402_s24 + $0xa8] sm:$0xff]  ;;  %v488_v22 = vld [vmem:[%s2402_s24 + $0xb0] sm:$0xff] }
  0x21   : > { %485 = vst [vmem:[%s2407_s25 + $0xa0] sm:$0xff] %v484_v20  ;;  %v490_v23 = vld [vmem:[%s2402_s24 + $0xb8] sm:$0xff]  ;;  %487 = vst [vmem:[%s2407_s25 + $0xa8] sm:$0xff] %v486_v21  ;;  %v492_v24 = vld [vmem:[%s2402_s24 + $0xc0] sm:$0xff] }
  0x22   : > { %489 = vst [vmem:[%s2407_s25 + $0xb0] sm:$0xff] %v488_v22  ;;  %491 = vst [vmem:[%s2407_s25 + $0xb8] sm:$0xff] %v490_v23  ;;  %v494_v25 = vld [vmem:[%s2402_s24 + $0xc8] sm:$0xff]  ;;  %v496_v26 = vld [vmem:[%s2402_s24 + $0xd0] sm:$0xff] }
  0x23   : > { %493 = vst [vmem:[%s2407_s25 + $0xc0] sm:$0xff] %v492_v24  ;;  %495 = vst [vmem:[%s2407_s25 + $0xc8] sm:$0xff] %v494_v25  ;;  %v498_v27 = vld [vmem:[%s2402_s24 + $0xd8] sm:$0xff]  ;;  %v500_v28 = vld [vmem:[%s2402_s24 + $0xe0] sm:$0xff] }
  0x24   : > { %497 = vst [vmem:[%s2407_s25 + $0xd0] sm:$0xff] %v496_v26  ;;  %v502_v29 = vld [vmem:[%s2402_s24 + $0xe8] sm:$0xff]  ;;  %499 = vst [vmem:[%s2407_s25 + $0xd8] sm:$0xff] %v498_v27  ;;  %v504_v30 = vld [vmem:[%s2402_s24 + $0xf0] sm:$0xff] }
  0x25   : > { %501 = vst [vmem:[%s2407_s25 + $0xe0] sm:$0xff] %v500_v28  ;;  %503 = vst [vmem:[%s2407_s25 + $0xe8] sm:$0xff] %v502_v29  ;;  %v506_v31 = vld [vmem:[%s2402_s24 + $0xf8] sm:$0xff]  ;;  %v508_v32 = vld [vmem:[%s2402_s24 + $0x200] sm:$0xff] }
  0x26   : > { %505 = vst [vmem:[%s2407_s25 + $0xf0] sm:$0xff] %v504_v30  ;;  %507 = vst [vmem:[%s2407_s25 + $0xf8] sm:$0xff] %v506_v31  ;;  %v510_v33 = vld [vmem:[%s2402_s24 + $0x208] sm:$0xff]  ;;  %v512_v34 = vld [vmem:[%s2402_s24 + $0x210] sm:$0xff] }
  0x27   : > { %509 = vst [vmem:[%s2407_s25 + $0x100] sm:$0xff] %v508_v32  ;;  %v514_v35 = vld [vmem:[%s2402_s24 + $0x218] sm:$0xff]  ;;  %511 = vst [vmem:[%s2407_s25 + $0x108] sm:$0xff] %v510_v33  ;;  %v516_v36 = vld [vmem:[%s2402_s24 + $0x220] sm:$0xff] }
  0x28   : > { %513 = vst [vmem:[%s2407_s25 + $0x110] sm:$0xff] %v512_v34  ;;  %515 = vst [vmem:[%s2407_s25 + $0x118] sm:$0xff] %v514_v35  ;;  %v518_v37 = vld [vmem:[%s2402_s24 + $0x228] sm:$0xff]  ;;  %v520_v38 = vld [vmem:[%s2402_s24 + $0x230] sm:$0xff] }
  0x29   : > { %517 = vst [vmem:[%s2407_s25 + $0x120] sm:$0xff] %v516_v36  ;;  %519 = vst [vmem:[%s2407_s25 + $0x128] sm:$0xff] %v518_v37  ;;  %v522_v39 = vld [vmem:[%s2402_s24 + $0x238] sm:$0xff]  ;;  %v524_v40 = vld [vmem:[%s2402_s24 + $0x240] sm:$0xff] }
  0x2a   : > { %521 = vst [vmem:[%s2407_s25 + $0x130] sm:$0xff] %v520_v38  ;;  %v526_v41 = vld [vmem:[%s2402_s24 + $0x248] sm:$0xff]  ;;  %523 = vst [vmem:[%s2407_s25 + $0x138] sm:$0xff] %v522_v39  ;;  %v528_v42 = vld [vmem:[%s2402_s24 + $0x250] sm:$0xff] }
  0x2b   : > { %525 = vst [vmem:[%s2407_s25 + $0x140] sm:$0xff] %v524_v40  ;;  %527 = vst [vmem:[%s2407_s25 + $0x148] sm:$0xff] %v526_v41  ;;  %v530_v43 = vld [vmem:[%s2402_s24 + $0x258] sm:$0xff]  ;;  %v532_v44 = vld [vmem:[%s2402_s24 + $0x260] sm:$0xff] }
  0x2c   : > { %529 = vst [vmem:[%s2407_s25 + $0x150] sm:$0xff] %v528_v42  ;;  %531 = vst [vmem:[%s2407_s25 + $0x158] sm:$0xff] %v530_v43  ;;  %v534_v45 = vld [vmem:[%s2402_s24 + $0x268] sm:$0xff]  ;;  %v536_v46 = vld [vmem:[%s2402_s24 + $0x270] sm:$0xff] }
  0x2d   : > { %533 = vst [vmem:[%s2407_s25 + $0x160] sm:$0xff] %v532_v44  ;;  %v538_v47 = vld [vmem:[%s2402_s24 + $0x278] sm:$0xff]  ;;  %535 = vst [vmem:[%s2407_s25 + $0x168] sm:$0xff] %v534_v45  ;;  %v540_v48 = vld [vmem:[%s2402_s24 + $0x280] sm:$0xff] }
  0x2e   : > { %537 = vst [vmem:[%s2407_s25 + $0x170] sm:$0xff] %v536_v46  ;;  %539 = vst [vmem:[%s2407_s25 + $0x178] sm:$0xff] %v538_v47  ;;  %v542_v49 = vld [vmem:[%s2402_s24 + $0x288] sm:$0xff]  ;;  %v544_v50 = vld [vmem:[%s2402_s24 + $0x290] sm:$0xff] }
  0x2f   : > { %541 = vst [vmem:[%s2407_s25 + $0x180] sm:$0xff] %v540_v48  ;;  %543 = vst [vmem:[%s2407_s25 + $0x188] sm:$0xff] %v542_v49  ;;  %v546_v51 = vld [vmem:[%s2402_s24 + $0x298] sm:$0xff]  ;;  %v548_v52 = vld [vmem:[%s2402_s24 + $0x2a0] sm:$0xff] }
  0x30   : > { %545 = vst [vmem:[%s2407_s25 + $0x190] sm:$0xff] %v544_v50  ;;  %v550_v53 = vld [vmem:[%s2402_s24 + $0x2a8] sm:$0xff]  ;;  %547 = vst [vmem:[%s2407_s25 + $0x198] sm:$0xff] %v546_v51  ;;  %v552_v54 = vld [vmem:[%s2402_s24 + $0x2b0] sm:$0xff] }
  0x31   : > { %549 = vst [vmem:[%s2407_s25 + $0x1a0] sm:$0xff] %v548_v52  ;;  %551 = vst [vmem:[%s2407_s25 + $0x1a8] sm:$0xff] %v550_v53  ;;  %v554_v55 = vld [vmem:[%s2402_s24 + $0x2b8] sm:$0xff]  ;;  %v556_v56 = vld [vmem:[%s2402_s24 + $0x2c0] sm:$0xff] }
  0x32   : > { %553 = vst [vmem:[%s2407_s25 + $0x1b0] sm:$0xff] %v552_v54  ;;  %555 = vst [vmem:[%s2407_s25 + $0x1b8] sm:$0xff] %v554_v55  ;;  %v558_v57 = vld [vmem:[%s2402_s24 + $0x2c8] sm:$0xff]  ;;  %v560_v58 = vld [vmem:[%s2402_s24 + $0x2d0] sm:$0xff] }
  0x33   : > { %557 = vst [vmem:[%s2407_s25 + $0x1c0] sm:$0xff] %v556_v56  ;;  %v562_v59 = vld [vmem:[%s2402_s24 + $0x2d8] sm:$0xff]  ;;  %559 = vst [vmem:[%s2407_s25 + $0x1c8] sm:$0xff] %v558_v57  ;;  %v564_v60 = vld [vmem:[%s2402_s24 + $0x2e0] sm:$0xff] }
  0x34   : > { %561 = vst [vmem:[%s2407_s25 + $0x1d0] sm:$0xff] %v560_v58  ;;  %563 = vst [vmem:[%s2407_s25 + $0x1d8] sm:$0xff] %v562_v59  ;;  %v566_v61 = vld [vmem:[%s2402_s24 + $0x2e8] sm:$0xff]  ;;  %v568_v62 = vld [vmem:[%s2402_s24 + $0x2f0] sm:$0xff] }
  0x35   : > { %565 = vst [vmem:[%s2407_s25 + $0x1e0] sm:$0xff] %v564_v60  ;;  %567 = vst [vmem:[%s2407_s25 + $0x1e8] sm:$0xff] %v566_v61  ;;  %v570_v63 = vld [vmem:[%s2402_s24 + $0x2f8] sm:$0xff] }
  0x36   : > { %569 = vst [vmem:[%s2407_s25 + $0x1f0] sm:$0xff] %v568_v62  ;;  %571 = vst [vmem:[%s2407_s25 + $0x1f8] sm:$0xff] %v570_v63 }
  0x37 PF: > { %p1866_p11 = scmp.ge.s32.totalorder %s2290_s10, 1  ;;  %p596_p12 = scmp.lt.s32.totalorder %s2290_s10, 3 }
  0x39   : > { %p597_p13 = pnand %p1866_p11, %p596_p12 }
  0x3a   : > { %p650_p0 = scmp.lt.s32.totalorder (!%p597_p13), %s2282_s30, 1  ;;  %s2544_s16 = sand.u32 (!%p597_p13), 1, %s2274_s28  }
  0x3b   : > { %600 = sbr.rel (%p597_p13) target bundleno = 358 (0x166), region = 86  ;;  %s1867_s23 = sshll.u32 (!%p597_p13), %s2544_s16, 9 }
  0x3c   : > { %s2560_s20 = scalar_lea.vmem (!%p597_p13), [#allocation2], %s1867_s23  ;;  %s1868_s22 = sshll.u32 (!%p597_p13), %s2544_s16, 8 }
  0x3d   : > { %s1978_s25 = sshll.u32 (!%p597_p13), %s2282_s30, 12 }
  0x3e   : > { %s2980_s12 = scalar_lea.hbm (!%p597_p13), %s3042_s8, %s1978_s25 }
  0x40   : > { %v982_v0 = vld [vmem:[%s3040_s6 + $0x18] sm:$0xff]  ;;  %v981_v1 = vld [vmem:[%s3040_s6 + $0x10] sm:$0xff]  ;;  %v698_v2 = vlaneseq  ;;  %v946_v3 = vld [vmem:[%s3039_s5 + $0x8] sm:$0xff]  ;;  %s651_s26 = scalar_select %p650_p0, %s2282_s30, 1  ;;  %vm983_vm0 = vcmask 261120   ;;  %vm1305_vm1 = vcmask 130048  }
  0x41   : > { %2049 = vmatprep.subr.mxu0 %v982_v0  ;;  %v945_v4 = vld [vmem:[%s3039_s5] sm:$0xff]  ;;  %v980_v5 = vld [vmem:[%s3040_s6 + $0x8] sm:$0xff]  ;;  %2105 = vmatprep.subr.mxu1 %v946_v3  ;;  %v668_v20 = vld [vmem:[%s2560_s20 + $0x10] sm:$0xff]  ;;  %vm1698_vm2 = vcmask 523264   ;;  %s1732_s30 = scalar_lea.sflag [#allocation4], %s2544_s16 }
  0x42   : > { %2050 = vmatpush3.msra.mxu0 %v982_v0  ;;  %v699_v6 = vshrl.u32 %v698_v2, 7  ;;  %2106 = vmatpush3.msra.mxu1 %v946_v3  ;;  %v979_v7 = vld [vmem:[%s3040_s6] sm:$0xff]  ;;  %s1869_s14 = sshll.u32 %s651_s26, 1  ;;  %s1977_s19 = sshll.u32 %s651_s26, 8  ;;  %v667_v12 = vld [vmem:[%s2560_s20 + $0x8] sm:$0xff]  ;;  %v1874_v21 = vld [vmem:[%s2560_s20 + $0x110] sm:$0xff] }
  0x43   : > { %2051 = vmatprep.subr.mxu0 %v981_v1  ;;  %2107 = vmatprep.subr.mxu1 %v945_v4  ;;  %v666_v10 = vld [vmem:[%s2560_s20] sm:$0xff]  ;;  %s653_s24 = scalar_lea.vmem %s3035_s1, %s1869_s14  ;;  %s2569_s26 = scalar_lea.vmem %s3036_s2, %s1977_s19  ;;  %v1873_v13 = vld [vmem:[%s2560_s20 + $0x108] sm:$0xff]  ;;  %v669_v22 = vld [vmem:[%s2560_s20 + $0x18] sm:$0xff] }
  0x44   : > { %2052 = vmatpush3.msra.mxu0 %v981_v1  ;;  %v700_v8 = vsub.s32 0, %v699_v6  ;;  %v769_v9 = vsub.s32 1, %v699_v6  ;;  %2108 = vmatpush3.msra.mxu1 %v945_v4  ;;  %v1872_v11 = vld [vmem:[%s2560_s20 + $0x100] sm:$0xff]  ;;  %v948_v16 = vld [vmem:[%s2569_s26 + $0x8] sm:$0xff]  ;;  %v949_v19 = vld [vmem:[%s2569_s26 + $0x10] sm:$0xff]  ;;  %s2292_s19 = smov [#allocation3]  }
  0x45   : > { %2053 = vmatprep.subr.mxu0 %v980_v5  ;;  %v665_v14 = vld [vmem:[%s653_s24] sm:$0x3]  ;;  %v1875_v23 = vld [vmem:[%s2560_s20 + $0x118] sm:$0xff]  ;;  %v671_v36 = vld [vmem:[%s2560_s20 + $0x28] sm:$0xff]  ;;  %s2883_s24 = scalar_lea.vmem [#allocation3], %s1868_s22 }
  0x46   : > { %2054 = vmatpush3.msra.mxu0 %v980_v5  ;;  %v947_v15 = vld [vmem:[%s2569_s26] sm:$0xff]  ;;  %v2576_v17 = vrot.slane %v665_v14, %v700_v8  ;;  %v2578_v18 = vrot.slane %v665_v14, %v769_v9  ;;  %v950_v31 = vld [vmem:[%s2569_s26 + $0x18] sm:$0xff]  ;;  %v1877_v37 = vld [vmem:[%s2560_s20 + $0x128] sm:$0xff]  ;;  %s1747_s11 = sshll.u32 %s2883_s24, 4  ;;  %s2982_s11 = int_to_ptr.vmem [resolvable:$true] %s1747_s11 }
  0x47   : > { %2055 = vmatprep.subr.mxu0 %v979_v7  ;;  %2057 = vmatprep.mubr.msk.f32.mxu0 %vm983_vm0, %v947_v15  ;;  %v2592_v26 = vld [vmem:[%s3037_s3] ss:$0 sm:$0xff]  ;;  %v672_v43 = vld [vmem:[%s2560_s20 + $0x30] sm:$0xff]  ;;  %v673_v50 = vld [vmem:[%s2560_s20 + $0x38] sm:$0xff]  ;;  %s2214_s14 = scalar_lea.vmem %s2982_s11, 4096 }
  0x48   : > { %2056 = vmatpush3.msra.mxu0 %v979_v7  ;;  %v702_v24 = vmul.f32 %v2576_v17, %v666_v10  ;;  %v771_v25 = vmul.f32 %v1872_v11, %v2578_v18  ;;  %v703_v27 = vmul.f32 %v2576_v17, %v667_v12  ;;  %v772_v28 = vmul.f32 %v1873_v13, %v2578_v18  ;;  %v670_v29 = vld [vmem:[%s2560_s20 + $0x20] sm:$0xff]  ;;  %v1878_v44 = vld [vmem:[%s2560_s20 + $0x130] sm:$0xff]  ;;  %v952_v57 = vld [vmem:[%s2569_s26 + $0x28] sm:$0xff]  ;;  %p2215_p1 = scmp.ne.s32.totalorder %s2982_s11, %s2214_s14 }
  0x49   : > { %2058 = vmatmul.mubr.msk.f32.vlgmr.msra.gmra.mxu0 %vm983_vm0, %v948_v16  ;;  %v1876_v30 = vld [vmem:[%s2560_s20 + $0x120] sm:$0xff]  ;;  %v704_v32 = vmul.f32 %v2576_v17, %v668_v20  ;;  %v773_v33 = vmul.f32 %v1874_v21, %v2578_v18  ;;  %v705_v34 = vmul.f32 %v2576_v17, %v669_v22  ;;  %v774_v35 = vmul.f32 %v1875_v23, %v2578_v18  ;;  %v1879_v60 = vld [vmem:[%s2560_s20 + $0x138] sm:$0xff]  ;;  %v953_v0 = vld [vmem:[%s2569_s26 + $0x30] sm:$0xff] }
  0x4a   : > { %2060 = vmatprep.mubr.msk.f32.mxu0 %vm983_vm0, %v949_v19  ;;  %v803_v38 = vadd.f32 %v771_v25, %v702_v24  ;;  %v804_v39 = vadd.f32 %v772_v28, %v703_v27  ;;  %v951_v40 = vld [vmem:[%s2569_s26 + $0x20] sm:$0xff]  ;;  %v706_v41 = vmul.f32 %v2576_v17, %v670_v29  ;;  %v775_v42 = vmul.f32 %v1876_v30, %v2578_v18  ;;  %v675_v12 = vld [vmem:[%s2560_s20 + $0x48] sm:$0xff]  ;;  %v954_v16 = vld [vmem:[%s2569_s26 + $0x38] sm:$0xff]  ;;  %p2216_p2 = pnand %p2215_p1, %p2379_p5 }
  0x4b   : > { %v2614_v45 = vld [vmem:[%s3038_s4] ss:$0 sm:$0xff]  ;;  %v805_v46 = vadd.f32 %v773_v33, %v704_v32  ;;  %v806_v47 = vadd.f32 %v774_v35, %v705_v34  ;;  %v707_v48 = vmul.f32 %v2576_v17, %v671_v36  ;;  %v776_v49 = vmul.f32 %v1877_v37, %v2578_v18  ;;  %v1881_v13 = vld [vmem:[%s2560_s20 + $0x148] sm:$0xff]  ;;  %v676_v20 = vld [vmem:[%s2560_s20 + $0x50] sm:$0xff] }
  0x4c   : > { %v842_v51 = vmul.f32 %v2592_v26, %v803_v38  ;;  %v843_v52 = vmul.f32 %v2592_v26, %v804_v39  ;;  %v807_v53 = vadd.f32 %v775_v42, %v706_v41  ;;  %v708_v54 = vmul.f32 %v2576_v17, %v672_v43  ;;  %v674_v6 = vld [vmem:[%s2560_s20 + $0x40] sm:$0xff]  ;;  %v1882_v25 = vld [vmem:[%s2560_s20 + $0x150] sm:$0xff]  ;;  %v677_v27 = vld [vmem:[%s2560_s20 + $0x58] sm:$0xff]  ;;  %p2217_p3 = pneg %p2216_p2 }
  0x4d   : > { %2061 = vmatmul.mubr.msk.f32.gmra.mxu0 %vm983_vm0, %v950_v31  ;;  %v844_v55 = vmul.f32 %v2592_v26, %v805_v46  ;;  %v845_v56 = vmul.f32 %v2592_v26, %v806_v47  ;;  %v808_v58 = vadd.f32 %v776_v49, %v707_v48  ;;  %v777_v59 = vmul.f32 %v1878_v44, %v2578_v18  ;;  %v1880_v7 = vld [vmem:[%s2560_s20 + $0x140] sm:$0xff]  ;;  %v1883_v32 = vld [vmem:[%s2560_s20 + $0x158] sm:$0xff]  ;;  %v679_v39 = vld [vmem:[%s2560_s20 + $0x68] sm:$0xff] }
  0x4e   : > { %2063 = vmatprep.mubr.msk.f32.mxu0 %vm983_vm0, %v951_v40  ;;  %v881_v61 = vadd.f32 %v2614_v45, %v842_v51  ;;  %v882_v62 = vadd.f32 %v2614_v45, %v843_v52  ;;  %v846_v63 = vmul.f32 %v2592_v26, %v807_v53  ;;  %v709_v1 = vmul.f32 %v2576_v17, %v673_v50  ;;  %v955_v22 = vld [vmem:[%s2569_s26 + $0x40] sm:$0xff]  ;;  %v956_v41 = vld [vmem:[%s2569_s26 + $0x48] sm:$0xff]  ;;  %v957_v49 = vld [vmem:[%s2569_s26 + $0x50] sm:$0xff] }
  0x4f   : > { %v883_v2 = vadd.f32 %v2614_v45, %v844_v55  ;;  %v884_v3 = vadd.f32 %v2614_v45, %v845_v56  ;;  %v847_v4 = vmul.f32 %v2592_v26, %v808_v58  ;;  %v809_v5 = vadd.f32 %v777_v59, %v708_v54  ;;  %v678_v33 = vld [vmem:[%s2560_s20 + $0x60] sm:$0xff]  ;;  %v1885_v46 = vld [vmem:[%s2560_s20 + $0x168] sm:$0xff]  ;;  %v680_v52 = vld [vmem:[%s2560_s20 + $0x70] sm:$0xff] }
  0x50   : > { %v913_v8 = vmax.f32 %v881_v61, 0.0  ;;  %v914_v9 = vmax.f32 %v882_v62, 0.0  ;;  %v885_v10 = vadd.f32 %v2614_v45, %v846_v63  ;;  %v778_v11 = vmul.f32 %v1879_v60, %v2578_v18  ;;  %v1884_v38 = vld [vmem:[%s2560_s20 + $0x160] sm:$0xff]  ;;  %v681_v62 = vld [vmem:[%s2560_s20 + $0x78] sm:$0xff] }
  0x51   : > { %2064 = vmatmul.mubr.msk.f32.gmra.mxu0 %vm983_vm0, %v952_v57  ;;  %v915_v14 = vmax.f32 %v883_v2, 0.0  ;;  %v2645_v15 = vadd.f32 %v2614_v45, %v847_v4  ;;  %v848_v19 = vmul.f32 %v2592_v26, %v809_v5  ;;  %v710_v23 = vmul.f32 %v2576_v17, %v674_v6  ;;  %v1886_v57 = vld [vmem:[%s2560_s20 + $0x170] sm:$0xff]  ;;  %v958_v63 = vld [vmem:[%s2569_s26 + $0x58] sm:$0xff]  ;;  %v959_v5 = vld [vmem:[%s2569_s26 + $0x60] sm:$0xff] }
  0x52   : > { %2066 = vmatprep.mubr.msk.f32.mxu0 %vm983_vm0, %v953_v0  ;;  %2109 = vmatprep.mubr.msk.f32.mxu1 %vm1305_vm1, %v913_v8  ;;  %v810_v21 = vadd.f32 %v778_v11, %v709_v1  ;;  %v779_v24 = vmul.f32 %v1880_v7, %v2578_v18  ;;  %v916_v28 = vmax.f32 %v884_v3, 0.0  ;;  %v711_v30 = vmul.f32 %v2576_v17, %v675_v12  ;;  %v1887_v8 = vld [vmem:[%s2560_s20 + $0x178] sm:$0xff] }
  0x53   : > { %2110 = vmatmul.mubr.msk.f32.vlgmr.msra.gmra.mxu1 %vm1305_vm1, %v914_v9  ;;  %v887_v29 = vadd.f32 %v2614_v45, %v848_v19  ;;  %v780_v31 = vmul.f32 %v1881_v13, %v2578_v18  ;;  %v917_v34 = vmax.f32 %v885_v10, 0.0  ;;  %v712_v37 = vmul.f32 %v2576_v17, %v676_v20  ;;  %v682_v9 = vld [vmem:[%s2560_s20 + $0x80] sm:$0xff]  ;;  %v683_v19 = vld [vmem:[%s2560_s20 + $0x88] sm:$0xff] }
  0x54   : > { %2112 = vmatprep.mubr.msk.f32.mxu1 %vm1305_vm1, %v915_v14  ;;  %v849_v35 = vmul.f32 %v2592_v26, %v810_v21  ;;  %v811_v36 = vadd.f32 %v779_v24, %v710_v23  ;;  %v918_v40 = vmax.f32 %v2645_v15, 0.0  ;;  %v781_v43 = vmul.f32 %v1882_v25, %v2578_v18  ;;  %v1888_v13 = vld [vmem:[%s2560_s20 + $0x180] sm:$0xff]  ;;  %v1889_v20 = vld [vmem:[%s2560_s20 + $0x188] sm:$0xff]  ;;  %v684_v24 = vld [vmem:[%s2560_s20 + $0x90] sm:$0xff] }
  0x55   : > { %2067 = vmatmul.mubr.msk.f32.gmra.mxu0 %vm983_vm0, %v954_v16  ;;  %v812_v42 = vadd.f32 %v780_v31, %v711_v30  ;;  %v713_v44 = vmul.f32 %v2576_v17, %v677_v27  ;;  %v782_v50 = vmul.f32 %v1883_v32, %v2578_v18  ;;  %v714_v51 = vmul.f32 %v2576_v17, %v678_v33  ;;  %v960_v21 = vld [vmem:[%s2569_s26 + $0x68] sm:$0xff]  ;;  %v1890_v31 = vld [vmem:[%s2560_s20 + $0x190] sm:$0xff] }
  0x56   : > { %2069 = vmatprep.mubr.msk.f32.mxu0 %vm983_vm0, %v955_v22  ;;  %v888_v47 = vadd.f32 %v2614_v45, %v849_v35  ;;  %v850_v48 = vmul.f32 %v2592_v26, %v811_v36  ;;  %v813_v54 = vadd.f32 %v781_v43, %v712_v37  ;;  %v783_v55 = vmul.f32 %v1884_v38, %v2578_v18 }
  0x57   : > { %2113 = vmatmul.mubr.msk.f32.gmra.mxu1 %vm1305_vm1, %v916_v28  ;;  %v851_v53 = vmul.f32 %v2592_v26, %v812_v42  ;;  %v715_v56 = vmul.f32 %v2576_v17, %v679_v39  ;;  %v919_v58 = vmax.f32 %v887_v29, 0.0  ;;  %v814_v60 = vadd.f32 %v782_v50, %v713_v44  ;;  %v961_v29 = vld [vmem:[%s2569_s26 + $0x70] sm:$0xff]  ;;  %v962_v42 = vld [vmem:[%s2569_s26 + $0x78] sm:$0xff]  ;;  %v686_v44 = vld [vmem:[%s2560_s20 + $0xa0] sm:$0xff] }
  0x58   : > { %2115 = vmatprep.mubr.msk.f32.mxu1 %vm1305_vm1, %v917_v34  ;;  %v889_v59 = vadd.f32 %v2614_v45, %v850_v48  ;;  %v784_v61 = vmul.f32 %v1885_v46, %v2578_v18  ;;  %v852_v0 = vmul.f32 %v2592_v26, %v813_v54  ;;  %v815_v1 = vadd.f32 %v783_v55, %v714_v51  ;;  %v1892_v46 = vld [vmem:[%s2560_s20 + $0x1a0] sm:$0xff] }
  0x59   : > { %2070 = vmatmul.mubr.msk.f32.gmra.mxu0 %vm983_vm0, %v956_v41  ;;  %v716_v2 = vmul.f32 %v2576_v17, %v680_v52  ;;  %v890_v3 = vadd.f32 %v2614_v45, %v851_v53  ;;  %v853_v4 = vmul.f32 %v2592_v26, %v814_v60  ;;  %v785_v7 = vmul.f32 %v1886_v57, %v2578_v18  ;;  %v1891_v41 = vld [vmem:[%s2560_s20 + $0x198] sm:$0xff]  ;;  %v963_v50 = vld [vmem:[%s2569_s26 + $0x80] sm:$0xff]  ;;  %v687_v52 = vld [vmem:[%s2560_s20 + $0xa8] sm:$0xff] }
  0x5a   : > { %2072 = vmatprep.mubr.msk.f32.mxu0 %vm983_vm0, %v957_v49  ;;  %v816_v6 = vadd.f32 %v784_v61, %v715_v56  ;;  %v920_v10 = vmax.f32 %v888_v47, 0.0  ;;  %v854_v11 = vmul.f32 %v2592_v26, %v815_v1  ;;  %v717_v12 = vmul.f32 %v2576_v17, %v681_v62  ;;  %v1893_v57 = vld [vmem:[%s2560_s20 + $0x1a8] sm:$0xff]  ;;  %v1894_v1 = vld [vmem:[%s2560_s20 + $0x1b0] sm:$0xff] }
  0x5b   : > { %2116 = vmatmul.mubr.msk.f32.gmra.mxu1 %vm1305_vm1, %v918_v40  ;;  %v921_v14 = vmax.f32 %v889_v59, 0.0  ;;  %v891_v15 = vadd.f32 %v2614_v45, %v852_v0  ;;  %v817_v16 = vadd.f32 %v785_v7, %v716_v2  ;;  %v786_v22 = vmul.f32 %v1887_v8, %v2578_v18  ;;  %v685_v40 = vld [vmem:[%s2560_s20 + $0x98] sm:$0xff]  ;;  %v964_v62 = vld [vmem:[%s2569_s26 + $0x88] sm:$0xff]  ;;  %v688_v0 = vld [vmem:[%s2560_s20 + $0xb0] sm:$0xff] }
  0x5c   : > { %2118 = vmatprep.mubr.msk.f32.mxu1 %vm1305_vm1, %v919_v58  ;;  %v718_v23 = vmul.f32 %v2576_v17, %v682_v9  ;;  %v922_v25 = vmax.f32 %v890_v3, 0.0  ;;  %v892_v27 = vadd.f32 %v2614_v45, %v853_v4  ;;  %v855_v28 = vmul.f32 %v2592_v26, %v816_v6  ;;  %v965_v4 = vld [vmem:[%s2569_s26 + $0x90] sm:$0xff]  ;;  %v689_v6 = vld [vmem:[%s2560_s20 + $0xb8] sm:$0xff] }
  0x5d   : > { %2073 = vmatmul.mubr.msk.f32.gmra.mxu0 %vm983_vm0, %v958_v63  ;;  %v787_v30 = vmul.f32 %v1888_v13, %v2578_v18  ;;  %v893_v32 = vadd.f32 %v2614_v45, %v854_v11  ;;  %v818_v33 = vadd.f32 %v786_v22, %v717_v12  ;;  %v719_v34 = vmul.f32 %v2576_v17, %v683_v19  ;;  %v1895_v11 = vld [vmem:[%s2560_s20 + $0x1b8] sm:$0xff]  ;;  %v690_v12 = vld [vmem:[%s2560_s20 + $0xc0] sm:$0xff] }
  0x5e   : > { %2075 = vmatprep.mubr.msk.f32.mxu0 %vm983_vm0, %v959_v5  ;;  %v788_v35 = vmul.f32 %v1889_v20, %v2578_v18  ;;  %v923_v36 = vmax.f32 %v891_v15, 0.0  ;;  %v856_v37 = vmul.f32 %v2592_v26, %v817_v16  ;;  %v720_v39 = vmul.f32 %v2576_v17, %v684_v24  ;;  %v1896_v13 = vld [vmem:[%s2560_s20 + $0x1c0] sm:$0xff]  ;;  %v966_v20 = vld [vmem:[%s2569_s26 + $0x98] sm:$0xff] }
  0x5f   : > { %2119 = vmatmul.mubr.msk.f32.gmra.mxu1 %vm1305_vm1, %v920_v10  ;;  %v819_v38 = vadd.f32 %v787_v30, %v718_v23  ;;  %v789_v43 = vmul.f32 %v1890_v31, %v2578_v18  ;;  %v924_v47 = vmax.f32 %v892_v27, 0.0  ;;  %v894_v48 = vadd.f32 %v2614_v45, %v855_v28  ;;  %v967_v22 = vld [vmem:[%s2569_s26 + $0xa0] sm:$0xff]  ;;  %v691_v31 = vld [vmem:[%s2560_s20 + $0xc8] sm:$0xff] }
  0x60   : > { %2121 = vmatprep.mubr.msk.f32.mxu1 %vm1305_vm1, %v921_v14  ;;  %v857_v49 = vmul.f32 %v2592_v26, %v818_v33  ;;  %v820_v51 = vadd.f32 %v788_v35, %v719_v34  ;;  %v721_v55 = vmul.f32 %v2576_v17, %v685_v40  ;;  %v790_v56 = vmul.f32 %v1891_v41, %v2578_v18  ;;  %v969_v41 = vld [vmem:[%s2569_s26 + $0xb0] sm:$0xff] }
  0x61   : > { %2076 = vmatmul.mubr.msk.f32.gmra.mxu0 %vm983_vm0, %v960_v21  ;;  %v858_v53 = vmul.f32 %v2592_v26, %v819_v38  ;;  %v821_v54 = vadd.f32 %v789_v43, %v720_v39  ;;  %v925_v58 = vmax.f32 %v893_v32, 0.0  ;;  %v895_v59 = vadd.f32 %v2614_v45, %v856_v37  ;;  %v1897_v32 = vld [vmem:[%s2560_s20 + $0x1c8] sm:$0xff]  ;;  %v692_v37 = vld [vmem:[%s2560_s20 + $0xd0] sm:$0xff] }
  0x62   : > { %2078 = vmatprep.mubr.msk.f32.mxu0 %vm983_vm0, %v961_v29  ;;  %v722_v60 = vmul.f32 %v2576_v17, %v686_v44  ;;  %v791_v61 = vmul.f32 %v1892_v46, %v2578_v18  ;;  %v723_v63 = vmul.f32 %v2576_v17, %v687_v52  ;;  %v926_v2 = vmax.f32 %v894_v48, 0.0  ;;  %v1898_v38 = vld [vmem:[%s2560_s20 + $0x1d0] sm:$0xff]  ;;  %v968_v39 = vld [vmem:[%s2569_s26 + $0xa8] sm:$0xff] }
  0x63   : > { %2122 = vmatmul.mubr.msk.f32.gmra.mxu1 %vm1305_vm1, %v922_v25  ;;  %v896_v3 = vadd.f32 %v2614_v45, %v857_v49  ;;  %v792_v5 = vmul.f32 %v1893_v57, %v2578_v18  ;;  %v897_v7 = vadd.f32 %v2614_v45, %v858_v53  ;;  %v859_v8 = vmul.f32 %v2592_v26, %v820_v51  ;;  %v694_v57 = vld [vmem:[%s2560_s20 + $0xe0] sm:$0xff] }
  0x64   : > { %2124 = vmatprep.mubr.msk.f32.mxu1 %vm1305_vm1, %v923_v36  ;;  %v860_v9 = vmul.f32 %v2592_v26, %v821_v54  ;;  %v822_v10 = vadd.f32 %v790_v56, %v721_v55  ;;  %v927_v14 = vmax.f32 %v895_v59, 0.0  ;;  %v823_v15 = vadd.f32 %v791_v61, %v722_v60  ;;  %v693_v54 = vld [vmem:[%s2560_s20 + $0xd8] sm:$0xff]  ;;  %v971_v61 = vld [vmem:[%s2569_s26 + $0xc0] sm:$0xff] }
  0x65   : > { %2079 = vmatmul.mubr.msk.f32.gmra.mxu0 %vm983_vm0, %v962_v42  ;;  %v724_v16 = vmul.f32 %v2576_v17, %v688_v0  ;;  %v793_v19 = vmul.f32 %v1894_v1, %v2578_v18  ;;  %v824_v21 = vadd.f32 %v792_v5, %v723_v63  ;;  %v725_v23 = vmul.f32 %v2576_v17, %v689_v6  ;;  %v1899_v55 = vld [vmem:[%s2560_s20 + $0x1d8] sm:$0xff] }
  0x66   : > { %2081 = vmatprep.mubr.msk.f32.mxu0 %vm983_vm0, %v963_v50  ;;  %v794_v24 = vmul.f32 %v1895_v11, %v2578_v18  ;;  %v726_v25 = vmul.f32 %v2576_v17, %v690_v12  ;;  %v795_v27 = vmul.f32 %v1896_v13, %v2578_v18  ;;  %v928_v28 = vmax.f32 %v896_v3, 0.0  ;;  %v970_v56 = vld [vmem:[%s2569_s26 + $0xb8] sm:$0xff]  ;;  %v696_v11 = vld [vmem:[%s2560_s20 + $0xf0] sm:$0xff] }
  0x67   : > { %2125 = vmatmul.mubr.msk.f32.gmra.mxu1 %vm1305_vm1, %v924_v47  ;;  %v898_v29 = vadd.f32 %v2614_v45, %v859_v8  ;;  %v861_v30 = vmul.f32 %v2592_v26, %v822_v10  ;;  %v929_v33 = vmax.f32 %v897_v7, 0.0  ;;  %v899_v34 = vadd.f32 %v2614_v45, %v860_v9  ;;  %v695_v8 = vld [vmem:[%s2560_s20 + $0xe8] sm:$0xff]  ;;  %v1902_v12 = vld [vmem:[%s2560_s20 + $0x1f0] sm:$0xff] }
  0x68   : > { %2127 = vmatprep.mubr.msk.f32.mxu1 %vm1305_vm1, %v925_v58  ;;  %v862_v35 = vmul.f32 %v2592_v26, %v823_v15  ;;  %v825_v36 = vadd.f32 %v793_v19, %v724_v16  ;;  %v863_v40 = vmul.f32 %v2592_v26, %v824_v21  ;;  %v826_v42 = vadd.f32 %v794_v24, %v725_v23  ;;  %v1900_v58 = vld [vmem:[%s2560_s20 + $0x1e0] sm:$0xff]  ;;  %v1901_v9 = vld [vmem:[%s2560_s20 + $0x1e8] sm:$0xff]  ;;  %v973_v19 = vld [vmem:[%s2569_s26 + $0xd0] sm:$0xff] }
  0x69   : > { %2082 = vmatmul.mubr.msk.f32.gmra.mxu0 %vm983_vm0, %v964_v62  ;;  %v827_v43 = vadd.f32 %v795_v27, %v726_v25  ;;  %v727_v44 = vmul.f32 %v2576_v17, %v691_v31  ;;  %v796_v46 = vmul.f32 %v1897_v32, %v2578_v18  ;;  %v930_v47 = vmax.f32 %v898_v29, 0.0  ;;  %v972_v10 = vld [vmem:[%s2569_s26 + $0xc8] sm:$0xff]  ;;  %v697_v29 = vld [vmem:[%s2560_s20 + $0xf8] sm:$0xff] }
  0x6a   : > { %2084 = vmatprep.mubr.msk.f32.mxu0 %vm983_vm0, %v965_v4  ;;  %v900_v48 = vadd.f32 %v2614_v45, %v861_v30  ;;  %v728_v49 = vmul.f32 %v2576_v17, %v692_v37  ;;  %v797_v50 = vmul.f32 %v1898_v38, %v2578_v18  ;;  %v931_v51 = vmax.f32 %v899_v34, 0.0  ;;  %v1903_v30 = vld [vmem:[%s2560_s20 + $0x1f8] sm:$0xff]  ;;  %v975_v34 = vld [vmem:[%s2569_s26 + $0xe0] sm:$0xff]  ;;  %s2218_s20 = sshll.u32 %s2292_s19, 4  ;;  %s2219_s20 = int_to_ptr.vmem [resolvable:$false] %s2218_s20 }
  0x6b   : > { %2128 = vmatmul.mubr.msk.f32.gmra.mxu1 %vm1305_vm1, %v926_v2  ;;  %v901_v52 = vadd.f32 %v2614_v45, %v862_v35  ;;  %v864_v53 = vmul.f32 %v2592_v26, %v825_v36  ;;  %v902_v59 = vadd.f32 %v2614_v45, %v863_v40  ;;  %v865_v60 = vmul.f32 %v2592_v26, %v826_v42  ;;  %v974_v31 = vld [vmem:[%s2569_s26 + $0xd8] sm:$0xff]  ;;  %s2220_s21 = scalar_lea.vmem %s2219_s20, 8192  ;;  %p2221_p4 = scmp.lt.s32.totalorder %s2982_s11, %s2219_s20 }
  0x6c   : > { %2130 = vmatprep.mubr.msk.f32.mxu1 %vm1305_vm1, %v927_v14  ;;  %v866_v62 = vmul.f32 %v2592_v26, %v827_v43  ;;  %v828_v63 = vadd.f32 %v796_v46, %v727_v44  ;;  %v932_v0 = vmax.f32 %v900_v48, 0.0  ;;  %v829_v1 = vadd.f32 %v797_v50, %v728_v49  ;;  %v976_v43 = vld [vmem:[%s2569_s26 + $0xe8] sm:$0xff]  ;;  %v977_v44 = vld [vmem:[%s2569_s26 + $0xf0] sm:$0xff]  ;;  %p2222_p6 = scmp.lt.s32.totalorder %s2220_s21, %s2214_s14 }
  0x6d   : > { %2085 = vmatmul.mubr.msk.f32.gmra.mxu0 %vm983_vm0, %v966_v20  ;;  %v729_v2 = vmul.f32 %v2576_v17, %v693_v54  ;;  %v798_v3 = vmul.f32 %v1899_v55, %v2578_v18  ;;  %v933_v4 = vmax.f32 %v901_v52, 0.0  ;;  %v903_v5 = vadd.f32 %v2614_v45, %v864_v53 }
  0x6e   : > { %2087 = vmatprep.mubr.msk.f32.mxu0 %vm983_vm0, %v967_v22  ;;  %v730_v6 = vmul.f32 %v2576_v17, %v694_v57  ;;  %v799_v7 = vmul.f32 %v1900_v58, %v2578_v18  ;;  %v934_v13 = vmax.f32 %v902_v59, 0.0  ;;  %v904_v14 = vadd.f32 %v2614_v45, %v865_v60  ;;  %p2223_p7 = por %p2222_p6, %p2221_p4 }
  0x6f   : > { %2131 = vmatmul.mubr.msk.f32.gmra.mxu1 %vm1305_vm1, %v928_v28  ;;  %v905_v15 = vadd.f32 %v2614_v45, %v866_v62  ;;  %v867_v16 = vmul.f32 %v2592_v26, %v828_v63  ;;  %v868_v20 = vmul.f32 %v2592_v26, %v829_v1  ;;  %v830_v21 = vadd.f32 %v798_v3, %v729_v2 }
  0x70   : > { %2133 = vmatprep.mubr.msk.f32.mxu1 %vm1305_vm1, %v929_v33  ;;  %v731_v22 = vmul.f32 %v2576_v17, %v695_v8  ;;  %v800_v23 = vmul.f32 %v1901_v9, %v2578_v18  ;;  %v935_v24 = vmax.f32 %v903_v5, 0.0  ;;  %v831_v25 = vadd.f32 %v799_v7, %v730_v6  ;;  %p2224_p8 = pnand %p2223_p7, %p2217_p3 }
  0x71   : > { %2088 = vmatmul.mubr.msk.f32.gmra.mxu0 %vm983_vm0, %v968_v39  ;;  %v732_v27 = vmul.f32 %v2576_v17, %v696_v11  ;;  %v801_v28 = vmul.f32 %v1902_v12, %v2578_v18  ;;  %v936_v32 = vmax.f32 %v904_v14, 0.0  ;;  %v906_v33 = vadd.f32 %v2614_v45, %v867_v16 }
  0x72   : > { %2090 = vmatprep.mubr.msk.f32.mxu0 %vm983_vm0, %v969_v41  ;;  %v869_v35 = vmul.f32 %v2592_v26, %v830_v21  ;;  %v832_v36 = vadd.f32 %v800_v23, %v731_v22  ;;  %v733_v37 = vmul.f32 %v2576_v17, %v697_v29  ;;  %v802_v38 = vmul.f32 %v1903_v30, %v2578_v18 }
  0x73   : > { %2134 = vmatmul.mubr.msk.f32.gmra.mxu1 %vm1305_vm1, %v930_v47  ;;  %v937_v39 = vmax.f32 %v905_v15, 0.0  ;;  %v907_v40 = vadd.f32 %v2614_v45, %v868_v20  ;;  %v870_v41 = vmul.f32 %v2592_v26, %v831_v25  ;;  %v833_v42 = vadd.f32 %v801_v28, %v732_v27 }
  0x74   : > { %2136 = vmatprep.mubr.msk.f32.mxu1 %vm1305_vm1, %v931_v51  ;;  %v938_v17 = vmax.f32 %v906_v33, 0.0  ;;  %v908_v18 = vadd.f32 %v2614_v45, %v869_v35  ;;  %v871_v46 = vmul.f32 %v2592_v26, %v832_v36  ;;  %v834_v47 = vadd.f32 %v802_v38, %v733_v37  ;;  %v978_v51 = vld [vmem:[%s2569_s26 + $0xf8] sm:$0xff] }
  0x75   : > { %2091 = vmatmul.mubr.msk.f32.gmra.mxu0 %vm983_vm0, %v970_v56  ;;  %v939_v48 = vmax.f32 %v907_v40, 0.0  ;;  %v909_v49 = vadd.f32 %v2614_v45, %v870_v41  ;;  %v872_v50 = vmul.f32 %v2592_v26, %v833_v42 }
  0x76   : > { %2093 = vmatprep.mubr.msk.f32.mxu0 %vm983_vm0, %v971_v61  ;;  %v940_v52 = vmax.f32 %v908_v18, 0.0  ;;  %v910_v53 = vadd.f32 %v2614_v45, %v871_v46  ;;  %v873_v54 = vmul.f32 %v2592_v26, %v834_v47 }
  0x77   : > { %2137 = vmatmul.mubr.msk.f32.gmra.mxu1 %vm1305_vm1, %v932_v0  ;;  %v941_v55 = vmax.f32 %v909_v49, 0.0  ;;  %v911_v56 = vadd.f32 %v2614_v45, %v872_v50 }
  0x78   : > { %2139 = vmatprep.mubr.msk.f32.mxu1 %vm1305_vm1, %v933_v4  ;;  %v942_v57 = vmax.f32 %v910_v53, 0.0  ;;  %v912_v58 = vadd.f32 %v2614_v45, %v873_v54  ;;  %v2878_v45 = vld [vmem:[%s3041_s7] ss:$0 sm:$0xff] }
  0x79   : > { %2094 = vmatmul.mubr.msk.f32.gmra.mxu0 %vm983_vm0, %v972_v10  ;;  %v943_v59 = vmax.f32 %v911_v56, 0.0 }
  0x7a   : > { %2096 = vmatprep.mubr.msk.f32.mxu0 %vm983_vm0, %v973_v19  ;;  %v944_v60 = vmax.f32 %v912_v58, 0.0 }
  0x7b   : > { %2140 = vmatmul.mubr.msk.f32.gmra.mxu1 %vm1305_vm1, %v934_v13 }
  0x7c   : > { %2142 = vmatprep.mubr.msk.f32.mxu1 %vm1305_vm1, %v935_v24 }
  0x7d   : > { %2097 = vmatmul.mubr.msk.f32.gmra.mxu0 %vm983_vm0, %v974_v31 }
  0x7e   : > { %2099 = vmatprep.mubr.msk.f32.mxu0 %vm983_vm0, %v975_v34 }
  0x7f   : > { %2143 = vmatmul.mubr.msk.f32.gmra.mxu1 %vm1305_vm1, %v936_v32 }
  0x80   : > { %2145 = vmatprep.mubr.msk.f32.mxu1 %vm1305_vm1, %v937_v39 }
  0x81   : > { %2100 = vmatmul.mubr.msk.f32.gmra.mxu0 %vm983_vm0, %v976_v43 }
  0x82   : > { %2102 = vmatprep.mubr.msk.f32.mxu0 %vm983_vm0, %v977_v44 }
  0x83   : > { %2146 = vmatmul.mubr.msk.f32.gmra.mxu1 %vm1305_vm1, %v938_v17 }
  0x84   : > { %2148 = vmatprep.mubr.msk.f32.mxu1 %vm1305_vm1, %v939_v48 }
  0x85   : > { %2103 = vmatmul.mubr.msk.f32.gmra.mxu0 %vm983_vm0, %v978_v51 }
  0x87   : > { %2149 = vmatmul.mubr.msk.f32.gmra.mxu1 %vm1305_vm1, %v940_v52 }
  0x88   : > { %2151 = vmatprep.mubr.msk.f32.mxu1 %vm1305_vm1, %v941_v55 }
  0x8b   : > { %2152 = vmatmul.mubr.msk.f32.gmra.mxu1 %vm1305_vm1, %v942_v57 }
  0x8c   : > { %2154 = vmatprep.mubr.msk.f32.mxu1 %vm1305_vm1, %v943_v59 }
  0x8f   : > { %2155 = vmatmul.mubr.msk.f32.gmra.mxu1 %vm1305_vm1, %v944_v60 }
 0x109   : > { %v2059_v26 = vpop.f32.mrf.mxu0 }
 0x10b   : > { %v1146_v61 = vpop.f32.mrf.mxu0 }
 0x10d   : > { %v2062_v62 = vpop.f32.mrf.mxu0 }
 0x10f   : > { %v1156_v63 = vpop.f32.mrf.mxu0 }
 0x111   : > { %v2065_v0 = vpop.f32.mrf.mxu0 }
 0x113   : > { %v1166_v1 = vpop.f32.mrf.mxu0  ;;  %v2111_v2 = vpop.f32.mrf.mxu1 }
 0x114   : > { %v1474_v3 = vadd.f32 %v2111_v2, %v2059_v26 }
 0x115   : > { %v2068_v4 = vpop.f32.mrf.mxu0  ;;  %v1468_v5 = vpop.f32.mrf.mxu1 }
 0x116   : > { %v1635_v6 = vadd.f32 %v2878_v45, %v1474_v3  ;;  %v1469_v7 = vadd.f32 %v1468_v5, %v1146_v61 }
 0x117   : > { %v1176_v8 = vpop.f32.mrf.mxu0  ;;  %v2114_v9 = vpop.f32.mrf.mxu1 }
 0x118   : > { %v1667_v10 = vmax.f32 %v1635_v6, 0.0  ;;  %v1634_v11 = vadd.f32 %v2878_v45, %v1469_v7  ;;  %v1484_v12 = vadd.f32 %v2114_v9, %v2062_v62 }
 0x119   : > { %v2071_v13 = vpop.f32.mrf.mxu0  ;;  %v1478_v14 = vpop.f32.mrf.mxu1 }
 0x11a   : > { %1700 = vst.msk [vmem:[%s2883_s24 + $0x8] sm:$0xff] %vm1698_vm2, %v1667_v10  ;;  %v1666_v15 = vmax.f32 %v1634_v11, 0.0  ;;  %v1637_v16 = vadd.f32 %v2878_v45, %v1484_v12  ;;  %v1479_v19 = vadd.f32 %v1478_v14, %v1156_v63 }
 0x11b   : > { %v1186_v20 = vpop.f32.mrf.mxu0  ;;  %v2117_v21 = vpop.f32.mrf.mxu1 }
 0x11c   : > { %1699 = vst.msk [vmem:[%s2883_s24] sm:$0xff] %vm1698_vm2, %v1666_v15  ;;  %v1669_v22 = vmax.f32 %v1637_v16, 0.0  ;;  %v1636_v23 = vadd.f32 %v2878_v45, %v1479_v19  ;;  %v1494_v24 = vadd.f32 %v2117_v21, %v2065_v0 }
 0x11d   : > { %v2074_v25 = vpop.f32.mrf.mxu0  ;;  %v1488_v27 = vpop.f32.mrf.mxu1 }
 0x11e   : > { %1702 = vst.msk [vmem:[%s2883_s24 + $0x18] sm:$0xff] %vm1698_vm2, %v1669_v22  ;;  %v1668_v28 = vmax.f32 %v1636_v23, 0.0  ;;  %v1639_v29 = vadd.f32 %v2878_v45, %v1494_v24  ;;  %v1489_v30 = vadd.f32 %v1488_v27, %v1166_v1 }
 0x11f   : > { %v1196_v31 = vpop.f32.mrf.mxu0  ;;  %v2120_v32 = vpop.f32.mrf.mxu1 }
 0x120   : > { %1701 = vst.msk [vmem:[%s2883_s24 + $0x10] sm:$0xff] %vm1698_vm2, %v1668_v28  ;;  %v1671_v33 = vmax.f32 %v1639_v29, 0.0  ;;  %v1638_v34 = vadd.f32 %v2878_v45, %v1489_v30  ;;  %v1504_v35 = vadd.f32 %v2120_v32, %v2068_v4 }
 0x121   : > { %v2077_v36 = vpop.f32.mrf.mxu0  ;;  %v1498_v37 = vpop.f32.mrf.mxu1 }
 0x122   : > { %1704 = vst.msk [vmem:[%s2883_s24 + $0x28] sm:$0xff] %vm1698_vm2, %v1671_v33  ;;  %v1670_v38 = vmax.f32 %v1638_v34, 0.0  ;;  %v1641_v39 = vadd.f32 %v2878_v45, %v1504_v35  ;;  %v1499_v40 = vadd.f32 %v1498_v37, %v1176_v8 }
 0x123   : > { %v1206_v41 = vpop.f32.mrf.mxu0  ;;  %v2123_v42 = vpop.f32.mrf.mxu1 }
 0x124   : > { %1703 = vst.msk [vmem:[%s2883_s24 + $0x20] sm:$0xff] %vm1698_vm2, %v1670_v38  ;;  %v1673_v43 = vmax.f32 %v1641_v39, 0.0  ;;  %v1640_v44 = vadd.f32 %v2878_v45, %v1499_v40  ;;  %v1514_v17 = vadd.f32 %v2123_v42, %v2071_v13 }
 0x125   : > { %v2080_v18 = vpop.f32.mrf.mxu0  ;;  %v1508_v46 = vpop.f32.mrf.mxu1 }
 0x126   : > { %1706 = vst.msk [vmem:[%s2883_s24 + $0x38] sm:$0xff] %vm1698_vm2, %v1673_v43  ;;  %v1672_v47 = vmax.f32 %v1640_v44, 0.0  ;;  %v1643_v48 = vadd.f32 %v2878_v45, %v1514_v17  ;;  %v1509_v49 = vadd.f32 %v1508_v46, %v1186_v20 }
 0x127   : > { %v1216_v50 = vpop.f32.mrf.mxu0  ;;  %v2126_v51 = vpop.f32.mrf.mxu1 }
 0x128   : > { %1705 = vst.msk [vmem:[%s2883_s24 + $0x30] sm:$0xff] %vm1698_vm2, %v1672_v47  ;;  %v1675_v52 = vmax.f32 %v1643_v48, 0.0  ;;  %v1642_v53 = vadd.f32 %v2878_v45, %v1509_v49  ;;  %v1524_v54 = vadd.f32 %v2126_v51, %v2074_v25 }
 0x129   : > { %v2083_v55 = vpop.f32.mrf.mxu0  ;;  %v1518_v56 = vpop.f32.mrf.mxu1 }
 0x12a   : > { %1708 = vst.msk [vmem:[%s2883_s24 + $0x48] sm:$0xff] %vm1698_vm2, %v1675_v52  ;;  %v1674_v57 = vmax.f32 %v1642_v53, 0.0  ;;  %v1645_v58 = vadd.f32 %v2878_v45, %v1524_v54  ;;  %v1519_v59 = vadd.f32 %v1518_v56, %v1196_v31 }
 0x12b   : > { %v1226_v60 = vpop.f32.mrf.mxu0  ;;  %v2129_v26 = vpop.f32.mrf.mxu1 }
 0x12c   : > { %1707 = vst.msk [vmem:[%s2883_s24 + $0x40] sm:$0xff] %vm1698_vm2, %v1674_v57  ;;  %v1677_v61 = vmax.f32 %v1645_v58, 0.0  ;;  %v1644_v62 = vadd.f32 %v2878_v45, %v1519_v59  ;;  %v1534_v63 = vadd.f32 %v2129_v26, %v2077_v36 }
 0x12d   : > { %v2086_v0 = vpop.f32.mrf.mxu0  ;;  %v1528_v1 = vpop.f32.mrf.mxu1 }
 0x12e   : > { %1710 = vst.msk [vmem:[%s2883_s24 + $0x58] sm:$0xff] %vm1698_vm2, %v1677_v61  ;;  %v1676_v2 = vmax.f32 %v1644_v62, 0.0  ;;  %v1647_v3 = vadd.f32 %v2878_v45, %v1534_v63  ;;  %v1529_v4 = vadd.f32 %v1528_v1, %v1206_v41 }
 0x12f   : > { %v1236_v5 = vpop.f32.mrf.mxu0  ;;  %v2132_v6 = vpop.f32.mrf.mxu1 }
 0x130   : > { %1709 = vst.msk [vmem:[%s2883_s24 + $0x50] sm:$0xff] %vm1698_vm2, %v1676_v2  ;;  %v1679_v7 = vmax.f32 %v1647_v3, 0.0  ;;  %v1646_v8 = vadd.f32 %v2878_v45, %v1529_v4  ;;  %v1544_v9 = vadd.f32 %v2132_v6, %v2080_v18 }
 0x131   : > { %v2089_v10 = vpop.f32.mrf.mxu0  ;;  %v1538_v11 = vpop.f32.mrf.mxu1 }
 0x132   : > { %1712 = vst.msk [vmem:[%s2883_s24 + $0x68] sm:$0xff] %vm1698_vm2, %v1679_v7  ;;  %v1678_v12 = vmax.f32 %v1646_v8, 0.0  ;;  %v1649_v13 = vadd.f32 %v2878_v45, %v1544_v9  ;;  %v1539_v14 = vadd.f32 %v1538_v11, %v1216_v50 }
 0x133   : > { %v1246_v15 = vpop.f32.mrf.mxu0  ;;  %v2135_v16 = vpop.f32.mrf.mxu1 }
 0x134   : > { %1711 = vst.msk [vmem:[%s2883_s24 + $0x60] sm:$0xff] %vm1698_vm2, %v1678_v12  ;;  %v1681_v19 = vmax.f32 %v1649_v13, 0.0  ;;  %v1648_v20 = vadd.f32 %v2878_v45, %v1539_v14  ;;  %v1554_v21 = vadd.f32 %v2135_v16, %v2083_v55 }
 0x135   : > { %v2092_v22 = vpop.f32.mrf.mxu0  ;;  %v1548_v23 = vpop.f32.mrf.mxu1 }
 0x136   : > { %1714 = vst.msk [vmem:[%s2883_s24 + $0x78] sm:$0xff] %vm1698_vm2, %v1681_v19  ;;  %v1680_v24 = vmax.f32 %v1648_v20, 0.0  ;;  %v1651_v25 = vadd.f32 %v2878_v45, %v1554_v21  ;;  %v1549_v27 = vadd.f32 %v1548_v23, %v1226_v60 }
 0x137   : > { %v1256_v28 = vpop.f32.mrf.mxu0  ;;  %v2138_v29 = vpop.f32.mrf.mxu1 }
 0x138   : > { %1713 = vst.msk [vmem:[%s2883_s24 + $0x70] sm:$0xff] %vm1698_vm2, %v1680_v24  ;;  %v1683_v30 = vmax.f32 %v1651_v25, 0.0  ;;  %v1650_v31 = vadd.f32 %v2878_v45, %v1549_v27  ;;  %v1564_v32 = vadd.f32 %v2138_v29, %v2086_v0 }
 0x139   : > { %v2095_v33 = vpop.f32.mrf.mxu0  ;;  %v1558_v34 = vpop.f32.mrf.mxu1 }
 0x13a   : > { %1716 = vst.msk [vmem:[%s2883_s24 + $0x88] sm:$0xff] %vm1698_vm2, %v1683_v30  ;;  %v1682_v35 = vmax.f32 %v1650_v31, 0.0  ;;  %v1653_v36 = vadd.f32 %v2878_v45, %v1564_v32  ;;  %v1559_v37 = vadd.f32 %v1558_v34, %v1236_v5 }
 0x13b   : > { %v1266_v38 = vpop.f32.mrf.mxu0  ;;  %v2141_v39 = vpop.f32.mrf.mxu1 }
 0x13c   : > { %1715 = vst.msk [vmem:[%s2883_s24 + $0x80] sm:$0xff] %vm1698_vm2, %v1682_v35  ;;  %v1685_v40 = vmax.f32 %v1653_v36, 0.0  ;;  %v1652_v41 = vadd.f32 %v2878_v45, %v1559_v37  ;;  %v1574_v42 = vadd.f32 %v2141_v39, %v2089_v10 }
 0x13d   : > { %v1568_v43 = vpop.f32.mrf.mxu1  ;;  %v2098_v44 = vpop.f32.mrf.mxu0 }
 0x13e   : > { %1718 = vst.msk [vmem:[%s2883_s24 + $0x98] sm:$0xff] %vm1698_vm2, %v1685_v40  ;;  %v1684_v17 = vmax.f32 %v1652_v41, 0.0  ;;  %v1655_v18 = vadd.f32 %v2878_v45, %v1574_v42  ;;  %v1569_v46 = vadd.f32 %v1568_v43, %v1246_v15 }
 0x13f   : > { %v2144_v47 = vpop.f32.mrf.mxu1  ;;  %v1276_v52 = vpop.f32.mrf.mxu0 }
 0x140   : > { %1717 = vst.msk [vmem:[%s2883_s24 + $0x90] sm:$0xff] %vm1698_vm2, %v1684_v17  ;;  %v1687_v48 = vmax.f32 %v1655_v18, 0.0  ;;  %v1654_v49 = vadd.f32 %v2878_v45, %v1569_v46  ;;  %v1584_v50 = vadd.f32 %v2144_v47, %v2092_v22 }
 0x141   : > { %v1578_v51 = vpop.f32.mrf.mxu1  ;;  %v2101_v26 = vpop.f32.mrf.mxu0 }
 0x142   : > { %1720 = vst.msk [vmem:[%s2883_s24 + $0xa8] sm:$0xff] %vm1698_vm2, %v1687_v48  ;;  %v1686_v53 = vmax.f32 %v1654_v49, 0.0  ;;  %v1657_v54 = vadd.f32 %v2878_v45, %v1584_v50  ;;  %v1579_v55 = vadd.f32 %v1578_v51, %v1256_v28 }
 0x143   : > { %v2147_v56 = vpop.f32.mrf.mxu1  ;;  %v1286_v5 = vpop.f32.mrf.mxu0 }
 0x144   : > { %1719 = vst.msk [vmem:[%s2883_s24 + $0xa0] sm:$0xff] %vm1698_vm2, %v1686_v53  ;;  %v1689_v57 = vmax.f32 %v1657_v54, 0.0  ;;  %v1656_v58 = vadd.f32 %v2878_v45, %v1579_v55  ;;  %v1594_v59 = vadd.f32 %v2147_v56, %v2095_v33 }
 0x145   : > { %v1588_v60 = vpop.f32.mrf.mxu1  ;;  %v2104_v13 = vpop.f32.mrf.mxu0 }
 0x146   : > { %1722 = vst.msk [vmem:[%s2883_s24 + $0xb8] sm:$0xff] %vm1698_vm2, %v1689_v57  ;;  %v1688_v61 = vmax.f32 %v1656_v58, 0.0  ;;  %v1659_v62 = vadd.f32 %v2878_v45, %v1594_v59  ;;  %v1589_v63 = vadd.f32 %v1588_v60, %v1266_v38 }
 0x147   : > { %v2150_v0 = vpop.f32.mrf.mxu1  ;;  %v1296_v24 = vpop.f32.mrf.mxu0 }
 0x148   : > { %1721 = vst.msk [vmem:[%s2883_s24 + $0xb0] sm:$0xff] %vm1698_vm2, %v1688_v61  ;;  %v1691_v1 = vmax.f32 %v1659_v62, 0.0  ;;  %v1658_v2 = vadd.f32 %v2878_v45, %v1589_v63  ;;  %v1604_v3 = vadd.f32 %v2150_v0, %v2098_v44 }
 0x149   : > { %v1598_v4 = vpop.f32.mrf.mxu1 }
 0x14a   : > { %1724 = vst.msk [vmem:[%s2883_s24 + $0xc8] sm:$0xff] %vm1698_vm2, %v1691_v1  ;;  %v1690_v6 = vmax.f32 %v1658_v2, 0.0  ;;  %v1661_v7 = vadd.f32 %v2878_v45, %v1604_v3  ;;  %v1599_v8 = vadd.f32 %v1598_v4, %v1276_v52 }
 0x14b   : > { %v2153_v9 = vpop.f32.mrf.mxu1 }
 0x14c   : > { %1723 = vst.msk [vmem:[%s2883_s24 + $0xc0] sm:$0xff] %vm1698_vm2, %v1690_v6  ;;  %v1693_v10 = vmax.f32 %v1661_v7, 0.0  ;;  %v1660_v11 = vadd.f32 %v2878_v45, %v1599_v8  ;;  %v1614_v12 = vadd.f32 %v2153_v9, %v2101_v26 }
 0x14d   : > { %v1608_v14 = vpop.f32.mrf.mxu1 }
 0x14e   : > { %1726 = vst.msk [vmem:[%s2883_s24 + $0xd8] sm:$0xff] %vm1698_vm2, %v1693_v10  ;;  %v1692_v15 = vmax.f32 %v1660_v11, 0.0  ;;  %v1663_v16 = vadd.f32 %v2878_v45, %v1614_v12  ;;  %v1609_v19 = vadd.f32 %v1608_v14, %v1286_v5 }
 0x14f   : > { %v2156_v20 = vpop.f32.mrf.mxu1 }
 0x150   : > { %1725 = vst.msk [vmem:[%s2883_s24 + $0xd0] sm:$0xff] %vm1698_vm2, %v1692_v15  ;;  %v1695_v21 = vmax.f32 %v1663_v16, 0.0  ;;  %v1662_v22 = vadd.f32 %v2878_v45, %v1609_v19  ;;  %v1624_v23 = vadd.f32 %v2156_v20, %v2104_v13 }
 0x151   : > { %v1618_v25 = vpop.f32.mrf.mxu1 }
 0x152   : > { %1728 = vst.msk [vmem:[%s2883_s24 + $0xe8] sm:$0xff] %vm1698_vm2, %v1695_v21  ;;  %v1694_v27 = vmax.f32 %v1662_v22, 0.0  ;;  %v1665_v28 = vadd.f32 %v2878_v45, %v1624_v23  ;;  %v1619_v29 = vadd.f32 %v1618_v25, %v1296_v24 }
 0x154   : > { %1727 = vst.msk [vmem:[%s2883_s24 + $0xe0] sm:$0xff] %vm1698_vm2, %v1694_v27  ;;  %v1697_v30 = vmax.f32 %v1665_v28, 0.0  ;;  %v1664_v31 = vadd.f32 %v2878_v45, %v1619_v29 }
 0x156   : > { %1730 = vst.msk [vmem:[%s2883_s24 + $0xf8] sm:$0xff] %vm1698_vm2, %v1697_v30  ;;  %v1696_v32 = vmax.f32 %v1664_v31, 0.0 }
 0x158   : > { %1729 = vst.msk [vmem:[%s2883_s24 + $0xf0] sm:$0xff] %vm1698_vm2, %v1696_v32 }
 0x159   : > { %2227 = shalt.err (!%p2224_p8)
}
 0x15a   : > { %s2228_s22 = scalar_lea.hbm %s2980_s12, 4096  ;;  %s2232_s26 = scalar_lea.hbm %s3042_s8, 8192 }
 0x15b   : > { %p2229_p11 = scmp.ne.s32.totalorder %s2980_s12, %s2228_s22  ;;  %p2233_p0 = scmp.lt.s32.totalorder %s2980_s12, %s3042_s8 }
 0x15c   : > { %p2234_p1 = scmp.lt.s32.totalorder %s2232_s26, %s2228_s22 }
 0x15d   : > { %p2230_p12 = pnand %p2229_p11, %p2379_p5 }
 0x15e   : > { %p2235_p2 = por %p2234_p1, %p2233_p0 }
 0x15f   : > { %p2231_p13 = pneg %p2230_p12 }
 0x161   : > { %p2236_p3 = pnand %p2235_p2, %p2231_p13 }
 0x163   : > { %2239 = shalt.err (!%p2236_p3)
}
 0x164   : > { %s2293_s14 = smov 128   ;;  %s2294_s20 = smov 8  }
 0x165   : > { %2157 = dma.vmem_to_hbm [thread:$0]  (%p2379_p5), %s2982_s11, 4096, %s2980_s12, %s1732_s30, %s2293_s14, %s2293_s14, %s2294_s20  }
 0x166 PF: > { %s1762_s21 = sand.u32 1, %s2270_s27   ;;  %p2160_p4 = pnand %p1862_p10, %p2390_p9 }
 0x167   : > { %s1763_s22 = scalar_lea.sflag [#allocation4], %s1762_s21 }
 0x168   : > { %p2161_p6 = pneg %p2160_p4 }
 0x16a   : > { %2265 = dma.done.wait (%p2161_p6), %s1763_s22, 4096  }
 0x16b   : > { %2267 = vsyncadd (%p2161_p6), %s1763_s22, 4294963200  ;;  %s21_s10 = sadd.s32 1, %s2290_s10   ;;  %s3045_s27 = smov %s2274_s28 }
 0x16c   : > { %p18_p7 = scmp.ge.s32.totalorder %s21_s10, 4   ;;  %s3046_s28 = smov %s2278_s29 }
 0x16d   : > { %s3047_s29 = smov %s2388_s17  ;;  %s3048_s30 = smov %s2286_s9 }
 0x16e   : > { %s3049_s9 = smov %s3051_s13  ;;  %20 = sbr.rel (!%p18_p7) target bundleno = 4 (0x4), region = 137 }
 0x173   :  { %1768 = vsyncpa [#allocation4], 1 }
 0x174   :  { %1770 = vsyncpa [#allocation4 + $0x1], 1 }

// kernel: bottleneck_forward.8
= control target key start
LH: loop header
LB: loop body
LE: loop exit
PB: predicated region body
PF: predicated region fallthrough
CT: control target
= control target key end

     0   :  { %s8147_s12 = smov 0   ;;  %s11990_s0 = inlined_call_operand.vmem [shape: f32[2,18,18,16], index: 0, kind: input, shape index: {}]   ;;  %s11991_s1 = inlined_call_operand.vmem [shape: f32[18,8,8], index: 1, kind: input, shape index: {}]   ;;  %s11992_s2 = inlined_call_operand.vmem [shape: f32[1,16], index: 2, kind: input, shape index: {}]   ;;  %s11993_s3 = inlined_call_operand.vmem [shape: f32[2,256,16], index: 3, kind: output, shape index: {}]  }
   0x1 LB: > { %s5962_s13 = sadd.s32 4294967295, %s8123_s12   ;;  %p5966_p0 = scmp.ge.s32.totalorder %s8123_s12, 1  ;;  %s8123_s12 = sphi %s8147_s12, %s13_s12  }
   0x2   : > { %p137_p1 = scmp.lt.s32.totalorder %s8123_s12, 3 }
   0x4   : > { %p138_p2 = pnand %p5966_p0, %p137_p1 }
   0x6   : > { %141 = sbr.rel (%p138_p2) target bundleno = 1024 (0x400), region = 32 }
   0xb   : > { %p161_p3 = scmp.lt.s32.totalorder %s5962_s13, 1  ;;  %v225_v0 = vld [vmem:[%s11991_s1] sm:$0xff]  ;;  %v5971_v1 = vld [vmem:[%s11991_s1 + $0x10] sm:$0xff]  ;;  %v5970_v2 = vld [vmem:[%s11991_s1 + $0x8] sm:$0xff]  ;;  %vm359_vm0 = vcmask 64512   ;;  %vm276_vm1 = vcmask 1046528  }
   0xc   : > { %7211 = vmatprep.subr.mxu1 %v225_v0  ;;  %7161 = vmatprep.subr.mxu0 %v5971_v1  ;;  %s8125_s24 = smov 120   ;;  %vm1646_vm2 = vcmask 1045504   ;;  %vm5874_vm3 = vcmask 130048  }
   0xd   : > { %s13122_s13 = smov (!%p161_p3, %s5962_s13), 1  ;;  %7212 = vmatpush3.msra.mxu1 %v225_v0  ;;  %7162 = vmatpush3.msra.mxu0 %v5971_v1 }
   0xe   : > { %7311 = vmatprep.subr.mxu1 %v5970_v2  ;;  %s8061_s20 = smul.u32 432, %s13122_s13  ;;  %s6566_s6 = sshll.u32 %s13122_s13, 8 }
   0xf   : > { %s11772_s13 = scalar_lea.vmem %s11993_s3, %s6566_s6 }
  0x10   : > { %s8170_s23 = scalar_lea.vmem %s11990_s0, %s8061_s20 }
  0x11   : > { %v171_v3 = vld [vmem:[%s8170_s23] sm:$0xff]  ;;  %v8174_v4 = vld [vmem:[%s8170_s23 + $0x18] sm:$0xff]  ;;  %v8177_v5 = vld [vmem:[%s8170_s23 + $0x8] sm:$0xff] }
  0x12   : > { %1293 = vrot.lane.b32.xlu0 %v171_v3, %s8125_s24  ;;  %1297 = vrot.lane.b32.xlu1 %v8174_v4, %s8125_s24  ;;  %v277_v6 = vrot.slane %v171_v3, 1  ;;  %v278_v7 = vrot.slane %v8177_v5, 1  ;;  %v1647_v8 = vrot.slane %v171_v3, 2  ;;  %v8184_v9 = vld [vmem:[%s8170_s23 + $0x20] sm:$0xff]  ;;  %v11994_v10 = vrot.slane %v8177_v5, 2  ;;  %v8207_v13 = vld [vmem:[%s8170_s23 + $0x30] sm:$0xff] }
  0x13   : > { %7213 = vmatprep.mubr.msk.f32.mxu1 %vm359_vm0, %v171_v3  ;;  %v8210_v14 = vld [vmem:[%s8170_s23 + $0x38] sm:$0xff]  ;;  %v8221_v15 = vld [vmem:[%s8170_s23 + $0x48] sm:$0xff]  ;;  %v8224_v16 = vld [vmem:[%s8170_s23 + $0x50] sm:$0xff]  ;;  %v282_v20 = vrot.slane %v8174_v4, 1  ;;  %v283_v21 = vrot.slane %v8184_v9, 1  ;;  %v287_v28 = vrot.slane %v8207_v13, 1 }
  0x14   : > { %7214 = vmatmul.mubr.msk.f32.vlgmr.msra.gmra.mxu1 %vm359_vm0, %v8177_v5  ;;  %v8191_v11 = vsel %vm276_vm1, %v277_v6, %v278_v7  ;;  %v8198_v12 = vsel %vm1646_vm2, %v1647_v8, %v11994_v10  ;;  %v8227_v17 = vld [vmem:[%s8170_s23 + $0x10] sm:$0x3]  ;;  %v8235_v19 = vld [vmem:[%s8170_s23 + $0x28] sm:$0x3]  ;;  %v8244_v22 = vld [vmem:[%s8170_s23 + $0x60] sm:$0xff]  ;;  %v288_v29 = vrot.slane %v8210_v14, 1 }
  0x15   : > { %7216 = vmatprep.mubr.msk.f32.mxu1 %vm359_vm0, %v8174_v4  ;;  %7163 = vmatprep.mubr.msk.f32.mxu0 %vm359_vm0, %v8191_v11  ;;  %v280_v18 = vrot.slane %v8227_v17, 1  ;;  %v8247_v23 = vld [vmem:[%s8170_s23 + $0x68] sm:$0xff]  ;;  %v285_v25 = vrot.slane %v8235_v19, 1  ;;  %v8258_v26 = vld [vmem:[%s8170_s23 + $0x40] sm:$0x3]  ;;  %v8267_v27 = vsel %vm276_vm1, %v282_v20, %v283_v21  ;;  %v8272_v30 = vld [vmem:[%s8170_s23 + $0x78] sm:$0xff] }
  0x16   : > { %1295 = vrot.lane.b32.xlu0 %v8177_v5, %s8125_s24  ;;  %1299 = vrot.lane.b32.xlu1 %v8184_v9, %s8125_s24  ;;  %12298 = vst [vmem:[#allocation2_spill] sm:$0xff] %v8267_v27  ;;  %v8275_v31 = vld [vmem:[%s8170_s23 + $0x80] sm:$0xff]  ;;  %v290_v33 = vrot.slane %v8258_v26, 1  ;;  %v8288_v34 = vld [vmem:[%s8170_s23 + $0x58] sm:$0x3]  ;;  %v8297_v35 = vsel %vm276_vm1, %v287_v28, %v288_v29  ;;  %v292_v36 = vrot.slane %v8221_v15, 1 }
  0x17   : > { %7312 = vmatpush3.msra.mxu1 %v5970_v2  ;;  %v8250_v24 = vsel %vm276_vm1, %v278_v7, %v280_v18  ;;  %v8280_v32 = vsel %vm276_vm1, %v283_v21, %v285_v25  ;;  %12300 = vst [vmem:[#allocation4_spill] sm:$0xff] %v8297_v35  ;;  %v293_v37 = vrot.slane %v8224_v16, 1  ;;  %v8302_v38 = vld [vmem:[%s8170_s23 + $0x90] sm:$0xff]  ;;  %v8305_v39 = vld [vmem:[%s8170_s23 + $0x98] sm:$0xff]  ;;  %v295_v41 = vrot.slane %v8288_v34, 1  ;;  %v8332_v46 = vld [vmem:[%s8170_s23 + $0xa8] sm:$0xff] }
  0x18   : > { %7217 = vmatmul.mubr.msk.f32.gmra.mxu1 %vm359_vm0, %v8184_v9  ;;  %7164 = vmatmul.mubr.msk.f32.vlgmr.msra.gmra.mxu0 %vm359_vm0, %v8250_v24  ;;  %12299 = vst [vmem:[#allocation3_spill] sm:$0xff] %v8280_v32  ;;  %v8312_v40 = vsel %vm276_vm1, %v288_v29, %v290_v33  ;;  %v8318_v42 = vld [vmem:[%s8170_s23 + $0x70] sm:$0x3]  ;;  %v297_v44 = vrot.slane %v8244_v22, 1  ;;  %v298_v45 = vrot.slane %v8247_v23, 1  ;;  %v302_v52 = vrot.slane %v8272_v30, 1 }
  0x19   : > { %7219 = vmatprep.mubr.msk.f32.mxu1 %vm359_vm0, %v8207_v13  ;;  %7166 = vmatprep.mubr.msk.f32.mxu0 %vm359_vm0, %v8267_v27  ;;  %12301 = vst [vmem:[#allocation5_spill] sm:$0xff] %v8312_v40  ;;  %v8327_v43 = vsel %vm276_vm1, %v292_v36, %v293_v37  ;;  %v8335_v47 = vld [vmem:[%s8170_s23 + $0xb0] sm:$0xff]  ;;  %v8342_v48 = vsel %vm276_vm1, %v293_v37, %v295_v41  ;;  %v300_v49 = vrot.slane %v8318_v42, 1  ;;  %v8348_v50 = vld [vmem:[%s8170_s23 + $0x88] sm:$0x3]  ;;  %v303_v53 = vrot.slane %v8275_v31, 1 }
  0x1a   : > { %1301 = vrot.lane.b32.xlu0 %v8207_v13, %s8125_s24  ;;  %1303 = vrot.lane.b32.xlu1 %v8210_v14, %s8125_s24  ;;  %12302 = vst [vmem:[#allocation6_spill] sm:$0xff] %v8327_v43  ;;  %12303 = vst [vmem:[#allocation7_spill] sm:$0xff] %v8342_v48  ;;  %v8357_v51 = vsel %vm276_vm1, %v297_v44, %v298_v45  ;;  %v8362_v54 = vld [vmem:[%s8170_s23 + $0xc0] sm:$0xff]  ;;  %v8365_v55 = vld [vmem:[%s8170_s23 + $0xc8] sm:$0xff]  ;;  %v305_v57 = vrot.slane %v8348_v50, 1  ;;  %v307_v60 = vrot.slane %v8302_v38, 1 }
  0x1b   : > { %12304 = vst [vmem:[#allocation8_spill] sm:$0xff] %v8357_v51  ;;  %v8372_v56 = vsel %vm276_vm1, %v298_v45, %v300_v49  ;;  %v8378_v58 = vld [vmem:[%s8170_s23 + $0xa0] sm:$0x3]  ;;  %v8387_v59 = vsel %vm276_vm1, %v302_v52, %v303_v53  ;;  %v308_v61 = vrot.slane %v8305_v39, 1  ;;  %v8392_v62 = vld [vmem:[%s8170_s23 + $0xd8] sm:$0xff]  ;;  %v312_v6 = vrot.slane %v8332_v46, 1 }
  0x1c   : > { %7220 = vmatmul.mubr.msk.f32.gmra.mxu1 %vm359_vm0, %v8210_v14  ;;  %7167 = vmatmul.mubr.msk.f32.gmra.mxu0 %vm359_vm0, %v8280_v32  ;;  %12305 = vst [vmem:[#allocation9_spill] sm:$0xff] %v8372_v56  ;;  %12306 = vst [vmem:[#allocation10_spill] sm:$0xff] %v8387_v59  ;;  %v8395_v63 = vld [vmem:[%s8170_s23 + $0xe0] sm:$0xff]  ;;  %v8402_v0 = vsel %vm276_vm1, %v303_v53, %v305_v57  ;;  %v310_v1 = vrot.slane %v8378_v58, 1  ;;  %v8408_v2 = vld [vmem:[%s8170_s23 + $0xb8] sm:$0x3] }
  0x1d   : > { %7222 = vmatprep.mubr.msk.f32.mxu1 %vm359_vm0, %v8221_v15  ;;  %7169 = vmatprep.mubr.msk.f32.mxu0 %vm359_vm0, %v8297_v35  ;;  %12307 = vst [vmem:[#allocation11_spill] sm:$0xff] %v8392_v62  ;;  %12308 = vst [vmem:[#allocation12_spill] sm:$0xff] %v8395_v63  ;;  %v8417_v3 = vsel %vm276_vm1, %v307_v60, %v308_v61  ;;  %v313_v7 = vrot.slane %v8335_v47, 1  ;;  %v8422_v8 = vld [vmem:[%s8170_s23 + $0xf0] sm:$0xff]  ;;  %v8425_v18 = vld [vmem:[%s8170_s23 + $0xf8] sm:$0xff]  ;;  %v315_v21 = vrot.slane %v8408_v2, 1 }
  0x1e   : > { %1305 = vrot.lane.b32.xlu0 %v8221_v15, %s8125_s24  ;;  %1307 = vrot.lane.b32.xlu1 %v8224_v16, %s8125_s24  ;;  %12309 = vst [vmem:[#allocation13_spill] sm:$0xff] %v8402_v0  ;;  %12310 = vst [vmem:[#allocation14_spill] sm:$0xff] %v8417_v3  ;;  %v8432_v20 = vsel %vm276_vm1, %v308_v61, %v310_v1  ;;  %v8438_v25 = vld [vmem:[%s8170_s23 + $0xd0] sm:$0x3]  ;;  %v317_v29 = vrot.slane %v8362_v54, 1  ;;  %v318_v33 = vrot.slane %v8365_v55, 1 }
  0x1f   : > { %12311 = vst [vmem:[#allocation15_spill] sm:$0xff] %v8422_v8  ;;  %12312 = vst [vmem:[#allocation16_spill] sm:$0xff] %v8425_v18  ;;  %v8447_v28 = vsel %vm276_vm1, %v312_v6, %v313_v7  ;;  %v8452_v36 = vld [vmem:[%s8170_s23 + $0x108] sm:$0xff]  ;;  %v8455_v37 = vld [vmem:[%s8170_s23 + $0x110] sm:$0xff]  ;;  %v8462_v41 = vsel %vm276_vm1, %v313_v7, %v315_v21  ;;  %v320_v44 = vrot.slane %v8438_v25, 1  ;;  %v322_v52 = vrot.slane %v8392_v62, 1 }
  0x20   : > { %7223 = vmatmul.mubr.msk.f32.gmra.mxu1 %vm359_vm0, %v8224_v16  ;;  %7170 = vmatmul.mubr.msk.f32.gmra.mxu0 %vm359_vm0, %v8312_v40  ;;  %12313 = vst [vmem:[#allocation17_spill] sm:$0xff] %v8432_v20  ;;  %12314 = vst [vmem:[#allocation18_spill] sm:$0xff] %v8447_v28  ;;  %v8468_v45 = vld [vmem:[%s8170_s23 + $0xe8] sm:$0x3]  ;;  %v8477_v49 = vsel %vm276_vm1, %v317_v29, %v318_v33  ;;  %v323_v53 = vrot.slane %v8395_v63, 1  ;;  %v8482_v57 = vld [vmem:[%s8170_s23 + $0x120] sm:$0xff] }
  0x21   : > { %7225 = vmatprep.mubr.msk.f32.mxu1 %vm359_vm0, %v8244_v22  ;;  %7172 = vmatprep.mubr.msk.f32.mxu0 %vm359_vm0, %v8327_v43  ;;  %12315 = vst [vmem:[#allocation19_spill] sm:$0xff] %v8452_v36  ;;  %12316 = vst [vmem:[#allocation20_spill] sm:$0xff] %v8455_v37  ;;  %v8485_v60 = vld [vmem:[%s8170_s23 + $0x128] sm:$0xff]  ;;  %v6036_v61 = vld [vmem:[%s11991_s1 + $0x18] sm:$0xff]  ;;  %v8495_v1 = vsel %vm276_vm1, %v318_v33, %v320_v44  ;;  %v325_v6 = vrot.slane %v8468_v45, 1  ;;  %v327_v29 = vrot.slane %v8422_v8, 1 }
  0x22   : > { %1309 = vrot.lane.b32.xlu0 %v8244_v22, %s8125_s24  ;;  %1311 = vrot.lane.b32.xlu1 %v8247_v23, %s8125_s24  ;;  %12317 = vst [vmem:[#allocation21_spill] sm:$0xff] %v8462_v41  ;;  %12318 = vst [vmem:[#allocation22_spill] sm:$0xff] %v8468_v45  ;;  %v8501_v7 = vld [vmem:[%s8170_s23 + $0x100] sm:$0x3]  ;;  %v8510_v21 = vsel %vm276_vm1, %v322_v52, %v323_v53  ;;  %v328_v33 = vrot.slane %v8425_v18, 1  ;;  %v8515_v44 = vld [vmem:[%s8170_s23 + $0x138] sm:$0xff] }
  0x23   : > { %12319 = vst [vmem:[#allocation23_spill] sm:$0xff] %v8477_v49  ;;  %12320 = vst [vmem:[#allocation24_spill] sm:$0xff] %v8482_v57  ;;  %7261 = vmatprep.subr.mxu0 %v6036_v61  ;;  %v8518_v10 = vld [vmem:[%s8170_s23 + $0x140] sm:$0xff]  ;;  %v8525_v52 = vsel %vm276_vm1, %v323_v53, %v325_v6  ;;  %v332_v6 = vrot.slane %v8452_v36, 1  ;;  %v8550_v45 = vld [vmem:[%s8170_s23 + $0x150] sm:$0xff] }
  0x24   : > { %7226 = vmatmul.mubr.msk.f32.gmra.mxu1 %vm359_vm0, %v8247_v23  ;;  %7173 = vmatmul.mubr.msk.f32.gmra.mxu0 %vm359_vm0, %v8342_v48  ;;  %12321 = vst [vmem:[#allocation25_spill] sm:$0xff] %v8485_v60  ;;  %12322 = vst [vmem:[#allocation26_spill] sm:$0xff] %v8495_v1  ;;  %v8545_v53 = vsel %vm276_vm1, %v327_v29, %v328_v33 }
  0x25   : > { %7228 = vmatprep.mubr.msk.f32.mxu1 %vm359_vm0, %v8272_v30  ;;  %7175 = vmatprep.mubr.msk.f32.mxu0 %vm359_vm0, %v8357_v51  ;;  %12323 = vst [vmem:[#allocation27_spill] sm:$0xff] %v8501_v7  ;;  %12324 = vst [vmem:[#allocation28_spill] sm:$0xff] %v8510_v21 }
  0x26   : > { %1313 = vrot.lane.b32.xlu0 %v8272_v30, %s8125_s24  ;;  %1315 = vrot.lane.b32.xlu1 %v8275_v31, %s8125_s24  ;;  %12325 = vst [vmem:[#allocation29_spill] sm:$0xff] %v8515_v44  ;;  %12326 = vst [vmem:[#allocation30_spill] sm:$0xff] %v8518_v10 }
  0x27   : > { %7262 = vmatpush3.msra.mxu0 %v6036_v61  ;;  %12327 = vst [vmem:[#allocation31_spill] sm:$0xff] %v8525_v52  ;;  %v8538_v61 = vld [vmem:[%s11991_s1 + $0x28] sm:$0xff]  ;;  %12329 = vst [vmem:[#allocation33_spill] sm:$0xff] %v8545_v53 }
  0x28   : > { %7229 = vmatmul.mubr.msk.f32.gmra.mxu1 %vm359_vm0, %v8275_v31  ;;  %7176 = vmatmul.mubr.msk.f32.gmra.mxu0 %vm359_vm0, %v8372_v56  ;;  %12330 = vst [vmem:[#allocation34_spill] sm:$0xff] %v8550_v45 }
  0x29   : > { %7231 = vmatprep.mubr.msk.f32.mxu1 %vm359_vm0, %v8302_v38  ;;  %7178 = vmatprep.mubr.msk.f32.mxu0 %vm359_vm0, %v8387_v59 }
  0x2a   : > { %1317 = vrot.lane.b32.xlu0 %v8302_v38, %s8125_s24  ;;  %1319 = vrot.lane.b32.xlu1 %v8305_v39, %s8125_s24 }
  0x2b   : > { %7411 = vmatprep.subr.mxu1 %v8538_v61 }
  0x2c   : > { %7232 = vmatmul.mubr.msk.f32.gmra.mxu1 %vm359_vm0, %v8305_v39  ;;  %7179 = vmatmul.mubr.msk.f32.gmra.mxu0 %vm359_vm0, %v8402_v0 }
  0x2d   : > { %7234 = vmatprep.mubr.msk.f32.mxu1 %vm359_vm0, %v8332_v46  ;;  %7181 = vmatprep.mubr.msk.f32.mxu0 %vm359_vm0, %v8417_v3 }
  0x2e   : > { %1321 = vrot.lane.b32.xlu0 %v8332_v46, %s8125_s24  ;;  %1323 = vrot.lane.b32.xlu1 %v8335_v47, %s8125_s24 }
  0x30   : > { %7235 = vmatmul.mubr.msk.f32.gmra.mxu1 %vm359_vm0, %v8335_v47  ;;  %7182 = vmatmul.mubr.msk.f32.gmra.mxu0 %vm359_vm0, %v8432_v20 }
  0x31   : > { %7237 = vmatprep.mubr.msk.f32.mxu1 %vm359_vm0, %v8362_v54  ;;  %7184 = vmatprep.mubr.msk.f32.mxu0 %vm359_vm0, %v8447_v28 }
  0x32   : > { %1325 = vrot.lane.b32.xlu0 %v8362_v54, %s8125_s24  ;;  %1327 = vrot.lane.b32.xlu1 %v8365_v55, %s8125_s24 }
  0x34   : > { %7238 = vmatmul.mubr.msk.f32.gmra.mxu1 %vm359_vm0, %v8365_v55  ;;  %7185 = vmatmul.mubr.msk.f32.gmra.mxu0 %vm359_vm0, %v8462_v41 }
  0x35   : > { %7240 = vmatprep.mubr.msk.f32.mxu1 %vm359_vm0, %v8392_v62  ;;  %7187 = vmatprep.mubr.msk.f32.mxu0 %vm359_vm0, %v8477_v49 }
  0x36   : > { %1329 = vrot.lane.b32.xlu0 %v8392_v62, %s8125_s24  ;;  %1331 = vrot.lane.b32.xlu1 %v8395_v63, %s8125_s24 }
  0x38   : > { %7241 = vmatmul.mubr.msk.f32.gmra.mxu1 %vm359_vm0, %v8395_v63  ;;  %7188 = vmatmul.mubr.msk.f32.gmra.mxu0 %vm359_vm0, %v8495_v1  ;;  %v8553_v63 = vld [vmem:[%s8170_s23 + $0x158] sm:$0xff] }
  0x39   : > { %7243 = vmatprep.mubr.msk.f32.mxu1 %vm359_vm0, %v8422_v8  ;;  %7190 = vmatprep.mubr.msk.f32.mxu0 %vm359_vm0, %v8510_v21  ;;  %12331 = vst [vmem:[#allocation35_spill] sm:$0xff] %v8553_v63 }
  0x3a   : > { %1333 = vrot.lane.b32.xlu0 %v8422_v8, %s8125_s24  ;;  %1335 = vrot.lane.b32.xlu1 %v8425_v18, %s8125_s24  ;;  %v330_v8 = vrot.slane %v8501_v7, 1  ;;  %v333_v7 = vrot.slane %v8455_v37, 1 }
  0x3c   : > { %7244 = vmatmul.mubr.msk.f32.gmra.mxu1 %vm359_vm0, %v8425_v18  ;;  %7191 = vmatmul.mubr.msk.f32.gmra.mxu0 %vm359_vm0, %v8525_v52  ;;  %v8533_v18 = vld [vmem:[%s8170_s23 + $0x118] sm:$0x3]  ;;  %v8561_v29 = vsel %vm276_vm1, %v328_v33, %v330_v8  ;;  %v337_v8 = vrot.slane %v8482_v57, 1  ;;  %v338_v33 = vrot.slane %v8485_v60, 1 }
  0x3d   : > { %7246 = vmatprep.mubr.msk.f32.mxu1 %vm359_vm0, %v8452_v36  ;;  %12328 = vst [vmem:[#allocation32_spill] sm:$0xff] %v8533_v18  ;;  %7193 = vmatprep.mubr.msk.f32.mxu0 %vm359_vm0, %v8545_v53  ;;  %12332 = vst [vmem:[#allocation36_spill] sm:$0xff] %v8561_v29  ;;  %v8576_v53 = vsel %vm276_vm1, %v332_v6, %v333_v7 }
  0x3e   : > { %1337 = vrot.lane.b32.xlu0 %v8452_v36, %s8125_s24  ;;  %1339 = vrot.lane.b32.xlu1 %v8455_v37, %s8125_s24  ;;  %v335_v36 = vrot.slane %v8533_v18, 1  ;;  %12334 = vst [vmem:[#allocation38_spill] sm:$0xff] %v8576_v53  ;;  %v8583_v18 = vld [vmem:[%s8170_s23 + $0x148] sm:$0x3] }
  0x3f   : > { %12335 = vst [vmem:[#allocation39_spill] sm:$0xff] %v8583_v18 }
  0x40   : > { %7247 = vmatmul.mubr.msk.f32.gmra.mxu1 %vm359_vm0, %v8455_v37  ;;  %7194 = vmatmul.mubr.msk.f32.gmra.mxu0 %vm359_vm0, %v8561_v29  ;;  %v8569_v37 = vld [vmem:[%s8170_s23 + $0x130] sm:$0x3]  ;;  %v8586_v29 = vld [vmem:[%s8170_s23 + $0x168] sm:$0xff]  ;;  %v8591_v62 = vsel %vm276_vm1, %v333_v7, %v335_v36  ;;  %v8605_v36 = vsel %vm276_vm1, %v337_v8, %v338_v33  ;;  %v345_v7 = vrot.slane %v8583_v18, 1  ;;  %v347_v8 = vrot.slane %v8550_v45, 1 }
  0x41   : > { %7249 = vmatprep.mubr.msk.f32.mxu1 %vm359_vm0, %v8482_v57  ;;  %12333 = vst [vmem:[#allocation37_spill] sm:$0xff] %v8569_v37  ;;  %7196 = vmatprep.mubr.msk.f32.mxu0 %vm359_vm0, %v8576_v53  ;;  %12336 = vst [vmem:[#allocation40_spill] sm:$0xff] %v8591_v62  ;;  %v340_v6 = vrot.slane %v8569_v37, 1  ;;  %v348_v18 = vrot.slane %v8553_v63, 1 }
  0x42   : > { %1341 = vrot.lane.b32.xlu0 %v8482_v57, %s8125_s24  ;;  %1343 = vrot.lane.b32.xlu1 %v8485_v60, %s8125_s24  ;;  %v342_v57 = vrot.slane %v8515_v44, 1  ;;  %12337 = vst [vmem:[#allocation41_spill] sm:$0xff] %v8605_v36 }
  0x44   : > { %7250 = vmatmul.mubr.msk.f32.gmra.mxu1 %vm359_vm0, %v8485_v60  ;;  %v343_v60 = vrot.slane %v8518_v10, 1  ;;  %7197 = vmatmul.mubr.msk.f32.gmra.mxu0 %vm359_vm0, %v8591_v62 }
  0x45   : > { %7252 = vmatprep.mubr.msk.f32.mxu1 %vm359_vm0, %v8515_v44  ;;  %7199 = vmatprep.mubr.msk.f32.mxu0 %vm359_vm0, %v8605_v36 }
  0x46   : > { %1345 = vrot.lane.b32.xlu0 %v8515_v44, %s8125_s24  ;;  %1347 = vrot.lane.b32.xlu1 %v8518_v10, %s8125_s24  ;;  %v8609_v44 = vld [vmem:[%s8170_s23 + $0x170] sm:$0xff]  ;;  %v8633_v37 = vsel %vm276_vm1, %v343_v60, %v345_v7  ;;  %v12344_v7 = vrot.slane %v8177_v5, 2 }
  0x47   : > { %12338 = vst [vmem:[#allocation42_spill] sm:$0xff] %v8609_v44  ;;  %12341 = vst [vmem:[#allocation45_spill] sm:$0xff] %v8633_v37 }
  0x48   : > { %7253 = vmatmul.mubr.msk.f32.gmra.mxu1 %vm359_vm0, %v8518_v10  ;;  %v8614_v10 = vld [vmem:[%s8170_s23 + $0x160] sm:$0x3] }
  0x49   : > { %7255 = vmatprep.mubr.msk.f32.mxu1 %vm359_vm0, %v8550_v45 }
  0x4a   : > { %1349 = vrot.lane.b32.xlu0 %v8550_v45, %s8125_s24  ;;  %1351 = vrot.lane.b32.xlu1 %v8553_v63, %s8125_s24  ;;  %v352_v45 = vrot.slane %v8586_v29, 1 }
  0x4c   : > { %7256 = vmatmul.mubr.msk.f32.gmra.mxu1 %vm359_vm0, %v8553_v63  ;;  %v8643_v63 = vsel %vm276_vm1, %v347_v8, %v348_v18 }
  0x4d   : > { %7258 = vmatprep.mubr.msk.f32.mxu1 %vm359_vm0, %v8586_v29  ;;  %12342 = vst [vmem:[#allocation46_spill] sm:$0xff] %v8643_v63 }
  0x4e   : > { %940 = vrot.lane.b32.xlu0 %v8191_v11, %s8125_s24  ;;  %942 = vrot.lane.b32.xlu1 %v8250_v24, %s8125_s24  ;;  %v8619_v11 = vsel %vm276_vm1, %v338_v33, %v340_v6  ;;  %v8622_v24 = vsel %vm276_vm1, %v342_v57, %v343_v60  ;;  %v350_v33 = vrot.slane %v8614_v10, 1  ;;  %v1650_v57 = vrot.slane %v8227_v17, 2  ;;  %v8640_v6 = vld [vmem:[%s8170_s23 + $0x178] sm:$0x3] }
  0x4f   : > { %12339 = vst [vmem:[#allocation43_spill] sm:$0xff] %v8619_v11  ;;  %12340 = vst [vmem:[#allocation44_spill] sm:$0xff] %v8622_v24  ;;  %7200 = vmatmul.mubr.msk.f32.gmra.mxu0 %vm359_vm0, %v8619_v11  ;;  %v353_v11 = vrot.slane %v8609_v44, 1  ;;  %v355_v60 = vrot.slane %v8640_v6, 1 }
  0x50   : > { %7259 = vmatmul.mubr.msk.f32.gmra.mxu1 %vm359_vm0, %v8609_v44  ;;  %7202 = vmatprep.mubr.msk.f32.mxu0 %vm359_vm0, %v8622_v24  ;;  %v8654_v17 = vsel %vm276_vm1, %v348_v18, %v350_v33  ;;  %v8660_v8 = vsel %vm1646_vm2, %v12344_v7, %v1650_v57  ;;  %v1652_v18 = vrot.slane %v8174_v4, 2  ;;  %v1653_v33 = vrot.slane %v8184_v9, 2 }
  0x51   : > { %12343 = vst [vmem:[#allocation47_spill] sm:$0xff] %v8654_v17  ;;  %v8674_v5 = vsel %vm276_vm1, %v353_v11, %v355_v60  ;;  %v1655_v57 = vrot.slane %v8235_v19, 2  ;;  %v1657_v9 = vrot.slane %v8207_v13, 2  ;;  %v1658_v19 = vrot.slane %v8210_v14, 2 }
  0x52   : > { %1353 = vrot.lane.b32.xlu0 %v8586_v29, %s8125_s24  ;;  %1355 = vrot.lane.b32.xlu1 %v8609_v44, %s8125_s24  ;;  %v8665_v44 = vsel %vm276_vm1, %v352_v45, %v353_v11  ;;  %12346 = vst [vmem:[#allocation49_spill] sm:$0xff] %v8674_v5  ;;  %v8688_v45 = vsel %vm1646_vm2, %v1652_v18, %v1653_v33  ;;  %v1660_v11 = vrot.slane %v8258_v26, 2  ;;  %v1662_v13 = vrot.slane %v8221_v15, 2 }
  0x53   : > { %7203 = vmatmul.mubr.msk.f32.gmra.mxu0 %vm359_vm0, %v8633_v37  ;;  %12345 = vst [vmem:[#allocation48_spill] sm:$0xff] %v8665_v44  ;;  %v8691_v4 = vsel %vm1646_vm2, %v1653_v33, %v1655_v57  ;;  %v8705_v60 = vsel %vm1646_vm2, %v1657_v9, %v1658_v19  ;;  %v1663_v14 = vrot.slane %v8224_v16, 2  ;;  %v1665_v26 = vrot.slane %v8288_v34, 2 }
  0x54   : > { %7205 = vmatprep.mubr.msk.f32.mxu0 %vm359_vm0, %v8643_v63  ;;  %12347 = vst [vmem:[#allocation50_spill] sm:$0xff] %v8705_v60  ;;  %v8708_v7 = vsel %vm1646_vm2, %v1658_v19, %v1660_v11  ;;  %v1667_v15 = vrot.slane %v8244_v22, 2  ;;  %v1668_v16 = vrot.slane %v8247_v23, 2  ;;  %v1670_v34 = vrot.slane %v8318_v42, 2 }
  0x55   : > { %12348 = vst [vmem:[#allocation51_spill] sm:$0xff] %v8708_v7  ;;  %v8722_v18 = vsel %vm1646_vm2, %v1662_v13, %v1663_v14  ;;  %v8725_v33 = vsel %vm1646_vm2, %v1663_v14, %v1665_v26  ;;  %v1672_v22 = vrot.slane %v8272_v30, 2  ;;  %v1673_v23 = vrot.slane %v8275_v31, 2 }
  0x56   : > { %944 = vrot.lane.b32.xlu0 %v8267_v27, %s8125_s24  ;;  %946 = vrot.lane.b32.xlu1 %v8280_v32, %s8125_s24  ;;  %12349 = vst [vmem:[#allocation52_spill] sm:$0xff] %v8722_v18  ;;  %12350 = vst [vmem:[#allocation53_spill] sm:$0xff] %v8725_v33  ;;  %v8739_v57 = vsel %vm1646_vm2, %v1667_v15, %v1668_v16  ;;  %v8742_v9 = vsel %vm1646_vm2, %v1668_v16, %v1670_v34  ;;  %v1675_v42 = vrot.slane %v8348_v50, 2 }
  0x57   : > { %7206 = vmatmul.mubr.msk.f32.gmra.mxu0 %vm359_vm0, %v8654_v17  ;;  %12351 = vst [vmem:[#allocation54_spill] sm:$0xff] %v8739_v57  ;;  %12352 = vst [vmem:[#allocation55_spill] sm:$0xff] %v8742_v9  ;;  %v8756_v19 = vsel %vm1646_vm2, %v1672_v22, %v1673_v23  ;;  %v1677_v30 = vrot.slane %v8302_v38, 2  ;;  %v1678_v31 = vrot.slane %v8305_v39, 2  ;;  %v1680_v14 = vrot.slane %v8378_v58, 2  ;;  %v8787_v58 = vld [vmem:[%s11991_s1 + $0x38] sm:$0xff] }
  0x58   : > { %7208 = vmatprep.mubr.msk.f32.mxu0 %vm359_vm0, %v8665_v44  ;;  %12353 = vst [vmem:[#allocation56_spill] sm:$0xff] %v8756_v19  ;;  %v8759_v11 = vsel %vm1646_vm2, %v1673_v23, %v1675_v42  ;;  %v1682_v16 = vrot.slane %v8332_v46, 2  ;;  %v1683_v34 = vrot.slane %v8335_v47, 2  ;;  %v1685_v42 = vrot.slane %v8408_v2, 2 }
  0x59   : > { %12354 = vst [vmem:[#allocation57_spill] sm:$0xff] %v8759_v11  ;;  %v8776_v26 = vsel %vm1646_vm2, %v1677_v30, %v1678_v31  ;;  %v8781_v39 = vsel %vm1646_vm2, %v1678_v31, %v1680_v14  ;;  %v1687_v30 = vrot.slane %v8362_v54, 2  ;;  %v1688_v31 = vrot.slane %v8365_v55, 2 }
  0x5a   : > { %2052 = vrot.lane.b32.xlu0 %v8198_v12, %s8125_s24  ;;  %2054 = vrot.lane.b32.xlu1 %v8660_v8, %s8125_s24  ;;  %12355 = vst [vmem:[#allocation58_spill] sm:$0xff] %v8776_v26  ;;  %12356 = vst [vmem:[#allocation59_spill] sm:$0xff] %v8781_v39  ;;  %v8813_v46 = vsel %vm1646_vm2, %v1682_v16, %v1683_v34 }
  0x5b   : > { %7209 = vmatmul.mubr.msk.f32.gmra.mxu0 %vm359_vm0, %v8674_v5  ;;  %12358 = vst [vmem:[#allocation61_spill] sm:$0xff] %v8813_v46  ;;  %v8846_v54 = vsel %vm1646_vm2, %v1687_v30, %v1688_v31  ;;  %v12369_v30 = vld [vmem:[#allocation12_spill] sm:$0xff] }
  0x5c   : > { %12364 = vst [vmem:[#allocation67_spill] sm:$0xff] %v8846_v54 }
  0x5e   : > { %948 = vrot.lane.b32.xlu0 %v8297_v35, %s8125_s24  ;;  %950 = vrot.lane.b32.xlu1 %v8312_v40, %s8125_s24 }
  0x62   : > { %2056 = vrot.lane.b32.xlu0 %v8688_v45, %s8125_s24  ;;  %2058 = vrot.lane.b32.xlu1 %v8691_v4, %s8125_s24 }
  0x66   : > { %952 = vrot.lane.b32.xlu0 %v8327_v43, %s8125_s24  ;;  %954 = vrot.lane.b32.xlu1 %v8342_v48, %s8125_s24  ;;  %v12393_v43 = vld [vmem:[#allocation43_spill] sm:$0xff] }
  0x6a   : > { %2060 = vrot.lane.b32.xlu0 %v8705_v60, %s8125_s24  ;;  %2062 = vrot.lane.b32.xlu1 %v8708_v7, %s8125_s24 }
  0x6e   : > { %956 = vrot.lane.b32.xlu0 %v8357_v51, %s8125_s24  ;;  %958 = vrot.lane.b32.xlu1 %v8372_v56, %s8125_s24 }
  0x72   : > { %2064 = vrot.lane.b32.xlu0 %v8722_v18, %s8125_s24  ;;  %2066 = vrot.lane.b32.xlu1 %v8725_v33, %s8125_s24 }
  0x76   : > { %960 = vrot.lane.b32.xlu0 %v8387_v59, %s8125_s24  ;;  %962 = vrot.lane.b32.xlu1 %v8402_v0, %s8125_s24 }
  0x7a   : > { %2068 = vrot.lane.b32.xlu0 %v8739_v57, %s8125_s24  ;;  %2070 = vrot.lane.b32.xlu1 %v8742_v9, %s8125_s24 }
  0x7e   : > { %964 = vrot.lane.b32.xlu0 %v8417_v3, %s8125_s24  ;;  %966 = vrot.lane.b32.xlu1 %v8432_v20, %s8125_s24 }
  0x82   : > { %2072 = vrot.lane.b32.xlu0 %v8756_v19, %s8125_s24  ;;  %2074 = vrot.lane.b32.xlu1 %v8759_v11, %s8125_s24 }
  0x84   : > { %v1294_v50 = vpop.permute.xlu0 %1293  ;;  %v8767_v13 = vpop.permute.xlu1 %1297 }
  0x85   : > { %7313 = vmatprep.mubr.msk.f32.mxu1 %vm359_vm0, %v1294_v50 }
  0x86   : > { %968 = vrot.lane.b32.xlu0 %v8447_v28, %s8125_s24  ;;  %970 = vrot.lane.b32.xlu1 %v8462_v41, %s8125_s24  ;;  %v12374_v41 = vld [vmem:[#allocation36_spill] sm:$0xff] }
  0x88   : > { %v1296_v15 = vpop.permute.xlu0 %1295  ;;  %v8778_v38 = vpop.permute.xlu1 %1299 }
  0x89   : > { %7314 = vmatmul.mubr.msk.f32.vlgmr.msra.gmra.mxu1 %vm359_vm0, %v1296_v15  ;;  %v1690_v15 = vrot.slane %v8438_v25, 2 }
  0x8a   : > { %7316 = vmatprep.mubr.msk.f32.mxu1 %vm359_vm0, %v8767_v13  ;;  %2076 = vrot.lane.b32.xlu0 %v8776_v26, %s8125_s24 }
  0x8b   : > { %2078 = vrot.lane.b32.xlu1 %v8781_v39, %s8125_s24  ;;  %7412 = vmatpush3.msra.mxu1 %v8538_v61  ;;  %v8820_v61 = vsel %vm1646_vm2, %v1683_v34, %v1685_v42  ;;  %v8853_v25 = vsel %vm1646_vm2, %v1688_v31, %v1690_v15  ;;  %v12368_v34 = vld [vmem:[#allocation11_spill] sm:$0xff]  ;;  %v12372_v15 = vld [vmem:[#allocation22_spill] sm:$0xff] }
  0x8c   : > { %v8798_v22 = vpop.permute.xlu0 %1301  ;;  %v8800_v23 = vpop.permute.xlu1 %1303  ;;  %7511 = vmatprep.subr.mxu1 %v8787_v58  ;;  %12361 = vst [vmem:[#allocation64_spill] sm:$0xff] %v8820_v61  ;;  %12367 = vst [vmem:[#allocation70_spill] sm:$0xff] %v8853_v25  ;;  %v1692_v42 = vrot.slane %v12368_v34, 2 }
  0x8d   : > { %12357 = vst [vmem:[#allocation60_spill] sm:$0xff] %v8800_v23  ;;  %7317 = vmatmul.mubr.msk.f32.gmra.mxu1 %vm359_vm0, %v8778_v38 }
  0x8e   : > { %7319 = vmatprep.mubr.msk.f32.mxu1 %vm359_vm0, %v8798_v22  ;;  %972 = vrot.lane.b32.xlu0 %v8477_v49, %s8125_s24  ;;  %v12373_v49 = vld [vmem:[#allocation33_spill] sm:$0xff] }
  0x8f   : > { %974 = vrot.lane.b32.xlu1 %v8495_v1, %s8125_s24  ;;  %v1695_v1 = vrot.slane %v12372_v15, 2 }
  0x90   : > { %v8815_v47 = vpop.permute.xlu0 %1305  ;;  %v8817_v2 = vpop.permute.xlu1 %1307 }
  0x91   : > { %12359 = vst [vmem:[#allocation62_spill] sm:$0xff] %v8815_v47  ;;  %12360 = vst [vmem:[#allocation63_spill] sm:$0xff] %v8817_v2  ;;  %7320 = vmatmul.mubr.msk.f32.gmra.mxu1 %vm359_vm0, %v8800_v23 }
  0x92   : > { %7322 = vmatprep.mubr.msk.f32.mxu1 %vm359_vm0, %v8815_v47  ;;  %2080 = vrot.lane.b32.xlu0 %v8813_v46, %s8125_s24 }
  0x93   : > { %2082 = vrot.lane.b32.xlu1 %v8820_v61, %s8125_s24 }
  0x94   : > { %v8832_v50 = vpop.permute.xlu0 %1309  ;;  %v8834_v14 = vpop.permute.xlu1 %1311 }
  0x95   : > { %12362 = vst [vmem:[#allocation65_spill] sm:$0xff] %v8832_v50  ;;  %12363 = vst [vmem:[#allocation66_spill] sm:$0xff] %v8834_v14  ;;  %7323 = vmatmul.mubr.msk.f32.gmra.mxu1 %vm359_vm0, %v8817_v2 }
  0x96   : > { %7325 = vmatprep.mubr.msk.f32.mxu1 %vm359_vm0, %v8832_v50  ;;  %976 = vrot.lane.b32.xlu0 %v8510_v21, %s8125_s24 }
  0x97   : > { %978 = vrot.lane.b32.xlu1 %v8525_v52, %s8125_s24  ;;  %v1693_v52 = vrot.slane %v12369_v30, 2 }
  0x98   : > { %v8848_v55 = vpop.permute.xlu0 %1313  ;;  %v8850_v16 = vpop.permute.xlu1 %1315 }
  0x99   : > { %12365 = vst [vmem:[#allocation68_spill] sm:$0xff] %v8848_v55  ;;  %12366 = vst [vmem:[#allocation69_spill] sm:$0xff] %v8850_v16  ;;  %7326 = vmatmul.mubr.msk.f32.gmra.mxu1 %vm359_vm0, %v8834_v14  ;;  %v8879_v34 = vsel %vm1646_vm2, %v1692_v42, %v1693_v52  ;;  %v8886_v15 = vsel %vm1646_vm2, %v1693_v52, %v1695_v1  ;;  %v12379_v42 = vld [vmem:[#allocation15_spill] sm:$0xff] }
  0x9a   : > { %7328 = vmatprep.mubr.msk.f32.mxu1 %vm359_vm0, %v8848_v55  ;;  %2084 = vrot.lane.b32.xlu0 %v8846_v54, %s8125_s24  ;;  %12375 = vst [vmem:[#allocation22_spill] sm:$0xff] %v8879_v34  ;;  %12378 = vst [vmem:[#allocation73_spill] sm:$0xff] %v8886_v15  ;;  %v12383_v52 = vld [vmem:[#allocation27_spill] sm:$0xff] }
  0x9b   : > { %2086 = vrot.lane.b32.xlu1 %v8853_v25, %s8125_s24  ;;  %v1700_v0 = vrot.slane %v12383_v52, 2 }
  0x9c   : > { %v8865_v21 = vpop.permute.xlu0 %1317  ;;  %v8867_v31 = vpop.permute.xlu1 %1319 }
  0x9d   : > { %12370 = vst [vmem:[#allocation11_spill] sm:$0xff] %v8865_v21  ;;  %12371 = vst [vmem:[#allocation12_spill] sm:$0xff] %v8867_v31  ;;  %7329 = vmatmul.mubr.msk.f32.gmra.mxu1 %vm359_vm0, %v8850_v16 }
  0x9e   : > { %7331 = vmatprep.mubr.msk.f32.mxu1 %vm359_vm0, %v8865_v21  ;;  %980 = vrot.lane.b32.xlu0 %v12373_v49, %s8125_s24  ;;  %v12380_v49 = vld [vmem:[#allocation16_spill] sm:$0xff] }
  0x9f   : > { %982 = vrot.lane.b32.xlu1 %v12374_v41, %s8125_s24  ;;  %v1697_v41 = vrot.slane %v12379_v42, 2  ;;  %v1698_v20 = vrot.slane %v12380_v49, 2 }
  0xa0   : > { %v8881_v30 = vpop.permute.xlu0 %1321  ;;  %v8883_v28 = vpop.permute.xlu1 %1323 }
  0xa1   : > { %12376 = vst [vmem:[#allocation71_spill] sm:$0xff] %v8881_v30  ;;  %12377 = vst [vmem:[#allocation72_spill] sm:$0xff] %v8883_v28  ;;  %7332 = vmatmul.mubr.msk.f32.gmra.mxu1 %vm359_vm0, %v8867_v31  ;;  %v8912_v49 = vsel %vm1646_vm2, %v1697_v41, %v1698_v20  ;;  %v8919_v52 = vsel %vm1646_vm2, %v1698_v20, %v1700_v0  ;;  %v12388_v41 = vld [vmem:[#allocation19_spill] sm:$0xff]  ;;  %v12392_v20 = vld [vmem:[#allocation32_spill] sm:$0xff] }
  0xa2   : > { %7334 = vmatprep.mubr.msk.f32.mxu1 %vm359_vm0, %v8881_v30  ;;  %2088 = vrot.lane.b32.xlu0 %v8879_v34, %s8125_s24  ;;  %12384 = vst [vmem:[#allocation27_spill] sm:$0xff] %v8912_v49  ;;  %12387 = vst [vmem:[#allocation76_spill] sm:$0xff] %v8919_v52  ;;  %v1705_v48 = vrot.slane %v12392_v20, 2 }
  0xa3   : > { %2090 = vrot.lane.b32.xlu1 %v8886_v15, %s8125_s24 }
  0xa4   : > { %v8898_v3 = vpop.permute.xlu0 %1325  ;;  %v8900_v1 = vpop.permute.xlu1 %1327 }
  0xa5   : > { %12381 = vst [vmem:[#allocation15_spill] sm:$0xff] %v8898_v3  ;;  %12382 = vst [vmem:[#allocation16_spill] sm:$0xff] %v8900_v1  ;;  %7335 = vmatmul.mubr.msk.f32.gmra.mxu1 %vm359_vm0, %v8883_v28 }
  0xa6   : > { %7337 = vmatprep.mubr.msk.f32.mxu1 %vm359_vm0, %v8898_v3  ;;  %984 = vrot.lane.b32.xlu0 %v8576_v53, %s8125_s24  ;;  %v12389_v53 = vld [vmem:[#allocation20_spill] sm:$0xff] }
  0xa7   : > { %986 = vrot.lane.b32.xlu1 %v8591_v62, %s8125_s24  ;;  %v1702_v62 = vrot.slane %v12388_v41, 2  ;;  %v1703_v56 = vrot.slane %v12389_v53, 2 }
  0xa8   : > { %v8914_v42 = vpop.permute.xlu0 %1329  ;;  %v8916_v59 = vpop.permute.xlu1 %1331 }
  0xa9   : > { %12385 = vst [vmem:[#allocation74_spill] sm:$0xff] %v8914_v42  ;;  %12386 = vst [vmem:[#allocation75_spill] sm:$0xff] %v8916_v59  ;;  %7338 = vmatmul.mubr.msk.f32.gmra.mxu1 %vm359_vm0, %v8900_v1  ;;  %v8945_v53 = vsel %vm1646_vm2, %v1702_v62, %v1703_v56  ;;  %v8952_v20 = vsel %vm1646_vm2, %v1703_v56, %v1705_v48  ;;  %v12398_v62 = vld [vmem:[#allocation24_spill] sm:$0xff]  ;;  %v12402_v56 = vld [vmem:[#allocation37_spill] sm:$0xff] }
  0xaa   : > { %7340 = vmatprep.mubr.msk.f32.mxu1 %vm359_vm0, %v8914_v42  ;;  %2092 = vrot.lane.b32.xlu0 %v8912_v49, %s8125_s24  ;;  %12394 = vst [vmem:[#allocation32_spill] sm:$0xff] %v8945_v53  ;;  %12397 = vst [vmem:[#allocation79_spill] sm:$0xff] %v8952_v20  ;;  %v1710_v27 = vrot.slane %v12402_v56, 2 }
  0xab   : > { %2094 = vrot.lane.b32.xlu1 %v8919_v52, %s8125_s24 }
  0xac   : > { %v8931_v51 = vpop.permute.xlu0 %1333  ;;  %v8933_v0 = vpop.permute.xlu1 %1335 }
  0xad   : > { %12390 = vst [vmem:[#allocation19_spill] sm:$0xff] %v8931_v51  ;;  %12391 = vst [vmem:[#allocation20_spill] sm:$0xff] %v8933_v0  ;;  %7341 = vmatmul.mubr.msk.f32.gmra.mxu1 %vm359_vm0, %v8916_v59 }
  0xae   : > { %7343 = vmatprep.mubr.msk.f32.mxu1 %vm359_vm0, %v8931_v51  ;;  %988 = vrot.lane.b32.xlu0 %v8605_v36, %s8125_s24  ;;  %v12399_v36 = vld [vmem:[#allocation25_spill] sm:$0xff] }
  0xaf   : > { %990 = vrot.lane.b32.xlu1 %v12393_v43, %s8125_s24  ;;  %v1707_v43 = vrot.slane %v12398_v62, 2  ;;  %v1708_v35 = vrot.slane %v12399_v36, 2 }
  0xb0   : > { %v8947_v41 = vpop.permute.xlu0 %1337  ;;  %v8949_v40 = vpop.permute.xlu1 %1339 }
  0xb1   : > { %12395 = vst [vmem:[#allocation77_spill] sm:$0xff] %v8947_v41  ;;  %12396 = vst [vmem:[#allocation78_spill] sm:$0xff] %v8949_v40  ;;  %7344 = vmatmul.mubr.msk.f32.gmra.mxu1 %vm359_vm0, %v8933_v0  ;;  %v8978_v36 = vsel %vm1646_vm2, %v1707_v43, %v1708_v35  ;;  %v8985_v56 = vsel %vm1646_vm2, %v1708_v35, %v1710_v27  ;;  %v12407_v43 = vld [vmem:[#allocation29_spill] sm:$0xff]  ;;  %v12408_v35 = vld [vmem:[#allocation30_spill] sm:$0xff] }
  0xb2   : > { %7346 = vmatprep.mubr.msk.f32.mxu1 %vm359_vm0, %v8947_v41  ;;  %2096 = vrot.lane.b32.xlu0 %v8945_v53, %s8125_s24  ;;  %12403 = vst [vmem:[#allocation37_spill] sm:$0xff] %v8978_v36  ;;  %12406 = vst [vmem:[#allocation82_spill] sm:$0xff] %v8985_v56  ;;  %v1712_v27 = vrot.slane %v12407_v43, 2  ;;  %v12411_v0 = vld [vmem:[#allocation39_spill] sm:$0xff] }
  0xb3   : > { %2098 = vrot.lane.b32.xlu1 %v8952_v20, %s8125_s24 }
  0xb4   : > { %v8964_v32 = vpop.permute.xlu0 %1341  ;;  %v8966_v48 = vpop.permute.xlu1 %1343 }
  0xb5   : > { %12400 = vst [vmem:[#allocation24_spill] sm:$0xff] %v8964_v32  ;;  %12401 = vst [vmem:[#allocation25_spill] sm:$0xff] %v8966_v48  ;;  %7347 = vmatmul.mubr.msk.f32.gmra.mxu1 %vm359_vm0, %v8949_v40 }
  0xb6   : > { %7349 = vmatprep.mubr.msk.f32.mxu1 %vm359_vm0, %v8964_v32  ;;  %992 = vrot.lane.b32.xlu0 %v8622_v24, %s8125_s24  ;;  %v6101_v32 = vld [vmem:[%s11991_s1 + $0x20] sm:$0xff] }
  0xb7   : > { %994 = vrot.lane.b32.xlu1 %v8633_v37, %s8125_s24  ;;  %7361 = vmatprep.subr.mxu0 %v6101_v32  ;;  %v1713_v37 = vrot.slane %v12408_v35, 2 }
  0xb8   : > { %v8980_v62 = vpop.permute.xlu0 %1345  ;;  %v8982_v41 = vpop.permute.xlu1 %1347 }
  0xb9   : > { %12404 = vst [vmem:[#allocation80_spill] sm:$0xff] %v8980_v62  ;;  %12405 = vst [vmem:[#allocation81_spill] sm:$0xff] %v8982_v41  ;;  %7350 = vmatmul.mubr.msk.f32.gmra.mxu1 %vm359_vm0, %v8966_v48  ;;  %v1715_v48 = vrot.slane %v12411_v0, 2  ;;  %v9014_v43 = vsel %vm1646_vm2, %v1712_v27, %v1713_v37  ;;  %v12414_v0 = vld [vmem:[#allocation34_spill] sm:$0xff] }
  0xba   : > { %7352 = vmatprep.mubr.msk.f32.mxu1 %vm359_vm0, %v8980_v62  ;;  %2100 = vrot.lane.b32.xlu0 %v8978_v36, %s8125_s24  ;;  %12412 = vst [vmem:[#allocation39_spill] sm:$0xff] %v9014_v43  ;;  %v1717_v27 = vrot.slane %v12414_v0, 2 }
  0xbb   : > { %2102 = vrot.lane.b32.xlu1 %v8985_v56, %s8125_s24  ;;  %v9017_v56 = vsel %vm1646_vm2, %v1713_v37, %v1715_v48 }
  0xbc   : > { %v9000_v24 = vpop.permute.xlu0 %1349  ;;  %v9002_v40 = vpop.permute.xlu1 %1351  ;;  %12413 = vst [vmem:[#allocation83_spill] sm:$0xff] %v9017_v56 }
  0xbd   : > { %12409 = vst [vmem:[#allocation29_spill] sm:$0xff] %v9000_v24  ;;  %12410 = vst [vmem:[#allocation30_spill] sm:$0xff] %v9002_v40  ;;  %7353 = vmatmul.mubr.msk.f32.gmra.mxu1 %vm359_vm0, %v8982_v41 }
  0xbe   : > { %7355 = vmatprep.mubr.msk.f32.mxu1 %vm359_vm0, %v9000_v24  ;;  %996 = vrot.lane.b32.xlu0 %v8643_v63, %s8125_s24 }
  0xbf   : > { %998 = vrot.lane.b32.xlu1 %v8654_v17, %s8125_s24  ;;  %v12415_v17 = vld [vmem:[#allocation35_spill] sm:$0xff] }
  0xc0   : > { %v941_v35 = vpop.permute.xlu0 %940  ;;  %v943_v62 = vpop.permute.xlu1 %942  ;;  %v1718_v63 = vrot.slane %v12415_v17, 2  ;;  %v1722_v17 = vrot.slane %v8586_v29, 2 }
  0xc1   : > { %7263 = vmatprep.mubr.msk.f32.mxu0 %vm359_vm0, %v941_v35  ;;  %7356 = vmatmul.mubr.msk.f32.gmra.mxu1 %vm359_vm0, %v9002_v40  ;;  %v1720_v35 = vrot.slane %v8614_v10, 2 }
  0xc2   : > { %2104 = vrot.lane.b32.xlu0 %v9014_v43, %s8125_s24  ;;  %7264 = vmatmul.mubr.msk.f32.vlgmr.msra.gmra.mxu0 %vm359_vm0, %v943_v62  ;;  %v12419_v62 = vld [vmem:[#allocation42_spill] sm:$0xff] }
  0xc3   : > { %2106 = vrot.lane.b32.xlu1 %v9017_v56, %s8125_s24  ;;  %7362 = vmatpush3.msra.mxu0 %v6101_v32  ;;  %v9043_v32 = vsel %vm1646_vm2, %v1717_v27, %v1718_v63  ;;  %v1723_v10 = vrot.slane %v12419_v62, 2  ;;  %v9076_v62 = vld [vmem:[%s8170_s23 + $0x190] sm:$0x3] }
  0xc4   : > { %v9029_v37 = vpop.permute.xlu0 %1353  ;;  %v9031_v48 = vpop.permute.xlu1 %1355  ;;  %12418 = vst [vmem:[#allocation84_spill] sm:$0xff] %v9043_v32 }
  0xc5   : > { %12416 = vst [vmem:[#allocation34_spill] sm:$0xff] %v9029_v37  ;;  %12417 = vst [vmem:[#allocation35_spill] sm:$0xff] %v9031_v48  ;;  %7358 = vmatprep.mubr.msk.f32.mxu1 %vm359_vm0, %v9029_v37  ;;  %v9064_v29 = vsel %vm1646_vm2, %v1722_v17, %v1723_v10  ;;  %v9082_v17 = vld [vmem:[%s8170_s23 + $0x180] sm:$0xff] }
  0xc6   : > { %1000 = vrot.lane.b32.xlu0 %v8665_v44, %s8125_s24  ;;  %7359 = vmatmul.mubr.msk.f32.gmra.mxu1 %vm359_vm0, %v9031_v48  ;;  %v9052_v44 = vsel %vm1646_vm2, %v1718_v63, %v1720_v35  ;;  %v1725_v48 = vrot.slane %v8640_v6, 2  ;;  %12423 = vst [vmem:[#allocation87_spill] sm:$0xff] %v9064_v29  ;;  %v9073_v6 = vld [vmem:[%s11991_s1 + $0x48] sm:$0xff]  ;;  %12425 = vst [vmem:[#allocation89_spill] sm:$0xff] %v9082_v17 }
  0xc7   : > { %1002 = vrot.lane.b32.xlu1 %v8674_v5, %s8125_s24  ;;  %12422 = vst [vmem:[#allocation86_spill] sm:$0xff] %v9052_v44  ;;  %v9085_v5 = vld [vmem:[%s8170_s23 + $0x188] sm:$0xff] }
  0xc8   : > { %v9047_v0 = vpop.permute.xlu0 %944  ;;  %v9049_v37 = vpop.permute.xlu1 %946  ;;  %v9067_v35 = vsel %vm1646_vm2, %v1723_v10, %v1725_v48  ;;  %12426 = vst [vmem:[#allocation90_spill] sm:$0xff] %v9085_v5  ;;  %v2970_v48 = vrot.slane %v9082_v17, 1  ;;  %v2971_v10 = vrot.slane %v9085_v5, 1 }
  0xc9   : > { %12420 = vst [vmem:[#allocation42_spill] sm:$0xff] %v9047_v0  ;;  %12421 = vst [vmem:[#allocation85_spill] sm:$0xff] %v9049_v37  ;;  %7266 = vmatprep.mubr.msk.f32.mxu0 %vm359_vm0, %v9047_v0 }
  0xca   : > { %2108 = vrot.lane.b32.xlu0 %v9043_v32, %s8125_s24  ;;  %7267 = vmatmul.mubr.msk.f32.gmra.mxu0 %vm359_vm0, %v9049_v37  ;;  %12424 = vst [vmem:[#allocation88_spill] sm:$0xff] %v9067_v35 }
  0xcb   : > { %2110 = vrot.lane.b32.xlu1 %v9052_v44, %s8125_s24 }
  0xcc   : > { %v2053_v63 = vpop.permute.xlu0 %2052  ;;  %v2055_v27 = vpop.permute.xlu1 %2054 }
  0xcd   : > { %7413 = vmatprep.mubr.msk.f32.mxu1 %vm359_vm0, %v2053_v63 }
  0xce   : > { %2112 = vrot.lane.b32.xlu0 %v9064_v29, %s8125_s24  ;;  %7414 = vmatmul.mubr.msk.f32.vlgmr.msra.gmra.mxu1 %vm359_vm0, %v2055_v27  ;;  %v2973_v27 = vrot.slane %v9076_v62, 1 }
  0xcf   : > { %2114 = vrot.lane.b32.xlu1 %v9067_v35, %s8125_s24  ;;  %7512 = vmatpush3.msra.mxu1 %v8787_v58  ;;  %v9107_v58 = vsel %vm276_vm1, %v2970_v48, %v2971_v10 }
  0xd0   : > { %v9092_v63 = vpop.permute.xlu0 %948  ;;  %v9094_v37 = vpop.permute.xlu1 %950  ;;  %7611 = vmatprep.subr.mxu1 %v9073_v6  ;;  %12429 = vst [vmem:[#allocation93_spill] sm:$0xff] %v9107_v58  ;;  %v9114_v35 = vsel %vm276_vm1, %v2971_v10, %v2973_v27 }
  0xd1   : > { %12427 = vst [vmem:[#allocation91_spill] sm:$0xff] %v9092_v63  ;;  %12428 = vst [vmem:[#allocation92_spill] sm:$0xff] %v9094_v37  ;;  %7269 = vmatprep.mubr.msk.f32.mxu0 %vm359_vm0, %v9092_v63 }
  0xd2   : > { %7270 = vmatmul.mubr.msk.f32.gmra.mxu0 %vm359_vm0, %v9094_v37  ;;  %2704 = vrot.lane.b32.xlu0 %v9082_v17, %s8125_s24  ;;  %12432 = vst [vmem:[#allocation96_spill] sm:$0xff] %v9114_v35 }
  0xd3   : > { %2706 = vrot.lane.b32.xlu1 %v9085_v5, %s8125_s24 }
  0xd4   : > { %v9109_v0 = vpop.permute.xlu0 %2056  ;;  %v9111_v40 = vpop.permute.xlu1 %2058 }
  0xd5   : > { %12430 = vst [vmem:[#allocation94_spill] sm:$0xff] %v9109_v0  ;;  %12431 = vst [vmem:[#allocation95_spill] sm:$0xff] %v9111_v40  ;;  %7416 = vmatprep.mubr.msk.f32.mxu1 %vm359_vm0, %v9109_v0  ;;  %v7215_v37 = vpop.f32.mrf.mxu1 }
  0xd6   : > { %7417 = vmatmul.mubr.msk.f32.gmra.mxu1 %vm359_vm0, %v9111_v40  ;;  %3240 = vrot.lane.b32.xlu0 %v9107_v58, %s8125_s24 }
  0xd7   : > { %v9122_v63 = vpop.f32.mrf.mxu1  ;;  %3242 = vrot.lane.b32.xlu1 %v9114_v35, %s8125_s24 }
  0xd8   : > { %12433 = vst [vmem:[#allocation97_spill] sm:$0xff] %v9122_v63  ;;  %v9126_v48 = vpop.permute.xlu0 %952  ;;  %v9128_v29 = vpop.permute.xlu1 %954 }
  0xd9   : > { %12434 = vst [vmem:[#allocation98_spill] sm:$0xff] %v9126_v48  ;;  %12435 = vst [vmem:[#allocation99_spill] sm:$0xff] %v9128_v29  ;;  %7272 = vmatprep.mubr.msk.f32.mxu0 %vm359_vm0, %v9126_v48  ;;  %v7218_v10 = vpop.f32.mrf.mxu1 }
  0xda   : > { %7273 = vmatmul.mubr.msk.f32.gmra.mxu0 %vm359_vm0, %v9128_v29  ;;  %v7165_v29 = vpop.f32.mrf.mxu0 }
  0xdb   : > { %v9134_v27 = vpop.f32.mrf.mxu1  ;;  %v9154_v24 = vadd.f32 %v7215_v37, %v7165_v29 }
  0xdc   : > { %12436 = vst [vmem:[#allocation100_spill] sm:$0xff] %v9134_v27  ;;  %v9136_v40 = vpop.permute.xlu0 %2060  ;;  %v9138_v58 = vpop.permute.xlu1 %2062 }
  0xdd   : > { %12437 = vst [vmem:[#allocation101_spill] sm:$0xff] %v9136_v40  ;;  %12438 = vst [vmem:[#allocation102_spill] sm:$0xff] %v9138_v58  ;;  %7419 = vmatprep.mubr.msk.f32.mxu1 %vm359_vm0, %v9136_v40  ;;  %v7221_v63 = vpop.f32.mrf.mxu1  ;;  %v9158_v41 = vpop.f32.mrf.mxu0 }
  0xde   : > { %7420 = vmatmul.mubr.msk.f32.gmra.mxu1 %vm359_vm0, %v9138_v58  ;;  %12442 = vst [vmem:[#allocation106_spill] sm:$0xff] %v9154_v24  ;;  %12444 = vst [vmem:[#allocation108_spill] sm:$0xff] %v9158_v41 }
  0xdf   : > { %v9144_v35 = vpop.f32.mrf.mxu1 }
  0xe0   : > { %12439 = vst [vmem:[#allocation103_spill] sm:$0xff] %v9144_v35  ;;  %v9146_v0 = vpop.permute.xlu0 %956  ;;  %v9148_v48 = vpop.permute.xlu1 %958 }
  0xe1   : > { %12440 = vst [vmem:[#allocation104_spill] sm:$0xff] %v9146_v0  ;;  %12441 = vst [vmem:[#allocation105_spill] sm:$0xff] %v9148_v48  ;;  %7275 = vmatprep.mubr.msk.f32.mxu0 %vm359_vm0, %v9146_v0  ;;  %v7224_v27 = vpop.f32.mrf.mxu1  ;;  %v7168_v0 = vpop.f32.mrf.mxu0 }
  0xe2   : > { %7276 = vmatmul.mubr.msk.f32.gmra.mxu0 %vm359_vm0, %v9148_v48  ;;  %v9168_v32 = vadd.f32 %v7218_v10, %v7168_v0 }
  0xe3   : > { %v9156_v40 = vpop.f32.mrf.mxu1  ;;  %v9172_v29 = vpop.f32.mrf.mxu0 }
  0xe4   : > { %12443 = vst [vmem:[#allocation107_spill] sm:$0xff] %v9156_v40  ;;  %v9160_v58 = vpop.permute.xlu0 %2064  ;;  %v9162_v35 = vpop.permute.xlu1 %2066  ;;  %12447 = vst [vmem:[#allocation111_spill] sm:$0xff] %v9168_v32 }
  0xe5   : > { %12445 = vst [vmem:[#allocation109_spill] sm:$0xff] %v9160_v58  ;;  %12446 = vst [vmem:[#allocation110_spill] sm:$0xff] %v9162_v35  ;;  %7422 = vmatprep.mubr.msk.f32.mxu1 %vm359_vm0, %v9160_v58  ;;  %v7227_v44 = vpop.f32.mrf.mxu1  ;;  %v7171_v58 = vpop.f32.mrf.mxu0 }
  0xe6   : > { %7423 = vmatmul.mubr.msk.f32.gmra.mxu1 %vm359_vm0, %v9162_v35  ;;  %12449 = vst [vmem:[#allocation113_spill] sm:$0xff] %v9172_v29  ;;  %v9182_v48 = vadd.f32 %v7221_v63, %v7171_v58 }
  0xe7   : > { %v9170_v37 = vpop.f32.mrf.mxu1  ;;  %v9186_v10 = vpop.f32.mrf.mxu0 }
  0xe8   : > { %12448 = vst [vmem:[#allocation112_spill] sm:$0xff] %v9170_v37  ;;  %v9174_v40 = vpop.permute.xlu0 %960  ;;  %v9176_v41 = vpop.permute.xlu1 %962  ;;  %12452 = vst [vmem:[#allocation116_spill] sm:$0xff] %v9182_v48 }
  0xe9   : > { %12450 = vst [vmem:[#allocation114_spill] sm:$0xff] %v9174_v40  ;;  %12451 = vst [vmem:[#allocation115_spill] sm:$0xff] %v9176_v41  ;;  %7278 = vmatprep.mubr.msk.f32.mxu0 %vm359_vm0, %v9174_v40  ;;  %v7230_v24 = vpop.f32.mrf.mxu1  ;;  %v7174_v35 = vpop.f32.mrf.mxu0 }
  0xea   : > { %7279 = vmatmul.mubr.msk.f32.gmra.mxu0 %vm359_vm0, %v9176_v41  ;;  %12454 = vst [vmem:[#allocation118_spill] sm:$0xff] %v9186_v10  ;;  %v9196_v40 = vadd.f32 %v7224_v27, %v7174_v35 }
  0xeb   : > { %v9184_v0 = vpop.f32.mrf.mxu1  ;;  %v9200_v58 = vpop.f32.mrf.mxu0 }
  0xec   : > { %12453 = vst [vmem:[#allocation117_spill] sm:$0xff] %v9184_v0  ;;  %v9188_v37 = vpop.permute.xlu0 %2068  ;;  %v9190_v29 = vpop.permute.xlu1 %2070  ;;  %12457 = vst [vmem:[#allocation121_spill] sm:$0xff] %v9196_v40 }
  0xed   : > { %12455 = vst [vmem:[#allocation119_spill] sm:$0xff] %v9188_v37  ;;  %12456 = vst [vmem:[#allocation120_spill] sm:$0xff] %v9190_v29  ;;  %7425 = vmatprep.mubr.msk.f32.mxu1 %vm359_vm0, %v9188_v37  ;;  %v7233_v32 = vpop.f32.mrf.mxu1  ;;  %v7177_v37 = vpop.f32.mrf.mxu0 }
  0xee   : > { %7426 = vmatmul.mubr.msk.f32.gmra.mxu1 %vm359_vm0, %v9190_v29  ;;  %12459 = vst [vmem:[#allocation123_spill] sm:$0xff] %v9200_v58  ;;  %v9210_v41 = vadd.f32 %v7227_v44, %v7177_v37 }
  0xef   : > { %v9198_v63 = vpop.f32.mrf.mxu1  ;;  %v9214_v27 = vpop.f32.mrf.mxu0 }
  0xf0   : > { %12458 = vst [vmem:[#allocation122_spill] sm:$0xff] %v9198_v63  ;;  %v9202_v0 = vpop.permute.xlu0 %964  ;;  %v9204_v10 = vpop.permute.xlu1 %966  ;;  %12462 = vst [vmem:[#allocation126_spill] sm:$0xff] %v9210_v41 }
  0xf1   : > { %12460 = vst [vmem:[#allocation124_spill] sm:$0xff] %v9202_v0  ;;  %12461 = vst [vmem:[#allocation125_spill] sm:$0xff] %v9204_v10  ;;  %7281 = vmatprep.mubr.msk.f32.mxu0 %vm359_vm0, %v9202_v0  ;;  %v7236_v48 = vpop.f32.mrf.mxu1  ;;  %v7180_v29 = vpop.f32.mrf.mxu0 }
  0xf2   : > { %7282 = vmatmul.mubr.msk.f32.gmra.mxu0 %vm359_vm0, %v9204_v10  ;;  %12464 = vst [vmem:[#allocation128_spill] sm:$0xff] %v9214_v27  ;;  %v9224_v0 = vadd.f32 %v7230_v24, %v7180_v29 }
  0xf3   : > { %v9212_v35 = vpop.f32.mrf.mxu1  ;;  %v9228_v37 = vpop.f32.mrf.mxu0 }
  0xf4   : > { %12463 = vst [vmem:[#allocation127_spill] sm:$0xff] %v9212_v35  ;;  %v9216_v63 = vpop.permute.xlu0 %2072  ;;  %v9218_v58 = vpop.permute.xlu1 %2074  ;;  %12467 = vst [vmem:[#allocation131_spill] sm:$0xff] %v9224_v0  ;;  %v9233_v35 = vld [vmem:[%s11991_s1 + $0x30] sm:$0xff] }
  0xf5   : > { %12465 = vst [vmem:[#allocation129_spill] sm:$0xff] %v9216_v63  ;;  %12466 = vst [vmem:[#allocation130_spill] sm:$0xff] %v9218_v58  ;;  %7428 = vmatprep.mubr.msk.f32.mxu1 %vm359_vm0, %v9216_v63  ;;  %v7239_v40 = vpop.f32.mrf.mxu1  ;;  %7461 = vmatprep.subr.mxu0 %v9233_v35  ;;  %v7183_v29 = vpop.f32.mrf.mxu0 }
  0xf6   : > { %7429 = vmatmul.mubr.msk.f32.gmra.mxu1 %vm359_vm0, %v9218_v58  ;;  %12469 = vst [vmem:[#allocation133_spill] sm:$0xff] %v9228_v37 }
  0xf7   : > { %v9226_v44 = vpop.f32.mrf.mxu1  ;;  %v9248_v0 = vpop.f32.mrf.mxu0 }
  0xf8   : > { %12468 = vst [vmem:[#allocation132_spill] sm:$0xff] %v9226_v44  ;;  %v9235_v27 = vpop.permute.xlu0 %968  ;;  %v9237_v41 = vpop.permute.xlu1 %970  ;;  %v9244_v44 = vadd.f32 %v7233_v32, %v7183_v29  ;;  %12474 = vst [vmem:[#allocation138_spill] sm:$0xff] %v9248_v0 }
  0xf9   : > { %12470 = vst [vmem:[#allocation134_spill] sm:$0xff] %v9235_v27  ;;  %12471 = vst [vmem:[#allocation135_spill] sm:$0xff] %v9237_v41  ;;  %7284 = vmatprep.mubr.msk.f32.mxu0 %vm359_vm0, %v9235_v27  ;;  %v7242_v24 = vpop.f32.mrf.mxu1  ;;  %v7186_v27 = vpop.f32.mrf.mxu0 }
  0xfa   : > { %7285 = vmatmul.mubr.msk.f32.gmra.mxu0 %vm359_vm0, %v9237_v41  ;;  %12472 = vst [vmem:[#allocation136_spill] sm:$0xff] %v9244_v44  ;;  %v9260_v32 = vadd.f32 %v7236_v48, %v7186_v27 }
  0xfb   : > { %v9246_v37 = vpop.f32.mrf.mxu1 }
  0xfc   : > { %12473 = vst [vmem:[#allocation137_spill] sm:$0xff] %v9246_v37  ;;  %v9250_v58 = vpop.permute.xlu0 %2076  ;;  %12478 = vst [vmem:[#allocation142_spill] sm:$0xff] %v9260_v32  ;;  %v9264_v37 = vpop.f32.mrf.mxu0 }
  0xfd   : > { %12475 = vst [vmem:[#allocation139_spill] sm:$0xff] %v9250_v58  ;;  %v9252_v63 = vpop.permute.xlu1 %2078  ;;  %7431 = vmatprep.mubr.msk.f32.mxu1 %vm359_vm0, %v9250_v58  ;;  %v7245_v10 = vpop.f32.mrf.mxu1  ;;  %12480 = vst [vmem:[#allocation144_spill] sm:$0xff] %v9264_v37 }
  0xfe   : > { %12476 = vst [vmem:[#allocation140_spill] sm:$0xff] %v9252_v63  ;;  %7432 = vmatmul.mubr.msk.f32.gmra.mxu1 %vm359_vm0, %v9252_v63  ;;  %v7189_v58 = vpop.f32.mrf.mxu0 }
  0xff   : > { %v9258_v56 = vpop.f32.mrf.mxu1  ;;  %v9274_v41 = vadd.f32 %v7239_v40, %v7189_v58 }
 0x100   : > { %12477 = vst [vmem:[#allocation141_spill] sm:$0xff] %v9258_v56  ;;  %v9262_v29 = vpop.permute.xlu0 %972  ;;  %v9278_v27 = vpop.f32.mrf.mxu0 }
 0x101   : > { %12479 = vst [vmem:[#allocation143_spill] sm:$0xff] %v9262_v29  ;;  %v9266_v0 = vpop.permute.xlu1 %974  ;;  %7287 = vmatprep.mubr.msk.f32.mxu0 %vm359_vm0, %v9262_v29  ;;  %v7248_v44 = vpop.f32.mrf.mxu1  ;;  %12483 = vst [vmem:[#allocation147_spill] sm:$0xff] %v9274_v41 }
 0x102   : > { %12481 = vst [vmem:[#allocation145_spill] sm:$0xff] %v9266_v0  ;;  %7288 = vmatmul.mubr.msk.f32.gmra.mxu0 %vm359_vm0, %v9266_v0  ;;  %12485 = vst [vmem:[#allocation149_spill] sm:$0xff] %v9278_v27  ;;  %v7192_v32 = vpop.f32.mrf.mxu0 }
 0x103   : > { %v9272_v63 = vpop.f32.mrf.mxu1  ;;  %v9286_v0 = vadd.f32 %v7242_v24, %v7192_v32  ;;  %v3505_v24 = vrot.slane %v9082_v17, 2  ;;  %v3506_v32 = vrot.slane %v9085_v5, 2 }
 0x104   : > { %12482 = vst [vmem:[#allocation146_spill] sm:$0xff] %v9272_v63  ;;  %v9276_v48 = vpop.permute.xlu0 %2080  ;;  %v9290_v40 = vpop.f32.mrf.mxu0 }
 0x105   : > { %12484 = vst [vmem:[#allocation148_spill] sm:$0xff] %v9276_v48  ;;  %v9280_v56 = vpop.permute.xlu1 %2082  ;;  %7434 = vmatprep.mubr.msk.f32.mxu1 %vm359_vm0, %v9276_v48  ;;  %v7251_v37 = vpop.f32.mrf.mxu1  ;;  %12487 = vst [vmem:[#allocation151_spill] sm:$0xff] %v9286_v0 }
 0x106   : > { %12486 = vst [vmem:[#allocation150_spill] sm:$0xff] %v9280_v56  ;;  %7435 = vmatmul.mubr.msk.f32.gmra.mxu1 %vm359_vm0, %v9280_v56  ;;  %12489 = vst [vmem:[#allocation153_spill] sm:$0xff] %v9290_v40  ;;  %v7195_v27 = vpop.f32.mrf.mxu0  ;;  %v3508_v56 = vrot.slane %v9076_v62, 2 }
 0x107   : > { %v9298_v63 = vpop.f32.mrf.mxu1  ;;  %v9300_v41 = vadd.f32 %v7245_v10, %v7195_v27 }
 0x108   : > { %v9288_v29 = vpop.permute.xlu0 %976  ;;  %12491 = vst [vmem:[#allocation155_spill] sm:$0xff] %v9298_v63  ;;  %v9306_v40 = vpop.f32.mrf.mxu0  ;;  %v9314_v63 = vsel %vm1646_vm2, %v3505_v24, %v3506_v32 }
 0x109   : > { %12488 = vst [vmem:[#allocation152_spill] sm:$0xff] %v9288_v29  ;;  %v9292_v58 = vpop.permute.xlu1 %978  ;;  %7290 = vmatprep.mubr.msk.f32.mxu0 %vm359_vm0, %v9288_v29  ;;  %12492 = vst [vmem:[#allocation156_spill] sm:$0xff] %v9300_v41  ;;  %v7254_v10 = vpop.f32.mrf.mxu1  ;;  %3775 = vrot.lane.b32.xlu0 %v9314_v63, %s8125_s24 }
 0x10a   : > { %12490 = vst [vmem:[#allocation154_spill] sm:$0xff] %v9292_v58  ;;  %7291 = vmatmul.mubr.msk.f32.gmra.mxu0 %vm359_vm0, %v9292_v58  ;;  %12494 = vst [vmem:[#allocation158_spill] sm:$0xff] %v9306_v40  ;;  %v7198_v27 = vpop.f32.mrf.mxu0  ;;  %v9321_v40 = vsel %vm1646_vm2, %v3506_v32, %v3508_v56 }
 0x10b   : > { %12496 = vst [vmem:[#allocation160_spill] sm:$0xff] %v9314_v63  ;;  %12497 = vst [vmem:[#allocation161_spill] sm:$0xff] %v9321_v40  ;;  %v9323_v62 = vadd.f32 %v7248_v44, %v7198_v27  ;;  %3777 = vrot.lane.b32.xlu1 %v9321_v40, %s8125_s24  ;;  %v9337_v63 = vpop.f32.mrf.mxu1 }
 0x10c   : > { %v9304_v0 = vpop.permute.xlu0 %2084  ;;  %v9329_v24 = vpop.f32.mrf.mxu0  ;;  %12502 = vst [vmem:[#allocation166_spill] sm:$0xff] %v9337_v63 }
 0x10d   : > { %12493 = vst [vmem:[#allocation157_spill] sm:$0xff] %v9304_v0  ;;  %v9309_v48 = vpop.permute.xlu1 %2086  ;;  %7437 = vmatprep.mubr.msk.f32.mxu1 %vm359_vm0, %v9304_v0  ;;  %12498 = vst [vmem:[#allocation162_spill] sm:$0xff] %v9323_v62 }
 0x10e   : > { %12495 = vst [vmem:[#allocation159_spill] sm:$0xff] %v9309_v48  ;;  %7438 = vmatmul.mubr.msk.f32.gmra.mxu1 %vm359_vm0, %v9309_v48  ;;  %12500 = vst [vmem:[#allocation164_spill] sm:$0xff] %v9329_v24  ;;  %v7257_v24 = vpop.f32.mrf.mxu1 }
 0x10f   : > { %v7201_v56 = vpop.f32.mrf.mxu0 }
 0x110   : > { %v9327_v41 = vpop.permute.xlu0 %980  ;;  %v9339_v44 = vadd.f32 %v7251_v37, %v7201_v56 }
 0x111   : > { %12499 = vst [vmem:[#allocation163_spill] sm:$0xff] %v9327_v41  ;;  %v9331_v0 = vpop.permute.xlu1 %982  ;;  %7293 = vmatprep.mubr.msk.f32.mxu0 %vm359_vm0, %v9327_v41  ;;  %v9343_v27 = vpop.f32.mrf.mxu0 }
 0x112   : > { %12501 = vst [vmem:[#allocation165_spill] sm:$0xff] %v9331_v0  ;;  %7294 = vmatmul.mubr.msk.f32.gmra.mxu0 %vm359_vm0, %v9331_v0  ;;  %12503 = vst [vmem:[#allocation167_spill] sm:$0xff] %v9339_v44 }
 0x113   : > { %12505 = vst [vmem:[#allocation169_spill] sm:$0xff] %v9343_v27  ;;  %v7204_v62 = vpop.f32.mrf.mxu0  ;;  %v9363_v27 = vpop.f32.mrf.mxu1 }
 0x114   : > { %v9341_v32 = vpop.permute.xlu0 %2088  ;;  %v9351_v48 = vadd.f32 %v7254_v10, %v7204_v62  ;;  %12511 = vst [vmem:[#allocation175_spill] sm:$0xff] %v9363_v27 }
 0x115   : > { %12504 = vst [vmem:[#allocation168_spill] sm:$0xff] %v9341_v32  ;;  %v9345_v40 = vpop.permute.xlu1 %2090  ;;  %7440 = vmatprep.mubr.msk.f32.mxu1 %vm359_vm0, %v9341_v32  ;;  %v9355_v37 = vpop.f32.mrf.mxu0 }
 0x116   : > { %12506 = vst [vmem:[#allocation170_spill] sm:$0xff] %v9345_v40  ;;  %7441 = vmatmul.mubr.msk.f32.gmra.mxu1 %vm359_vm0, %v9345_v40  ;;  %12507 = vst [vmem:[#allocation171_spill] sm:$0xff] %v9351_v48 }
 0x117   : > { %12509 = vst [vmem:[#allocation173_spill] sm:$0xff] %v9355_v37  ;;  %v7207_v44 = vpop.f32.mrf.mxu0  ;;  %v7260_v37 = vpop.f32.mrf.mxu1 }
 0x118   : > { %v9353_v63 = vpop.permute.xlu0 %984  ;;  %v9365_v40 = vadd.f32 %v7257_v24, %v7207_v44 }
 0x119   : > { %12508 = vst [vmem:[#allocation172_spill] sm:$0xff] %v9353_v63  ;;  %v9357_v56 = vpop.permute.xlu1 %986  ;;  %7296 = vmatprep.mubr.msk.f32.mxu0 %vm359_vm0, %v9353_v63  ;;  %v9369_v10 = vpop.f32.mrf.mxu0 }
 0x11a   : > { %12510 = vst [vmem:[#allocation174_spill] sm:$0xff] %v9357_v56  ;;  %7297 = vmatmul.mubr.msk.f32.gmra.mxu0 %vm359_vm0, %v9357_v56  ;;  %12512 = vst [vmem:[#allocation176_spill] sm:$0xff] %v9365_v40 }
 0x11b   : > { %12514 = vst [vmem:[#allocation178_spill] sm:$0xff] %v9369_v10  ;;  %v7210_v48 = vpop.f32.mrf.mxu0 }
 0x11c   : > { %v9367_v32 = vpop.permute.xlu0 %2092  ;;  %v9377_v5 = vadd.f32 %v7260_v37, %v7210_v48 }
 0x11d   : > { %12513 = vst [vmem:[#allocation177_spill] sm:$0xff] %v9367_v32  ;;  %v9371_v62 = vpop.permute.xlu1 %2094  ;;  %7443 = vmatprep.mubr.msk.f32.mxu1 %vm359_vm0, %v9367_v32 }
 0x11e   : > { %12515 = vst [vmem:[#allocation179_spill] sm:$0xff] %v9371_v62  ;;  %7444 = vmatmul.mubr.msk.f32.gmra.mxu1 %vm359_vm0, %v9371_v62  ;;  %12516 = vst [vmem:[#allocation180_spill] sm:$0xff] %v9377_v5 }
 0x120   : > { %v9379_v27 = vpop.permute.xlu0 %988 }
 0x121   : > { %12517 = vst [vmem:[#allocation181_spill] sm:$0xff] %v9379_v27  ;;  %v9381_v24 = vpop.permute.xlu1 %990  ;;  %7299 = vmatprep.mubr.msk.f32.mxu0 %vm359_vm0, %v9379_v27 }
 0x122   : > { %12518 = vst [vmem:[#allocation182_spill] sm:$0xff] %v9381_v24  ;;  %7300 = vmatmul.mubr.msk.f32.gmra.mxu0 %vm359_vm0, %v9381_v24 }
 0x124   : > { %v9387_v44 = vpop.permute.xlu0 %2096 }
 0x125   : > { %12519 = vst [vmem:[#allocation183_spill] sm:$0xff] %v9387_v44  ;;  %v9389_v10 = vpop.permute.xlu1 %2098  ;;  %7446 = vmatprep.mubr.msk.f32.mxu1 %vm359_vm0, %v9387_v44 }
 0x126   : > { %12520 = vst [vmem:[#allocation184_spill] sm:$0xff] %v9389_v10  ;;  %7447 = vmatmul.mubr.msk.f32.gmra.mxu1 %vm359_vm0, %v9389_v10 }
 0x128   : > { %v9395_v48 = vpop.permute.xlu0 %992 }
 0x129   : > { %12521 = vst [vmem:[#allocation185_spill] sm:$0xff] %v9395_v48  ;;  %v9397_v37 = vpop.permute.xlu1 %994  ;;  %7302 = vmatprep.mubr.msk.f32.mxu0 %vm359_vm0, %v9395_v48 }
 0x12a   : > { %12522 = vst [vmem:[#allocation186_spill] sm:$0xff] %v9397_v37  ;;  %7303 = vmatmul.mubr.msk.f32.gmra.mxu0 %vm359_vm0, %v9397_v37 }
 0x12c   : > { %v9403_v5 = vpop.permute.xlu0 %2100 }
 0x12d   : > { %12523 = vst [vmem:[#allocation187_spill] sm:$0xff] %v9403_v5  ;;  %v9405_v40 = vpop.permute.xlu1 %2102  ;;  %7449 = vmatprep.mubr.msk.f32.mxu1 %vm359_vm0, %v9403_v5 }
 0x12e   : > { %12524 = vst [vmem:[#allocation188_spill] sm:$0xff] %v9405_v40  ;;  %7450 = vmatmul.mubr.msk.f32.gmra.mxu1 %vm359_vm0, %v9405_v40 }
 0x130   : > { %v9411_v10 = vpop.permute.xlu0 %996 }
 0x131   : > { %12525 = vst [vmem:[#allocation189_spill] sm:$0xff] %v9411_v10  ;;  %v9413_v44 = vpop.permute.xlu1 %998  ;;  %7305 = vmatprep.mubr.msk.f32.mxu0 %vm359_vm0, %v9411_v10 }
 0x132   : > { %12526 = vst [vmem:[#allocation190_spill] sm:$0xff] %v9413_v44  ;;  %7306 = vmatmul.mubr.msk.f32.gmra.mxu0 %vm359_vm0, %v9413_v44 }
 0x134   : > { %v9419_v62 = vpop.permute.xlu0 %2104 }
 0x135   : > { %12527 = vst [vmem:[#allocation191_spill] sm:$0xff] %v9419_v62  ;;  %v9421_v32 = vpop.permute.xlu1 %2106  ;;  %7452 = vmatprep.mubr.msk.f32.mxu1 %vm359_vm0, %v9419_v62 }
 0x136   : > { %12528 = vst [vmem:[#allocation192_spill] sm:$0xff] %v9421_v32  ;;  %7453 = vmatmul.mubr.msk.f32.gmra.mxu1 %vm359_vm0, %v9421_v32  ;;  %v9446_v32 = vld [vmem:[%s11991_s1 + $0x40] sm:$0xff] }
 0x138   : > { %v9427_v40 = vpop.permute.xlu0 %1000 }
 0x139   : > { %12529 = vst [vmem:[#allocation193_spill] sm:$0xff] %v9427_v40  ;;  %v9429_v5 = vpop.permute.xlu1 %1002  ;;  %7308 = vmatprep.mubr.msk.f32.mxu0 %vm359_vm0, %v9427_v40 }
 0x13a   : > { %12530 = vst [vmem:[#allocation194_spill] sm:$0xff] %v9429_v5  ;;  %7309 = vmatmul.mubr.msk.f32.gmra.mxu0 %vm359_vm0, %v9429_v5 }
 0x13b   : > { %7363 = vmatprep.mubr.msk.f32.mxu0 %vm359_vm0, %v8198_v12 }
 0x13c   : > { %v9437_v44 = vpop.permute.xlu0 %2108 }
 0x13d   : > { %12531 = vst [vmem:[#allocation195_spill] sm:$0xff] %v9437_v44  ;;  %v9439_v17 = vpop.permute.xlu1 %2110  ;;  %7455 = vmatprep.mubr.msk.f32.mxu1 %vm359_vm0, %v9437_v44 }
 0x13e   : > { %12532 = vst [vmem:[#allocation196_spill] sm:$0xff] %v9439_v17  ;;  %7364 = vmatmul.mubr.msk.f32.vlgmr.msra.gmra.mxu0 %vm359_vm0, %v8660_v8  ;;  %7456 = vmatmul.mubr.msk.f32.gmra.mxu1 %vm359_vm0, %v9439_v17  ;;  %v9470_v8 = vpop.f32.mrf.mxu1 }
 0x13f   : > { %7366 = vmatprep.mubr.msk.f32.mxu0 %vm359_vm0, %v8688_v45  ;;  %7462 = vmatpush3.msra.mxu0 %v9233_v35  ;;  %12535 = vst [vmem:[#allocation199_spill] sm:$0xff] %v9470_v8  ;;  %v9475_v35 = vld [vmem:[%s11991_s1 + $0x58] sm:$0xff] }
 0x140   : > { %v9455_v12 = vpop.permute.xlu0 %2112  ;;  %7561 = vmatprep.subr.mxu0 %v9446_v32 }
 0x141   : > { %12533 = vst [vmem:[#allocation197_spill] sm:$0xff] %v9455_v12  ;;  %v9458_v44 = vpop.permute.xlu1 %2114  ;;  %7458 = vmatprep.mubr.msk.f32.mxu1 %vm359_vm0, %v9455_v12 }
 0x142   : > { %12534 = vst [vmem:[#allocation198_spill] sm:$0xff] %v9458_v44  ;;  %7367 = vmatmul.mubr.msk.f32.gmra.mxu0 %vm359_vm0, %v8691_v4  ;;  %7459 = vmatmul.mubr.msk.f32.gmra.mxu1 %vm359_vm0, %v9458_v44 }
 0x143   : > { %7513 = vmatprep.mubr.msk.f32.mxu1 %vm359_vm0, %v8767_v13  ;;  %7369 = vmatprep.mubr.msk.f32.mxu0 %vm359_vm0, %v8705_v60 }
 0x146   : > { %7370 = vmatmul.mubr.msk.f32.gmra.mxu0 %vm359_vm0, %v8708_v7  ;;  %7514 = vmatmul.mubr.msk.f32.vlgmr.msra.gmra.mxu1 %vm359_vm0, %v8778_v38 }
 0x147   : > { %7612 = vmatpush3.msra.mxu1 %v9073_v6  ;;  %7516 = vmatprep.mubr.msk.f32.mxu1 %vm359_vm0, %v8798_v22  ;;  %v9502_v6 = vld [vmem:[%s8170_s23 + $0x198] sm:$0xff] }
 0x148   : > { %7372 = vmatprep.mubr.msk.f32.mxu0 %vm359_vm0, %v8722_v18  ;;  %7711 = vmatprep.subr.mxu1 %v9475_v35 }
 0x149   : > { %v9487_v13 = vpop.f32.mrf.mxu1  ;;  %4307 = vrot.lane.b32.xlu0 %v9502_v6, %s8125_s24 }
 0x14a   : > { %7373 = vmatmul.mubr.msk.f32.gmra.mxu0 %vm359_vm0, %v8725_v33  ;;  %7517 = vmatmul.mubr.msk.f32.gmra.mxu1 %vm359_vm0, %v8800_v23  ;;  %v9509_v33 = vld [vmem:[%s8170_s23 + $0x1a0] sm:$0xff] }
 0x14b   : > { %v9493_v8 = vpop.f32.mrf.mxu1  ;;  %7519 = vmatprep.mubr.msk.f32.mxu1 %vm359_vm0, %v8815_v47  ;;  %7375 = vmatprep.mubr.msk.f32.mxu0 %vm359_vm0, %v8739_v57  ;;  %v12580_v57 = vld [vmem:[#allocation104_spill] sm:$0xff] }
 0x14c   : > { %12536 = vst [vmem:[#allocation200_spill] sm:$0xff] %v9493_v8  ;;  %4309 = vrot.lane.b32.xlu1 %v9509_v33, %s8125_s24 }
 0x14d   : > { %v9499_v38 = vpop.f32.mrf.mxu1 }
 0x14e   : > { %7376 = vmatmul.mubr.msk.f32.gmra.mxu0 %vm359_vm0, %v8742_v9  ;;  %7520 = vmatmul.mubr.msk.f32.gmra.mxu1 %vm359_vm0, %v8817_v2 }
 0x14f   : > { %v9511_v23 = vpop.f32.mrf.mxu1  ;;  %7522 = vmatprep.mubr.msk.f32.mxu1 %vm359_vm0, %v8832_v50  ;;  %7378 = vmatprep.mubr.msk.f32.mxu0 %vm359_vm0, %v8756_v19  ;;  %v9743_v50 = vld [vmem:[%s8170_s23 + $0x1a8] sm:$0x3] }
 0x150   : > { %12537 = vst [vmem:[#allocation201_spill] sm:$0xff] %v9511_v23 }
 0x151   : > { %v9521_v8 = vpop.f32.mrf.mxu1 }
 0x152   : > { %7379 = vmatmul.mubr.msk.f32.gmra.mxu0 %vm359_vm0, %v8759_v11  ;;  %7523 = vmatmul.mubr.msk.f32.gmra.mxu1 %vm359_vm0, %v8834_v14  ;;  %v9738_v14 = vld [vmem:[%s8170_s23 + $0x78] sm:$0xff] }
 0x153   : > { %v9527_v23 = vpop.f32.mrf.mxu1  ;;  %7525 = vmatprep.mubr.msk.f32.mxu1 %vm359_vm0, %v8848_v55  ;;  %7381 = vmatprep.mubr.msk.f32.mxu0 %vm359_vm0, %v8776_v26  ;;  %v9706_v26 = vld [vmem:[%s8170_s23 + $0x50] sm:$0xff]  ;;  %v9728_v55 = vld [vmem:[%s8170_s23 + $0x68] sm:$0xff]  ;;  %12575 = vst [vmem:[#allocation215_spill] sm:$0xff] %v9738_v14 }
 0x154   : > { %12538 = vst [vmem:[#allocation202_spill] sm:$0xff] %v9527_v23  ;;  %12567 = vst [vmem:[#allocation212_spill] sm:$0xff] %v9706_v26 }
 0x155   : > { %v9533_v19 = vpop.f32.mrf.mxu1  ;;  %12572 = vst [vmem:[#allocation214_spill] sm:$0xff] %v9728_v55 }
 0x156   : > { %7382 = vmatmul.mubr.msk.f32.gmra.mxu0 %vm359_vm0, %v8781_v39  ;;  %7526 = vmatmul.mubr.msk.f32.gmra.mxu1 %vm359_vm0, %v8850_v16  ;;  %v12565_v16 = vld [vmem:[#allocation42_spill] sm:$0xff] }
 0x157   : > { %v9539_v11 = vpop.f32.mrf.mxu1  ;;  %7528 = vmatprep.mubr.msk.f32.mxu1 %vm359_vm0, %v8865_v21  ;;  %7384 = vmatprep.mubr.msk.f32.mxu0 %vm359_vm0, %v8813_v46  ;;  %v9670_v46 = vpop.permute.xlu1 %2706  ;;  %v9673_v21 = vld [vmem:[%s8170_s23 + $0x30] sm:$0xff] }
 0x158   : > { %12539 = vst [vmem:[#allocation203_spill] sm:$0xff] %v9539_v11  ;;  %12562 = vst [vmem:[#allocation209_spill] sm:$0xff] %v9670_v46 }
 0x159   : > { %v9545_v23 = vpop.f32.mrf.mxu1  ;;  %12563 = vst [vmem:[#allocation210_spill] sm:$0xff] %v9673_v21 }
 0x15a   : > { %7385 = vmatmul.mubr.msk.f32.gmra.mxu0 %vm359_vm0, %v8820_v61  ;;  %7529 = vmatmul.mubr.msk.f32.gmra.mxu1 %vm359_vm0, %v8867_v31  ;;  %v8073_v31 = vld [vmem:[%s8170_s23 + $0x20] sm:$0xff] }
 0x15b   : > { %v9551_v39 = vpop.f32.mrf.mxu1  ;;  %7531 = vmatprep.mubr.msk.f32.mxu1 %vm359_vm0, %v8881_v30  ;;  %7387 = vmatprep.mubr.msk.f32.mxu0 %vm359_vm0, %v8846_v54  ;;  %v12557_v54 = vld [vmem:[#allocation30_spill] sm:$0xff]  ;;  %v8072_v30 = vld [vmem:[%s8170_s23 + $0x18] sm:$0xff] }
 0x15c   : > { %12540 = vst [vmem:[#allocation204_spill] sm:$0xff] %v9551_v39 }
 0x15d   : > { %v9557_v11 = vpop.f32.mrf.mxu1 }
 0x15e   : > { %7388 = vmatmul.mubr.msk.f32.gmra.mxu0 %vm359_vm0, %v8853_v25  ;;  %7532 = vmatmul.mubr.msk.f32.gmra.mxu1 %vm359_vm0, %v8883_v28  ;;  %v12555_v28 = vld [vmem:[#allocation87_spill] sm:$0xff] }
 0x15f   : > { %v9563_v61 = vpop.f32.mrf.mxu1  ;;  %7534 = vmatprep.mubr.msk.f32.mxu1 %vm359_vm0, %v8898_v3  ;;  %7390 = vmatprep.mubr.msk.f32.mxu0 %vm359_vm0, %v8879_v34  ;;  %v12551_v34 = vld [vmem:[#allocation84_spill] sm:$0xff]  ;;  %v12553_v3 = vld [vmem:[#allocation81_spill] sm:$0xff] }
 0x160   : > { %12541 = vst [vmem:[#allocation205_spill] sm:$0xff] %v9563_v61 }
 0x161   : > { %v9569_v39 = vpop.f32.mrf.mxu1 }
 0x162   : > { %7391 = vmatmul.mubr.msk.f32.gmra.mxu0 %vm359_vm0, %v8886_v15  ;;  %7535 = vmatmul.mubr.msk.f32.gmra.mxu1 %vm359_vm0, %v8900_v1  ;;  %v12544_v1 = vld [vmem:[#allocation77_spill] sm:$0xff] }
 0x163   : > { %v9575_v25 = vpop.f32.mrf.mxu1  ;;  %7537 = vmatprep.mubr.msk.f32.mxu1 %vm359_vm0, %v8914_v42  ;;  %7393 = vmatprep.mubr.msk.f32.mxu0 %vm359_vm0, %v8912_v49  ;;  %v12543_v49 = vld [vmem:[#allocation20_spill] sm:$0xff] }
 0x164   : > { %12542 = vst [vmem:[#allocation206_spill] sm:$0xff] %v9575_v25  ;;  %v12547_v25 = vld [vmem:[#allocation24_spill] sm:$0xff] }
 0x165   : > { %v9581_v61 = vpop.f32.mrf.mxu1 }
 0x166   : > { %7394 = vmatmul.mubr.msk.f32.gmra.mxu0 %vm359_vm0, %v8919_v52  ;;  %7538 = vmatmul.mubr.msk.f32.gmra.mxu1 %vm359_vm0, %v8916_v59  ;;  %v12545_v59 = vld [vmem:[#allocation82_spill] sm:$0xff] }
 0x167   : > { %v9587_v15 = vpop.f32.mrf.mxu1  ;;  %7540 = vmatprep.mubr.msk.f32.mxu1 %vm359_vm0, %v8931_v51  ;;  %7396 = vmatprep.mubr.msk.f32.mxu0 %vm359_vm0, %v8945_v53  ;;  %v12546_v53 = vld [vmem:[#allocation78_spill] sm:$0xff] }
 0x169   : > { %v9593_v42 = vpop.f32.mrf.mxu1 }
 0x16a   : > { %7397 = vmatmul.mubr.msk.f32.gmra.mxu0 %vm359_vm0, %v8952_v20  ;;  %7541 = vmatmul.mubr.msk.f32.gmra.mxu1 %vm359_vm0, %v12543_v49  ;;  %v12548_v49 = vld [vmem:[#allocation83_spill] sm:$0xff] }
 0x16b   : > { %v9599_v52 = vpop.f32.mrf.mxu1  ;;  %7543 = vmatprep.mubr.msk.f32.mxu1 %vm359_vm0, %v12544_v1  ;;  %7399 = vmatprep.mubr.msk.f32.mxu0 %vm359_vm0, %v8978_v36  ;;  %v12549_v36 = vld [vmem:[#allocation25_spill] sm:$0xff] }
 0x16d   : > { %v9605_v51 = vpop.f32.mrf.mxu1 }
 0x16e   : > { %7400 = vmatmul.mubr.msk.f32.gmra.mxu0 %vm359_vm0, %v12545_v59  ;;  %7544 = vmatmul.mubr.msk.f32.gmra.mxu1 %vm359_vm0, %v12546_v53  ;;  %v12550_v53 = vld [vmem:[#allocation80_spill] sm:$0xff] }
 0x16f   : > { %v9611_v20 = vpop.f32.mrf.mxu1  ;;  %7546 = vmatprep.mubr.msk.f32.mxu1 %vm359_vm0, %v12547_v25  ;;  %7402 = vmatprep.mubr.msk.f32.mxu0 %vm359_vm0, %v9014_v43  ;;  %v12552_v43 = vld [vmem:[#allocation86_spill] sm:$0xff] }
 0x171   : > { %v9617_v1 = vpop.f32.mrf.mxu1 }
 0x172   : > { %7403 = vmatmul.mubr.msk.f32.gmra.mxu0 %vm359_vm0, %v12548_v49  ;;  %7547 = vmatmul.mubr.msk.f32.gmra.mxu1 %vm359_vm0, %v12549_v36  ;;  %v12554_v36 = vld [vmem:[#allocation29_spill] sm:$0xff] }
 0x173   : > { %v9623_v59 = vpop.f32.mrf.mxu1  ;;  %7549 = vmatprep.mubr.msk.f32.mxu1 %vm359_vm0, %v12550_v53  ;;  %7405 = vmatprep.mubr.msk.f32.mxu0 %vm359_vm0, %v12551_v34  ;;  %v12556_v34 = vld [vmem:[#allocation88_spill] sm:$0xff] }
 0x175   : > { %v9629_v25 = vpop.f32.mrf.mxu1 }
 0x176   : > { %7406 = vmatmul.mubr.msk.f32.gmra.mxu0 %vm359_vm0, %v12552_v43  ;;  %7550 = vmatmul.mubr.msk.f32.gmra.mxu1 %vm359_vm0, %v12553_v3  ;;  %v12558_v3 = vld [vmem:[#allocation34_spill] sm:$0xff] }
 0x177   : > { %v9635_v49 = vpop.f32.mrf.mxu1  ;;  %7552 = vmatprep.mubr.msk.f32.mxu1 %vm359_vm0, %v12554_v36  ;;  %7408 = vmatprep.mubr.msk.f32.mxu0 %vm359_vm0, %v12555_v28  ;;  %v9653_v36 = vpop.permute.xlu0 %2704 }
 0x178   : > { %12559 = vst [vmem:[#allocation207_spill] sm:$0xff] %v9653_v36 }
 0x179   : > { %v9641_v53 = vpop.f32.mrf.mxu1 }
 0x17a   : > { %7409 = vmatmul.mubr.msk.f32.gmra.mxu0 %vm359_vm0, %v12556_v34  ;;  %7553 = vmatmul.mubr.msk.f32.gmra.mxu1 %vm359_vm0, %v12557_v54  ;;  %v12560_v34 = vld [vmem:[#allocation35_spill] sm:$0xff]  ;;  %v9661_v54 = vpop.f32.mrf.mxu0 }
 0x17b   : > { %v9647_v43 = vpop.f32.mrf.mxu1  ;;  %7555 = vmatprep.mubr.msk.f32.mxu1 %vm359_vm0, %v12558_v3  ;;  %7463 = vmatprep.mubr.msk.f32.mxu0 %vm359_vm0, %v8072_v30  ;;  %12561 = vst [vmem:[#allocation208_spill] sm:$0xff] %v9661_v54  ;;  %v9666_v3 = vld [vmem:[%s11991_s1 + $0x50] sm:$0xff] }
 0x17d   : > { %v9655_v28 = vpop.f32.mrf.mxu1 }
 0x17e   : > { %7464 = vmatmul.mubr.msk.f32.vlgmr.msra.gmra.mxu0 %vm359_vm0, %v8073_v31  ;;  %7556 = vmatmul.mubr.msk.f32.gmra.mxu1 %vm359_vm0, %v12560_v34  ;;  %v9684_v34 = vld [vmem:[%s8170_s23 + $0x38] sm:$0xff] }
 0x17f   : > { %v9668_v30 = vpop.f32.mrf.mxu1  ;;  %7466 = vmatprep.mubr.msk.f32.mxu0 %vm359_vm0, %v9673_v21  ;;  %7558 = vmatprep.mubr.msk.f32.mxu1 %vm359_vm0, %v9653_v36  ;;  %12564 = vst [vmem:[#allocation211_spill] sm:$0xff] %v9684_v34 }
 0x180   : > { %7562 = vmatpush3.msra.mxu0 %v9446_v32  ;;  %v9694_v32 = vld [vmem:[%s8170_s23 + $0x48] sm:$0xff] }
 0x181   : > { %v9680_v31 = vpop.f32.mrf.mxu1  ;;  %7661 = vmatprep.subr.mxu0 %v9666_v3  ;;  %12566 = vst [vmem:[#allocation42_spill] sm:$0xff] %v9694_v32 }
 0x182   : > { %v7265_v54 = vpop.f32.mrf.mxu0  ;;  %7467 = vmatmul.mubr.msk.f32.gmra.mxu0 %vm359_vm0, %v9684_v34  ;;  %7559 = vmatmul.mubr.msk.f32.gmra.mxu1 %vm359_vm0, %v9670_v46  ;;  %v9703_v34 = vld [vmem:[%s11991_s1 + $0x68] sm:$0xff]  ;;  %v9720_v46 = vld [vmem:[%s8170_s23 + $0x60] sm:$0xff] }
 0x183   : > { %v1493_v21 = vadd.f32 %v9487_v13, %v7265_v54  ;;  %7613 = vmatprep.mubr.msk.f32.mxu1 %vm359_vm0, %v12565_v16  ;;  %7469 = vmatprep.mubr.msk.f32.mxu0 %vm359_vm0, %v9694_v32  ;;  %v9698_v36 = vpop.f32.mrf.mxu1  ;;  %v12568_v54 = vld [vmem:[#allocation85_spill] sm:$0xff]  ;;  %v12569_v16 = vld [vmem:[#allocation91_spill] sm:$0xff]  ;;  %12571 = vst [vmem:[#allocation213_spill] sm:$0xff] %v9720_v46 }
 0x184   : > { %v9715_v13 = vpop.f32.mrf.mxu0 }
 0x185   : > { %12570 = vst [vmem:[#allocation85_spill] sm:$0xff] %v9715_v13 }
 0x186   : > { %7470 = vmatmul.mubr.msk.f32.gmra.mxu0 %vm359_vm0, %v9706_v26  ;;  %7614 = vmatmul.mubr.msk.f32.vlgmr.msra.gmra.mxu1 %vm359_vm0, %v12568_v54  ;;  %v9717_v32 = vpop.f32.mrf.mxu1  ;;  %v4573_v54 = vrot.slane %v9502_v6, 1 }
 0x187   : > { %7712 = vmatpush3.msra.mxu1 %v9475_v35  ;;  %7616 = vmatprep.mubr.msk.f32.mxu1 %vm359_vm0, %v12569_v16  ;;  %v4574_v35 = vrot.slane %v9509_v33, 1  ;;  %v12573_v16 = vld [vmem:[#allocation92_spill] sm:$0xff] }
 0x188   : > { %7472 = vmatprep.mubr.msk.f32.mxu0 %vm359_vm0, %v9720_v46  ;;  %7811 = vmatprep.subr.mxu1 %v9703_v34  ;;  %v12574_v46 = vld [vmem:[#allocation98_spill] sm:$0xff]  ;;  %v9745_v2 = vpop.f32.mrf.mxu1 }
 0x18a   : > { %v7268_v26 = vpop.f32.mrf.mxu0  ;;  %7473 = vmatmul.mubr.msk.f32.gmra.mxu0 %vm359_vm0, %v9728_v55  ;;  %7617 = vmatmul.mubr.msk.f32.gmra.mxu1 %vm359_vm0, %v12573_v16  ;;  %v4576_v55 = vrot.slane %v9743_v50, 1  ;;  %v9749_v16 = vsel %vm276_vm1, %v4573_v54, %v4574_v35  ;;  %v9766_v54 = vld [vmem:[%s8170_s23 + $0x90] sm:$0xff] }
 0x18b   : > { %v1503_v13 = vadd.f32 %v9499_v38, %v7268_v26  ;;  %7619 = vmatprep.mubr.msk.f32.mxu1 %vm359_vm0, %v12574_v46  ;;  %7475 = vmatprep.mubr.msk.f32.mxu0 %vm359_vm0, %v9738_v14  ;;  %12576 = vst [vmem:[#allocation216_spill] sm:$0xff] %v9749_v16  ;;  %v9752_v26 = vld [vmem:[%s8170_s23 + $0x80] sm:$0xff]  ;;  %v12578_v38 = vld [vmem:[#allocation99_spill] sm:$0xff]  ;;  %12581 = vst [vmem:[#allocation219_spill] sm:$0xff] %v9766_v54 }
 0x18c   : > { %12577 = vst [vmem:[#allocation217_spill] sm:$0xff] %v9752_v26  ;;  %v9759_v14 = vsel %vm276_vm1, %v4574_v35, %v4576_v55  ;;  %v9770_v47 = vpop.f32.mrf.mxu0  ;;  %4843 = vrot.lane.b32.xlu0 %v9749_v16, %s8125_s24  ;;  %v12583_v55 = vld [vmem:[#allocation105_spill] sm:$0xff]  ;;  %v9787_v16 = vld [vmem:[%s8170_s23 + $0xa8] sm:$0xff] }
 0x18d   : > { %12579 = vst [vmem:[#allocation218_spill] sm:$0xff] %v9759_v14  ;;  %4845 = vrot.lane.b32.xlu1 %v9759_v14, %s8125_s24  ;;  %12585 = vst [vmem:[#allocation221_spill] sm:$0xff] %v9787_v16 }
 0x18e   : > { %v7415_v9 = vpop.f32.mrf.mxu1  ;;  %7476 = vmatmul.mubr.msk.f32.gmra.mxu0 %vm359_vm0, %v9752_v26  ;;  %7620 = vmatmul.mubr.msk.f32.gmra.mxu1 %vm359_vm0, %v12578_v38  ;;  %v9794_v38 = vld [vmem:[%s8170_s23 + $0xb0] sm:$0xff] }
 0x18f   : > { %v9761_v46 = vadd.f32 %v7415_v9, %v1493_v21  ;;  %7622 = vmatprep.mubr.msk.f32.mxu1 %vm359_vm0, %v12580_v57  ;;  %7478 = vmatprep.mubr.msk.f32.mxu0 %vm359_vm0, %v9766_v54  ;;  %v9777_v9 = vld [vmem:[%s8170_s23 + $0x98] sm:$0xff]  ;;  %v12584_v54 = vld [vmem:[#allocation114_spill] sm:$0xff]  ;;  %12586 = vst [vmem:[#allocation222_spill] sm:$0xff] %v9794_v38 }
 0x190   : > { %12582 = vst [vmem:[#allocation220_spill] sm:$0xff] %v9777_v9  ;;  %v9791_v14 = vpop.f32.mrf.mxu1 }
 0x192   : > { %v7271_v21 = vpop.f32.mrf.mxu0  ;;  %7479 = vmatmul.mubr.msk.f32.gmra.mxu0 %vm359_vm0, %v9777_v9  ;;  %7623 = vmatmul.mubr.msk.f32.gmra.mxu1 %vm359_vm0, %v12583_v55  ;;  %v12587_v55 = vld [vmem:[#allocation115_spill] sm:$0xff]  ;;  %v9837_v9 = vld [vmem:[%s8170_s23 + $0xf0] sm:$0xff] }
 0x193   : > { %v1513_v35 = vadd.f32 %v9521_v8, %v7271_v21  ;;  %7625 = vmatprep.mubr.msk.f32.mxu1 %vm359_vm0, %v12584_v54  ;;  %7481 = vmatprep.mubr.msk.f32.mxu0 %vm359_vm0, %v9787_v16  ;;  %v12588_v21 = vld [vmem:[#allocation124_spill] sm:$0xff]  ;;  %v9805_v54 = vld [vmem:[%s8170_s23 + $0xc0] sm:$0xff]  ;;  %v9810_v16 = vld [vmem:[%s8170_s23 + $0xc8] sm:$0xff]  ;;  %12598 = vst [vmem:[#allocation228_spill] sm:$0xff] %v9837_v9 }
 0x194   : > { %12589 = vst [vmem:[#allocation223_spill] sm:$0xff] %v9805_v54  ;;  %12590 = vst [vmem:[#allocation224_spill] sm:$0xff] %v9810_v16 }
 0x196   : > { %v7418_v57 = vpop.f32.mrf.mxu1  ;;  %7482 = vmatmul.mubr.msk.f32.gmra.mxu0 %vm359_vm0, %v9794_v38  ;;  %7626 = vmatmul.mubr.msk.f32.gmra.mxu1 %vm359_vm0, %v12587_v55  ;;  %v12591_v38 = vld [vmem:[#allocation125_spill] sm:$0xff]  ;;  %v9826_v55 = vld [vmem:[%s8170_s23 + $0xe0] sm:$0xff] }
 0x197   : > { %v9800_v8 = vadd.f32 %v7418_v57, %v1503_v13  ;;  %7628 = vmatprep.mubr.msk.f32.mxu1 %vm359_vm0, %v12588_v21  ;;  %7484 = vmatprep.mubr.msk.f32.mxu0 %vm359_vm0, %v9805_v54  ;;  %v12592_v57 = vld [vmem:[#allocation134_spill] sm:$0xff]  ;;  %v9819_v13 = vld [vmem:[%s8170_s23 + $0xd8] sm:$0xff]  ;;  %12595 = vst [vmem:[#allocation227_spill] sm:$0xff] %v9826_v55 }
 0x198   : > { %12593 = vst [vmem:[#allocation225_spill] sm:$0xff] %v9819_v13  ;;  %v9823_v21 = vpop.f32.mrf.mxu1 }
 0x199   : > { %12594 = vst [vmem:[#allocation226_spill] sm:$0xff] %v9823_v21  ;;  %v8091_v21 = vld [vmem:[%s8170_s23 + $0xf8] sm:$0xff] }
 0x19a   : > { %7485 = vmatmul.mubr.msk.f32.gmra.mxu0 %vm359_vm0, %v9810_v16  ;;  %7629 = vmatmul.mubr.msk.f32.gmra.mxu1 %vm359_vm0, %v12591_v38  ;;  %v12596_v16 = vld [vmem:[#allocation135_spill] sm:$0xff] }
 0x19b   : > { %7631 = vmatprep.mubr.msk.f32.mxu1 %vm359_vm0, %v12592_v57  ;;  %7487 = vmatprep.mubr.msk.f32.mxu0 %vm359_vm0, %v9819_v13  ;;  %v12597_v57 = vld [vmem:[#allocation143_spill] sm:$0xff]  ;;  %v9841_v13 = vpop.f32.mrf.mxu0 }
 0x19d   : > { %v7274_v26 = vpop.f32.mrf.mxu0 }
 0x19e   : > { %v7421_v54 = vpop.f32.mrf.mxu1  ;;  %7488 = vmatmul.mubr.msk.f32.gmra.mxu0 %vm359_vm0, %v9826_v55  ;;  %7632 = vmatmul.mubr.msk.f32.gmra.mxu1 %vm359_vm0, %v12596_v16  ;;  %v12599_v55 = vld [vmem:[#allocation145_spill] sm:$0xff]  ;;  %v8093_v16 = vld [vmem:[%s8170_s23 + $0x110] sm:$0xff] }
 0x19f   : > { %v9832_v38 = vadd.f32 %v7421_v54, %v1513_v35  ;;  %7634 = vmatprep.mubr.msk.f32.mxu1 %vm359_vm0, %v12597_v57  ;;  %7490 = vmatprep.mubr.msk.f32.mxu0 %vm359_vm0, %v9837_v9  ;;  %v8092_v54 = vld [vmem:[%s8170_s23 + $0x108] sm:$0xff]  ;;  %v1523_v9 = vadd.f32 %v9533_v19, %v7274_v26 }
 0x1a0   : > { %v9851_v35 = vpop.f32.mrf.mxu1  ;;  %v8095_v26 = vld [vmem:[%s8170_s23 + $0x128] sm:$0xff] }
 0x1a2   : > { %7491 = vmatmul.mubr.msk.f32.gmra.mxu0 %vm359_vm0, %v8091_v21  ;;  %7635 = vmatmul.mubr.msk.f32.gmra.mxu1 %vm359_vm0, %v12599_v55 }
 0x1a3   : > { %7637 = vmatprep.mubr.msk.f32.mxu1 %vm359_vm0, %v9288_v29  ;;  %7493 = vmatprep.mubr.msk.f32.mxu0 %vm359_vm0, %v8092_v54  ;;  %v8094_v29 = vld [vmem:[%s8170_s23 + $0x120] sm:$0xff]  ;;  %v9864_v54 = vpop.f32.mrf.mxu0 }
 0x1a5   : > { %v7277_v19 = vpop.f32.mrf.mxu0 }
 0x1a6   : > { %v7424_v57 = vpop.f32.mrf.mxu1  ;;  %7494 = vmatmul.mubr.msk.f32.gmra.mxu0 %vm359_vm0, %v8093_v16  ;;  %7638 = vmatmul.mubr.msk.f32.gmra.mxu1 %vm359_vm0, %v9292_v58  ;;  %v8096_v16 = vld [vmem:[%s8170_s23 + $0x138] sm:$0xff]  ;;  %v12617_v58 = vld [vmem:[#allocation8_spill] sm:$0xff] }
 0x1a7   : > { %v9858_v21 = vadd.f32 %v7424_v57, %v1523_v9  ;;  %7640 = vmatprep.mubr.msk.f32.mxu1 %vm359_vm0, %v9327_v41  ;;  %7496 = vmatprep.mubr.msk.f32.mxu0 %vm359_vm0, %v8094_v29  ;;  %v1533_v29 = vadd.f32 %v9545_v23, %v7277_v19  ;;  %v8097_v41 = vld [vmem:[%s8170_s23 + $0x140] sm:$0xff]  ;;  %v8099_v23 = vld [vmem:[%s8170_s23 + $0x158] sm:$0xff] }
 0x1a8   : > { %v9874_v9 = vpop.f32.mrf.mxu1 }
 0x1aa   : > { %7497 = vmatmul.mubr.msk.f32.gmra.mxu0 %vm359_vm0, %v8095_v26  ;;  %7641 = vmatmul.mubr.msk.f32.gmra.mxu1 %vm359_vm0, %v9331_v0 }
 0x1ab   : > { %7643 = vmatprep.mubr.msk.f32.mxu1 %vm359_vm0, %v9353_v63  ;;  %7499 = vmatprep.mubr.msk.f32.mxu0 %vm359_vm0, %v8096_v16  ;;  %v8098_v63 = vld [vmem:[%s8170_s23 + $0x150] sm:$0xff]  ;;  %v9887_v16 = vpop.f32.mrf.mxu0 }
 0x1ad   : > { %v7280_v0 = vpop.f32.mrf.mxu0 }
 0x1ae   : > { %v7427_v57 = vpop.f32.mrf.mxu1  ;;  %7500 = vmatmul.mubr.msk.f32.gmra.mxu0 %vm359_vm0, %v8097_v41  ;;  %7644 = vmatmul.mubr.msk.f32.gmra.mxu1 %vm359_vm0, %v9357_v56  ;;  %v8100_v41 = vld [vmem:[%s8170_s23 + $0x168] sm:$0xff]  ;;  %v12616_v56 = vld [vmem:[#allocation101_spill] sm:$0xff] }
 0x1af   : > { %v9881_v26 = vadd.f32 %v7427_v57, %v1533_v29  ;;  %7646 = vmatprep.mubr.msk.f32.mxu1 %vm359_vm0, %v9379_v27  ;;  %7502 = vmatprep.mubr.msk.f32.mxu0 %vm359_vm0, %v8098_v63  ;;  %v1543_v29 = vadd.f32 %v9557_v11, %v7280_v0  ;;  %v8101_v57 = vld [vmem:[%s8170_s23 + $0x170] sm:$0xff]  ;;  %v12603_v27 = vld [vmem:[#allocation90_spill] sm:$0xff] }
 0x1b0   : > { %v9897_v19 = vpop.f32.mrf.mxu1  ;;  %v12604_v11 = vld [vmem:[#allocation190_spill] sm:$0xff] }
 0x1b1   : > { %12600 = vst [vmem:[#allocation229_spill] sm:$0xff] %v9897_v19  ;;  %v12605_v0 = vld [vmem:[#allocation2_spill] sm:$0xff] }
 0x1b2   : > { %7503 = vmatmul.mubr.msk.f32.gmra.mxu0 %vm359_vm0, %v8099_v23  ;;  %7647 = vmatmul.mubr.msk.f32.gmra.mxu1 %vm359_vm0, %v9381_v24 }
 0x1b3   : > { %7649 = vmatprep.mubr.msk.f32.mxu1 %vm359_vm0, %v9395_v48  ;;  %7505 = vmatprep.mubr.msk.f32.mxu0 %vm359_vm0, %v8100_v41  ;;  %v12601_v48 = vld [vmem:[#allocation89_spill] sm:$0xff]  ;;  %v9910_v41 = vpop.f32.mrf.mxu0 }
 0x1b4   : > { %12602 = vst [vmem:[#allocation89_spill] sm:$0xff] %v9910_v41 }
 0x1b5   : > { %v7283_v24 = vpop.f32.mrf.mxu0 }
 0x1b6   : > { %v7430_v63 = vpop.f32.mrf.mxu1  ;;  %7506 = vmatmul.mubr.msk.f32.gmra.mxu0 %vm359_vm0, %v8101_v57  ;;  %7650 = vmatmul.mubr.msk.f32.gmra.mxu1 %vm359_vm0, %v9397_v37  ;;  %v12608_v37 = vld [vmem:[#allocation3_spill] sm:$0xff] }
 0x1b7   : > { %v9904_v23 = vadd.f32 %v7430_v63, %v1543_v29  ;;  %7652 = vmatprep.mubr.msk.f32.mxu1 %vm359_vm0, %v9411_v10  ;;  %7508 = vmatprep.mubr.msk.f32.mxu0 %vm359_vm0, %v12601_v48  ;;  %v9922_v63 = vpop.permute.xlu0 %3240  ;;  %v1553_v48 = vadd.f32 %v9569_v39, %v7283_v24  ;;  %v9925_v57 = vpop.f32.mrf.mxu0  ;;  %v12611_v24 = vld [vmem:[#allocation5_spill] sm:$0xff] }
 0x1b8   : > { %v9920_v29 = vpop.f32.mrf.mxu1  ;;  %12607 = vst [vmem:[#allocation2_spill] sm:$0xff] %v9922_v63 }
 0x1b9   : > { %12606 = vst [vmem:[#allocation90_spill] sm:$0xff] %v9920_v29  ;;  %v12693_v29 = vld [vmem:[#allocation64_spill] sm:$0xff] }
 0x1ba   : > { %7509 = vmatmul.mubr.msk.f32.gmra.mxu0 %vm359_vm0, %v12603_v27  ;;  %7653 = vmatmul.mubr.msk.f32.gmra.mxu1 %vm359_vm0, %v12604_v11  ;;  %v9934_v27 = vld [vmem:[%s11991_s1 + $0x60] sm:$0xff]  ;;  %v12610_v11 = vld [vmem:[#allocation4_spill] sm:$0xff]  ;;  %v7286_v39 = vpop.f32.mrf.mxu0 }
 0x1bb   : > { %7655 = vmatprep.mubr.msk.f32.mxu1 %vm359_vm0, %v9427_v40  ;;  %7563 = vmatprep.mubr.msk.f32.mxu0 %vm359_vm0, %v12605_v0  ;;  %v9938_v40 = vpop.permute.xlu1 %3242 }
 0x1bc   : > { %12609 = vst [vmem:[#allocation3_spill] sm:$0xff] %v9938_v40 }
 0x1be   : > { %v7433_v10 = vpop.f32.mrf.mxu1  ;;  %7564 = vmatmul.mubr.msk.f32.vlgmr.msra.gmra.mxu0 %vm359_vm0, %v12608_v37  ;;  %7656 = vmatmul.mubr.msk.f32.gmra.mxu1 %vm359_vm0, %v9429_v5  ;;  %v12613_v37 = vld [vmem:[#allocation6_spill] sm:$0xff]  ;;  %v12614_v5 = vld [vmem:[#allocation7_spill] sm:$0xff] }
 0x1bf   : > { %v9936_v0 = vadd.f32 %v7433_v10, %v1553_v48  ;;  %7566 = vmatprep.mubr.msk.f32.mxu0 %vm359_vm0, %v12610_v11  ;;  %7658 = vmatprep.mubr.msk.f32.mxu1 %vm359_vm0, %v9922_v63  ;;  %v12612_v10 = vld [vmem:[#allocation94_spill] sm:$0xff]  ;;  %v1204_v48 = vpop.f32.mrf.mxu0  ;;  %v1563_v63 = vadd.f32 %v9581_v61, %v7286_v39 }
 0x1c0   : > { %7662 = vmatpush3.msra.mxu0 %v9666_v3  ;;  %v9954_v11 = vpop.f32.mrf.mxu1  ;;  %v9960_v3 = vld [vmem:[%s11991_s1 + $0x78] sm:$0xff] }
 0x1c1   : > { %7761 = vmatprep.subr.mxu0 %v9934_v27 }
 0x1c2   : > { %7567 = vmatmul.mubr.msk.f32.gmra.mxu0 %vm359_vm0, %v12611_v24  ;;  %7659 = vmatmul.mubr.msk.f32.gmra.mxu1 %vm359_vm0, %v9938_v40  ;;  %v12615_v40 = vld [vmem:[#allocation95_spill] sm:$0xff]  ;;  %v7289_v61 = vpop.f32.mrf.mxu0 }
 0x1c3   : > { %7713 = vmatprep.mubr.msk.f32.mxu1 %vm359_vm0, %v12612_v10  ;;  %7569 = vmatprep.mubr.msk.f32.mxu0 %vm359_vm0, %v12613_v37  ;;  %v1558_v10 = vadd.f32 %v9587_v15, %v1204_v48  ;;  %v5109_v15 = vrot.slane %v9509_v33, 2  ;;  %v12621_v48 = vld [vmem:[#allocation10_spill] sm:$0xff] }
 0x1c6   : > { %v7436_v24 = vpop.f32.mrf.mxu1  ;;  %7570 = vmatmul.mubr.msk.f32.gmra.mxu0 %vm359_vm0, %v12614_v5  ;;  %7714 = vmatmul.mubr.msk.f32.vlgmr.msra.gmra.mxu1 %vm359_vm0, %v12615_v40  ;;  %v5108_v40 = vrot.slane %v9502_v6, 2 }
 0x1c7   : > { %v9967_v37 = vadd.f32 %v7436_v24, %v1563_v63  ;;  %7812 = vmatpush3.msra.mxu1 %v9703_v34  ;;  %7716 = vmatprep.mubr.msk.f32.mxu1 %vm359_vm0, %v12616_v56  ;;  %v12618_v63 = vld [vmem:[#allocation9_spill] sm:$0xff]  ;;  %v12619_v34 = vld [vmem:[#allocation102_spill] sm:$0xff] }
 0x1c8   : > { %v2316_v39 = vpop.f32.mrf.mxu1  ;;  %7572 = vmatprep.mubr.msk.f32.mxu0 %vm359_vm0, %v12617_v58  ;;  %7911 = vmatprep.subr.mxu1 %v9960_v3  ;;  %v12620_v24 = vld [vmem:[#allocation109_spill] sm:$0xff]  ;;  %v1214_v58 = vpop.f32.mrf.mxu0  ;;  %v9990_v6 = vsel %vm1646_vm2, %v5108_v40, %v5109_v15 }
 0x1c9   : > { %v9975_v5 = vadd.f32 %v2316_v39, %v1558_v10  ;;  %v5111_v10 = vrot.slane %v9743_v50, 2  ;;  %v1573_v39 = vadd.f32 %v9593_v42, %v7289_v61  ;;  %12622 = vst [vmem:[#allocation94_spill] sm:$0xff] %v9990_v6  ;;  %v12623_v56 = vld [vmem:[#allocation13_spill] sm:$0xff]  ;;  %v12626_v50 = vld [vmem:[#allocation119_spill] sm:$0xff]  ;;  %v12627_v42 = vld [vmem:[#allocation14_spill] sm:$0xff]  ;;  %5378 = vrot.lane.b32.xlu0 %v9990_v6, %s8125_s24 }
 0x1ca   : > { %7573 = vmatmul.mubr.msk.f32.gmra.mxu0 %vm359_vm0, %v12618_v63  ;;  %7717 = vmatmul.mubr.msk.f32.gmra.mxu1 %vm359_vm0, %v12619_v34  ;;  %v12624_v63 = vld [vmem:[#allocation110_spill] sm:$0xff]  ;;  %v7292_v61 = vpop.f32.mrf.mxu0 }
 0x1cb   : > { %7719 = vmatprep.mubr.msk.f32.mxu1 %vm359_vm0, %v12620_v24  ;;  %7575 = vmatprep.mubr.msk.f32.mxu0 %vm359_vm0, %v12621_v48  ;;  %v9997_v24 = vsel %vm1646_vm2, %v5109_v15, %v5111_v10  ;;  %v1568_v48 = vadd.f32 %v9599_v52, %v1214_v58  ;;  %v12628_v10 = vld [vmem:[#allocation17_spill] sm:$0xff]  ;;  %v12629_v52 = vld [vmem:[#allocation120_spill] sm:$0xff]  ;;  %v1583_v6 = vadd.f32 %v9605_v51, %v7292_v61  ;;  %v12636_v61 = vld [vmem:[#allocation26_spill] sm:$0xff] }
 0x1cc   : > { %12625 = vst [vmem:[#allocation95_spill] sm:$0xff] %v9997_v24  ;;  %5380 = vrot.lane.b32.xlu1 %v9997_v24, %s8125_s24  ;;  %v12630_v58 = vld [vmem:[#allocation129_spill] sm:$0xff] }
 0x1ce   : > { %v7439_v33 = vpop.f32.mrf.mxu1  ;;  %7576 = vmatmul.mubr.msk.f32.gmra.mxu0 %vm359_vm0, %v12623_v56  ;;  %7720 = vmatmul.mubr.msk.f32.gmra.mxu1 %vm359_vm0, %v12624_v63  ;;  %v12660_v63 = vld [vmem:[#allocation47_spill] sm:$0xff] }
 0x1cf   : > { %v10000_v34 = vadd.f32 %v7439_v33, %v1573_v39  ;;  %7722 = vmatprep.mubr.msk.f32.mxu1 %vm359_vm0, %v12626_v50  ;;  %7578 = vmatprep.mubr.msk.f32.mxu0 %vm359_vm0, %v12627_v42  ;;  %v12631_v39 = vld [vmem:[#allocation18_spill] sm:$0xff]  ;;  %v1224_v33 = vpop.f32.mrf.mxu0  ;;  %v12632_v50 = vld [vmem:[#allocation21_spill] sm:$0xff] }
 0x1d0   : > { %v2326_v40 = vpop.f32.mrf.mxu1 }
 0x1d1   : > { %v10010_v15 = vadd.f32 %v2326_v40, %v1568_v48  ;;  %v12633_v48 = vld [vmem:[#allocation130_spill] sm:$0xff]  ;;  %v1578_v40 = vadd.f32 %v9611_v20, %v1224_v33  ;;  %v12639_v20 = vld [vmem:[#allocation28_spill] sm:$0xff] }
 0x1d2   : > { %7579 = vmatmul.mubr.msk.f32.gmra.mxu0 %vm359_vm0, %v12628_v10  ;;  %7723 = vmatmul.mubr.msk.f32.gmra.mxu1 %vm359_vm0, %v12629_v52  ;;  %v12634_v52 = vld [vmem:[#allocation139_spill] sm:$0xff] }
 0x1d3   : > { %7725 = vmatprep.mubr.msk.f32.mxu1 %vm359_vm0, %v12630_v58  ;;  %7581 = vmatprep.mubr.msk.f32.mxu0 %vm359_vm0, %v12631_v39  ;;  %v12635_v58 = vld [vmem:[#allocation23_spill] sm:$0xff]  ;;  %v7295_v39 = vpop.f32.mrf.mxu0 }
 0x1d6   : > { %v7442_v42 = vpop.f32.mrf.mxu1  ;;  %7582 = vmatmul.mubr.msk.f32.gmra.mxu0 %vm359_vm0, %v12632_v50  ;;  %7726 = vmatmul.mubr.msk.f32.gmra.mxu1 %vm359_vm0, %v12633_v48  ;;  %v12637_v50 = vld [vmem:[#allocation140_spill] sm:$0xff] }
 0x1d7   : > { %v10026_v24 = vadd.f32 %v7442_v42, %v1583_v6  ;;  %7728 = vmatprep.mubr.msk.f32.mxu1 %vm359_vm0, %v12634_v52  ;;  %7584 = vmatprep.mubr.msk.f32.mxu0 %vm359_vm0, %v12635_v58  ;;  %v12638_v48 = vld [vmem:[#allocation148_spill] sm:$0xff]  ;;  %v1234_v6 = vpop.f32.mrf.mxu0  ;;  %v1593_v42 = vadd.f32 %v9617_v1, %v7295_v39  ;;  %v12640_v58 = vld [vmem:[#allocation31_spill] sm:$0xff] }
 0x1d8   : > { %v2336_v10 = vpop.f32.mrf.mxu1  ;;  %v12644_v39 = vld [vmem:[#allocation36_spill] sm:$0xff] }
 0x1d9   : > { %v10032_v51 = vadd.f32 %v2336_v10, %v1578_v40  ;;  %v12641_v10 = vld [vmem:[#allocation150_spill] sm:$0xff]  ;;  %v1588_v40 = vadd.f32 %v9623_v59, %v1234_v6 }
 0x1da   : > { %7585 = vmatmul.mubr.msk.f32.gmra.mxu0 %vm359_vm0, %v12636_v61  ;;  %7729 = vmatmul.mubr.msk.f32.gmra.mxu1 %vm359_vm0, %v12637_v50  ;;  %v12642_v50 = vld [vmem:[#allocation157_spill] sm:$0xff]  ;;  %v12647_v59 = vld [vmem:[#allocation38_spill] sm:$0xff] }
 0x1db   : > { %7731 = vmatprep.mubr.msk.f32.mxu1 %vm359_vm0, %v12638_v48  ;;  %7587 = vmatprep.mubr.msk.f32.mxu0 %vm359_vm0, %v12639_v20  ;;  %v12643_v48 = vld [vmem:[#allocation33_spill] sm:$0xff]  ;;  %v7298_v20 = vpop.f32.mrf.mxu0 }
 0x1dd   : > { %v1244_v6 = vpop.f32.mrf.mxu0 }
 0x1de   : > { %v7445_v33 = vpop.f32.mrf.mxu1  ;;  %7588 = vmatmul.mubr.msk.f32.gmra.mxu0 %vm359_vm0, %v12640_v58  ;;  %7732 = vmatmul.mubr.msk.f32.gmra.mxu1 %vm359_vm0, %v12641_v10  ;;  %v12645_v58 = vld [vmem:[#allocation159_spill] sm:$0xff]  ;;  %v12646_v10 = vld [vmem:[#allocation168_spill] sm:$0xff] }
 0x1df   : > { %v10048_v61 = vadd.f32 %v7445_v33, %v1593_v42  ;;  %7734 = vmatprep.mubr.msk.f32.mxu1 %vm359_vm0, %v12642_v50  ;;  %7590 = vmatprep.mubr.msk.f32.mxu0 %vm359_vm0, %v12643_v48  ;;  %v1603_v42 = vadd.f32 %v9629_v25, %v7298_v20  ;;  %v12648_v48 = vld [vmem:[#allocation40_spill] sm:$0xff]  ;;  %v12652_v20 = vld [vmem:[#allocation43_spill] sm:$0xff] }
 0x1e0   : > { %v2346_v52 = vpop.f32.mrf.mxu1 }
 0x1e1   : > { %v10054_v1 = vadd.f32 %v2346_v52, %v1588_v40  ;;  %v12649_v52 = vld [vmem:[#allocation170_spill] sm:$0xff]  ;;  %v1598_v40 = vadd.f32 %v9635_v49, %v1244_v6  ;;  %v12655_v49 = vld [vmem:[#allocation44_spill] sm:$0xff] }
 0x1e2   : > { %7591 = vmatmul.mubr.msk.f32.gmra.mxu0 %vm359_vm0, %v12644_v39  ;;  %7735 = vmatmul.mubr.msk.f32.gmra.mxu1 %vm359_vm0, %v12645_v58  ;;  %v12650_v58 = vld [vmem:[#allocation177_spill] sm:$0xff] }
 0x1e3   : > { %7737 = vmatprep.mubr.msk.f32.mxu1 %vm359_vm0, %v12646_v10  ;;  %7593 = vmatprep.mubr.msk.f32.mxu0 %vm359_vm0, %v12647_v59  ;;  %v12651_v10 = vld [vmem:[#allocation41_spill] sm:$0xff]  ;;  %v7301_v59 = vpop.f32.mrf.mxu0 }
 0x1e5   : > { %v1254_v6 = vpop.f32.mrf.mxu0 }
 0x1e6   : > { %v7448_v33 = vpop.f32.mrf.mxu1  ;;  %7594 = vmatmul.mubr.msk.f32.gmra.mxu0 %vm359_vm0, %v12648_v48  ;;  %7738 = vmatmul.mubr.msk.f32.gmra.mxu1 %vm359_vm0, %v12649_v52  ;;  %v12653_v48 = vld [vmem:[#allocation179_spill] sm:$0xff] }
 0x1e7   : > { %v10070_v39 = vadd.f32 %v7448_v33, %v1603_v42  ;;  %7740 = vmatprep.mubr.msk.f32.mxu1 %vm359_vm0, %v12650_v58  ;;  %7596 = vmatprep.mubr.msk.f32.mxu0 %vm359_vm0, %v12651_v10  ;;  %v12654_v52 = vld [vmem:[#allocation183_spill] sm:$0xff]  ;;  %v1613_v42 = vadd.f32 %v9641_v53, %v7301_v59  ;;  %v12656_v58 = vld [vmem:[#allocation45_spill] sm:$0xff] }
 0x1e8   : > { %v2356_v50 = vpop.f32.mrf.mxu1 }
 0x1e9   : > { %v10076_v25 = vadd.f32 %v2356_v50, %v1598_v40  ;;  %v12657_v50 = vld [vmem:[#allocation184_spill] sm:$0xff]  ;;  %v1608_v40 = vadd.f32 %v9647_v43, %v1254_v6 }
 0x1ea   : > { %7597 = vmatmul.mubr.msk.f32.gmra.mxu0 %vm359_vm0, %v12652_v20  ;;  %7741 = vmatmul.mubr.msk.f32.gmra.mxu1 %vm359_vm0, %v12653_v48  ;;  %v7304_v33 = vpop.f32.mrf.mxu0  ;;  %v12658_v20 = vld [vmem:[#allocation187_spill] sm:$0xff]  ;;  %v12662_v43 = vld [vmem:[#allocation48_spill] sm:$0xff] }
 0x1eb   : > { %7743 = vmatprep.mubr.msk.f32.mxu1 %vm359_vm0, %v12654_v52  ;;  %7599 = vmatprep.mubr.msk.f32.mxu0 %vm359_vm0, %v12655_v49  ;;  %v12659_v52 = vld [vmem:[#allocation46_spill] sm:$0xff]  ;;  %v1623_v6 = vadd.f32 %v9655_v28, %v7304_v33 }
 0x1ec   : > { %v1264_v59 = vpop.f32.mrf.mxu0 }
 0x1ee   : > { %v7451_v10 = vpop.f32.mrf.mxu1  ;;  %7600 = vmatmul.mubr.msk.f32.gmra.mxu0 %vm359_vm0, %v12656_v58  ;;  %7744 = vmatmul.mubr.msk.f32.gmra.mxu1 %vm359_vm0, %v12657_v50  ;;  %v12661_v58 = vld [vmem:[#allocation188_spill] sm:$0xff] }
 0x1ef   : > { %v10092_v48 = vadd.f32 %v7451_v10, %v1613_v42  ;;  %7746 = vmatprep.mubr.msk.f32.mxu1 %vm359_vm0, %v12658_v20  ;;  %7602 = vmatprep.mubr.msk.f32.mxu0 %vm359_vm0, %v12659_v52  ;;  %v12663_v52 = vld [vmem:[#allocation49_spill] sm:$0xff]  ;;  %v12667_v50 = vld [vmem:[#allocation96_spill] sm:$0xff] }
 0x1f0   : > { %v2366_v49 = vpop.f32.mrf.mxu1 }
 0x1f1   : > { %v10098_v53 = vadd.f32 %v2366_v49, %v1608_v40  ;;  %v12664_v49 = vld [vmem:[#allocation192_spill] sm:$0xff]  ;;  %v1618_v40 = vadd.f32 %v9668_v30, %v1264_v59  ;;  %v10130_v59 = vpop.permute.xlu0 %3775 }
 0x1f2   : > { %7603 = vmatmul.mubr.msk.f32.gmra.mxu0 %vm359_vm0, %v12660_v63  ;;  %7747 = vmatmul.mubr.msk.f32.gmra.mxu1 %vm359_vm0, %v12661_v58  ;;  %v7307_v10 = vpop.f32.mrf.mxu0  ;;  %v12665_v58 = vld [vmem:[#allocation195_spill] sm:$0xff]  ;;  %12668 = vst [vmem:[#allocation230_spill] sm:$0xff] %v10130_v59 }
 0x1f3   : > { %7749 = vmatprep.mubr.msk.f32.mxu1 %vm359_vm0, %v9419_v62  ;;  %7605 = vmatprep.mubr.msk.f32.mxu0 %vm359_vm0, %v12662_v43  ;;  %v12666_v62 = vld [vmem:[#allocation93_spill] sm:$0xff] }
 0x1f4   : > { %v1274_v43 = vpop.f32.mrf.mxu0 }
 0x1f6   : > { %v7454_v42 = vpop.f32.mrf.mxu1  ;;  %7606 = vmatmul.mubr.msk.f32.gmra.mxu0 %vm359_vm0, %v12663_v52  ;;  %7750 = vmatmul.mubr.msk.f32.gmra.mxu1 %vm359_vm0, %v12664_v49  ;;  %v12687_v52 = vld [vmem:[#allocation59_spill] sm:$0xff] }
 0x1f7   : > { %v10114_v63 = vadd.f32 %v7454_v42, %v1623_v6  ;;  %7752 = vmatprep.mubr.msk.f32.mxu1 %vm359_vm0, %v12665_v58  ;;  %7608 = vmatprep.mubr.msk.f32.mxu0 %vm359_vm0, %v12666_v62  ;;  %v1633_v6 = vadd.f32 %v9680_v31, %v7307_v10  ;;  %v10148_v31 = vpop.permute.xlu1 %3777  ;;  %v12682_v62 = vld [vmem:[#allocation57_spill] sm:$0xff] }
 0x1f8   : > { %v2376_v20 = vpop.f32.mrf.mxu1 }
 0x1f9   : > { %v10120_v28 = vadd.f32 %v2376_v20, %v1618_v40  ;;  %v10140_v40 = vld [vmem:[%s11991_s1 + $0x70] sm:$0xff] }
 0x1fa   : > { %v7310_v33 = vpop.f32.mrf.mxu0  ;;  %7609 = vmatmul.mubr.msk.f32.gmra.mxu0 %vm359_vm0, %v12667_v50  ;;  %7753 = vmatmul.mubr.msk.f32.gmra.mxu1 %vm359_vm0, %v9439_v17 }
 0x1fb   : > { %7755 = vmatprep.mubr.msk.f32.mxu1 %vm359_vm0, %v9455_v12  ;;  %7663 = vmatprep.mubr.msk.f32.mxu0 %vm359_vm0, %v8688_v45  ;;  %v1628_v45 = vadd.f32 %v9698_v36, %v1274_v43  ;;  %v12669_v12 = vld [vmem:[#allocation106_spill] sm:$0xff]  ;;  %v1643_v36 = vadd.f32 %v9717_v32, %v7310_v33 }
 0x1fc   : > { %v1284_v30 = vpop.f32.mrf.mxu0  ;;  %12670 = vst [vmem:[#allocation106_spill] sm:$0xff] %v10148_v31 }
 0x1fe   : > { %v7365_v20 = vpop.f32.mrf.mxu0  ;;  %v7457_v42 = vpop.f32.mrf.mxu1  ;;  %7664 = vmatmul.mubr.msk.f32.vlgmr.msra.gmra.mxu0 %vm359_vm0, %v8691_v4  ;;  %7756 = vmatmul.mubr.msk.f32.gmra.mxu1 %vm359_vm0, %v9458_v44 }
 0x1ff   : > { %v10144_v17 = vadd.f32 %v7365_v20, %v12669_v12  ;;  %v10146_v50 = vadd.f32 %v7457_v42, %v1633_v6  ;;  %7666 = vmatprep.mubr.msk.f32.mxu0 %vm359_vm0, %v8705_v60  ;;  %7758 = vmatprep.mubr.msk.f32.mxu1 %vm359_vm0, %v10130_v59  ;;  %v1638_v20 = vadd.f32 %v9745_v2, %v1284_v30  ;;  %v12671_v42 = vld [vmem:[#allocation111_spill] sm:$0xff] }
 0x200   : > { %v2386_v4 = vpop.f32.mrf.mxu1  ;;  %v10154_v10 = vpop.f32.mrf.mxu0  ;;  %7762 = vmatpush3.msra.mxu0 %v9934_v27  ;;  %v10182_v2 = vld [vmem:[%s11991_s1 + $0x88] sm:$0xff] }
 0x201   : > { %v10158_v43 = vadd.f32 %v2386_v4, %v1628_v45  ;;  %7861 = vmatprep.subr.mxu0 %v10140_v40 }
 0x202   : > { %v7368_v12 = vpop.f32.mrf.mxu0  ;;  %v7460_v6 = vpop.f32.mrf.mxu1  ;;  %7667 = vmatmul.mubr.msk.f32.gmra.mxu0 %vm359_vm0, %v8708_v7  ;;  %7759 = vmatmul.mubr.msk.f32.gmra.mxu1 %vm359_vm0, %v10148_v31  ;;  %v12676_v31 = vld [vmem:[#allocation54_spill] sm:$0xff] }
 0x203   : > { %v10167_v60 = vadd.f32 %v7368_v12, %v12671_v42  ;;  %v10169_v27 = vadd.f32 %v7460_v6, %v1643_v36  ;;  %7813 = vmatprep.mubr.msk.f32.mxu1 %vm359_vm0, %v8798_v22  ;;  %7669 = vmatprep.mubr.msk.f32.mxu0 %vm359_vm0, %v8722_v18  ;;  %v12672_v36 = vld [vmem:[#allocation53_spill] sm:$0xff]  ;;  %v12673_v12 = vld [vmem:[#allocation60_spill] sm:$0xff] }
 0x204   : > { %v10175_v32 = vpop.f32.mrf.mxu0  ;;  %v2396_v33 = vpop.f32.mrf.mxu1  ;;  %v12674_v22 = vld [vmem:[#allocation116_spill] sm:$0xff] }
 0x205   : > { %v10177_v45 = vadd.f32 %v2396_v33, %v1638_v20  ;;  %v12675_v20 = vld [vmem:[#allocation62_spill] sm:$0xff] }
 0x206   : > { %v7371_v30 = vpop.f32.mrf.mxu0  ;;  %v7515_v4 = vpop.f32.mrf.mxu1  ;;  %7670 = vmatmul.mubr.msk.f32.gmra.mxu0 %vm359_vm0, %v12672_v36  ;;  %7814 = vmatmul.mubr.msk.f32.vlgmr.msra.gmra.mxu1 %vm359_vm0, %v12673_v12  ;;  %v12680_v36 = vld [vmem:[#allocation65_spill] sm:$0xff] }
 0x207   : > { %v10189_v6 = vadd.f32 %v7371_v30, %v12674_v22  ;;  %v10192_v42 = vadd.f32 %v7515_v4, %v9761_v46  ;;  %7912 = vmatpush3.msra.mxu1 %v9960_v3  ;;  %7816 = vmatprep.mubr.msk.f32.mxu1 %vm359_vm0, %v12675_v20  ;;  %v12677_v22 = vld [vmem:[#allocation55_spill] sm:$0xff]  ;;  %v12679_v3 = vld [vmem:[#allocation121_spill] sm:$0xff] }
 0x208   : > { %v10197_v33 = vpop.f32.mrf.mxu0  ;;  %v10199_v18 = vpop.f32.mrf.mxu1  ;;  %7672 = vmatprep.mubr.msk.f32.mxu0 %vm359_vm0, %v12676_v31  ;;  %8011 = vmatprep.subr.mxu1 %v10182_v2  ;;  %v12678_v46 = vld [vmem:[#allocation63_spill] sm:$0xff]  ;;  %v12681_v31 = vld [vmem:[#allocation56_spill] sm:$0xff] }
 0x20a   : > { %v7374_v12 = vpop.f32.mrf.mxu0  ;;  %v7518_v30 = vpop.f32.mrf.mxu1  ;;  %7673 = vmatmul.mubr.msk.f32.gmra.mxu0 %vm359_vm0, %v12677_v22  ;;  %7817 = vmatmul.mubr.msk.f32.gmra.mxu1 %vm359_vm0, %v12678_v46  ;;  %v12685_v46 = vld [vmem:[#allocation68_spill] sm:$0xff] }
 0x20b   : > { %v10209_v4 = vadd.f32 %v7374_v12, %v12679_v3  ;;  %v10212_v20 = vadd.f32 %v7518_v30, %v9800_v8  ;;  %7819 = vmatprep.mubr.msk.f32.mxu1 %vm359_vm0, %v12680_v36  ;;  %7675 = vmatprep.mubr.msk.f32.mxu0 %vm359_vm0, %v12681_v31  ;;  %v12683_v12 = vld [vmem:[#allocation66_spill] sm:$0xff] }
 0x20c   : > { %v10218_v7 = vpop.f32.mrf.mxu0  ;;  %v10220_v59 = vpop.f32.mrf.mxu1  ;;  %v12684_v8 = vld [vmem:[#allocation126_spill] sm:$0xff] }
 0x20d   : > { %v12686_v3 = vld [vmem:[#allocation58_spill] sm:$0xff] }
 0x20e   : > { %v7377_v22 = vpop.f32.mrf.mxu0  ;;  %v7521_v44 = vpop.f32.mrf.mxu1  ;;  %7676 = vmatmul.mubr.msk.f32.gmra.mxu0 %vm359_vm0, %v12682_v62  ;;  %7820 = vmatmul.mubr.msk.f32.gmra.mxu1 %vm359_vm0, %v12683_v12 }
 0x20f   : > { %v10227_v30 = vadd.f32 %v7377_v22, %v12684_v8  ;;  %v10230_v36 = vadd.f32 %v7521_v44, %v9832_v38  ;;  %7822 = vmatprep.mubr.msk.f32.mxu1 %vm359_vm0, %v12685_v46  ;;  %7678 = vmatprep.mubr.msk.f32.mxu0 %vm359_vm0, %v12686_v3  ;;  %v12688_v22 = vld [vmem:[#allocation69_spill] sm:$0xff]  ;;  %v12689_v44 = vld [vmem:[#allocation131_spill] sm:$0xff] }
 0x210   : > { %v10236_v31 = vpop.f32.mrf.mxu0  ;;  %v10238_v58 = vpop.f32.mrf.mxu1  ;;  %v12691_v8 = vld [vmem:[#allocation11_spill] sm:$0xff]  ;;  %v12692_v46 = vld [vmem:[#allocation61_spill] sm:$0xff] }
 0x212   : > { %v7380_v62 = vpop.f32.mrf.mxu0  ;;  %v7524_v49 = vpop.f32.mrf.mxu1  ;;  %7679 = vmatmul.mubr.msk.f32.gmra.mxu0 %vm359_vm0, %v12687_v52  ;;  %7823 = vmatmul.mubr.msk.f32.gmra.mxu1 %vm359_vm0, %v12688_v22 }
 0x213   : > { %v10245_v38 = vadd.f32 %v7380_v62, %v12689_v44  ;;  %v10248_v12 = vadd.f32 %v7524_v49, %v9858_v21  ;;  %7825 = vmatprep.mubr.msk.f32.mxu1 %vm359_vm0, %v12691_v8  ;;  %7681 = vmatprep.mubr.msk.f32.mxu0 %vm359_vm0, %v12692_v46  ;;  %v12694_v62 = vld [vmem:[#allocation12_spill] sm:$0xff]  ;;  %v12698_v44 = vld [vmem:[#allocation71_spill] sm:$0xff] }
 0x214   : > { %v10254_v3 = vpop.f32.mrf.mxu0  ;;  %v10256_v56 = vpop.f32.mrf.mxu1  ;;  %v12695_v21 = vld [vmem:[#allocation136_spill] sm:$0xff]  ;;  %v12699_v8 = vld [vmem:[#allocation67_spill] sm:$0xff] }
 0x215   : > { %12690 = vst [vmem:[#allocation111_spill] sm:$0xff] %v10248_v12  ;;  %v12701_v12 = vld [vmem:[#allocation70_spill] sm:$0xff] }
 0x216   : > { %v7383_v52 = vpop.f32.mrf.mxu0  ;;  %v7527_v55 = vpop.f32.mrf.mxu1  ;;  %7682 = vmatmul.mubr.msk.f32.gmra.mxu0 %vm359_vm0, %v12693_v29  ;;  %7826 = vmatmul.mubr.msk.f32.gmra.mxu1 %vm359_vm0, %v12694_v62 }
 0x217   : > { %v10263_v49 = vadd.f32 %v7383_v52, %v12695_v21  ;;  %v10266_v22 = vadd.f32 %v7527_v55, %v9881_v26  ;;  %7828 = vmatprep.mubr.msk.f32.mxu1 %vm359_vm0, %v12698_v44  ;;  %7684 = vmatprep.mubr.msk.f32.mxu0 %vm359_vm0, %v12699_v8  ;;  %v12702_v52 = vld [vmem:[#allocation72_spill] sm:$0xff]  ;;  %v12703_v55 = vld [vmem:[#allocation142_spill] sm:$0xff]  ;;  %v12706_v21 = vld [vmem:[#allocation15_spill] sm:$0xff] }
 0x218   : > { %v10272_v46 = vpop.f32.mrf.mxu0  ;;  %v10274_v41 = vpop.f32.mrf.mxu1  ;;  %v12707_v44 = vld [vmem:[#allocation22_spill] sm:$0xff] }
 0x219   : > { %12696 = vst [vmem:[#allocation60_spill] sm:$0xff] %v10263_v49  ;;  %12697 = vst [vmem:[#allocation116_spill] sm:$0xff] %v10266_v22 }
 0x21a   : > { %12700 = vst [vmem:[#allocation62_spill] sm:$0xff] %v10274_v41  ;;  %v7386_v29 = vpop.f32.mrf.mxu0  ;;  %v7530_v19 = vpop.f32.mrf.mxu1  ;;  %7685 = vmatmul.mubr.msk.f32.gmra.mxu0 %vm359_vm0, %v12701_v12  ;;  %7829 = vmatmul.mubr.msk.f32.gmra.mxu1 %vm359_vm0, %v12702_v52  ;;  %v12709_v12 = vld [vmem:[#allocation206_spill] sm:$0xff] }
 0x21b   : > { %v10281_v26 = vadd.f32 %v7386_v29, %v12703_v55  ;;  %v10284_v62 = vadd.f32 %v7530_v19, %v9904_v23  ;;  %7831 = vmatprep.mubr.msk.f32.mxu1 %vm359_vm0, %v12706_v21  ;;  %7687 = vmatprep.mubr.msk.f32.mxu0 %vm359_vm0, %v12707_v44  ;;  %v1548_v49 = vadd.f32 %v12709_v12, %v9925_v57  ;;  %v12710_v29 = vld [vmem:[#allocation73_spill] sm:$0xff]  ;;  %v12711_v19 = vld [vmem:[#allocation16_spill] sm:$0xff]  ;;  %v12712_v55 = vld [vmem:[#allocation147_spill] sm:$0xff] }
 0x21c   : > { %v10290_v8 = vpop.f32.mrf.mxu0  ;;  %v10292_v22 = vpop.f32.mrf.mxu1  ;;  %v12714_v57 = vld [vmem:[#allocation27_spill] sm:$0xff] }
 0x21d   : > { %12704 = vst [vmem:[#allocation63_spill] sm:$0xff] %v10281_v26  ;;  %12705 = vst [vmem:[#allocation121_spill] sm:$0xff] %v10284_v62  ;;  %v2417_v23 = vadd.f32 %v9954_v11, %v1548_v49  ;;  %v12713_v62 = vld [vmem:[#allocation74_spill] sm:$0xff]  ;;  %v12716_v11 = vld [vmem:[#allocation76_spill] sm:$0xff] }
 0x21e   : > { %12708 = vst [vmem:[#allocation65_spill] sm:$0xff] %v10292_v22  ;;  %v7389_v52 = vpop.f32.mrf.mxu0  ;;  %v7533_v41 = vpop.f32.mrf.mxu1  ;;  %7688 = vmatmul.mubr.msk.f32.gmra.mxu0 %vm359_vm0, %v12710_v29  ;;  %7832 = vmatmul.mubr.msk.f32.gmra.mxu1 %vm359_vm0, %v12711_v19  ;;  %v12717_v49 = vld [vmem:[#allocation75_spill] sm:$0xff] }
 0x21f   : > { %v10302_v21 = vadd.f32 %v7389_v52, %v12712_v55  ;;  %v10305_v44 = vadd.f32 %v7533_v41, %v9936_v0  ;;  %7834 = vmatprep.mubr.msk.f32.mxu1 %vm359_vm0, %v12713_v62  ;;  %7690 = vmatprep.mubr.msk.f32.mxu0 %vm359_vm0, %v12714_v57  ;;  %v12718_v41 = vld [vmem:[#allocation151_spill] sm:$0xff]  ;;  %v12721_v55 = vld [vmem:[#allocation32_spill] sm:$0xff] }
 0x220   : > { %v10311_v12 = vpop.f32.mrf.mxu0  ;;  %v2838_v29 = vpop.f32.mrf.mxu1  ;;  %v12720_v52 = vld [vmem:[#allocation19_spill] sm:$0xff] }
 0x221   : > { %v10313_v26 = vadd.f32 %v2838_v29, %v2417_v23 }
 0x222   : > { %v7392_v19 = vpop.f32.mrf.mxu0  ;;  %v7536_v22 = vpop.f32.mrf.mxu1  ;;  %7691 = vmatmul.mubr.msk.f32.gmra.mxu0 %vm359_vm0, %v12716_v11  ;;  %7835 = vmatmul.mubr.msk.f32.gmra.mxu1 %vm359_vm0, %v12717_v49 }
 0x223   : > { %12715 = vst [vmem:[#allocation66_spill] sm:$0xff] %v10313_v26  ;;  %v10320_v0 = vadd.f32 %v7392_v19, %v12718_v41  ;;  %v10323_v62 = vadd.f32 %v7536_v22, %v9967_v37  ;;  %7837 = vmatprep.mubr.msk.f32.mxu1 %vm359_vm0, %v12720_v52  ;;  %7693 = vmatprep.mubr.msk.f32.mxu0 %vm359_vm0, %v12721_v55  ;;  %v12723_v26 = vld [vmem:[#allocation79_spill] sm:$0xff]  ;;  %v12724_v19 = vld [vmem:[#allocation20_spill] sm:$0xff]  ;;  %v12727_v52 = vld [vmem:[#allocation77_spill] sm:$0xff] }
 0x224   : > { %v10329_v29 = vpop.f32.mrf.mxu0  ;;  %v2848_v23 = vpop.f32.mrf.mxu1  ;;  %v12725_v37 = vld [vmem:[#allocation156_spill] sm:$0xff]  ;;  %v12728_v55 = vld [vmem:[#allocation37_spill] sm:$0xff] }
 0x225   : > { %12719 = vst [vmem:[#allocation126_spill] sm:$0xff] %v10323_v62  ;;  %v10332_v11 = vadd.f32 %v2848_v23, %v9975_v5  ;;  %v12730_v62 = vld [vmem:[#allocation82_spill] sm:$0xff] }
 0x226   : > { %v7395_v57 = vpop.f32.mrf.mxu0  ;;  %v7539_v49 = vpop.f32.mrf.mxu1  ;;  %7694 = vmatmul.mubr.msk.f32.gmra.mxu0 %vm359_vm0, %v12723_v26  ;;  %7838 = vmatmul.mubr.msk.f32.gmra.mxu1 %vm359_vm0, %v12724_v19 }
 0x227   : > { %12722 = vst [vmem:[#allocation68_spill] sm:$0xff] %v10332_v11  ;;  %v10339_v22 = vadd.f32 %v7395_v57, %v12725_v37  ;;  %v10342_v41 = vadd.f32 %v7539_v49, %v10000_v34  ;;  %7840 = vmatprep.mubr.msk.f32.mxu1 %vm359_vm0, %v12727_v52  ;;  %7696 = vmatprep.mubr.msk.f32.mxu0 %vm359_vm0, %v12728_v55  ;;  %v12731_v57 = vld [vmem:[#allocation78_spill] sm:$0xff]  ;;  %v12734_v52 = vld [vmem:[#allocation24_spill] sm:$0xff]  ;;  %v12735_v55 = vld [vmem:[#allocation39_spill] sm:$0xff] }
 0x228   : > { %v10348_v5 = vpop.f32.mrf.mxu0  ;;  %v2858_v23 = vpop.f32.mrf.mxu1  ;;  %v12732_v34 = vld [vmem:[#allocation162_spill] sm:$0xff] }
 0x229   : > { %12726 = vst [vmem:[#allocation69_spill] sm:$0xff] %v10342_v41  ;;  %v10351_v26 = vadd.f32 %v2858_v23, %v10010_v15  ;;  %v12737_v41 = vld [vmem:[#allocation83_spill] sm:$0xff] }
 0x22a   : > { %v7398_v11 = vpop.f32.mrf.mxu0  ;;  %v7542_v19 = vpop.f32.mrf.mxu1  ;;  %7697 = vmatmul.mubr.msk.f32.gmra.mxu0 %vm359_vm0, %v12730_v62  ;;  %7841 = vmatmul.mubr.msk.f32.gmra.mxu1 %vm359_vm0, %v12731_v57 }
 0x22b   : > { %12729 = vst [vmem:[#allocation131_spill] sm:$0xff] %v10351_v26  ;;  %v10358_v49 = vadd.f32 %v7398_v11, %v12732_v34  ;;  %v10361_v37 = vadd.f32 %v7542_v19, %v10026_v24  ;;  %7843 = vmatprep.mubr.msk.f32.mxu1 %vm359_vm0, %v12734_v52  ;;  %7699 = vmatprep.mubr.msk.f32.mxu0 %vm359_vm0, %v12735_v55  ;;  %v12738_v11 = vld [vmem:[#allocation25_spill] sm:$0xff]  ;;  %v12739_v24 = vld [vmem:[#allocation167_spill] sm:$0xff]  ;;  %v12741_v52 = vld [vmem:[#allocation80_spill] sm:$0xff] }
 0x22c   : > { %v10367_v15 = vpop.f32.mrf.mxu0  ;;  %v2868_v23 = vpop.f32.mrf.mxu1  ;;  %v12742_v55 = vld [vmem:[#allocation84_spill] sm:$0xff] }
 0x22d   : > { %12733 = vst [vmem:[#allocation11_spill] sm:$0xff] %v10361_v37  ;;  %v10370_v62 = vadd.f32 %v2868_v23, %v10032_v51  ;;  %v12744_v37 = vld [vmem:[#allocation86_spill] sm:$0xff] }
 0x22e   : > { %v7401_v26 = vpop.f32.mrf.mxu0  ;;  %v7545_v57 = vpop.f32.mrf.mxu1  ;;  %7700 = vmatmul.mubr.msk.f32.gmra.mxu0 %vm359_vm0, %v12737_v41  ;;  %7844 = vmatmul.mubr.msk.f32.gmra.mxu1 %vm359_vm0, %v12738_v11 }
 0x22f   : > { %12736 = vst [vmem:[#allocation12_spill] sm:$0xff] %v10370_v62  ;;  %v10377_v19 = vadd.f32 %v7401_v26, %v12739_v24  ;;  %v10380_v34 = vadd.f32 %v7545_v57, %v10048_v61  ;;  %7846 = vmatprep.mubr.msk.f32.mxu1 %vm359_vm0, %v12741_v52  ;;  %7702 = vmatprep.mubr.msk.f32.mxu0 %vm359_vm0, %v12742_v55  ;;  %v12745_v26 = vld [vmem:[#allocation81_spill] sm:$0xff]  ;;  %v12746_v61 = vld [vmem:[#allocation171_spill] sm:$0xff] }
 0x230   : > { %v10386_v51 = vpop.f32.mrf.mxu0  ;;  %v2878_v23 = vpop.f32.mrf.mxu1  ;;  %v12748_v52 = vld [vmem:[#allocation29_spill] sm:$0xff]  ;;  %v12749_v55 = vld [vmem:[#allocation87_spill] sm:$0xff] }
 0x231   : > { %12740 = vst [vmem:[#allocation136_spill] sm:$0xff] %v10380_v34  ;;  %v10389_v41 = vadd.f32 %v2878_v23, %v10054_v1  ;;  %v12751_v34 = vld [vmem:[#allocation88_spill] sm:$0xff] }
 0x232   : > { %v7404_v62 = vpop.f32.mrf.mxu0  ;;  %v7548_v11 = vpop.f32.mrf.mxu1  ;;  %7703 = vmatmul.mubr.msk.f32.gmra.mxu0 %vm359_vm0, %v12744_v37  ;;  %7847 = vmatmul.mubr.msk.f32.gmra.mxu1 %vm359_vm0, %v12745_v26 }
 0x233   : > { %12743 = vst [vmem:[#allocation71_spill] sm:$0xff] %v10389_v41  ;;  %v10396_v57 = vadd.f32 %v7404_v62, %v12746_v61  ;;  %v10399_v24 = vadd.f32 %v7548_v11, %v10070_v39  ;;  %7849 = vmatprep.mubr.msk.f32.mxu1 %vm359_vm0, %v12748_v52  ;;  %7705 = vmatprep.mubr.msk.f32.mxu0 %vm359_vm0, %v12749_v55  ;;  %v12752_v62 = vld [vmem:[#allocation30_spill] sm:$0xff]  ;;  %v12753_v39 = vld [vmem:[#allocation176_spill] sm:$0xff] }
 0x234   : > { %v10405_v1 = vpop.f32.mrf.mxu0  ;;  %v2888_v23 = vpop.f32.mrf.mxu1  ;;  %v12756_v52 = vld [vmem:[#allocation34_spill] sm:$0xff]  ;;  %v12757_v55 = vld [vmem:[#allocation160_spill] sm:$0xff] }
 0x235   : > { %12747 = vst [vmem:[#allocation72_spill] sm:$0xff] %v10399_v24  ;;  %v10408_v37 = vadd.f32 %v2888_v23, %v10076_v25  ;;  %v12759_v24 = vld [vmem:[#allocation161_spill] sm:$0xff] }
 0x236   : > { %v7407_v41 = vpop.f32.mrf.mxu0  ;;  %v7551_v26 = vpop.f32.mrf.mxu1  ;;  %7706 = vmatmul.mubr.msk.f32.gmra.mxu0 %vm359_vm0, %v12751_v34  ;;  %7850 = vmatmul.mubr.msk.f32.gmra.mxu1 %vm359_vm0, %v12752_v62 }
 0x237   : > { %12750 = vst [vmem:[#allocation142_spill] sm:$0xff] %v10408_v37  ;;  %v10415_v11 = vadd.f32 %v7407_v41, %v12753_v39  ;;  %v10418_v61 = vadd.f32 %v7551_v26, %v10092_v48  ;;  %7852 = vmatprep.mubr.msk.f32.mxu1 %vm359_vm0, %v12756_v52  ;;  %7708 = vmatprep.mubr.msk.f32.mxu0 %vm359_vm0, %v12757_v55  ;;  %v12760_v41 = vld [vmem:[#allocation35_spill] sm:$0xff]  ;;  %v12761_v48 = vld [vmem:[#allocation180_spill] sm:$0xff]  ;;  %v12765_v55 = vld [vmem:[#allocation210_spill] sm:$0xff] }
 0x238   : > { %v10424_v25 = vpop.f32.mrf.mxu0  ;;  %v2898_v23 = vpop.f32.mrf.mxu1  ;;  %v12764_v52 = vld [vmem:[#allocation207_spill] sm:$0xff] }
 0x239   : > { %12754 = vst [vmem:[#allocation15_spill] sm:$0xff] %v10415_v11  ;;  %12755 = vst [vmem:[#allocation206_spill] sm:$0xff] %v10418_v61  ;;  %v10427_v34 = vadd.f32 %v2898_v23, %v10098_v53  ;;  %v4308_v53 = vpop.permute.xlu0 %4307  ;;  %v12767_v61 = vld [vmem:[#allocation97_spill] sm:$0xff] }
 0x23a   : > { %v7410_v37 = vpop.f32.mrf.mxu0  ;;  %v7554_v62 = vpop.f32.mrf.mxu1  ;;  %7709 = vmatmul.mubr.msk.f32.gmra.mxu0 %vm359_vm0, %v12759_v24  ;;  %7853 = vmatmul.mubr.msk.f32.gmra.mxu1 %vm359_vm0, %v12760_v41  ;;  %v12766_v24 = vld [vmem:[#allocation108_spill] sm:$0xff] }
 0x23b   : > { %12758 = vst [vmem:[#allocation16_spill] sm:$0xff] %v10427_v34  ;;  %v10434_v26 = vadd.f32 %v7410_v37, %v12761_v48  ;;  %v10437_v39 = vadd.f32 %v7554_v62, %v10114_v63  ;;  %7855 = vmatprep.mubr.msk.f32.mxu1 %vm359_vm0, %v12764_v52  ;;  %7763 = vmatprep.mubr.msk.f32.mxu0 %vm359_vm0, %v12765_v55  ;;  %v12769_v63 = vld [vmem:[#allocation211_spill] sm:$0xff]  ;;  %v12770_v62 = vld [vmem:[#allocation209_spill] sm:$0xff]  ;;  %v10457_v55 = vld [vmem:[%s11991_s1 + $0x80] sm:$0xff] }
 0x23c   : > { %v10443_v23 = vpop.f32.mrf.mxu0  ;;  %v2908_v34 = vpop.f32.mrf.mxu1  ;;  %v780_v11 = vadd.f32 %v12767_v61, %v12766_v24  ;;  %v12771_v61 = vld [vmem:[#allocation42_spill] sm:$0xff] }
 0x23d   : > { %12762 = vst [vmem:[#allocation147_spill] sm:$0xff] %v10434_v26  ;;  %12763 = vst [vmem:[#allocation74_spill] sm:$0xff] %v10437_v39  ;;  %v10448_v41 = vadd.f32 %v2908_v34, %v10120_v28  ;;  %v4310_v34 = vpop.permute.xlu1 %4309  ;;  %v12773_v39 = vld [vmem:[#allocation100_spill] sm:$0xff] }
 0x23e   : > { %v7465_v37 = vpop.f32.mrf.mxu0  ;;  %v7557_v48 = vpop.f32.mrf.mxu1  ;;  %7764 = vmatmul.mubr.msk.f32.vlgmr.msra.gmra.mxu0 %vm359_vm0, %v12769_v63  ;;  %7856 = vmatmul.mubr.msk.f32.gmra.mxu1 %vm359_vm0, %v12770_v62  ;;  %v2018_v52 = vadd.f32 %v10154_v10, %v780_v11  ;;  %v12775_v11 = vld [vmem:[#allocation200_spill] sm:$0xff] }
 0x23f   : > { %12768 = vst [vmem:[#allocation75_spill] sm:$0xff] %v10448_v41  ;;  %v10461_v24 = vadd.f32 %v7465_v37, %v10144_v17  ;;  %v10464_v28 = vadd.f32 %v7557_v48, %v10146_v50  ;;  %7766 = vmatprep.mubr.msk.f32.mxu0 %vm359_vm0, %v12771_v61  ;;  %7858 = vmatprep.mubr.msk.f32.mxu1 %vm359_vm0, %v4308_v53  ;;  %v12772_v41 = vld [vmem:[#allocation113_spill] sm:$0xff]  ;;  %v12776_v53 = vld [vmem:[#allocation212_spill] sm:$0xff] }
 0x240   : > { %v2918_v63 = vpop.f32.mrf.mxu1  ;;  %v2511_v62 = vpop.f32.mrf.mxu0  ;;  %7862 = vmatpush3.msra.mxu0 %v10140_v40  ;;  %v790_v26 = vadd.f32 %v12773_v39, %v12772_v41  ;;  %v12774_v50 = vld [vmem:[#allocation85_spill] sm:$0xff]  ;;  %v12777_v41 = vld [vmem:[#allocation91_spill] sm:$0xff] }
 0x241   : > { %v10473_v10 = vadd.f32 %v2918_v63, %v10158_v43  ;;  %v10475_v17 = vadd.f32 %v2511_v62, %v2018_v52  ;;  %7961 = vmatprep.subr.mxu0 %v10457_v55  ;;  %v1488_v37 = vadd.f32 %v12775_v11, %v12774_v50  ;;  %v12778_v52 = vld [vmem:[#allocation213_spill] sm:$0xff]  ;;  %v12779_v63 = vld [vmem:[#allocation118_spill] sm:$0xff]  ;;  %v12780_v62 = vld [vmem:[#allocation103_spill] sm:$0xff] }
 0x242   : > { %v7468_v48 = vpop.f32.mrf.mxu0  ;;  %v7560_v61 = vpop.f32.mrf.mxu1  ;;  %7767 = vmatmul.mubr.msk.f32.gmra.mxu0 %vm359_vm0, %v12776_v53  ;;  %7859 = vmatmul.mubr.msk.f32.gmra.mxu1 %vm359_vm0, %v4310_v34  ;;  %v2020_v40 = vadd.f32 %v10175_v32, %v790_v26  ;;  %v800_v50 = vadd.f32 %v12780_v62, %v12779_v63  ;;  %v12783_v63 = vld [vmem:[#allocation92_spill] sm:$0xff] }
 0x243   : > { %v10485_v39 = vadd.f32 %v7468_v48, %v10167_v60  ;;  %v10488_v43 = vadd.f32 %v7560_v61, %v10169_v27  ;;  %7913 = vmatprep.mubr.msk.f32.mxu1 %vm359_vm0, %v12777_v41  ;;  %7769 = vmatprep.mubr.msk.f32.mxu0 %vm359_vm0, %v12778_v52  ;;  %v2405_v34 = vadd.f32 %v9791_v14, %v1488_v37  ;;  %v12781_v27 = vld [vmem:[#allocation201_spill] sm:$0xff]  ;;  %v12782_v52 = vld [vmem:[#allocation214_spill] sm:$0xff] }
 0x244   : > { %v2521_v11 = vpop.f32.mrf.mxu0  ;;  %v2928_v53 = vpop.f32.mrf.mxu1  ;;  %v1498_v26 = vadd.f32 %v12781_v27, %v9770_v47  ;;  %v2022_v48 = vadd.f32 %v10197_v33, %v800_v50  ;;  %v12784_v47 = vld [vmem:[#allocation98_spill] sm:$0xff]  ;;  %v12785_v33 = vld [vmem:[#allocation123_spill] sm:$0xff] }
 0x245   : > { %v10497_v32 = vadd.f32 %v2521_v11, %v2020_v40  ;;  %v10500_v60 = vadd.f32 %v2928_v53, %v10177_v45  ;;  %v2937_v14 = vadd.f32 %v10199_v18, %v2405_v34  ;;  %v12786_v40 = vld [vmem:[#allocation107_spill] sm:$0xff]  ;;  %v12788_v18 = vld [vmem:[#allocation226_spill] sm:$0xff] }
 0x246   : > { %v7471_v61 = vpop.f32.mrf.mxu0  ;;  %v7615_v41 = vpop.f32.mrf.mxu1  ;;  %7770 = vmatmul.mubr.msk.f32.gmra.mxu0 %vm359_vm0, %v12782_v52  ;;  %7914 = vmatmul.mubr.msk.f32.vlgmr.msra.gmra.mxu1 %vm359_vm0, %v12783_v63  ;;  %v810_v62 = vadd.f32 %v12786_v40, %v12785_v33  ;;  %v12787_v53 = vld [vmem:[#allocation215_spill] sm:$0xff]  ;;  %v2407_v34 = vadd.f32 %v12788_v18, %v1498_v26  ;;  %v12790_v63 = vld [vmem:[#allocation217_spill] sm:$0xff]  ;;  %v12795_v40 = vld [vmem:[#allocation112_spill] sm:$0xff] }
 0x247   : > { %v10511_v37 = vadd.f32 %v7471_v61, %v10189_v6  ;;  %v10514_v45 = vadd.f32 %v7615_v41, %v10192_v42  ;;  %8012 = vmatpush3.msra.mxu1 %v10182_v2  ;;  %7916 = vmatprep.mubr.msk.f32.mxu1 %vm359_vm0, %v12784_v47  ;;  %v12789_v42 = vld [vmem:[#allocation202_spill] sm:$0xff]  ;;  %v12791_v47 = vld [vmem:[#allocation99_spill] sm:$0xff] }
 0x248   : > { %v2531_v50 = vpop.f32.mrf.mxu0  ;;  %v3314_v11 = vpop.f32.mrf.mxu1  ;;  %7772 = vmatprep.mubr.msk.f32.mxu0 %vm359_vm0, %v12787_v53  ;;  %v1508_v2 = vadd.f32 %v12789_v42, %v9841_v13  ;;  %v2024_v61 = vadd.f32 %v10218_v7, %v810_v62  ;;  %v2939_v33 = vadd.f32 %v10220_v59, %v2407_v34  ;;  %v12793_v7 = vld [vmem:[#allocation219_spill] sm:$0xff]  ;;  %v12794_v13 = vld [vmem:[#allocation128_spill] sm:$0xff] }
 0x249   : > { %v10524_v6 = vadd.f32 %v2531_v50, %v2022_v48  ;;  %v10526_v27 = vadd.f32 %v3314_v11, %v2937_v14  ;;  %v12792_v14 = vld [vmem:[#allocation104_spill] sm:$0xff]  ;;  %v820_v62 = vadd.f32 %v12795_v40, %v12794_v13 }
 0x24a   : > { %v7474_v41 = vpop.f32.mrf.mxu0  ;;  %v7618_v52 = vpop.f32.mrf.mxu1  ;;  %7773 = vmatmul.mubr.msk.f32.gmra.mxu0 %vm359_vm0, %v12790_v63  ;;  %7917 = vmatmul.mubr.msk.f32.gmra.mxu1 %vm359_vm0, %v12791_v47  ;;  %v2409_v53 = vadd.f32 %v9851_v35, %v1508_v2  ;;  %v12798_v63 = vld [vmem:[#allocation105_spill] sm:$0xff] }
 0x24b   : > { %v10537_v26 = vadd.f32 %v7474_v41, %v10209_v4  ;;  %v10540_v48 = vadd.f32 %v7618_v52, %v10212_v20  ;;  %7919 = vmatprep.mubr.msk.f32.mxu1 %vm359_vm0, %v12792_v14  ;;  %7775 = vmatprep.mubr.msk.f32.mxu0 %vm359_vm0, %v12793_v7  ;;  %v12796_v20 = vld [vmem:[#allocation203_spill] sm:$0xff]  ;;  %v2026_v34 = vadd.f32 %v10236_v31, %v820_v62  ;;  %v12797_v52 = vld [vmem:[#allocation220_spill] sm:$0xff]  ;;  %v12801_v31 = vld [vmem:[#allocation133_spill] sm:$0xff] }
 0x24c   : > { %v2541_v50 = vpop.f32.mrf.mxu0  ;;  %v3324_v11 = vpop.f32.mrf.mxu1  ;;  %v1518_v18 = vadd.f32 %v12796_v20, %v9864_v54  ;;  %v2941_v47 = vadd.f32 %v10238_v58, %v2409_v53  ;;  %v12800_v54 = vld [vmem:[#allocation221_spill] sm:$0xff]  ;;  %v12804_v20 = vld [vmem:[#allocation222_spill] sm:$0xff] }
 0x24d   : > { %v10549_v59 = vadd.f32 %v2541_v50, %v2024_v61  ;;  %v10551_v4 = vadd.f32 %v3324_v11, %v2939_v33  ;;  %v12799_v61 = vld [vmem:[#allocation114_spill] sm:$0xff]  ;;  %v12802_v33 = vld [vmem:[#allocation117_spill] sm:$0xff] }
 0x24e   : > { %v7477_v42 = vpop.f32.mrf.mxu0  ;;  %v7621_v41 = vpop.f32.mrf.mxu1  ;;  %7776 = vmatmul.mubr.msk.f32.gmra.mxu0 %vm359_vm0, %v12797_v52  ;;  %7920 = vmatmul.mubr.msk.f32.gmra.mxu1 %vm359_vm0, %v12798_v63  ;;  %v830_v14 = vadd.f32 %v12802_v33, %v12801_v31  ;;  %v2411_v40 = vadd.f32 %v9874_v9, %v1518_v18  ;;  %v12806_v18 = vld [vmem:[#allocation111_spill] sm:$0xff]  ;;  %v12807_v52 = vld [vmem:[#allocation124_spill] sm:$0xff]  ;;  %v12810_v63 = vld [vmem:[#allocation122_spill] sm:$0xff] }
 0x24f   : > { %v10562_v35 = vadd.f32 %v7477_v42, %v10227_v30  ;;  %v10565_v2 = vadd.f32 %v7621_v41, %v10230_v36  ;;  %7922 = vmatprep.mubr.msk.f32.mxu1 %vm359_vm0, %v12799_v61  ;;  %7778 = vmatprep.mubr.msk.f32.mxu0 %vm359_vm0, %v12800_v54  ;;  %v12803_v36 = vld [vmem:[#allocation204_spill] sm:$0xff]  ;;  %v12805_v42 = vld [vmem:[#allocation115_spill] sm:$0xff]  ;;  %v12811_v31 = vld [vmem:[#allocation229_spill] sm:$0xff] }
 0x250   : > { %v2551_v7 = vpop.f32.mrf.mxu0  ;;  %v3334_v13 = vpop.f32.mrf.mxu1  ;;  %v1528_v62 = vadd.f32 %v12803_v36, %v9887_v16  ;;  %v2028_v50 = vadd.f32 %v10254_v3, %v830_v14  ;;  %v2943_v41 = vadd.f32 %v10256_v56, %v2411_v40  ;;  %v12808_v16 = vld [vmem:[#allocation223_spill] sm:$0xff]  ;;  %v12809_v3 = vld [vmem:[#allocation138_spill] sm:$0xff]  ;;  %v12812_v14 = vld [vmem:[#allocation89_spill] sm:$0xff] }
 0x251   : > { %v10574_v58 = vadd.f32 %v2551_v7, %v2026_v34  ;;  %v10576_v30 = vadd.f32 %v3334_v13, %v2941_v47  ;;  %v840_v47 = vadd.f32 %v12810_v63, %v12809_v3  ;;  %v12813_v7 = vld [vmem:[#allocation205_spill] sm:$0xff]  ;;  %v12821_v3 = vld [vmem:[#allocation144_spill] sm:$0xff]  ;;  %v12822_v63 = vld [vmem:[#allocation127_spill] sm:$0xff] }
 0x252   : > { %v7480_v11 = vpop.f32.mrf.mxu0  ;;  %v7624_v53 = vpop.f32.mrf.mxu1  ;;  %7779 = vmatmul.mubr.msk.f32.gmra.mxu0 %vm359_vm0, %v12804_v20  ;;  %7923 = vmatmul.mubr.msk.f32.gmra.mxu1 %vm359_vm0, %v12805_v42  ;;  %v2413_v33 = vadd.f32 %v12811_v31, %v1528_v62  ;;  %v1538_v13 = vadd.f32 %v12813_v7, %v12812_v14  ;;  %v12815_v20 = vld [vmem:[#allocation125_spill] sm:$0xff]  ;;  %v12816_v42 = vld [vmem:[#allocation62_spill] sm:$0xff]  ;;  %v12817_v62 = vld [vmem:[#allocation60_spill] sm:$0xff] }
 0x253   : > { %v10587_v9 = vadd.f32 %v7480_v11, %v10245_v38  ;;  %v10590_v34 = vadd.f32 %v7624_v53, %v12806_v18  ;;  %7925 = vmatprep.mubr.msk.f32.mxu1 %vm359_vm0, %v12807_v52  ;;  %7781 = vmatprep.mubr.msk.f32.mxu0 %vm359_vm0, %v12808_v16  ;;  %v2030_v40 = vadd.f32 %v10272_v46, %v840_v47  ;;  %v12814_v53 = vld [vmem:[#allocation224_spill] sm:$0xff]  ;;  %v12819_v16 = vld [vmem:[#allocation134_spill] sm:$0xff]  ;;  %v12820_v46 = vld [vmem:[#allocation225_spill] sm:$0xff] }
 0x254   : > { %v2561_v61 = vpop.f32.mrf.mxu0  ;;  %v3344_v54 = vpop.f32.mrf.mxu1  ;;  %v2945_v18 = vadd.f32 %v12816_v42, %v2413_v33  ;;  %v850_v47 = vadd.f32 %v12822_v63, %v12821_v3  ;;  %v12823_v31 = vld [vmem:[#allocation90_spill] sm:$0xff]  ;;  %v12825_v42 = vld [vmem:[#allocation135_spill] sm:$0xff] }
 0x255   : > { %v10599_v56 = vadd.f32 %v2561_v61, %v2028_v50  ;;  %v10601_v38 = vadd.f32 %v3344_v54, %v2943_v41  ;;  %v12818_v41 = vld [vmem:[#allocation116_spill] sm:$0xff]  ;;  %v2415_v14 = vadd.f32 %v12823_v31, %v1538_v13  ;;  %v12828_v13 = vld [vmem:[#allocation121_spill] sm:$0xff] }
 0x256   : > { %v7483_v36 = vpop.f32.mrf.mxu0  ;;  %v7627_v11 = vpop.f32.mrf.mxu1  ;;  %7782 = vmatmul.mubr.msk.f32.gmra.mxu0 %vm359_vm0, %v12814_v53  ;;  %7926 = vmatmul.mubr.msk.f32.gmra.mxu1 %vm359_vm0, %v12815_v20  ;;  %v12824_v20 = vld [vmem:[#allocation227_spill] sm:$0xff] }
 0x257   : > { %v10612_v50 = vadd.f32 %v7483_v36, %v12817_v62  ;;  %v10615_v52 = vadd.f32 %v7627_v11, %v12818_v41  ;;  %7928 = vmatprep.mubr.msk.f32.mxu1 %vm359_vm0, %v12819_v16  ;;  %7784 = vmatprep.mubr.msk.f32.mxu0 %vm359_vm0, %v12820_v46  ;;  %v2032_v36 = vadd.f32 %v10290_v8, %v850_v47  ;;  %v12826_v62 = vld [vmem:[#allocation65_spill] sm:$0xff]  ;;  %v12827_v16 = vld [vmem:[#allocation63_spill] sm:$0xff]  ;;  %v12830_v8 = vld [vmem:[#allocation228_spill] sm:$0xff] }
 0x258   : > { %v2571_v61 = vpop.f32.mrf.mxu0  ;;  %v3354_v54 = vpop.f32.mrf.mxu1  ;;  %v2947_v41 = vadd.f32 %v12826_v62, %v2415_v14  ;;  %v12831_v47 = vld [vmem:[#allocation149_spill] sm:$0xff] }
 0x259   : > { %v10624_v33 = vadd.f32 %v2571_v61, %v2030_v40  ;;  %v10626_v7 = vadd.f32 %v3354_v54, %v2945_v18  ;;  %v12829_v18 = vld [vmem:[#allocation143_spill] sm:$0xff]  ;;  %v12832_v61 = vld [vmem:[#allocation132_spill] sm:$0xff] }
 0x25a   : > { %v7486_v11 = vpop.f32.mrf.mxu0  ;;  %v7630_v53 = vpop.f32.mrf.mxu1  ;;  %7785 = vmatmul.mubr.msk.f32.gmra.mxu0 %vm359_vm0, %v12824_v20  ;;  %7929 = vmatmul.mubr.msk.f32.gmra.mxu1 %vm359_vm0, %v12825_v42  ;;  %v860_v54 = vadd.f32 %v12832_v61, %v12831_v47  ;;  %v12833_v42 = vld [vmem:[#allocation145_spill] sm:$0xff] }
 0x25b   : > { %v10635_v46 = vadd.f32 %v7486_v11, %v12827_v16  ;;  %v10638_v40 = vadd.f32 %v7630_v53, %v12828_v13  ;;  %7931 = vmatprep.mubr.msk.f32.mxu1 %vm359_vm0, %v12829_v18  ;;  %7787 = vmatprep.mubr.msk.f32.mxu0 %vm359_vm0, %v12830_v8  ;;  %v8102_v53 = vld [vmem:[%s8170_s23 + $0xf8] sm:$0xff] }
 0x25c   : > { %v2581_v3 = vpop.f32.mrf.mxu0  ;;  %v3364_v63 = vpop.f32.mrf.mxu1  ;;  %v2034_v62 = vadd.f32 %v10311_v12, %v860_v54  ;;  %v12837_v12 = vld [vmem:[#allocation66_spill] sm:$0xff] }
 0x25d   : > { %v10646_v31 = vadd.f32 %v2581_v3, %v2032_v36  ;;  %v10648_v14 = vadd.f32 %v3364_v63, %v2947_v41  ;;  %v12834_v36 = vld [vmem:[#allocation152_spill] sm:$0xff]  ;;  %v8103_v41 = vld [vmem:[%s8170_s23 + $0x108] sm:$0xff]  ;;  %v12835_v3 = vld [vmem:[#allocation153_spill] sm:$0xff] }
 0x25e   : > { %v7489_v11 = vpop.f32.mrf.mxu0  ;;  %v7633_v20 = vpop.f32.mrf.mxu1  ;;  %7788 = vmatmul.mubr.msk.f32.gmra.mxu0 %vm359_vm0, %v8102_v53  ;;  %7932 = vmatmul.mubr.msk.f32.gmra.mxu1 %vm359_vm0, %v12833_v42  ;;  %v12836_v63 = vld [vmem:[#allocation137_spill] sm:$0xff] }
 0x25f   : > { %v10656_v16 = vadd.f32 %v7489_v11, %v10302_v21  ;;  %v10659_v13 = vadd.f32 %v7633_v20, %v10305_v44  ;;  %7934 = vmatprep.mubr.msk.f32.mxu1 %vm359_vm0, %v12834_v36  ;;  %7790 = vmatprep.mubr.msk.f32.mxu0 %vm359_vm0, %v8103_v41  ;;  %v870_v47 = vadd.f32 %v12836_v63, %v12835_v3  ;;  %v8104_v11 = vld [vmem:[%s8170_s23 + $0x110] sm:$0xff]  ;;  %v12838_v20 = vld [vmem:[#allocation154_spill] sm:$0xff]  ;;  %v12840_v41 = vld [vmem:[#allocation163_spill] sm:$0xff] }
 0x260   : > { %v2591_v18 = vpop.f32.mrf.mxu0  ;;  %v3374_v8 = vpop.f32.mrf.mxu1  ;;  %v12839_v36 = vld [vmem:[#allocation126_spill] sm:$0xff] }
 0x261   : > { %v10667_v61 = vadd.f32 %v2591_v18, %v2034_v62  ;;  %v10670_v21 = vadd.f32 %v3374_v8, %v12837_v12  ;;  %v2036_v53 = vadd.f32 %v10329_v29, %v870_v47  ;;  %v8105_v18 = vld [vmem:[%s8170_s23 + $0x120] sm:$0xff]  ;;  %v12842_v12 = vld [vmem:[#allocation141_spill] sm:$0xff]  ;;  %v12844_v29 = vld [vmem:[#allocation68_spill] sm:$0xff] }
 0x262   : > { %v7492_v54 = vpop.f32.mrf.mxu0  ;;  %v7636_v44 = vpop.f32.mrf.mxu1  ;;  %7791 = vmatmul.mubr.msk.f32.gmra.mxu0 %vm359_vm0, %v8104_v11  ;;  %7935 = vmatmul.mubr.msk.f32.gmra.mxu1 %vm359_vm0, %v12838_v20  ;;  %v12841_v63 = vld [vmem:[#allocation158_spill] sm:$0xff] }
 0x263   : > { %v10678_v42 = vadd.f32 %v7492_v54, %v10320_v0  ;;  %v10681_v62 = vadd.f32 %v7636_v44, %v12839_v36  ;;  %7937 = vmatprep.mubr.msk.f32.mxu1 %vm359_vm0, %v12840_v41  ;;  %7793 = vmatprep.mubr.msk.f32.mxu0 %vm359_vm0, %v8105_v18  ;;  %v880_v11 = vadd.f32 %v12842_v12, %v12841_v63  ;;  %v8106_v44 = vld [vmem:[%s8170_s23 + $0x128] sm:$0xff]  ;;  %v12846_v36 = vld [vmem:[#allocation165_spill] sm:$0xff] }
 0x264   : > { %v2601_v8 = vpop.f32.mrf.mxu0  ;;  %v3384_v3 = vpop.f32.mrf.mxu1  ;;  %v12847_v63 = vld [vmem:[#allocation69_spill] sm:$0xff] }
 0x265   : > { %v10689_v20 = vadd.f32 %v2601_v8, %v2036_v53  ;;  %v10692_v0 = vadd.f32 %v3384_v3, %v12844_v29  ;;  %v2038_v41 = vadd.f32 %v10348_v5, %v880_v11  ;;  %v12848_v8 = vld [vmem:[#allocation172_spill] sm:$0xff]  ;;  %v8107_v3 = vld [vmem:[%s8170_s23 + $0x138] sm:$0xff]  ;;  %v12852_v5 = vld [vmem:[#allocation131_spill] sm:$0xff] }
 0x266   : > { %v7495_v47 = vpop.f32.mrf.mxu0  ;;  %v7639_v54 = vpop.f32.mrf.mxu1  ;;  %7794 = vmatmul.mubr.msk.f32.gmra.mxu0 %vm359_vm0, %v8106_v44  ;;  %7938 = vmatmul.mubr.msk.f32.gmra.mxu1 %vm359_vm0, %v12846_v36  ;;  %v12849_v44 = vld [vmem:[#allocation164_spill] sm:$0xff] }
 0x267   : > { %12843 = vst [vmem:[#allocation151_spill] sm:$0xff] %v10689_v20  ;;  %12845 = vst [vmem:[#allocation19_spill] sm:$0xff] %v10692_v0  ;;  %v10700_v18 = vadd.f32 %v7495_v47, %v10339_v22  ;;  %v10703_v53 = vadd.f32 %v7639_v54, %v12847_v63  ;;  %7940 = vmatprep.mubr.msk.f32.mxu1 %vm359_vm0, %v12848_v8  ;;  %7796 = vmatprep.mubr.msk.f32.mxu0 %vm359_vm0, %v8107_v3  ;;  %v12850_v0 = vld [vmem:[#allocation146_spill] sm:$0xff] }
 0x268   : > { %v2611_v12 = vpop.f32.mrf.mxu0  ;;  %v3394_v29 = vpop.f32.mrf.mxu1  ;;  %v890_v36 = vadd.f32 %v12850_v0, %v12849_v44  ;;  %v8108_v54 = vld [vmem:[%s8170_s23 + $0x140] sm:$0xff]  ;;  %v12855_v0 = vld [vmem:[#allocation11_spill] sm:$0xff] }
 0x269   : > { %v10711_v20 = vadd.f32 %v2611_v12, %v2038_v41  ;;  %v10714_v22 = vadd.f32 %v3394_v29, %v12852_v5  ;;  %v12854_v63 = vld [vmem:[#allocation174_spill] sm:$0xff]  ;;  %v12856_v12 = vld [vmem:[#allocation181_spill] sm:$0xff]  ;;  %v8109_v29 = vld [vmem:[%s8170_s23 + $0x150] sm:$0xff] }
 0x26a   : > { %v7498_v11 = vpop.f32.mrf.mxu0  ;;  %v7642_v47 = vpop.f32.mrf.mxu1  ;;  %7797 = vmatmul.mubr.msk.f32.gmra.mxu0 %vm359_vm0, %v8108_v54  ;;  %7941 = vmatmul.mubr.msk.f32.gmra.mxu1 %vm359_vm0, %v12854_v63  ;;  %v2040_v8 = vadd.f32 %v10367_v15, %v890_v36  ;;  %v12857_v54 = vld [vmem:[#allocation169_spill] sm:$0xff]  ;;  %v12860_v15 = vld [vmem:[#allocation12_spill] sm:$0xff] }
 0x26b   : > { %12851 = vst [vmem:[#allocation20_spill] sm:$0xff] %v10711_v20  ;;  %12853 = vst [vmem:[#allocation156_spill] sm:$0xff] %v10714_v22  ;;  %v10722_v3 = vadd.f32 %v7498_v11, %v10358_v49  ;;  %v10725_v41 = vadd.f32 %v7642_v47, %v12855_v0  ;;  %7943 = vmatprep.mubr.msk.f32.mxu1 %vm359_vm0, %v12856_v12  ;;  %7799 = vmatprep.mubr.msk.f32.mxu0 %vm359_vm0, %v8109_v29  ;;  %v12858_v22 = vld [vmem:[#allocation155_spill] sm:$0xff]  ;;  %v8110_v47 = vld [vmem:[%s8170_s23 + $0x158] sm:$0xff] }
 0x26c   : > { %v2621_v44 = vpop.f32.mrf.mxu0  ;;  %v3404_v5 = vpop.f32.mrf.mxu1  ;;  %v900_v63 = vadd.f32 %v12858_v22, %v12857_v54  ;;  %v12862_v0 = vld [vmem:[#allocation182_spill] sm:$0xff]  ;;  %v12863_v22 = vld [vmem:[#allocation136_spill] sm:$0xff] }
 0x26d   : > { %v10733_v20 = vadd.f32 %v2621_v44, %v2040_v8  ;;  %v10736_v49 = vadd.f32 %v3404_v5, %v12860_v15  ;;  %v12864_v44 = vld [vmem:[#allocation185_spill] sm:$0xff]  ;;  %v8111_v5 = vld [vmem:[%s8170_s23 + $0x168] sm:$0xff] }
 0x26e   : > { %v7501_v36 = vpop.f32.mrf.mxu0  ;;  %v7645_v11 = vpop.f32.mrf.mxu1  ;;  %7800 = vmatmul.mubr.msk.f32.gmra.mxu0 %vm359_vm0, %v8110_v47  ;;  %7944 = vmatmul.mubr.msk.f32.gmra.mxu1 %vm359_vm0, %v12862_v0  ;;  %v2042_v12 = vadd.f32 %v10386_v51, %v900_v63  ;;  %v12865_v47 = vld [vmem:[#allocation173_spill] sm:$0xff]  ;;  %v12868_v51 = vld [vmem:[#allocation71_spill] sm:$0xff] }
 0x26f   : > { %12859 = vst [vmem:[#allocation77_spill] sm:$0xff] %v10733_v20  ;;  %12861 = vst [vmem:[#allocation78_spill] sm:$0xff] %v10736_v49  ;;  %v10744_v29 = vadd.f32 %v7501_v36, %v10377_v19  ;;  %v10747_v8 = vadd.f32 %v7645_v11, %v12863_v22  ;;  %7946 = vmatprep.mubr.msk.f32.mxu1 %vm359_vm0, %v12864_v44  ;;  %7802 = vmatprep.mubr.msk.f32.mxu0 %vm359_vm0, %v8111_v5  ;;  %v12866_v49 = vld [vmem:[#allocation166_spill] sm:$0xff]  ;;  %v8112_v11 = vld [vmem:[%s8170_s23 + $0x170] sm:$0xff] }
 0x270   : > { %v2631_v54 = vpop.f32.mrf.mxu0  ;;  %v3414_v15 = vpop.f32.mrf.mxu1  ;;  %v910_v0 = vadd.f32 %v12866_v49, %v12865_v47  ;;  %v12870_v22 = vld [vmem:[#allocation186_spill] sm:$0xff]  ;;  %v12871_v49 = vld [vmem:[#allocation72_spill] sm:$0xff] }
 0x271   : > { %v10755_v20 = vadd.f32 %v2631_v54, %v2042_v12  ;;  %v10758_v19 = vadd.f32 %v3414_v15, %v12868_v51  ;;  %v12873_v54 = vld [vmem:[#allocation189_spill] sm:$0xff]  ;;  %v8113_v15 = vld [vmem:[%s8170_s23 + $0x180] sm:$0xff] }
 0x272   : > { %v7504_v63 = vpop.f32.mrf.mxu0  ;;  %v7648_v36 = vpop.f32.mrf.mxu1  ;;  %7803 = vmatmul.mubr.msk.f32.gmra.mxu0 %vm359_vm0, %v8112_v11  ;;  %7947 = vmatmul.mubr.msk.f32.gmra.mxu1 %vm359_vm0, %v12870_v22  ;;  %v2044_v44 = vadd.f32 %v10405_v1, %v910_v0  ;;  %v12874_v11 = vld [vmem:[#allocation178_spill] sm:$0xff] }
 0x273   : > { %12867 = vst [vmem:[#allocation162_spill] sm:$0xff] %v10755_v20  ;;  %12869 = vst [vmem:[#allocation24_spill] sm:$0xff] %v10758_v19  ;;  %v10766_v5 = vadd.f32 %v7504_v63, %v10396_v57  ;;  %v10769_v12 = vadd.f32 %v7648_v36, %v12871_v49  ;;  %7949 = vmatprep.mubr.msk.f32.mxu1 %vm359_vm0, %v12873_v54  ;;  %7805 = vmatprep.mubr.msk.f32.mxu0 %vm359_vm0, %v8113_v15  ;;  %v12875_v19 = vld [vmem:[#allocation175_spill] sm:$0xff]  ;;  %v12877_v1 = vld [vmem:[#allocation142_spill] sm:$0xff] }
 0x274   : > { %v2641_v47 = vpop.f32.mrf.mxu0  ;;  %v3424_v51 = vpop.f32.mrf.mxu1  ;;  %v920_v22 = vadd.f32 %v12875_v19, %v12874_v11  ;;  %v8114_v36 = vld [vmem:[%s8170_s23 + $0x188] sm:$0xff]  ;;  %v12879_v49 = vld [vmem:[#allocation190_spill] sm:$0xff] }
 0x275   : > { %12872 = vst [vmem:[#allocation25_spill] sm:$0xff] %v10769_v12  ;;  %v10777_v20 = vadd.f32 %v2641_v47, %v2044_v44  ;;  %v10780_v57 = vadd.f32 %v3424_v51, %v12877_v1  ;;  %v12880_v15 = vld [vmem:[#allocation15_spill] sm:$0xff]  ;;  %v12882_v19 = vld [vmem:[#allocation206_spill] sm:$0xff]  ;;  %v12884_v47 = vld [vmem:[#allocation193_spill] sm:$0xff] }
 0x276   : > { %v7507_v0 = vpop.f32.mrf.mxu0  ;;  %v7651_v63 = vpop.f32.mrf.mxu1  ;;  %7806 = vmatmul.mubr.msk.f32.gmra.mxu0 %vm359_vm0, %v8114_v36  ;;  %7950 = vmatmul.mubr.msk.f32.gmra.mxu1 %vm359_vm0, %v12879_v49  ;;  %v2046_v54 = vadd.f32 %v10424_v25, %v920_v22  ;;  %v8115_v51 = vld [vmem:[%s8170_s23 + $0x198] sm:$0xff]  ;;  %v12885_v36 = vld [vmem:[#allocation208_spill] sm:$0xff] }
 0x277   : > { %12876 = vst [vmem:[#allocation167_spill] sm:$0xff] %v10777_v20  ;;  %12878 = vst [vmem:[#allocation80_spill] sm:$0xff] %v10780_v57  ;;  %v10788_v12 = vadd.f32 %v7507_v0, %v12880_v15  ;;  %v10791_v44 = vadd.f32 %v7651_v63, %v12882_v19  ;;  %7952 = vmatprep.mubr.msk.f32.mxu1 %vm359_vm0, %v12884_v47  ;;  %7808 = vmatprep.mubr.msk.f32.mxu0 %vm359_vm0, %v8115_v51  ;;  %v12886_v57 = vld [vmem:[#allocation199_spill] sm:$0xff]  ;;  %v12887_v25 = vld [vmem:[#allocation16_spill] sm:$0xff] }
 0x278   : > { %v2651_v11 = vpop.f32.mrf.mxu0  ;;  %v3434_v1 = vpop.f32.mrf.mxu1  ;;  %v930_v20 = vadd.f32 %v12886_v57, %v12885_v36  ;;  %v8116_v63 = vld [vmem:[%s8170_s23 + $0x1a0] sm:$0xff]  ;;  %v12890_v51 = vld [vmem:[#allocation147_spill] sm:$0xff]  ;;  %s8126_s23 = smov 8  }
 0x279   : > { %12881 = vst [vmem:[#allocation81_spill] sm:$0xff] %v10788_v12  ;;  %12883 = vst [vmem:[#allocation171_spill] sm:$0xff] %v10791_v44  ;;  %v10799_v49 = vadd.f32 %v2651_v11, %v2046_v54  ;;  %v10802_v22 = vadd.f32 %v3434_v1, %v12887_v25  ;;  %v12889_v19 = vld [vmem:[#allocation194_spill] sm:$0xff]  ;;  %v12893_v11 = vld [vmem:[#allocation4_spill] sm:$0xff]  ;;  %v4844_v1 = vpop.permute.xlu0 %4843 }
 0x27a   : > { %v7510_v0 = vpop.f32.mrf.mxu0  ;;  %v7654_v15 = vpop.f32.mrf.mxu1  ;;  %7809 = vmatmul.mubr.msk.f32.gmra.mxu0 %vm359_vm0, %v8116_v63  ;;  %7953 = vmatmul.mubr.msk.f32.gmra.mxu1 %vm359_vm0, %v12889_v19  ;;  %v2048_v47 = vadd.f32 %v10443_v23, %v930_v20  ;;  %v12891_v12 = vld [vmem:[#allocation74_spill] sm:$0xff]  ;;  %v12894_v19 = vld [vmem:[#allocation75_spill] sm:$0xff] }
 0x27b   : > { %12888 = vst [vmem:[#allocation29_spill] sm:$0xff] %v10802_v22  ;;  %v10810_v44 = vadd.f32 %v7510_v0, %v12890_v51  ;;  %v10813_v57 = vadd.f32 %v7654_v15, %v12891_v12  ;;  %v12892_v54 = vld [vmem:[#allocation2_spill] sm:$0xff]  ;;  %7863 = vmatprep.mubr.msk.f32.mxu0 %vm359_vm0, %v12893_v11  ;;  %v12895_v0 = vld [vmem:[#allocation5_spill] sm:$0xff]  ;;  %v12896_v12 = vld [vmem:[#allocation3_spill] sm:$0xff] }
 0x27c   : > { %7955 = vmatprep.mubr.msk.f32.mxu1 %vm359_vm0, %v12892_v54  ;;  %v2661_v36 = vpop.f32.mrf.mxu0  ;;  %v3444_v25 = vpop.f32.mrf.mxu1 }
 0x27d   : > { %v10819_v63 = vadd.f32 %v2661_v36, %v2048_v47  ;;  %v10822_v22 = vadd.f32 %v3444_v25, %v12894_v19  ;;  %v4846_v54 = vpop.permute.xlu1 %4845  ;;  %v12897_v47 = vld [vmem:[#allocation6_spill] sm:$0xff] }
 0x27e   : > { %v7565_v23 = vpop.f32.mrf.mxu0  ;;  %v7657_v20 = vpop.f32.mrf.mxu1  ;;  %7864 = vmatmul.mubr.msk.f32.vlgmr.msra.gmra.mxu0 %vm359_vm0, %v12895_v0  ;;  %7956 = vmatmul.mubr.msk.f32.gmra.mxu1 %vm359_vm0, %v12896_v12 }
 0x27f   : > { %v10829_v15 = vadd.f32 %v7565_v23, %v10461_v24  ;;  %v10832_v51 = vadd.f32 %v7657_v20, %v10464_v28  ;;  %7866 = vmatprep.mubr.msk.f32.mxu0 %vm359_vm0, %v12897_v47  ;;  %7958 = vmatprep.mubr.msk.f32.mxu1 %vm359_vm0, %v4844_v1  ;;  %v12898_v28 = vld [vmem:[#allocation7_spill] sm:$0xff] }
 0x280   : > { %v3454_v11 = vpop.f32.mrf.mxu1  ;;  %v3047_v36 = vpop.f32.mrf.mxu0  ;;  %7962 = vmatpush3.msra.mxu0 %v10457_v55  ;;  %v12899_v55 = vld [vmem:[#allocation101_spill] sm:$0xff] }
 0x281   : > { %v10839_v25 = vadd.f32 %v3454_v11, %v10473_v10  ;;  %v10842_v19 = vadd.f32 %v3047_v36, %v10475_v17  ;;  %v12900_v10 = vld [vmem:[#allocation8_spill] sm:$0xff]  ;;  %v12901_v11 = vld [vmem:[#allocation9_spill] sm:$0xff] }
 0x282   : > { %v7568_v24 = vpop.f32.mrf.mxu0  ;;  %v7660_v23 = vpop.f32.mrf.mxu1  ;;  %7867 = vmatmul.mubr.msk.f32.gmra.mxu0 %vm359_vm0, %v12898_v28  ;;  %7959 = vmatmul.mubr.msk.f32.gmra.mxu1 %vm359_vm0, %v4846_v54 }
 0x283   : > { %v10848_v20 = vadd.f32 %v7568_v24, %v10485_v39  ;;  %v10851_v1 = vadd.f32 %v7660_v23, %v10488_v43  ;;  %8013 = vmatprep.mubr.msk.f32.mxu1 %vm359_vm0, %v12899_v55  ;;  %7869 = vmatprep.mubr.msk.f32.mxu0 %vm359_vm0, %v12900_v10  ;;  %v12902_v43 = vld [vmem:[#allocation102_spill] sm:$0xff]  ;;  %v12903_v23 = vld [vmem:[#allocation109_spill] sm:$0xff] }
 0x284   : > { %v3057_v17 = vpop.f32.mrf.mxu0  ;;  %v3464_v0 = vpop.f32.mrf.mxu1 }
 0x285   : > { %v10858_v12 = vadd.f32 %v3057_v17, %v10497_v32  ;;  %v10861_v47 = vadd.f32 %v3464_v0, %v10500_v60  ;;  %v12904_v32 = vld [vmem:[#allocation10_spill] sm:$0xff]  ;;  %v12905_v0 = vld [vmem:[#allocation13_spill] sm:$0xff] }
 0x286   : > { %v7571_v54 = vpop.f32.mrf.mxu0  ;;  %v7715_v39 = vpop.f32.mrf.mxu1  ;;  %7870 = vmatmul.mubr.msk.f32.gmra.mxu0 %vm359_vm0, %v12901_v11  ;;  %8014 = vmatmul.mubr.msk.f32.vlgmr.msra.gmra.mxu1 %vm359_vm0, %v12902_v43  ;;  %v12907_v11 = vld [vmem:[#allocation119_spill] sm:$0xff] }
 0x287   : > { %v10868_v36 = vadd.f32 %v7571_v54, %v10511_v37  ;;  %v10871_v24 = vadd.f32 %v7715_v39, %v10514_v45  ;;  %8016 = vmatprep.mubr.msk.f32.mxu1 %vm359_vm0, %v12903_v23  ;;  %7872 = vmatprep.mubr.msk.f32.mxu0 %vm359_vm0, %v12904_v32  ;;  %v12906_v45 = vld [vmem:[#allocation110_spill] sm:$0xff] }
 0x288   : > { %v3067_v60 = vpop.f32.mrf.mxu0  ;;  %v3849_v28 = vpop.f32.mrf.mxu1 }
 0x289   : > { %v10878_v55 = vadd.f32 %v3067_v60, %v10524_v6  ;;  %v10881_v10 = vadd.f32 %v3849_v28, %v10526_v27  ;;  %v12908_v6 = vld [vmem:[#allocation14_spill] sm:$0xff]  ;;  %v12909_v28 = vld [vmem:[#allocation17_spill] sm:$0xff] }
 0x28a   : > { %v7574_v17 = vpop.f32.mrf.mxu0  ;;  %v7718_v37 = vpop.f32.mrf.mxu1  ;;  %7873 = vmatmul.mubr.msk.f32.gmra.mxu0 %vm359_vm0, %v12905_v0  ;;  %8017 = vmatmul.mubr.msk.f32.gmra.mxu1 %vm359_vm0, %v12906_v45  ;;  %v12911_v0 = vld [vmem:[#allocation129_spill] sm:$0xff] }
 0x28b   : > { %v10888_v54 = vadd.f32 %v7574_v17, %v10537_v26  ;;  %v10891_v39 = vadd.f32 %v7718_v37, %v10540_v48  ;;  %8019 = vmatprep.mubr.msk.f32.mxu1 %vm359_vm0, %v12907_v11  ;;  %7875 = vmatprep.mubr.msk.f32.mxu0 %vm359_vm0, %v12908_v6  ;;  %v12910_v48 = vld [vmem:[#allocation120_spill] sm:$0xff] }
 0x28c   : > { %v3077_v27 = vpop.f32.mrf.mxu0  ;;  %v3859_v43 = vpop.f32.mrf.mxu1 }
 0x28d   : > { %v10898_v23 = vadd.f32 %v3077_v27, %v10549_v59  ;;  %v10901_v32 = vadd.f32 %v3859_v43, %v10551_v4  ;;  %v12912_v59 = vld [vmem:[#allocation18_spill] sm:$0xff]  ;;  %v12913_v43 = vld [vmem:[#allocation21_spill] sm:$0xff] }
 0x28e   : > { %v7577_v60 = vpop.f32.mrf.mxu0  ;;  %v7721_v26 = vpop.f32.mrf.mxu1  ;;  %7876 = vmatmul.mubr.msk.f32.gmra.mxu0 %vm359_vm0, %v12909_v28  ;;  %8020 = vmatmul.mubr.msk.f32.gmra.mxu1 %vm359_vm0, %v12910_v48  ;;  %v12915_v28 = vld [vmem:[#allocation139_spill] sm:$0xff] }
 0x28f   : > { %v10908_v17 = vadd.f32 %v7577_v60, %v10562_v35  ;;  %v10911_v37 = vadd.f32 %v7721_v26, %v10565_v2  ;;  %8022 = vmatprep.mubr.msk.f32.mxu1 %vm359_vm0, %v12911_v0  ;;  %7878 = vmatprep.mubr.msk.f32.mxu0 %vm359_vm0, %v12912_v59  ;;  %v12914_v2 = vld [vmem:[#allocation130_spill] sm:$0xff] }
 0x290   : > { %v3087_v4 = vpop.f32.mrf.mxu0  ;;  %v3869_v45 = vpop.f32.mrf.mxu1 }
 0x291   : > { %v10918_v11 = vadd.f32 %v3087_v4, %v10574_v58  ;;  %v10921_v6 = vadd.f32 %v3869_v45, %v10576_v30  ;;  %v12916_v58 = vld [vmem:[#allocation23_spill] sm:$0xff]  ;;  %v12917_v45 = vld [vmem:[#allocation26_spill] sm:$0xff] }
 0x292   : > { %v7580_v27 = vpop.f32.mrf.mxu0  ;;  %v7724_v35 = vpop.f32.mrf.mxu1  ;;  %7879 = vmatmul.mubr.msk.f32.gmra.mxu0 %vm359_vm0, %v12913_v43  ;;  %8023 = vmatmul.mubr.msk.f32.gmra.mxu1 %vm359_vm0, %v12914_v2  ;;  %v12919_v43 = vld [vmem:[#allocation148_spill] sm:$0xff] }
 0x293   : > { %v10928_v60 = vadd.f32 %v7580_v27, %v10587_v9  ;;  %v10931_v26 = vadd.f32 %v7724_v35, %v10590_v34  ;;  %8025 = vmatprep.mubr.msk.f32.mxu1 %vm359_vm0, %v12915_v28  ;;  %7881 = vmatprep.mubr.msk.f32.mxu0 %vm359_vm0, %v12916_v58  ;;  %v12918_v34 = vld [vmem:[#allocation140_spill] sm:$0xff] }
 0x294   : > { %v3097_v30 = vpop.f32.mrf.mxu0  ;;  %v3879_v48 = vpop.f32.mrf.mxu1 }
 0x295   : > { %v10938_v0 = vadd.f32 %v3097_v30, %v10599_v56  ;;  %v10941_v59 = vadd.f32 %v3879_v48, %v10601_v38  ;;  %v12920_v56 = vld [vmem:[#allocation28_spill] sm:$0xff]  ;;  %v12921_v48 = vld [vmem:[#allocation31_spill] sm:$0xff] }
 0x296   : > { %v7583_v4 = vpop.f32.mrf.mxu0  ;;  %v7727_v9 = vpop.f32.mrf.mxu1  ;;  %7882 = vmatmul.mubr.msk.f32.gmra.mxu0 %vm359_vm0, %v12917_v45  ;;  %8026 = vmatmul.mubr.msk.f32.gmra.mxu1 %vm359_vm0, %v12918_v34  ;;  %v12923_v45 = vld [vmem:[#allocation157_spill] sm:$0xff] }
 0x297   : > { %v10948_v27 = vadd.f32 %v7583_v4, %v10612_v50  ;;  %v10951_v35 = vadd.f32 %v7727_v9, %v10615_v52  ;;  %8028 = vmatprep.mubr.msk.f32.mxu1 %vm359_vm0, %v12919_v43  ;;  %7884 = vmatprep.mubr.msk.f32.mxu0 %vm359_vm0, %v12920_v56  ;;  %v12922_v52 = vld [vmem:[#allocation150_spill] sm:$0xff] }
 0x298   : > { %v3107_v38 = vpop.f32.mrf.mxu0  ;;  %v3889_v2 = vpop.f32.mrf.mxu1 }
 0x299   : > { %v10958_v28 = vadd.f32 %v3107_v38, %v10624_v33  ;;  %v10961_v58 = vadd.f32 %v3889_v2, %v10626_v7  ;;  %v12924_v33 = vld [vmem:[#allocation33_spill] sm:$0xff]  ;;  %v12925_v2 = vld [vmem:[#allocation36_spill] sm:$0xff] }
 0x29a   : > { %v7586_v30 = vpop.f32.mrf.mxu0  ;;  %v7730_v50 = vpop.f32.mrf.mxu1  ;;  %7885 = vmatmul.mubr.msk.f32.gmra.mxu0 %vm359_vm0, %v12921_v48  ;;  %8029 = vmatmul.mubr.msk.f32.gmra.mxu1 %vm359_vm0, %v12922_v52  ;;  %v12927_v48 = vld [vmem:[#allocation168_spill] sm:$0xff] }
 0x29b   : > { %v10968_v4 = vadd.f32 %v7586_v30, %v10635_v46  ;;  %v10971_v9 = vadd.f32 %v7730_v50, %v10638_v40  ;;  %8031 = vmatprep.mubr.msk.f32.mxu1 %vm359_vm0, %v12923_v45  ;;  %7887 = vmatprep.mubr.msk.f32.mxu0 %vm359_vm0, %v12924_v33  ;;  %v12926_v40 = vld [vmem:[#allocation159_spill] sm:$0xff] }
 0x29c   : > { %v3117_v7 = vpop.f32.mrf.mxu0  ;;  %v3899_v34 = vpop.f32.mrf.mxu1 }
 0x29d   : > { %v10978_v43 = vadd.f32 %v3117_v7, %v10646_v31  ;;  %v10981_v56 = vadd.f32 %v3899_v34, %v10648_v14  ;;  %v12928_v31 = vld [vmem:[#allocation38_spill] sm:$0xff]  ;;  %v12929_v34 = vld [vmem:[#allocation40_spill] sm:$0xff] }
 0x29e   : > { %v7589_v38 = vpop.f32.mrf.mxu0  ;;  %v7733_v46 = vpop.f32.mrf.mxu1  ;;  %7888 = vmatmul.mubr.msk.f32.gmra.mxu0 %vm359_vm0, %v12925_v2  ;;  %8032 = vmatmul.mubr.msk.f32.gmra.mxu1 %vm359_vm0, %v12926_v40  ;;  %v12931_v2 = vld [vmem:[#allocation177_spill] sm:$0xff] }
 0x29f   : > { %v10988_v30 = vadd.f32 %v7589_v38, %v10656_v16  ;;  %v10991_v50 = vadd.f32 %v7733_v46, %v10659_v13  ;;  %8034 = vmatprep.mubr.msk.f32.mxu1 %vm359_vm0, %v12927_v48  ;;  %7890 = vmatprep.mubr.msk.f32.mxu0 %vm359_vm0, %v12928_v31  ;;  %v12930_v13 = vld [vmem:[#allocation170_spill] sm:$0xff]  ;;  %v12933_v48 = vld [vmem:[#allocation151_spill] sm:$0xff] }
 0x2a0   : > { %v3127_v14 = vpop.f32.mrf.mxu0  ;;  %v3909_v52 = vpop.f32.mrf.mxu1 }
 0x2a1   : > { %v10998_v45 = vadd.f32 %v3127_v14, %v10667_v61  ;;  %v11001_v33 = vadd.f32 %v3909_v52, %v10670_v21  ;;  %v12932_v61 = vld [vmem:[#allocation41_spill] sm:$0xff]  ;;  %v12934_v14 = vld [vmem:[#allocation19_spill] sm:$0xff] }
 0x2a2   : > { %v7592_v7 = vpop.f32.mrf.mxu0  ;;  %v7736_v16 = vpop.f32.mrf.mxu1  ;;  %7891 = vmatmul.mubr.msk.f32.gmra.mxu0 %vm359_vm0, %v12929_v34  ;;  %8035 = vmatmul.mubr.msk.f32.gmra.mxu1 %vm359_vm0, %v12930_v13 }
 0x2a3   : > { %v11008_v38 = vadd.f32 %v7592_v7, %v10678_v42  ;;  %v11011_v46 = vadd.f32 %v7736_v16, %v10681_v62  ;;  %8037 = vmatprep.mubr.msk.f32.mxu1 %vm359_vm0, %v12931_v2  ;;  %7893 = vmatprep.mubr.msk.f32.mxu0 %vm359_vm0, %v12932_v61  ;;  %v12936_v7 = vld [vmem:[#allocation43_spill] sm:$0xff]  ;;  %v12939_v61 = vld [vmem:[#allocation44_spill] sm:$0xff] }
 0x2a4   : > { %v3137_v21 = vpop.f32.mrf.mxu0  ;;  %v3919_v40 = vpop.f32.mrf.mxu1  ;;  %v12937_v62 = vld [vmem:[#allocation179_spill] sm:$0xff] }
 0x2a5   : > { %v11018_v31 = vadd.f32 %v3137_v21, %v12933_v48  ;;  %v11021_v52 = vadd.f32 %v3919_v40, %v12934_v14  ;;  %v12938_v2 = vld [vmem:[#allocation183_spill] sm:$0xff]  ;;  %v12940_v48 = vld [vmem:[#allocation20_spill] sm:$0xff] }
 0x2a6   : > { %v7595_v34 = vpop.f32.mrf.mxu0  ;;  %v7739_v42 = vpop.f32.mrf.mxu1  ;;  %7894 = vmatmul.mubr.msk.f32.gmra.mxu0 %vm359_vm0, %v12936_v7  ;;  %8038 = vmatmul.mubr.msk.f32.gmra.mxu1 %vm359_vm0, %v12937_v62  ;;  %v12942_v7 = vld [vmem:[#allocation156_spill] sm:$0xff] }
 0x2a7   : > { %12935 = vst [vmem:[#allocation30_spill] sm:$0xff] %v11021_v52  ;;  %v11028_v16 = vadd.f32 %v7595_v34, %v10700_v18  ;;  %v11031_v13 = vadd.f32 %v7739_v42, %v10703_v53  ;;  %8040 = vmatprep.mubr.msk.f32.mxu1 %vm359_vm0, %v12938_v2  ;;  %7896 = vmatprep.mubr.msk.f32.mxu0 %vm359_vm0, %v12939_v61  ;;  %v12944_v34 = vld [vmem:[#allocation45_spill] sm:$0xff]  ;;  %v12945_v53 = vld [vmem:[#allocation184_spill] sm:$0xff]  ;;  %v12946_v61 = vld [vmem:[#allocation187_spill] sm:$0xff] }
 0x2a8   : > { %v3147_v21 = vpop.f32.mrf.mxu0  ;;  %v3929_v40 = vpop.f32.mrf.mxu1 }
 0x2a9   : > { %v11038_v14 = vadd.f32 %v3147_v21, %v12940_v48  ;;  %v11041_v52 = vadd.f32 %v3929_v40, %v12942_v7  ;;  %v12947_v21 = vld [vmem:[#allocation46_spill] sm:$0xff]  ;;  %v12948_v7 = vld [vmem:[#allocation77_spill] sm:$0xff] }
 0x2aa   : > { %v7598_v62 = vpop.f32.mrf.mxu0  ;;  %v7742_v18 = vpop.f32.mrf.mxu1  ;;  %7897 = vmatmul.mubr.msk.f32.gmra.mxu0 %vm359_vm0, %v12944_v34  ;;  %8041 = vmatmul.mubr.msk.f32.gmra.mxu1 %vm359_vm0, %v12945_v53  ;;  %v12950_v34 = vld [vmem:[#allocation78_spill] sm:$0xff] }
 0x2ab   : > { %12941 = vst [vmem:[#allocation176_spill] sm:$0xff] %v11038_v14  ;;  %12943 = vst [vmem:[#allocation34_spill] sm:$0xff] %v11041_v52  ;;  %v11048_v42 = vadd.f32 %v7598_v62, %v10722_v3  ;;  %v11051_v2 = vadd.f32 %v7742_v18, %v10725_v41  ;;  %8043 = vmatprep.mubr.msk.f32.mxu1 %vm359_vm0, %v12946_v61  ;;  %7899 = vmatprep.mubr.msk.f32.mxu0 %vm359_vm0, %v12947_v21  ;;  %v12952_v62 = vld [vmem:[#allocation47_spill] sm:$0xff]  ;;  %v12953_v41 = vld [vmem:[#allocation188_spill] sm:$0xff] }
 0x2ac   : > { %v3157_v40 = vpop.f32.mrf.mxu0  ;;  %v3939_v48 = vpop.f32.mrf.mxu1  ;;  %v12955_v21 = vld [vmem:[#allocation191_spill] sm:$0xff] }
 0x2ad   : > { %v11058_v52 = vadd.f32 %v3157_v40, %v12948_v7  ;;  %v11061_v14 = vadd.f32 %v3939_v48, %v12950_v34  ;;  %v12956_v40 = vld [vmem:[#allocation48_spill] sm:$0xff]  ;;  %v12957_v34 = vld [vmem:[#allocation162_spill] sm:$0xff] }
 0x2ae   : > { %v7601_v53 = vpop.f32.mrf.mxu0  ;;  %v7745_v3 = vpop.f32.mrf.mxu1  ;;  %7900 = vmatmul.mubr.msk.f32.gmra.mxu0 %vm359_vm0, %v12952_v62  ;;  %8044 = vmatmul.mubr.msk.f32.gmra.mxu1 %vm359_vm0, %v12953_v41  ;;  %v12959_v62 = vld [vmem:[#allocation24_spill] sm:$0xff] }
 0x2af   : > { %12949 = vst [vmem:[#allocation35_spill] sm:$0xff] %v11058_v52  ;;  %12951 = vst [vmem:[#allocation180_spill] sm:$0xff] %v11061_v14  ;;  %v11068_v18 = vadd.f32 %v7601_v53, %v10744_v29  ;;  %v11071_v61 = vadd.f32 %v7745_v3, %v10747_v8  ;;  %8046 = vmatprep.mubr.msk.f32.mxu1 %vm359_vm0, %v12955_v21  ;;  %7902 = vmatprep.mubr.msk.f32.mxu0 %vm359_vm0, %v12956_v40  ;;  %v12961_v53 = vld [vmem:[#allocation49_spill] sm:$0xff]  ;;  %v12962_v8 = vld [vmem:[#allocation192_spill] sm:$0xff] }
 0x2b0   : > { %v3167_v48 = vpop.f32.mrf.mxu0  ;;  %v3949_v7 = vpop.f32.mrf.mxu1  ;;  %v12964_v21 = vld [vmem:[#allocation25_spill] sm:$0xff] }
 0x2b1   : > { %12954 = vst [vmem:[#allocation207_spill] sm:$0xff] %v11071_v61  ;;  %v11078_v14 = vadd.f32 %v3167_v48, %v12957_v34  ;;  %v11081_v52 = vadd.f32 %v3949_v7, %v12959_v62  ;;  %v12966_v61 = vld [vmem:[#allocation195_spill] sm:$0xff]  ;;  %v12967_v48 = vld [vmem:[#allocation93_spill] sm:$0xff] }
 0x2b2   : > { %v7604_v41 = vpop.f32.mrf.mxu0  ;;  %v7748_v29 = vpop.f32.mrf.mxu1  ;;  %7903 = vmatmul.mubr.msk.f32.gmra.mxu0 %vm359_vm0, %v12961_v53  ;;  %8047 = vmatmul.mubr.msk.f32.gmra.mxu1 %vm359_vm0, %v12962_v8  ;;  %v12968_v62 = vld [vmem:[#allocation167_spill] sm:$0xff]  ;;  %v12969_v53 = vld [vmem:[#allocation80_spill] sm:$0xff] }
 0x2b3   : > { %12958 = vst [vmem:[#allocation210_spill] sm:$0xff] %v11078_v14  ;;  %12960 = vst [vmem:[#allocation108_spill] sm:$0xff] %v11081_v52  ;;  %v11088_v3 = vadd.f32 %v7604_v41, %v10766_v5  ;;  %v11091_v40 = vadd.f32 %v7748_v29, %v12964_v21  ;;  %8049 = vmatprep.mubr.msk.f32.mxu1 %vm359_vm0, %v12966_v61  ;;  %7905 = vmatprep.mubr.msk.f32.mxu0 %vm359_vm0, %v12967_v48  ;;  %v12971_v41 = vld [vmem:[#allocation96_spill] sm:$0xff]  ;;  %v12973_v61 = vld [vmem:[#allocation81_spill] sm:$0xff] }
 0x2b4   : > { %v3177_v7 = vpop.f32.mrf.mxu0  ;;  %v3959_v34 = vpop.f32.mrf.mxu1  ;;  %v12972_v29 = vld [vmem:[#allocation196_spill] sm:$0xff]  ;;  %v12974_v48 = vld [vmem:[#allocation171_spill] sm:$0xff] }
 0x2b5   : > { %12963 = vst [vmem:[#allocation97_spill] sm:$0xff] %v11088_v3  ;;  %12965 = vst [vmem:[#allocation211_spill] sm:$0xff] %v11091_v40  ;;  %v11098_v52 = vadd.f32 %v3177_v7, %v12968_v62  ;;  %v11101_v14 = vadd.f32 %v3959_v34, %v12969_v53  ;;  %v12975_v3 = vld [vmem:[#allocation197_spill] sm:$0xff]  ;;  %v12976_v7 = vld [vmem:[#allocation216_spill] sm:$0xff] }
 0x2b6   : > { %v7607_v8 = vpop.f32.mrf.mxu0  ;;  %v7751_v5 = vpop.f32.mrf.mxu1  ;;  %7906 = vmatmul.mubr.msk.f32.gmra.mxu0 %vm359_vm0, %v12971_v41  ;;  %8050 = vmatmul.mubr.msk.f32.gmra.mxu1 %vm359_vm0, %v12972_v29  ;;  %v12977_v41 = vld [vmem:[#allocation29_spill] sm:$0xff] }
 0x2b7   : > { %12970 = vst [vmem:[#allocation209_spill] sm:$0xff] %v11101_v14  ;;  %v11108_v21 = vadd.f32 %v7607_v8, %v12973_v61  ;;  %v11111_v40 = vadd.f32 %v7751_v5, %v12974_v48  ;;  %8052 = vmatprep.mubr.msk.f32.mxu1 %vm359_vm0, %v12975_v3  ;;  %7908 = vmatprep.mubr.msk.f32.mxu0 %vm359_vm0, %v12976_v7  ;;  %v12978_v61 = vld [vmem:[#allocation218_spill] sm:$0xff] }
 0x2b8   : > { %v3187_v34 = vpop.f32.mrf.mxu0  ;;  %v3969_v62 = vpop.f32.mrf.mxu1  ;;  %v12979_v5 = vld [vmem:[#allocation198_spill] sm:$0xff] }
 0x2b9   : > { %v11118_v53 = vadd.f32 %v3187_v34, %v10799_v49  ;;  %v11121_v14 = vadd.f32 %v3969_v62, %v12977_v41  ;;  %v12981_v7 = vld [vmem:[#allocation230_spill] sm:$0xff]  ;;  %v5379_v34 = vpop.permute.xlu0 %5378 }
 0x2ba   : > { %v7610_v29 = vpop.f32.mrf.mxu0  ;;  %v7754_v8 = vpop.f32.mrf.mxu1  ;;  %7909 = vmatmul.mubr.msk.f32.gmra.mxu0 %vm359_vm0, %v12978_v61  ;;  %8053 = vmatmul.mubr.msk.f32.gmra.mxu1 %vm359_vm0, %v12979_v5  ;;  %v12982_v49 = vld [vmem:[#allocation50_spill] sm:$0xff] }
 0x2bb   : > { %v11128_v3 = vadd.f32 %v7610_v29, %v10810_v44  ;;  %v11131_v48 = vadd.f32 %v7754_v8, %v10813_v57  ;;  %8055 = vmatprep.mubr.msk.f32.mxu1 %vm359_vm0, %v12981_v7  ;;  %7963 = vmatprep.mubr.msk.f32.mxu0 %vm359_vm0, %v12982_v49  ;;  %v12984_v57 = vld [vmem:[#allocation106_spill] sm:$0xff]  ;;  %v5381_v49 = vpop.permute.xlu1 %5380 }
 0x2bc   : > { %v3197_v62 = vpop.f32.mrf.mxu0  ;;  %v3979_v41 = vpop.f32.mrf.mxu1 }
 0x2bd   : > { %12980 = vst [vmem:[#allocation42_spill] sm:$0xff] %v11128_v3  ;;  %v11138_v61 = vadd.f32 %v3197_v62, %v10819_v63  ;;  %v11141_v5 = vadd.f32 %v3979_v41, %v10822_v22  ;;  %v12983_v3 = vld [vmem:[#allocation51_spill] sm:$0xff]  ;;  %v12985_v63 = vld [vmem:[#allocation52_spill] sm:$0xff] }
 0x2be   : > { %v7665_v44 = vpop.f32.mrf.mxu0  ;;  %v7757_v29 = vpop.f32.mrf.mxu1  ;;  %7964 = vmatmul.mubr.msk.f32.vlgmr.msra.gmra.mxu0 %vm359_vm0, %v12983_v3  ;;  %8056 = vmatmul.mubr.msk.f32.gmra.mxu1 %vm359_vm0, %v12984_v57 }
 0x2bf   : > { %v11148_v8 = vadd.f32 %v7665_v44, %v10829_v15  ;;  %v11151_v7 = vadd.f32 %v7757_v29, %v10832_v51  ;;  %7966 = vmatprep.mubr.msk.f32.mxu0 %vm359_vm0, %v12985_v63  ;;  %8058 = vmatprep.mubr.msk.f32.mxu1 %vm359_vm0, %v5379_v34  ;;  %v12986_v44 = vld [vmem:[#allocation53_spill] sm:$0xff]  ;;  %v12987_v29 = vld [vmem:[#allocation54_spill] sm:$0xff] }
 0x2c0   : > { %v3989_v22 = vpop.f32.mrf.mxu1  ;;  %v3582_v62 = vpop.f32.mrf.mxu0 }
 0x2c1   : > { %v11157_v41 = vadd.f32 %v3989_v22, %v10839_v25  ;;  %v11160_v3 = vadd.f32 %v3582_v62, %v10842_v19 }
 0x2c2   : > { %v7668_v57 = vpop.f32.mrf.mxu0  ;;  %v7760_v15 = vpop.f32.mrf.mxu1  ;;  %7967 = vmatmul.mubr.msk.f32.gmra.mxu0 %vm359_vm0, %v12986_v44  ;;  %8059 = vmatmul.mubr.msk.f32.gmra.mxu1 %vm359_vm0, %v5381_v49  ;;  %v12988_v49 = vld [vmem:[#allocation55_spill] sm:$0xff] }
 0x2c3   : > { %v11166_v51 = vadd.f32 %v7668_v57, %v10848_v20  ;;  %v11169_v34 = vadd.f32 %v7760_v15, %v10851_v1  ;;  %7969 = vmatprep.mubr.msk.f32.mxu0 %vm359_vm0, %v12987_v29  ;;  %v12989_v57 = vld [vmem:[#allocation56_spill] sm:$0xff] }
 0x2c4   : > { %v3592_v25 = vpop.f32.mrf.mxu0  ;;  %v3999_v63 = vpop.f32.mrf.mxu1 }
 0x2c5   : > { %v11174_v19 = vadd.f32 %v3592_v25, %v10858_v12  ;;  %v11177_v22 = vadd.f32 %v3999_v63, %v10861_v47 }
 0x2c6   : > { %v7671_v62 = vpop.f32.mrf.mxu0  ;;  %v7815_v44 = vpop.f32.mrf.mxu1  ;;  %7970 = vmatmul.mubr.msk.f32.gmra.mxu0 %vm359_vm0, %v12988_v49  ;;  %v12990_v49 = vld [vmem:[#allocation57_spill] sm:$0xff] }
 0x2c7   : > { %v11182_v20 = vadd.f32 %v7671_v62, %v10868_v36  ;;  %v11185_v1 = vadd.f32 %v7815_v44, %v10871_v24  ;;  %7972 = vmatprep.mubr.msk.f32.mxu0 %vm359_vm0, %v12989_v57  ;;  %v12991_v62 = vld [vmem:[#allocation58_spill] sm:$0xff] }
 0x2c8   : > { %v3602_v15 = vpop.f32.mrf.mxu0  ;;  %v4381_v12 = vpop.f32.mrf.mxu1 }
 0x2c9   : > { %v11190_v29 = vadd.f32 %v3602_v15, %v10878_v55  ;;  %v11193_v47 = vadd.f32 %v4381_v12, %v10881_v10 }
 0x2ca   : > { %v7674_v25 = vpop.f32.mrf.mxu0  ;;  %v7818_v63 = vpop.f32.mrf.mxu1  ;;  %7973 = vmatmul.mubr.msk.f32.gmra.mxu0 %vm359_vm0, %v12990_v49  ;;  %v12992_v49 = vld [vmem:[#allocation59_spill] sm:$0xff] }
 0x2cb   : > { %v11198_v36 = vadd.f32 %v7674_v25, %v10888_v54  ;;  %v11201_v24 = vadd.f32 %v7818_v63, %v10891_v39  ;;  %7975 = vmatprep.mubr.msk.f32.mxu0 %vm359_vm0, %v12991_v62  ;;  %v12993_v25 = vld [vmem:[#allocation61_spill] sm:$0xff] }
 0x2cc   : > { %v3612_v44 = vpop.f32.mrf.mxu0  ;;  %v4391_v55 = vpop.f32.mrf.mxu1 }
 0x2cd   : > { %v11206_v57 = vadd.f32 %v3612_v44, %v10898_v23  ;;  %v11209_v10 = vadd.f32 %v4391_v55, %v10901_v32 }
 0x2ce   : > { %v7677_v15 = vpop.f32.mrf.mxu0  ;;  %v7821_v12 = vpop.f32.mrf.mxu1  ;;  %7976 = vmatmul.mubr.msk.f32.gmra.mxu0 %vm359_vm0, %v12992_v49  ;;  %v12994_v49 = vld [vmem:[#allocation64_spill] sm:$0xff] }
 0x2cf   : > { %v11214_v54 = vadd.f32 %v7677_v15, %v10908_v17  ;;  %v11217_v39 = vadd.f32 %v7821_v12, %v10911_v37  ;;  %7978 = vmatprep.mubr.msk.f32.mxu0 %vm359_vm0, %v12993_v25  ;;  %v12995_v15 = vld [vmem:[#allocation67_spill] sm:$0xff] }
 0x2d0   : > { %v3622_v63 = vpop.f32.mrf.mxu0  ;;  %v4401_v23 = vpop.f32.mrf.mxu1 }
 0x2d1   : > { %v11222_v62 = vadd.f32 %v3622_v63, %v10918_v11  ;;  %v11225_v32 = vadd.f32 %v4401_v23, %v10921_v6 }
 0x2d2   : > { %v7680_v44 = vpop.f32.mrf.mxu0  ;;  %v7824_v55 = vpop.f32.mrf.mxu1  ;;  %7979 = vmatmul.mubr.msk.f32.gmra.mxu0 %vm359_vm0, %v12994_v49  ;;  %v12996_v49 = vld [vmem:[#allocation70_spill] sm:$0xff] }
 0x2d3   : > { %v11230_v17 = vadd.f32 %v7680_v44, %v10928_v60  ;;  %v11233_v37 = vadd.f32 %v7824_v55, %v10931_v26  ;;  %7981 = vmatprep.mubr.msk.f32.mxu0 %vm359_vm0, %v12995_v15  ;;  %v12997_v44 = vld [vmem:[#allocation22_spill] sm:$0xff] }
 0x2d4   : > { %v3632_v12 = vpop.f32.mrf.mxu0  ;;  %v4411_v11 = vpop.f32.mrf.mxu1 }
 0x2d5   : > { %v11238_v25 = vadd.f32 %v3632_v12, %v10938_v0  ;;  %v11241_v6 = vadd.f32 %v4411_v11, %v10941_v59 }
 0x2d6   : > { %v7683_v63 = vpop.f32.mrf.mxu0  ;;  %v7827_v23 = vpop.f32.mrf.mxu1  ;;  %7982 = vmatmul.mubr.msk.f32.gmra.mxu0 %vm359_vm0, %v12996_v49  ;;  %v12998_v49 = vld [vmem:[#allocation73_spill] sm:$0xff] }
 0x2d7   : > { %v11246_v60 = vadd.f32 %v7683_v63, %v10948_v27  ;;  %v11249_v26 = vadd.f32 %v7827_v23, %v10951_v35  ;;  %7984 = vmatprep.mubr.msk.f32.mxu0 %vm359_vm0, %v12997_v44  ;;  %v12999_v63 = vld [vmem:[#allocation27_spill] sm:$0xff] }
 0x2d8   : > { %v3642_v55 = vpop.f32.mrf.mxu0  ;;  %v4421_v0 = vpop.f32.mrf.mxu1 }
 0x2d9   : > { %v11254_v15 = vadd.f32 %v3642_v55, %v10958_v28  ;;  %v11257_v59 = vadd.f32 %v4421_v0, %v10961_v58 }
 0x2da   : > { %v7686_v12 = vpop.f32.mrf.mxu0  ;;  %v7830_v11 = vpop.f32.mrf.mxu1  ;;  %7985 = vmatmul.mubr.msk.f32.gmra.mxu0 %vm359_vm0, %v12998_v49  ;;  %v13001_v49 = vld [vmem:[#allocation76_spill] sm:$0xff] }
 0x2db   : > { %v11262_v27 = vadd.f32 %v7686_v12, %v10968_v4  ;;  %v11265_v35 = vadd.f32 %v7830_v11, %v10971_v9  ;;  %7987 = vmatprep.mubr.msk.f32.mxu0 %vm359_vm0, %v12999_v63  ;;  %v13003_v12 = vld [vmem:[#allocation32_spill] sm:$0xff] }
 0x2dc   : > { %v3652_v23 = vpop.f32.mrf.mxu0  ;;  %v4431_v28 = vpop.f32.mrf.mxu1 }
 0x2dd   : > { %v11270_v44 = vadd.f32 %v3652_v23, %v10978_v43  ;;  %v11273_v58 = vadd.f32 %v4431_v28, %v10981_v56 }
 0x2de   : > { %v7689_v55 = vpop.f32.mrf.mxu0  ;;  %v7833_v0 = vpop.f32.mrf.mxu1  ;;  %7988 = vmatmul.mubr.msk.f32.gmra.mxu0 %vm359_vm0, %v13001_v49  ;;  %v13005_v49 = vld [vmem:[#allocation79_spill] sm:$0xff] }
 0x2df   : > { %13000 = vst [vmem:[#allocation113_spill] sm:$0xff] %v11273_v58  ;;  %v11278_v4 = vadd.f32 %v7689_v55, %v10988_v30  ;;  %v11281_v9 = vadd.f32 %v7833_v0, %v10991_v50  ;;  %7990 = vmatprep.mubr.msk.f32.mxu0 %vm359_vm0, %v13003_v12  ;;  %v13007_v55 = vld [vmem:[#allocation37_spill] sm:$0xff] }
 0x2e0   : > { %v3662_v11 = vpop.f32.mrf.mxu0  ;;  %v4441_v43 = vpop.f32.mrf.mxu1 }
 0x2e1   : > { %13002 = vst [vmem:[#allocation100_spill] sm:$0xff] %v11281_v9  ;;  %v11286_v63 = vadd.f32 %v3662_v11, %v10998_v45  ;;  %v11289_v56 = vadd.f32 %v4441_v43, %v11001_v33  ;;  %v13008_v33 = vld [vmem:[#allocation30_spill] sm:$0xff] }
 0x2e2   : > { %v7692_v23 = vpop.f32.mrf.mxu0  ;;  %v7836_v28 = vpop.f32.mrf.mxu1  ;;  %7991 = vmatmul.mubr.msk.f32.gmra.mxu0 %vm359_vm0, %v13005_v49  ;;  %v13010_v49 = vld [vmem:[#allocation82_spill] sm:$0xff] }
 0x2e3   : > { %13004 = vst [vmem:[#allocation85_spill] sm:$0xff] %v11289_v56  ;;  %v11294_v30 = vadd.f32 %v7692_v23, %v11008_v38  ;;  %v11297_v50 = vadd.f32 %v7836_v28, %v11011_v46  ;;  %7993 = vmatprep.mubr.msk.f32.mxu0 %vm359_vm0, %v13007_v55  ;;  %v13012_v23 = vld [vmem:[#allocation39_spill] sm:$0xff]  ;;  %v13013_v55 = vld [vmem:[#allocation176_spill] sm:$0xff] }
 0x2e4   : > { %v3672_v0 = vpop.f32.mrf.mxu0  ;;  %v4451_v45 = vpop.f32.mrf.mxu1 }
 0x2e5   : > { %13006 = vst [vmem:[#allocation200_spill] sm:$0xff] %v11297_v50  ;;  %v11302_v12 = vadd.f32 %v3672_v0, %v11018_v31  ;;  %v11305_v11 = vadd.f32 %v4451_v45, %v13008_v33  ;;  %v13014_v45 = vld [vmem:[#allocation34_spill] sm:$0xff] }
 0x2e6   : > { %v7695_v43 = vpop.f32.mrf.mxu0  ;;  %v7839_v56 = vpop.f32.mrf.mxu1  ;;  %7994 = vmatmul.mubr.msk.f32.gmra.mxu0 %vm359_vm0, %v13010_v49  ;;  %v13016_v49 = vld [vmem:[#allocation83_spill] sm:$0xff] }
 0x2e7   : > { %13009 = vst [vmem:[#allocation212_spill] sm:$0xff] %v11305_v11  ;;  %v11310_v38 = vadd.f32 %v7695_v43, %v11028_v16  ;;  %v11313_v46 = vadd.f32 %v7839_v56, %v11031_v13  ;;  %7996 = vmatprep.mubr.msk.f32.mxu0 %vm359_vm0, %v13012_v23  ;;  %v13018_v56 = vld [vmem:[#allocation84_spill] sm:$0xff] }
 0x2e8   : > { %v3682_v28 = vpop.f32.mrf.mxu0  ;;  %v4461_v31 = vpop.f32.mrf.mxu1 }
 0x2e9   : > { %13011 = vst [vmem:[#allocation91_spill] sm:$0xff] %v11313_v46  ;;  %v11318_v0 = vadd.f32 %v3682_v28, %v13013_v55  ;;  %v11321_v33 = vadd.f32 %v4461_v31, %v13014_v45  ;;  %v13019_v28 = vld [vmem:[#allocation35_spill] sm:$0xff]  ;;  %v13020_v31 = vld [vmem:[#allocation180_spill] sm:$0xff] }
 0x2ea   : > { %v7698_v11 = vpop.f32.mrf.mxu0  ;;  %v7842_v50 = vpop.f32.mrf.mxu1  ;;  %7997 = vmatmul.mubr.msk.f32.gmra.mxu0 %vm359_vm0, %v13016_v49  ;;  %v13022_v49 = vld [vmem:[#allocation86_spill] sm:$0xff] }
 0x2eb   : > { %13015 = vst [vmem:[#allocation213_spill] sm:$0xff] %v11321_v33  ;;  %v11326_v16 = vadd.f32 %v7698_v11, %v11048_v42  ;;  %v11329_v13 = vadd.f32 %v7842_v50, %v11051_v2  ;;  %7999 = vmatprep.mubr.msk.f32.mxu0 %vm359_vm0, %v13018_v56  ;;  %v13023_v2 = vld [vmem:[#allocation207_spill] sm:$0xff] }
 0x2ec   : > { %v3692_v43 = vpop.f32.mrf.mxu0  ;;  %v4471_v23 = vpop.f32.mrf.mxu1  ;;  %v13025_v11 = vld [vmem:[#allocation87_spill] sm:$0xff] }
 0x2ed   : > { %13017 = vst [vmem:[#allocation118_spill] sm:$0xff] %v11329_v13  ;;  %v11334_v55 = vadd.f32 %v3692_v43, %v13019_v28  ;;  %v11337_v45 = vadd.f32 %v4471_v23, %v13020_v31  ;;  %v13026_v28 = vld [vmem:[#allocation210_spill] sm:$0xff]  ;;  %v13027_v23 = vld [vmem:[#allocation108_spill] sm:$0xff] }
 0x2ee   : > { %v7701_v33 = vpop.f32.mrf.mxu0  ;;  %v7845_v46 = vpop.f32.mrf.mxu1  ;;  %8000 = vmatmul.mubr.msk.f32.gmra.mxu0 %vm359_vm0, %v13022_v49  ;;  %v13029_v49 = vld [vmem:[#allocation88_spill] sm:$0xff] }
 0x2ef   : > { %13021 = vst [vmem:[#allocation103_spill] sm:$0xff] %v11337_v45  ;;  %v11342_v42 = vadd.f32 %v7701_v33, %v11068_v18  ;;  %v11345_v50 = vadd.f32 %v7845_v46, %v13023_v2  ;;  %8002 = vmatprep.mubr.msk.f32.mxu0 %vm359_vm0, %v13025_v11  ;;  %v13030_v18 = vld [vmem:[#allocation97_spill] sm:$0xff]  ;;  %v13031_v46 = vld [vmem:[#allocation211_spill] sm:$0xff]  ;;  %v13032_v11 = vld [vmem:[#allocation160_spill] sm:$0xff] }
 0x2f0   : > { %v3702_v56 = vpop.f32.mrf.mxu0  ;;  %v4481_v43 = vpop.f32.mrf.mxu1 }
 0x2f1   : > { %13024 = vst [vmem:[#allocation201_spill] sm:$0xff] %v11345_v50  ;;  %v11350_v13 = vadd.f32 %v3702_v56, %v13026_v28  ;;  %v11353_v31 = vadd.f32 %v4481_v43, %v13027_v23  ;;  %v13033_v43 = vld [vmem:[#allocation209_spill] sm:$0xff] }
 0x2f2   : > { %v7704_v45 = vpop.f32.mrf.mxu0  ;;  %v7848_v9 = vpop.f32.mrf.mxu1  ;;  %8003 = vmatmul.mubr.msk.f32.gmra.mxu0 %vm359_vm0, %v13029_v49  ;;  %v13034_v49 = vld [vmem:[#allocation161_spill] sm:$0xff] }
 0x2f3   : > { %13028 = vst [vmem:[#allocation214_spill] sm:$0xff] %v11353_v31  ;;  %v11358_v33 = vadd.f32 %v7704_v45, %v13030_v18  ;;  %v11361_v2 = vadd.f32 %v7848_v9, %v13031_v46  ;;  %8005 = vmatprep.mubr.msk.f32.mxu0 %vm359_vm0, %v13032_v11  ;;  %v13036_v18 = vld [vmem:[#allocation94_spill] sm:$0xff] }
 0x2f4   : > { %v3712_v50 = vpop.f32.mrf.mxu0  ;;  %v4491_v56 = vpop.f32.mrf.mxu1 }
 0x2f5   : > { %v11366_v28 = vadd.f32 %v3712_v50, %v11098_v52  ;;  %v11369_v23 = vadd.f32 %v4491_v56, %v13033_v43 }
 0x2f6   : > { %v7707_v31 = vpop.f32.mrf.mxu0  ;;  %v7851_v58 = vpop.f32.mrf.mxu1  ;;  %8006 = vmatmul.mubr.msk.f32.gmra.mxu0 %vm359_vm0, %v13034_v49  ;;  %v13037_v49 = vld [vmem:[#allocation95_spill] sm:$0xff] }
 0x2f7   : > { %v11374_v45 = vadd.f32 %v7707_v31, %v11108_v21  ;;  %v11377_v9 = vadd.f32 %v7851_v58, %v11111_v40  ;;  %8008 = vmatprep.mubr.msk.f32.mxu0 %vm359_vm0, %v13036_v18  ;;  %v13038_v21 = vld [vmem:[#allocation42_spill] sm:$0xff] }
 0x2f8   : > { %v3722_v46 = vpop.f32.mrf.mxu0  ;;  %v4501_v52 = vpop.f32.mrf.mxu1 }
 0x2f9   : > { %13035 = vst [vmem:[#allocation92_spill] sm:$0xff] %v11377_v9  ;;  %v11382_v50 = vadd.f32 %v3722_v46, %v11118_v53  ;;  %v11385_v11 = vadd.f32 %v4501_v52, %v11121_v14 }
 0x2fa   : > { %v7710_v56 = vpop.f32.mrf.mxu0  ;;  %v7854_v43 = vpop.f32.mrf.mxu1  ;;  %8009 = vmatmul.mubr.msk.f32.gmra.mxu0 %vm359_vm0, %v13037_v49 }
 0x2fb   : > { %v11390_v31 = vadd.f32 %v7710_v56, %v13038_v21  ;;  %v11393_v40 = vadd.f32 %v7854_v43, %v11131_v48 }
 0x2fc   : > { %v3732_v58 = vpop.f32.mrf.mxu0  ;;  %v4511_v18 = vpop.f32.mrf.mxu1 }
 0x2fd   : > { %v11396_v9 = vadd.f32 %v3732_v58, %v11138_v61  ;;  %v11399_v53 = vadd.f32 %v4511_v18, %v11141_v5 }
 0x2fe   : > { %v7765_v14 = vpop.f32.mrf.mxu0  ;;  %v7857_v46 = vpop.f32.mrf.mxu1 }
 0x2ff   : > { %v11402_v52 = vadd.f32 %v7765_v14, %v11148_v8  ;;  %v11405_v49 = vadd.f32 %v7857_v46, %v11151_v7 }
 0x300   : > { %v4114_v56 = vpop.f32.mrf.mxu0  ;;  %v4521_v21 = vpop.f32.mrf.mxu1 }
 0x301   : > { %v11408_v48 = vadd.f32 %v4114_v56, %v11160_v3  ;;  %v11411_v43 = vadd.f32 %v4521_v21, %v11157_v41 }
 0x302   : > { %v7768_v61 = vpop.f32.mrf.mxu0  ;;  %v7860_v58 = vpop.f32.mrf.mxu1 }
 0x303   : > { %13039 = vst [vmem:[#allocation98_spill] sm:$0xff] %v11408_v48  ;;  %v11414_v5 = vadd.f32 %v7768_v61, %v11166_v51  ;;  %v11417_v18 = vadd.f32 %v7860_v58, %v11169_v34 }
 0x304   : > { %v4124_v8 = vpop.f32.mrf.mxu0  ;;  %v4531_v14 = vpop.f32.mrf.mxu1 }
 0x305   : > { %13040 = vst [vmem:[#allocation123_spill] sm:$0xff] %v11414_v5  ;;  %v11420_v7 = vadd.f32 %v4124_v8, %v11174_v19  ;;  %v11423_v46 = vadd.f32 %v4531_v14, %v11177_v22 }
 0x306   : > { %v7771_v3 = vpop.f32.mrf.mxu0  ;;  %v11425_v56 = vpop.f32.mrf.mxu1 }
 0x307   : > { %13041 = vst [vmem:[#allocation107_spill] sm:$0xff] %v11420_v7  ;;  %v11428_v41 = vadd.f32 %v7771_v3, %v11182_v20 }
 0x308   : > { %v4134_v21 = vpop.f32.mrf.mxu0  ;;  %v11430_v51 = vpop.f32.mrf.mxu1 }
 0x309   : > { %13042 = vst [vmem:[#allocation215_spill] sm:$0xff] %v11428_v41  ;;  %v11433_v34 = vadd.f32 %v4134_v21, %v11190_v29 }
 0x30a   : > { %v7774_v61 = vpop.f32.mrf.mxu0  ;;  %v11435_v58 = vpop.f32.mrf.mxu1 }
 0x30b   : > { %13043 = vst [vmem:[#allocation226_spill] sm:$0xff] %v11433_v34  ;;  %v11438_v19 = vadd.f32 %v7774_v61, %v11198_v36 }
 0x30c   : > { %v4144_v22 = vpop.f32.mrf.mxu0  ;;  %v11440_v8 = vpop.f32.mrf.mxu1 }
 0x30d   : > { %13044 = vst [vmem:[#allocation202_spill] sm:$0xff] %v11438_v19  ;;  %v11443_v14 = vadd.f32 %v4144_v22, %v11206_v57 }
 0x30e   : > { %v7777_v20 = vpop.f32.mrf.mxu0  ;;  %v11445_v3 = vpop.f32.mrf.mxu1 }
 0x30f   : > { %13045 = vst [vmem:[#allocation217_spill] sm:$0xff] %v11443_v14  ;;  %v11448_v41 = vadd.f32 %v7777_v20, %v11214_v54 }
 0x310   : > { %v4154_v29 = vpop.f32.mrf.mxu0  ;;  %v11450_v21 = vpop.f32.mrf.mxu1 }
 0x311   : > { %13046 = vst [vmem:[#allocation99_spill] sm:$0xff] %v11448_v41  ;;  %v11453_v34 = vadd.f32 %v4154_v29, %v11222_v62 }
 0x312   : > { %v7780_v36 = vpop.f32.mrf.mxu0  ;;  %v11455_v61 = vpop.f32.mrf.mxu1 }
 0x313   : > { %13047 = vst [vmem:[#allocation104_spill] sm:$0xff] %v11453_v34  ;;  %v11458_v19 = vadd.f32 %v7780_v36, %v11230_v17 }
 0x314   : > { %v4164_v57 = vpop.f32.mrf.mxu0  ;;  %v11460_v22 = vpop.f32.mrf.mxu1 }
 0x315   : > { %13048 = vst [vmem:[#allocation219_spill] sm:$0xff] %v11458_v19  ;;  %v11463_v14 = vadd.f32 %v4164_v57, %v11238_v25 }
 0x316   : > { %v7783_v54 = vpop.f32.mrf.mxu0  ;;  %v11465_v20 = vpop.f32.mrf.mxu1 }
 0x317   : > { %13049 = vst [vmem:[#allocation128_spill] sm:$0xff] %v11463_v14  ;;  %v11468_v41 = vadd.f32 %v7783_v54, %v11246_v60 }
 0x318   : > { %v4174_v62 = vpop.f32.mrf.mxu0  ;;  %v11470_v29 = vpop.f32.mrf.mxu1 }
 0x319   : > { %13050 = vst [vmem:[#allocation112_spill] sm:$0xff] %v11468_v41  ;;  %v11473_v34 = vadd.f32 %v4174_v62, %v11254_v15 }
 0x31a   : > { %v7786_v17 = vpop.f32.mrf.mxu0  ;;  %v11475_v36 = vpop.f32.mrf.mxu1 }
 0x31b   : > { %13051 = vst [vmem:[#allocation203_spill] sm:$0xff] %v11473_v34  ;;  %v11478_v19 = vadd.f32 %v7786_v17, %v11262_v27 }
 0x31c   : > { %v4184_v25 = vpop.f32.mrf.mxu0  ;;  %v11480_v57 = vpop.f32.mrf.mxu1 }
 0x31d   : > { %13052 = vst [vmem:[#allocation220_spill] sm:$0xff] %v11478_v19  ;;  %v11483_v14 = vadd.f32 %v4184_v25, %v11270_v44 }
 0x31e   : > { %v7789_v60 = vpop.f32.mrf.mxu0  ;;  %v11485_v54 = vpop.f32.mrf.mxu1 }
 0x31f   : > { %13053 = vst [vmem:[#allocation105_spill] sm:$0xff] %v11483_v14  ;;  %v11488_v41 = vadd.f32 %v7789_v60, %v11278_v4 }
 0x320   : > { %v4194_v15 = vpop.f32.mrf.mxu0  ;;  %v11490_v62 = vpop.f32.mrf.mxu1 }
 0x321   : > { %13054 = vst [vmem:[#allocation114_spill] sm:$0xff] %v11488_v41  ;;  %v11493_v34 = vadd.f32 %v4194_v15, %v11286_v63 }
 0x322   : > { %v7792_v27 = vpop.f32.mrf.mxu0  ;;  %v11495_v17 = vpop.f32.mrf.mxu1 }
 0x323   : > { %13055 = vst [vmem:[#allocation221_spill] sm:$0xff] %v11493_v34  ;;  %v11498_v19 = vadd.f32 %v7792_v27, %v11294_v30 }
 0x324   : > { %v4204_v44 = vpop.f32.mrf.mxu0  ;;  %v11500_v25 = vpop.f32.mrf.mxu1 }
 0x325   : > { %13056 = vst [vmem:[#allocation133_spill] sm:$0xff] %v11498_v19  ;;  %v11503_v14 = vadd.f32 %v4204_v44, %v11302_v12 }
 0x326   : > { %v7795_v4 = vpop.f32.mrf.mxu0  ;;  %v11505_v60 = vpop.f32.mrf.mxu1 }
 0x327   : > { %13057 = vst [vmem:[#allocation117_spill] sm:$0xff] %v11503_v14  ;;  %v11508_v41 = vadd.f32 %v7795_v4, %v11310_v38 }
 0x328   : > { %v4214_v63 = vpop.f32.mrf.mxu0  ;;  %v11510_v15 = vpop.f32.mrf.mxu1 }
 0x329   : > { %13058 = vst [vmem:[#allocation204_spill] sm:$0xff] %v11508_v41  ;;  %v11513_v34 = vadd.f32 %v4214_v63, %v11318_v0 }
 0x32a   : > { %v7798_v30 = vpop.f32.mrf.mxu0  ;;  %v11515_v27 = vpop.f32.mrf.mxu1 }
 0x32b   : > { %13059 = vst [vmem:[#allocation222_spill] sm:$0xff] %v11513_v34  ;;  %v11518_v19 = vadd.f32 %v7798_v30, %v11326_v16 }
 0x32c   : > { %v4224_v12 = vpop.f32.mrf.mxu0  ;;  %v11520_v44 = vpop.f32.mrf.mxu1 }
 0x32d   : > { %13060 = vst [vmem:[#allocation115_spill] sm:$0xff] %v11518_v19  ;;  %v11523_v14 = vadd.f32 %v4224_v12, %v11334_v55 }
 0x32e   : > { %v7801_v38 = vpop.f32.mrf.mxu0  ;;  %v11525_v4 = vpop.f32.mrf.mxu1 }
 0x32f   : > { %13061 = vst [vmem:[#allocation111_spill] sm:$0xff] %v11523_v14  ;;  %v11528_v41 = vadd.f32 %v7801_v38, %v11342_v42 }
 0x330   : > { %v4234_v0 = vpop.f32.mrf.mxu0  ;;  %v11530_v63 = vpop.f32.mrf.mxu1 }
 0x331   : > { %13062 = vst [vmem:[#allocation124_spill] sm:$0xff] %v11528_v41  ;;  %v11533_v34 = vadd.f32 %v4234_v0, %v11350_v13 }
 0x332   : > { %v7804_v16 = vpop.f32.mrf.mxu0  ;;  %v11535_v30 = vpop.f32.mrf.mxu1 }
 0x333   : > { %13063 = vst [vmem:[#allocation223_spill] sm:$0xff] %v11533_v34  ;;  %v11538_v19 = vadd.f32 %v7804_v16, %v11358_v33 }
 0x334   : > { %v4244_v55 = vpop.f32.mrf.mxu0  ;;  %v11540_v12 = vpop.f32.mrf.mxu1 }
 0x335   : > { %13064 = vst [vmem:[#allocation138_spill] sm:$0xff] %v11538_v19  ;;  %v11543_v14 = vadd.f32 %v4244_v55, %v11366_v28 }
 0x336   : > { %v7807_v42 = vpop.f32.mrf.mxu0  ;;  %v11545_v38 = vpop.f32.mrf.mxu1 }
 0x337   : > { %13065 = vst [vmem:[#allocation122_spill] sm:$0xff] %v11543_v14  ;;  %v11548_v41 = vadd.f32 %v7807_v42, %v11374_v45 }
 0x338   : > { %v4254_v13 = vpop.f32.mrf.mxu0  ;;  %v11550_v0 = vpop.f32.mrf.mxu1 }
 0x339   : > { %13066 = vst [vmem:[#allocation229_spill] sm:$0xff] %v11548_v41  ;;  %v11553_v34 = vadd.f32 %v4254_v13, %v11382_v50 }
 0x33a   : > { %v7810_v33 = vpop.f32.mrf.mxu0  ;;  %v11555_v16 = vpop.f32.mrf.mxu1 }
 0x33b   : > { %13067 = vst [vmem:[#allocation89_spill] sm:$0xff] %v11553_v34  ;;  %v11558_v19 = vadd.f32 %v7810_v33, %v11390_v31 }
 0x33c   : > { %v4264_v28 = vpop.f32.mrf.mxu0  ;;  %v11560_v55 = vpop.f32.mrf.mxu1 }
 0x33d   : > { %13068 = vst [vmem:[#allocation205_spill] sm:$0xff] %v11558_v19  ;;  %v11563_v14 = vadd.f32 %v4264_v28, %v11396_v9  ;;  %v5077_v9 = vadd.f32 %v11425_v56, %v11185_v1  ;;  %v5076_v19 = vadd.f32 %v11430_v51, %v11193_v47  ;;  %v5078_v56 = vadd.f32 %v11440_v8, %v11209_v10 }
 0x33e   : > { %v11565_v45 = vpop.f32.mrf.mxu0  ;;  %v11567_v42 = vpop.f32.mrf.mxu1  ;;  %v5083_v8 = vadd.f32 %v11455_v61, %v11233_v37 }
 0x33f   : > { %13069 = vst [vmem:[#allocation224_spill] sm:$0xff] %v11563_v14 }
 0x340   : > { %v11569_v41 = vpop.f32.mrf.mxu0  ;;  %v11571_v50 = vpop.f32.mrf.mxu1 }
 0x341   : > { %13070 = vst [vmem:[#allocation125_spill] sm:$0xff] %v11569_v41 }
 0x342   : > { %v11573_v13 = vpop.f32.mrf.mxu0  ;;  %v11575_v34 = vpop.f32.mrf.mxu1 }
 0x343   : > { %13071 = vst [vmem:[#allocation62_spill] sm:$0xff] %v11573_v13  ;;  %v5079_v13 = vadd.f32 %v11435_v58, %v11201_v24  ;;  %v5080_v58 = vadd.f32 %v11450_v21, %v11225_v32 }
 0x344   : > { %v11577_v31 = vpop.f32.mrf.mxu0  ;;  %v11579_v33 = vpop.f32.mrf.mxu1 }
 0x345   : > { %13072 = vst [vmem:[#allocation60_spill] sm:$0xff] %v11577_v31 }
 0x346   : > { %v11583_v28 = vpop.f32.mrf.mxu0  ;;  %v8015_v14 = vpop.f32.mrf.mxu1 }
 0x347   : > { %13073 = vst [vmem:[#allocation116_spill] sm:$0xff] %v11583_v28  ;;  %v5612_v7 = vadd.f32 %v8015_v14, %v5077_v9  ;;  %v5081_v14 = vadd.f32 %v11445_v3, %v11217_v39  ;;  %v5082_v9 = vadd.f32 %v11460_v22, %v11241_v6 }
 0x348   : > { %v11587_v5 = vpop.f32.mrf.mxu0  ;;  %v5452_v41 = vpop.f32.mrf.mxu1 }
 0x349   : > { %v5611_v48 = vadd.f32 %v5452_v41, %v5076_v19  ;;  %5677 = vrot.lane.b32.xlu1 %v5612_v7, %s8126_s23 }
 0x34a   : > { %v11592_v31 = vpop.f32.mrf.mxu0  ;;  %v8018_v1 = vpop.f32.mrf.mxu1 }
 0x34b   : > { %v5614_v28 = vadd.f32 %v8018_v1, %v5079_v13  ;;  %5675 = vrot.lane.b32.xlu0 %v5611_v48, %s8126_s23  ;;  %v5085_v1 = vadd.f32 %v11465_v20, %v11249_v26 }
 0x34c   : > { %v11597_v47 = vpop.f32.mrf.mxu0  ;;  %v5462_v51 = vpop.f32.mrf.mxu1 }
 0x34d   : > { %v5613_v24 = vadd.f32 %v5462_v51, %v5078_v56  ;;  %5681 = vrot.lane.b32.xlu1 %v5614_v28, %s8126_s23  ;;  %v5084_v51 = vadd.f32 %v11470_v29, %v11257_v59 }
 0x34e   : > { %v11602_v41 = vpop.f32.mrf.mxu0  ;;  %v8021_v7 = vpop.f32.mrf.mxu1 }
 0x34f   : > { %v5616_v19 = vadd.f32 %v8021_v7, %v5081_v14  ;;  %5679 = vrot.lane.b32.xlu0 %v5613_v24, %s8126_s23  ;;  %v5087_v24 = vadd.f32 %v11475_v36, %v11265_v35 }
 0x350   : > { %v11607_v10 = vpop.f32.mrf.mxu0  ;;  %v5472_v48 = vpop.f32.mrf.mxu1 }
 0x351   : > { %v5615_v13 = vadd.f32 %v5472_v48, %v5080_v58  ;;  %5685 = vrot.lane.b32.xlu1 %v5616_v19, %s8126_s23  ;;  %v13074_v58 = vld [vmem:[#allocation113_spill] sm:$0xff] }
 0x352   : > { %v11612_v39 = vpop.f32.mrf.mxu0  ;;  %v8024_v3 = vpop.f32.mrf.mxu1  ;;  %v5086_v19 = vadd.f32 %v11480_v57, %v13074_v58  ;;  %v13079_v58 = vld [vmem:[#allocation91_spill] sm:$0xff] }
 0x353   : > { %v5618_v28 = vadd.f32 %v8024_v3, %v5083_v8  ;;  %5683 = vrot.lane.b32.xlu0 %v5615_v13, %s8126_s23  ;;  %v13075_v8 = vld [vmem:[#allocation100_spill] sm:$0xff] }
 0x354   : > { %v11617_v32 = vpop.f32.mrf.mxu0  ;;  %v5482_v21 = vpop.f32.mrf.mxu1  ;;  %v5089_v13 = vadd.f32 %v11485_v54, %v13075_v8  ;;  %v13080_v8 = vld [vmem:[#allocation213_spill] sm:$0xff] }
 0x355   : > { %v5617_v56 = vadd.f32 %v5482_v21, %v5082_v9  ;;  %5689 = vrot.lane.b32.xlu1 %v5618_v28, %s8126_s23  ;;  %v13076_v9 = vld [vmem:[#allocation85_spill] sm:$0xff] }
 0x356   : > { %v11622_v37 = vpop.f32.mrf.mxu0  ;;  %v8027_v61 = vpop.f32.mrf.mxu1  ;;  %v5088_v28 = vadd.f32 %v11490_v62, %v13076_v9  ;;  %v13081_v9 = vld [vmem:[#allocation118_spill] sm:$0xff] }
 0x357   : > { %v5620_v14 = vadd.f32 %v8027_v61, %v5085_v1  ;;  %5687 = vrot.lane.b32.xlu0 %v5617_v56, %s8126_s23  ;;  %v13077_v56 = vld [vmem:[#allocation200_spill] sm:$0xff] }
 0x358   : > { %v11627_v6 = vpop.f32.mrf.mxu0  ;;  %v5492_v22 = vpop.f32.mrf.mxu1  ;;  %v5091_v61 = vadd.f32 %v11495_v17, %v13077_v56  ;;  %v13082_v56 = vld [vmem:[#allocation103_spill] sm:$0xff] }
 0x359   : > { %v5619_v7 = vadd.f32 %v5492_v22, %v5084_v51  ;;  %5693 = vrot.lane.b32.xlu1 %v5620_v14, %s8126_s23  ;;  %v13078_v22 = vld [vmem:[#allocation212_spill] sm:$0xff] }
 0x35a   : > { %v11632_v26 = vpop.f32.mrf.mxu0  ;;  %v8030_v20 = vpop.f32.mrf.mxu1 }
 0x35b   : > { %v5622_v48 = vadd.f32 %v8030_v20, %v5087_v24  ;;  %5691 = vrot.lane.b32.xlu0 %v5619_v7, %s8126_s23  ;;  %v5090_v24 = vadd.f32 %v11500_v25, %v13078_v22  ;;  %v13083_v22 = vld [vmem:[#allocation201_spill] sm:$0xff] }
 0x35c   : > { %v11637_v59 = vpop.f32.mrf.mxu0  ;;  %v5502_v29 = vpop.f32.mrf.mxu1 }
 0x35d   : > { %v5621_v3 = vadd.f32 %v5502_v29, %v5086_v19  ;;  %5697 = vrot.lane.b32.xlu1 %v5622_v48, %s8126_s23  ;;  %v5093_v19 = vadd.f32 %v11505_v60, %v13079_v58  ;;  %v13084_v58 = vld [vmem:[#allocation214_spill] sm:$0xff] }
 0x35e   : > { %v11642_v35 = vpop.f32.mrf.mxu0  ;;  %v8033_v36 = vpop.f32.mrf.mxu1 }
 0x35f   : > { %v5624_v21 = vadd.f32 %v8033_v36, %v5089_v13  ;;  %5695 = vrot.lane.b32.xlu0 %v5621_v3, %s8126_s23  ;;  %v5092_v13 = vadd.f32 %v11510_v15, %v13080_v8  ;;  %v5099_v8 = vadd.f32 %v11535_v30, %v11361_v2 }
 0x360   : > { %v11647_v57 = vpop.f32.mrf.mxu0  ;;  %v5512_v1 = vpop.f32.mrf.mxu1 }
 0x361   : > { %v5623_v51 = vadd.f32 %v5512_v1, %v5088_v28  ;;  %5701 = vrot.lane.b32.xlu1 %v5624_v21, %s8126_s23  ;;  %v5095_v28 = vadd.f32 %v11515_v27, %v13081_v9 }
 0x362   : > { %v11652_v54 = vpop.f32.mrf.mxu0  ;;  %v8036_v14 = vpop.f32.mrf.mxu1 }
 0x363   : > { %v5626_v7 = vadd.f32 %v8036_v14, %v5091_v61  ;;  %5699 = vrot.lane.b32.xlu0 %v5623_v51, %s8126_s23  ;;  %v5094_v61 = vadd.f32 %v11520_v44, %v13082_v56 }
 0x364   : > { %v11657_v62 = vpop.f32.mrf.mxu0  ;;  %v5522_v20 = vpop.f32.mrf.mxu1 }
 0x365   : > { %v5625_v48 = vadd.f32 %v5522_v20, %v5090_v24  ;;  %5705 = vrot.lane.b32.xlu1 %v5626_v7, %s8126_s23  ;;  %v5097_v24 = vadd.f32 %v11525_v4, %v13083_v22 }
 0x366   : > { %v11662_v17 = vpop.f32.mrf.mxu0  ;;  %v8039_v29 = vpop.f32.mrf.mxu1 }
 0x367   : > { %v5628_v3 = vadd.f32 %v8039_v29, %v5093_v19  ;;  %5703 = vrot.lane.b32.xlu0 %v5625_v48, %s8126_s23  ;;  %v5096_v19 = vadd.f32 %v11530_v63, %v13084_v58  ;;  %v5105_v58 = vadd.f32 %v11567_v42, %v11405_v49 }
 0x368   : > { %v11667_v25 = vpop.f32.mrf.mxu0  ;;  %v5532_v36 = vpop.f32.mrf.mxu1 }
 0x369   : > { %v5627_v21 = vadd.f32 %v5532_v36, %v5092_v13  ;;  %5709 = vrot.lane.b32.xlu1 %v5628_v3, %s8126_s23  ;;  %v5098_v36 = vadd.f32 %v11540_v12, %v11369_v23 }
 0x36a   : > { %v11672_v60 = vpop.f32.mrf.mxu0  ;;  %v8042_v1 = vpop.f32.mrf.mxu1 }
 0x36b   : > { %v5630_v51 = vadd.f32 %v8042_v1, %v5095_v28  ;;  %5707 = vrot.lane.b32.xlu0 %v5627_v21, %s8126_s23  ;;  %v13085_v21 = vld [vmem:[#allocation92_spill] sm:$0xff] }
 0x36c   : > { %v11677_v15 = vpop.f32.mrf.mxu0  ;;  %v5542_v14 = vpop.f32.mrf.mxu1  ;;  %v5101_v1 = vadd.f32 %v11545_v38, %v13085_v21 }
 0x36d   : > { %v5629_v7 = vadd.f32 %v5542_v14, %v5094_v61  ;;  %5713 = vrot.lane.b32.xlu1 %v5630_v51, %s8126_s23  ;;  %v5100_v61 = vadd.f32 %v11550_v0, %v11385_v11  ;;  %v5103_v14 = vadd.f32 %v11555_v16, %v11393_v40 }
 0x36e   : > { %v11682_v27 = vpop.f32.mrf.mxu0  ;;  %v8045_v20 = vpop.f32.mrf.mxu1 }
 0x36f   : > { %v5632_v48 = vadd.f32 %v8045_v20, %v5097_v24  ;;  %5711 = vrot.lane.b32.xlu0 %v5629_v7, %s8126_s23  ;;  %v5102_v7 = vadd.f32 %v11560_v55, %v11399_v53 }
 0x370   : > { %v11687_v44 = vpop.f32.mrf.mxu0  ;;  %v5552_v29 = vpop.f32.mrf.mxu1 }
 0x371   : > { %v5631_v13 = vadd.f32 %v5552_v29, %v5096_v19  ;;  %5717 = vrot.lane.b32.xlu1 %v5632_v48, %s8126_s23  ;;  %v5104_v48 = vadd.f32 %v11571_v50, %v11411_v43 }
 0x372   : > { %v11692_v4 = vpop.f32.mrf.mxu0  ;;  %v8048_v3 = vpop.f32.mrf.mxu1 }
 0x373   : > { %v5634_v9 = vadd.f32 %v8048_v3, %v5099_v8  ;;  %5715 = vrot.lane.b32.xlu0 %v5631_v13, %s8126_s23  ;;  %v5107_v8 = vadd.f32 %v11575_v34, %v11417_v18  ;;  %v5106_v3 = vadd.f32 %v11579_v33, %v11423_v46 }
 0x374   : > { %v11697_v63 = vpop.f32.mrf.mxu0  ;;  %v5562_v28 = vpop.f32.mrf.mxu1 }
 0x375   : > { %v5633_v56 = vadd.f32 %v5562_v28, %v5098_v36  ;;  %5721 = vrot.lane.b32.xlu1 %v5634_v9, %s8126_s23 }
 0x376   : > { %v11702_v2 = vpop.f32.mrf.mxu0  ;;  %v8051_v30 = vpop.f32.mrf.mxu1 }
 0x377   : > { %v5636_v51 = vadd.f32 %v8051_v30, %v5101_v1  ;;  %5719 = vrot.lane.b32.xlu0 %v5633_v56, %s8126_s23 }
 0x378   : > { %v11707_v23 = vpop.f32.mrf.mxu0  ;;  %v5572_v12 = vpop.f32.mrf.mxu1 }
 0x379   : > { %v5635_v22 = vadd.f32 %v5572_v12, %v5100_v61  ;;  %5725 = vrot.lane.b32.xlu1 %v5636_v51, %s8126_s23 }
 0x37a   : > { %v11712_v38 = vpop.f32.mrf.mxu0  ;;  %v8054_v24 = vpop.f32.mrf.mxu1 }
 0x37b   : > { %v5638_v20 = vadd.f32 %v8054_v24, %v5103_v14  ;;  %5723 = vrot.lane.b32.xlu0 %v5635_v22, %s8126_s23  ;;  %v4810_v14 = vadd.f32 %v11565_v45, %v11402_v52  ;;  %v13086_v24 = vld [vmem:[#allocation98_spill] sm:$0xff] }
 0x37c   : > { %v11717_v11 = vpop.f32.mrf.mxu0  ;;  %v5582_v0 = vpop.f32.mrf.mxu1 }
 0x37d   : > { %v5637_v19 = vadd.f32 %v5582_v0, %v5102_v7  ;;  %5729 = vrot.lane.b32.xlu1 %v5638_v20, %s8126_s23  ;;  %v13087_v7 = vld [vmem:[#allocation125_spill] sm:$0xff] }
 0x37e   : > { %v7965_v40 = vpop.f32.mrf.mxu0  ;;  %v8057_v16 = vpop.f32.mrf.mxu1  ;;  %v4809_v20 = vadd.f32 %v13087_v7, %v13086_v24  ;;  %v13092_v24 = vld [vmem:[#allocation215_spill] sm:$0xff]  ;;  %v13093_v7 = vld [vmem:[#allocation116_spill] sm:$0xff] }
 0x37f   : > { %v5640_v29 = vadd.f32 %v8057_v16, %v5105_v58  ;;  %5727 = vrot.lane.b32.xlu0 %v5637_v19, %s8126_s23  ;;  %v5345_v0 = vadd.f32 %v7965_v40, %v4810_v14  ;;  %v11758_v58 = vld [vmem:[%s11992_s2] ss:$0 sm:$0xff]  ;;  %v13088_v16 = vld [vmem:[#allocation123_spill] sm:$0xff]  ;;  %v13091_v40 = vld [vmem:[#allocation60_spill] sm:$0xff] }
 0x380   : > { %v5185_v53 = vpop.f32.mrf.mxu0  ;;  %v5592_v55 = vpop.f32.mrf.mxu1 }
 0x381   : > { %v5639_v13 = vadd.f32 %v5592_v55, %v5104_v48  ;;  %5733 = vrot.lane.b32.xlu1 %v5640_v29, %s8126_s23  ;;  %v13089_v48 = vld [vmem:[#allocation62_spill] sm:$0xff]  ;;  %v5344_v55 = vadd.f32 %v5185_v53, %v4809_v20  ;;  %v4814_v20 = vadd.f32 %v13093_v7, %v13092_v24  ;;  %v13096_v24 = vld [vmem:[#allocation217_spill] sm:$0xff] }
 0x382   : > { %v7968_v49 = vpop.f32.mrf.mxu0  ;;  %v8060_v42 = vpop.f32.mrf.mxu1  ;;  %v4812_v29 = vadd.f32 %v13089_v48, %v13088_v16  ;;  %v4815_v7 = vadd.f32 %v11597_v47, %v13096_v24  ;;  %v13100_v24 = vld [vmem:[#allocation128_spill] sm:$0xff] }
 0x383   : > { %v5642_v36 = vadd.f32 %v8060_v42, %v5107_v8  ;;  %5731 = vrot.lane.b32.xlu0 %v5639_v13, %s8126_s23  ;;  %v13090_v42 = vld [vmem:[#allocation107_spill] sm:$0xff] }
 0x384   : > { %v5602_v43 = vpop.f32.mrf.mxu1  ;;  %v5195_v50 = vpop.f32.mrf.mxu0 }
 0x385   : > { %v5641_v9 = vadd.f32 %v5602_v43, %v5106_v3  ;;  %5737 = vrot.lane.b32.xlu1 %v5642_v36, %s8126_s23  ;;  %v4811_v3 = vadd.f32 %v13091_v40, %v13090_v42  ;;  %v5347_v36 = vadd.f32 %v7968_v49, %v4812_v29 }
 0x386   : > { %v7971_v28 = vpop.f32.mrf.mxu0 }
 0x387   : > { %5735 = vrot.lane.b32.xlu0 %v5641_v9, %s8126_s23 }
 0x388   : > { %v5205_v18 = vpop.f32.mrf.mxu0 }
 0x38a   : > { %v7974_v34 = vpop.f32.mrf.mxu0 }
 0x38c   : > { %v5215_v21 = vpop.f32.mrf.mxu0 }
 0x38e   : > { %v11733_v1 = vpop.f32.mrf.mxu0 }
 0x390   : > { %v11735_v56 = vpop.f32.mrf.mxu0 }
 0x392   : > { %v11737_v46 = vpop.f32.mrf.mxu0 }
 0x394   : > { %v11739_v33 = vpop.f32.mrf.mxu0 }
 0x396   : > { %v11741_v30 = vpop.f32.mrf.mxu0 }
 0x398   : > { %v11743_v61 = vpop.f32.mrf.mxu0 }
 0x39a   : > { %v11745_v51 = vpop.f32.mrf.mxu0 }
 0x39c   : > { %v11747_v12 = vpop.f32.mrf.mxu0 }
 0x39e   : > { %v11751_v22 = vpop.f32.mrf.mxu0 }
 0x3a0   : > { %v11764_v52 = vpop.f32.mrf.mxu0 }
 0x3bb   : > { %v5678_v19 = vpop.permute.xlu1 %5677 }
 0x3bc   : > { %v5772_v8 = vsel %vm359_vm0, %v5345_v0, %v5678_v19  ;;  %v5346_v0 = vadd.f32 %v5195_v50, %v4811_v3  ;;  %v11779_v19 = vpop.f32.mrf.mxu0  ;;  %v13095_v3 = vld [vmem:[#allocation202_spill] sm:$0xff] }
 0x3bd   : > { %v5811_v45 = vadd.f32 %v11758_v58, %v5772_v8  ;;  %v5676_v13 = vpop.permute.xlu0 %5675 }
 0x3be   : > { %v5771_v53 = vsel %vm359_vm0, %v5344_v55, %v5676_v13  ;;  %v13094_v55 = vld [vmem:[#allocation226_spill] sm:$0xff] }
 0x3bf   : > { %v5843_v43 = vmax.f32 %v5811_v45, 0.0  ;;  %v5810_v9 = vadd.f32 %v11758_v58, %v5771_v53  ;;  %v5682_v14 = vpop.permute.xlu1 %5681  ;;  %v4813_v8 = vadd.f32 %v11587_v5, %v13094_v55  ;;  %v5349_v45 = vadd.f32 %v7971_v28, %v4814_v20 }
 0x3c0   : > { %v5774_v49 = vsel %vm359_vm0, %v5347_v36, %v5682_v14  ;;  %v4816_v36 = vadd.f32 %v11592_v31, %v13095_v3 }
 0x3c1   : > { %5876 = vst.msk [vmem:[%s11772_s13 + $0x8] sm:$0xff] %vm5874_vm3, %v5843_v43  ;;  %v5842_v16 = vmax.f32 %v5810_v9, 0.0  ;;  %v5813_v48 = vadd.f32 %v11758_v58, %v5774_v49  ;;  %v5680_v29 = vpop.permute.xlu0 %5679  ;;  %v5348_v53 = vadd.f32 %v5205_v18, %v4813_v8  ;;  %v11793_v9 = vpop.f32.mrf.mxu0 }
 0x3c2   : > { %v5773_v13 = vsel %vm359_vm0, %v5346_v0, %v5680_v29  ;;  %v5351_v20 = vadd.f32 %v7974_v34, %v4816_v36  ;;  %v5350_v29 = vadd.f32 %v5215_v21, %v4815_v7  ;;  %v13099_v36 = vld [vmem:[#allocation219_spill] sm:$0xff]  ;;  %v4819_v7 = vadd.f32 %v11617_v32, %v13100_v24 }
 0x3c3   : > { %5875 = vst.msk [vmem:[%s11772_s13] sm:$0xff] %vm5874_vm3, %v5842_v16  ;;  %v5845_v50 = vmax.f32 %v5813_v48, 0.0  ;;  %v5812_v42 = vadd.f32 %v11758_v58, %v5773_v13  ;;  %v5686_v40 = vpop.permute.xlu1 %5685  ;;  %v13097_v16 = vld [vmem:[#allocation99_spill] sm:$0xff]  ;;  %v11807_v8 = vpop.f32.mrf.mxu0  ;;  %v13098_v13 = vld [vmem:[#allocation104_spill] sm:$0xff] }
 0x3c4   : > { %v5776_v43 = vsel %vm359_vm0, %v5349_v45, %v5686_v40  ;;  %v4818_v48 = vadd.f32 %v11602_v41, %v13097_v16  ;;  %v5354_v16 = vadd.f32 %v11739_v33, %v4819_v7 }
 0x3c5   : > { %5878 = vst.msk [vmem:[%s11772_s13 + $0x18] sm:$0xff] %vm5874_vm3, %v5845_v50  ;;  %v5844_v5 = vmax.f32 %v5812_v42, 0.0  ;;  %v5815_v28 = vadd.f32 %v11758_v58, %v5776_v43  ;;  %v5684_v14 = vpop.permute.xlu0 %5683  ;;  %v4817_v50 = vadd.f32 %v11607_v10, %v13098_v13 }
 0x3c6   : > { %v5775_v0 = vsel %vm359_vm0, %v5348_v53, %v5684_v14  ;;  %v5353_v42 = vadd.f32 %v11733_v1, %v4818_v48  ;;  %v4820_v53 = vadd.f32 %v11612_v39, %v13099_v36 }
 0x3c7   : > { %5877 = vst.msk [vmem:[%s11772_s13 + $0x10] sm:$0xff] %vm5874_vm3, %v5844_v5  ;;  %v5847_v31 = vmax.f32 %v5815_v28, 0.0  ;;  %v5814_v18 = vadd.f32 %v11758_v58, %v5775_v0  ;;  %v5690_v49 = vpop.permute.xlu1 %5689  ;;  %v5352_v43 = vadd.f32 %v11735_v56, %v4817_v50  ;;  %v11823_v28 = vpop.f32.mrf.mxu0 }
 0x3c8   : > { %v5778_v55 = vsel %vm359_vm0, %v5351_v20, %v5690_v49  ;;  %v5355_v20 = vadd.f32 %v11737_v46, %v4820_v53  ;;  %v13104_v53 = vld [vmem:[#allocation105_spill] sm:$0xff] }
 0x3c9   : > { %5880 = vst.msk [vmem:[%s11772_s13 + $0x28] sm:$0xff] %vm5874_vm3, %v5847_v31  ;;  %v5846_v47 = vmax.f32 %v5814_v18, 0.0  ;;  %v5817_v34 = vadd.f32 %v11758_v58, %v5778_v55  ;;  %v5688_v45 = vpop.permute.xlu0 %5687  ;;  %v13101_v18 = vld [vmem:[#allocation112_spill] sm:$0xff] }
 0x3ca   : > { %v5777_v40 = vsel %vm359_vm0, %v5350_v29, %v5688_v45  ;;  %v4822_v49 = vadd.f32 %v11622_v37, %v13101_v18  ;;  %v11839_v29 = vpop.f32.mrf.mxu0 }
 0x3cb   : > { %5879 = vst.msk [vmem:[%s11772_s13 + $0x20] sm:$0xff] %vm5874_vm3, %v5846_v47  ;;  %v5849_v41 = vmax.f32 %v5817_v34, 0.0  ;;  %v5816_v21 = vadd.f32 %v11758_v58, %v5777_v40  ;;  %v5694_v3 = vpop.permute.xlu1 %5693  ;;  %v13102_v47 = vld [vmem:[#allocation203_spill] sm:$0xff] }
 0x3cc   : > { %v5780_v5 = vsel %vm359_vm0, %v5353_v42, %v5694_v3  ;;  %v4821_v34 = vadd.f32 %v11627_v6, %v13102_v47  ;;  %v5357_v45 = vadd.f32 %v11741_v30, %v4822_v49  ;;  %v13103_v42 = vld [vmem:[#allocation220_spill] sm:$0xff]  ;;  %v11855_v3 = vpop.f32.mrf.mxu0 }
 0x3cd   : > { %5882 = vst.msk [vmem:[%s11772_s13 + $0x38] sm:$0xff] %vm5874_vm3, %v5849_v41  ;;  %v5848_v10 = vmax.f32 %v5816_v21, 0.0  ;;  %v5819_v1 = vadd.f32 %v11758_v58, %v5780_v5  ;;  %v5692_v14 = vpop.permute.xlu0 %5691  ;;  %v4824_v40 = vadd.f32 %v11632_v26, %v13103_v42  ;;  %v13109_v42 = vld [vmem:[#allocation204_spill] sm:$0xff] }
 0x3ce   : > { %v5779_v39 = vsel %vm359_vm0, %v5352_v43, %v5692_v14  ;;  %v5356_v41 = vadd.f32 %v11743_v61, %v4821_v34  ;;  %v4823_v43 = vadd.f32 %v11637_v59, %v13104_v53  ;;  %v13105_v14 = vld [vmem:[#allocation114_spill] sm:$0xff] }
 0x3cf   : > { %5881 = vst.msk [vmem:[%s11772_s13 + $0x30] sm:$0xff] %vm5874_vm3, %v5848_v10  ;;  %v5851_v56 = vmax.f32 %v5819_v1, 0.0  ;;  %v5818_v0 = vadd.f32 %v11758_v58, %v5779_v39  ;;  %v5698_v31 = vpop.permute.xlu1 %5697  ;;  %v5359_v5 = vadd.f32 %v11745_v51, %v4824_v40  ;;  %v4826_v24 = vadd.f32 %v11642_v35, %v13105_v14  ;;  %v11871_v39 = vpop.f32.mrf.mxu0 }
 0x3d0   : > { %v5782_v48 = vsel %vm359_vm0, %v5355_v20, %v5698_v31  ;;  %v5358_v7 = vadd.f32 %v11747_v12, %v4823_v43  ;;  %v4830_v40 = vadd.f32 %v11662_v17, %v13109_v42 }
 0x3d1   : > { %5884 = vst.msk [vmem:[%s11772_s13 + $0x48] sm:$0xff] %vm5874_vm3, %v5851_v56  ;;  %v5850_v32 = vmax.f32 %v5818_v0, 0.0  ;;  %v5821_v46 = vadd.f32 %v11758_v58, %v5782_v48  ;;  %v5696_v55 = vpop.permute.xlu0 %5695  ;;  %v13106_v0 = vld [vmem:[#allocation221_spill] sm:$0xff]  ;;  %v5361_v18 = vadd.f32 %v11751_v22, %v4826_v24  ;;  %v5305_v47 = vpop.f32.mrf.mxu0 }
 0x3d2   : > { %v5781_v37 = vsel %vm359_vm0, %v5354_v16, %v5696_v55  ;;  %v4825_v31 = vadd.f32 %v11647_v57, %v13106_v0  ;;  %v13107_v48 = vld [vmem:[#allocation133_spill] sm:$0xff]  ;;  %v5365_v43 = vadd.f32 %v11807_v8, %v4830_v40 }
 0x3d3   : > { %5883 = vst.msk [vmem:[%s11772_s13 + $0x40] sm:$0xff] %vm5874_vm3, %v5850_v32  ;;  %v5853_v33 = vmax.f32 %v5821_v46, 0.0  ;;  %v5820_v13 = vadd.f32 %v11758_v58, %v5781_v37  ;;  %v5702_v50 = vpop.permute.xlu1 %5701  ;;  %v4828_v32 = vadd.f32 %v11652_v54, %v13107_v48  ;;  %v13114_v48 = vld [vmem:[#allocation223_spill] sm:$0xff] }
 0x3d4   : > { %v5784_v21 = vsel %vm359_vm0, %v5357_v45, %v5702_v50  ;;  %v5360_v46 = vadd.f32 %v11764_v52, %v4825_v31  ;;  %v13108_v45 = vld [vmem:[#allocation117_spill] sm:$0xff]  ;;  %v13113_v31 = vld [vmem:[#allocation124_spill] sm:$0xff] }
 0x3d5   : > { %5886 = vst.msk [vmem:[%s11772_s13 + $0x58] sm:$0xff] %vm5874_vm3, %v5853_v33  ;;  %v5852_v6 = vmax.f32 %v5820_v13, 0.0  ;;  %v5823_v30 = vadd.f32 %v11758_v58, %v5784_v21  ;;  %v5700_v36 = vpop.permute.xlu0 %5699  ;;  %v4827_v37 = vadd.f32 %v11657_v62, %v13108_v45  ;;  %v5363_v33 = vadd.f32 %v11779_v19, %v4828_v32 }
 0x3d6   : > { %v5783_v26 = vsel %vm359_vm0, %v5356_v41, %v5700_v36  ;;  %v13110_v36 = vld [vmem:[#allocation222_spill] sm:$0xff]  ;;  %v4833_v32 = vadd.f32 %v11687_v44, %v13114_v48 }
 0x3d7   : > { %5885 = vst.msk [vmem:[%s11772_s13 + $0x50] sm:$0xff] %vm5874_vm3, %v5852_v6  ;;  %v5855_v61 = vmax.f32 %v5823_v30, 0.0  ;;  %v5822_v10 = vadd.f32 %v11758_v58, %v5783_v26  ;;  %v5706_v1 = vpop.permute.xlu1 %5705  ;;  %v5362_v41 = vadd.f32 %v11793_v9, %v4827_v37  ;;  %v8004_v6 = vpop.f32.mrf.mxu0  ;;  %v4829_v53 = vadd.f32 %v11667_v25, %v13110_v36 }
 0x3d8   : > { %v5786_v20 = vsel %vm359_vm0, %v5359_v5, %v5706_v1  ;;  %v5368_v45 = vadd.f32 %v5305_v47, %v4833_v32 }
 0x3d9   : > { %5888 = vst.msk [vmem:[%s11772_s13 + $0x68] sm:$0xff] %vm5874_vm3, %v5855_v61  ;;  %v5854_v59 = vmax.f32 %v5822_v10, 0.0  ;;  %v5825_v51 = vadd.f32 %v11758_v58, %v5786_v20  ;;  %v5704_v56 = vpop.permute.xlu0 %5703  ;;  %v13111_v61 = vld [vmem:[#allocation115_spill] sm:$0xff]  ;;  %v5364_v1 = vadd.f32 %v11823_v28, %v4829_v53  ;;  %v5315_v24 = vpop.f32.mrf.mxu0  ;;  %v13118_v53 = vld [vmem:[#allocation89_spill] sm:$0xff] }
 0x3da   : > { %v5785_v35 = vsel %vm359_vm0, %v5358_v7, %v5704_v56  ;;  %v4832_v10 = vadd.f32 %v11672_v60, %v13111_v61  ;;  %v13112_v20 = vld [vmem:[#allocation111_spill] sm:$0xff]  ;;  %v13119_v61 = vld [vmem:[#allocation205_spill] sm:$0xff] }
 0x3db   : > { %5887 = vst.msk [vmem:[%s11772_s13 + $0x60] sm:$0xff] %vm5874_vm3, %v5854_v59  ;;  %v5857_v12 = vmax.f32 %v5825_v51, 0.0  ;;  %v5824_v49 = vadd.f32 %v11758_v58, %v5785_v35  ;;  %v5710_v16 = vpop.permute.xlu1 %5709  ;;  %v4831_v59 = vadd.f32 %v11677_v15, %v13112_v20 }
 0x3dc   : > { %v5788_v55 = vsel %vm359_vm0, %v5361_v18, %v5710_v16  ;;  %v5367_v51 = vadd.f32 %v11839_v29, %v4832_v10  ;;  %v4834_v18 = vadd.f32 %v11682_v27, %v13113_v31  ;;  %v4840_v10 = vadd.f32 %v11712_v38, %v13119_v61 }
 0x3dd   : > { %5890 = vst.msk [vmem:[%s11772_s13 + $0x78] sm:$0xff] %vm5874_vm3, %v5857_v12  ;;  %v5856_v57 = vmax.f32 %v5824_v49, 0.0  ;;  %v5827_v22 = vadd.f32 %v11758_v58, %v5788_v55  ;;  %v5708_v34 = vpop.permute.xlu0 %5707  ;;  %v5366_v35 = vadd.f32 %v11855_v3, %v4831_v59  ;;  %v8007_v49 = vpop.f32.mrf.mxu0 }
 0x3de   : > { %v5787_v13 = vsel %vm359_vm0, %v5360_v46, %v5708_v34  ;;  %v5369_v46 = vadd.f32 %v11871_v39, %v4834_v18 }
 0x3df   : > { %5889 = vst.msk [vmem:[%s11772_s13 + $0x70] sm:$0xff] %vm5874_vm3, %v5856_v57  ;;  %v5859_v54 = vmax.f32 %v5827_v22, 0.0  ;;  %v5826_v52 = vadd.f32 %v11758_v58, %v5787_v13  ;;  %v5714_v50 = vpop.permute.xlu1 %5713  ;;  %v13115_v22 = vld [vmem:[#allocation138_spill] sm:$0xff] }
 0x3e0   : > { %v5790_v21 = vsel %vm359_vm0, %v5363_v33, %v5714_v50  ;;  %v4836_v34 = vadd.f32 %v11692_v4, %v13115_v22  ;;  %v5325_v33 = vpop.f32.mrf.mxu0 }
 0x3e1   : > { %5892 = vst.msk [vmem:[%s11772_s13 + $0x88] sm:$0xff] %vm5874_vm3, %v5859_v54  ;;  %v5858_v62 = vmax.f32 %v5826_v52, 0.0  ;;  %v5829_v19 = vadd.f32 %v11758_v58, %v5790_v21  ;;  %v5712_v30 = vpop.permute.xlu0 %5711  ;;  %v13116_v54 = vld [vmem:[#allocation122_spill] sm:$0xff] }
 0x3e2   : > { %v5789_v5 = vsel %vm359_vm0, %v5362_v41, %v5712_v30  ;;  %v4835_v52 = vadd.f32 %v11697_v63, %v13116_v54  ;;  %v5371_v50 = vadd.f32 %v8004_v6, %v4836_v34  ;;  %v13117_v41 = vld [vmem:[#allocation229_spill] sm:$0xff]  ;;  %v8010_v30 = vpop.f32.mrf.mxu0 }
 0x3e3   : > { %5891 = vst.msk [vmem:[%s11772_s13 + $0x80] sm:$0xff] %vm5874_vm3, %v5858_v62  ;;  %v5861_v17 = vmax.f32 %v5829_v19, 0.0  ;;  %v5828_v9 = vadd.f32 %v11758_v58, %v5789_v5  ;;  %v5718_v26 = vpop.permute.xlu1 %5717  ;;  %v4838_v21 = vadd.f32 %v11702_v2, %v13117_v41  ;;  %v5375_v59 = vadd.f32 %v8010_v30, %v4840_v10 }
 0x3e4   : > { %v5792_v14 = vsel %vm359_vm0, %v5365_v43, %v5718_v26  ;;  %v5370_v62 = vadd.f32 %v5315_v24, %v4835_v52  ;;  %v4837_v43 = vadd.f32 %v11707_v23, %v13118_v53  ;;  %v5335_v24 = vpop.f32.mrf.mxu0 }
 0x3e5   : > { %5894 = vst.msk [vmem:[%s11772_s13 + $0x98] sm:$0xff] %vm5874_vm3, %v5861_v17  ;;  %v5860_v25 = vmax.f32 %v5828_v9, 0.0  ;;  %v5831_v8 = vadd.f32 %v11758_v58, %v5792_v14  ;;  %v5716_v7 = vpop.permute.xlu0 %5715  ;;  %v5373_v5 = vadd.f32 %v8007_v49, %v4838_v21 }
 0x3e6   : > { %v5791_v56 = vsel %vm359_vm0, %v5364_v1, %v5716_v7  ;;  %v5372_v1 = vadd.f32 %v5325_v33, %v4837_v43  ;;  %v13120_v7 = vld [vmem:[#allocation224_spill] sm:$0xff] }
 0x3e7   : > { %5893 = vst.msk [vmem:[%s11772_s13 + $0x90] sm:$0xff] %vm5874_vm3, %v5860_v25  ;;  %v5863_v60 = vmax.f32 %v5831_v8, 0.0  ;;  %v5830_v28 = vadd.f32 %v11758_v58, %v5791_v56  ;;  %v5722_v0 = vpop.permute.xlu1 %5721  ;;  %v4839_v20 = vadd.f32 %v11717_v11, %v13120_v7 }
 0x3e8   : > { %v5794_v12 = vsel %vm359_vm0, %v5367_v51, %v5722_v0 }
 0x3e9   : > { %5896 = vst.msk [vmem:[%s11772_s13 + $0xa8] sm:$0xff] %vm5874_vm3, %v5863_v60  ;;  %v5862_v15 = vmax.f32 %v5830_v28, 0.0  ;;  %v5833_v29 = vadd.f32 %v11758_v58, %v5794_v12  ;;  %v5720_v16 = vpop.permute.xlu0 %5719  ;;  %v5374_v28 = vadd.f32 %v5335_v24, %v4839_v20 }
 0x3ea   : > { %v5793_v55 = vsel %vm359_vm0, %v5366_v35, %v5720_v16 }
 0x3eb   : > { %5895 = vst.msk [vmem:[%s11772_s13 + $0xa0] sm:$0xff] %vm5874_vm3, %v5862_v15  ;;  %v5865_v27 = vmax.f32 %v5833_v29, 0.0  ;;  %v5832_v3 = vadd.f32 %v11758_v58, %v5793_v55  ;;  %v5726_v57 = vpop.permute.xlu1 %5725 }
 0x3ec   : > { %v5796_v37 = vsel %vm359_vm0, %v5369_v46, %v5726_v57 }
 0x3ed   : > { %5898 = vst.msk [vmem:[%s11772_s13 + $0xb8] sm:$0xff] %vm5874_vm3, %v5865_v27  ;;  %v5864_v44 = vmax.f32 %v5832_v3, 0.0  ;;  %v5835_v39 = vadd.f32 %v11758_v58, %v5796_v37  ;;  %v5724_v13 = vpop.permute.xlu0 %5723 }
 0x3ee   : > { %v5795_v42 = vsel %vm359_vm0, %v5368_v45, %v5724_v13 }
 0x3ef   : > { %5897 = vst.msk [vmem:[%s11772_s13 + $0xb0] sm:$0xff] %vm5874_vm3, %v5864_v44  ;;  %v5867_v4 = vmax.f32 %v5835_v39, 0.0  ;;  %v5834_v47 = vadd.f32 %v11758_v58, %v5795_v42  ;;  %v5730_v40 = vpop.permute.xlu1 %5729 }
 0x3f0   : > { %v5798_v19 = vsel %vm359_vm0, %v5371_v50, %v5730_v40 }
 0x3f1   : > { %5900 = vst.msk [vmem:[%s11772_s13 + $0xc8] sm:$0xff] %vm5874_vm3, %v5867_v4  ;;  %v5866_v63 = vmax.f32 %v5834_v47, 0.0  ;;  %v5837_v6 = vadd.f32 %v11758_v58, %v5798_v19  ;;  %v5728_v36 = vpop.permute.xlu0 %5727 }
 0x3f2   : > { %v5797_v17 = vsel %vm359_vm0, %v5370_v62, %v5728_v36 }
 0x3f3   : > { %5899 = vst.msk [vmem:[%s11772_s13 + $0xc0] sm:$0xff] %vm5874_vm3, %v5866_v63  ;;  %v5869_v2 = vmax.f32 %v5837_v6, 0.0  ;;  %v5836_v9 = vadd.f32 %v11758_v58, %v5797_v17  ;;  %v5734_v26 = vpop.permute.xlu1 %5733 }
 0x3f4   : > { %v5800_v14 = vsel %vm359_vm0, %v5373_v5, %v5734_v26 }
 0x3f5   : > { %5902 = vst.msk [vmem:[%s11772_s13 + $0xd8] sm:$0xff] %vm5874_vm3, %v5869_v2  ;;  %v5868_v23 = vmax.f32 %v5836_v9, 0.0  ;;  %v5839_v25 = vadd.f32 %v11758_v58, %v5800_v14  ;;  %v5732_v8 = vpop.permute.xlu0 %5731 }
 0x3f6   : > { %v5799_v51 = vsel %vm359_vm0, %v5372_v1, %v5732_v8 }
 0x3f7   : > { %5901 = vst.msk [vmem:[%s11772_s13 + $0xd0] sm:$0xff] %vm5874_vm3, %v5868_v23  ;;  %v5871_v38 = vmax.f32 %v5839_v25, 0.0  ;;  %v5838_v56 = vadd.f32 %v11758_v58, %v5799_v51  ;;  %v5738_v60 = vpop.permute.xlu1 %5737 }
 0x3f8   : > { %v5802_v0 = vsel %vm359_vm0, %v5375_v59, %v5738_v60 }
 0x3f9   : > { %5904 = vst.msk [vmem:[%s11772_s13 + $0xe8] sm:$0xff] %vm5874_vm3, %v5871_v38  ;;  %v5870_v31 = vmax.f32 %v5838_v56, 0.0  ;;  %v5841_v18 = vadd.f32 %v11758_v58, %v5802_v0  ;;  %v5736_v11 = vpop.permute.xlu0 %5735 }
 0x3fa   : > { %v5801_v35 = vsel %vm359_vm0, %v5374_v28, %v5736_v11 }
 0x3fb   : > { %5903 = vst.msk [vmem:[%s11772_s13 + $0xe0] sm:$0xff] %vm5874_vm3, %v5870_v31  ;;  %v5873_v12 = vmax.f32 %v5841_v18, 0.0  ;;  %v5840_v49 = vadd.f32 %v11758_v58, %v5801_v35 }
 0x3fd   : > { %5906 = vst.msk [vmem:[%s11772_s13 + $0xf8] sm:$0xff] %vm5874_vm3, %v5873_v12  ;;  %v5872_v15 = vmax.f32 %v5840_v49, 0.0 }
 0x3ff   : > { %5905 = vst.msk [vmem:[%s11772_s13 + $0xf0] sm:$0xff] %vm5874_vm3, %v5872_v15 }
 0x400 PF: > { %s13_s12 = sadd.s32 1, %s8123_s12  }
 0x401   : > { %p10_p4 = scmp.ge.s32.totalorder %s13_s12, 4  }
 0x403   :  { %12 = sbr.rel (!%p10_p4) target bundleno = 1 (0x1), region = 79 }

</bundles_post_ra>
